<compile_context>
chip_gen: v6e
topology: v6e:2x2x1
jax: 0.10.0
libtpu: 0.0.40
codegen_flags: <defaults>
</compile_context>

<pallas_src>
import functools

import jax
import jax.numpy as jnp
import numpy as np
from jax import lax
from jax.experimental import pallas as pl
from jax.experimental.pallas import tpu as pltpu


def _round_up(x, m):
    return (x + m - 1) // m * m


def _fused_kernel(x_ref, w1_ref, w2_ref, b2_ref, o_ref,
                  xs_ref, s2_ref, s2s_ref, acc1_ref, *,
                  K, K2, Wp, Wo1, L1, L1p, L2p, TL, base, off,
                  slope1, slope2):
    NR = xs_ref.shape[1]            # rows per kw-shifted copy of x
    NR2 = s2s_ref.shape[1]          # rows per kw-shifted copy of the l2 plane
    R2 = s2_ref.shape[0]
    n_out = o_ref.shape[2]

    # ---- prologue (independent of the kw=0 matmuls -> scheduler overlaps) ----
    # kw-shifted copies of the flattened input so every matmul LHS slice below
    # starts on a 16-row bf16 tile boundary (no per-tap relayouts).
    for j in range(1, K):
        xs_ref[j - 1, :, :] = x_ref[0, pl.ds(j, NR), :]

    # Zero only the head rows of the layer-2 input plane; rows >= base are
    # fully overwritten by the layer-1 epilogue (masked rows written as zeros).
    s2_ref[pl.ds(0, base), :] = jnp.zeros((base, s2_ref.shape[1]), s2_ref.dtype)
    if base + L1p < R2:             # static; zero tail rows never written by l1
        tail = R2 - (base + L1p)
        s2_ref[pl.ds(base + L1p, tail), :] = jnp.zeros(
            (tail, s2_ref.shape[1]), s2_ref.dtype)

    # ---- layer 1: taps-outer shift-and-matmul over all L1p rows at once ------
    # One MXU weight push per tap (9 total / batch), f32 accumulation in VMEM.
    first = True
    for kw in range(K):             # kw-major: the first K taps only need x_ref
        for kh in range(K):
            row = kh * Wp           # static multiple of 16
            if kw == 0:
                patch = x_ref[0, pl.ds(row, L1p), :]
            else:
                patch = xs_ref[kw - 1, pl.ds(row, L1p), :]
            contrib = jnp.dot(patch, w1_ref[kh * K + kw],
                              preferred_element_type=jnp.float32)
            if first:
                acc1_ref[...] = contrib
                first = False
            else:
                acc1_ref[...] += contrib

    # Layer-1 epilogue (unrolled, 128-row chunks): leaky gate, zero the garbage
    # columns / padded rows (they act as layer 2's zero padding), store bf16.
    for t in range(L1p // TL):
        r0 = t * TL
        a = acc1_ref[pl.ds(r0, TL), :]
        a = jnp.where(a > 0.0, a, a * slope1)
        idx = r0 + lax.broadcasted_iota(jnp.int32, (TL, 1), 0)
        keep = ((idx % Wp) < Wo1) & (idx < L1)
        a = jnp.where(keep, a, 0.0)
        s2_ref[pl.ds(base + r0, TL), :] = a.astype(s2_ref.dtype)

    # kw-shifted copies of the layer-2 plane for kw = 0..K2-2 (kw = K2-1 lands
    # on a 16-row boundary and reads s2 directly) -> aligned loads in the loop.
    for j in range(K2 - 1):
        s2s_ref[j, :, :] = s2_ref[pl.ds(off + j, NR2), :]

    # ---- layer 2: unrolled 3x3 "full" conv over the plane + bias + leaky -----
    bias_tile = jnp.broadcast_to(b2_ref[...], (TL, n_out))   # hoisted broadcast
    for t in range(L2p // TL):
        r0 = t * TL
        acc = bias_tile
        for kh in range(K2):
            row = r0 + kh * Wp      # static multiple of 16
            for kw in range(K2):
                if kw < K2 - 1:
                    patch = s2s_ref[kw, pl.ds(row, TL), :]
                else:
                    patch = s2_ref[pl.ds(row + off + kw, TL), :]   # aligned
                acc = acc + jnp.dot(patch, w2_ref[kh * K2 + kw],
                                    preferred_element_type=jnp.float32)
        acc = jnp.where(acc > 0.0, acc, acc * slope2)
        o_ref[0, pl.ds(r0, TL), :] = acc


def model_forward(x_nchw, params):
    """Forward pass of the PyTorch Model (two ConvTranspose2d + leaky gates)."""
    w1, w2, b2 = params["w1"], params["w2"], params["b2"]
    N, Cin, H, W = x_nchw.shape
    Ci1, Cmid, K, _ = w1.shape
    _, Cout, K2, _ = w2.shape
    assert Ci1 == Cin and K == 3 and K2 == 3 and Cmid <= 128 and Cout <= 8
    s, p, op = 2, 3, 1                               # conv_t1 hyper-parameters
    slope1, slope2 = -0.08, -0.41

    Ho1 = (H - 1) * s - 2 * p + K + op
    Wo1 = (W - 1) * s - 2 * p + K + op
    Ho2, Wo2 = Ho1 + K2 - 1, Wo1 + K2 - 1

    # conv_t1 as a stride-1 conv: dilate by s, crop/pad edges by K-1-p (+op).
    x = jnp.transpose(x_nchw, (0, 2, 3, 1)).astype(jnp.float32)   # NCHW -> NHWC
    lo, hi = K - 1 - p, K - 1 - p + op
    xp = lax.pad(x, jnp.float32(0.0),
                 [(0, 0, 0), (lo, hi, s - 1), (lo, hi, s - 1), (0, 0, 0)])
    Hp1, Wp1 = xp.shape[1], xp.shape[2]
    assert Hp1 == Ho1 + K - 1 and Wp1 == Wo1 + K - 1

    TL = 128                                    # rows per epilogue/l2 chunk
    Wp = _round_up(Wp1, 16)                     # flattened plane width
    C1p = _round_up(Cin, 16)                    # layer-1 Cin padding
    L1 = Ho1 * Wp
    L1p = _round_up(L1, TL)
    L2 = Ho2 * Wp
    L2p = _round_up(L2, TL)
    NR = L1p + (K - 1) * Wp                     # rows read per shifted x copy
    Lp1 = NR + 16                               # flattened x rows incl. tail
    base = (K2 - 1) * Wp + 16                   # 16-aligned layer-2 write offset
    off = base - (K2 - 1) * Wp - (K2 - 1)       # first kw read offset (= 14)
    R2 = L2p + (K2 - 1) * Wp + 16               # layer-2 plane rows
    NR2 = L2p + (K2 - 1) * Wp                   # rows per shifted layer-2 copy
    Co2p = 8                                    # layer-2 output lanes (3 valid)

    # Guards: zeroed garbage columns must separate adjacent flattened rows for
    # the fused layer-2 "full" conv, and all shifted reads must stay in bounds.
    assert Wp >= Wp1 and Wp >= Wo1 + (K2 - 1), (Wp, Wo1)
    assert off >= 0 and (off + K2 - 1) % 16 == 0
    assert off + (K2 - 2) + NR2 <= R2 and base + L1p <= R2

    # flattened, width/channel/row zero-padded bf16 input.
    xp = jnp.pad(xp, ((0, 0), (0, 0), (0, Wp - Wp1), (0, C1p - Cin)))
    xf = xp.reshape(N, Hp1 * Wp, C1p)
    xf = jnp.pad(xf, ((0, 0), (0, Lp1 - Hp1 * Wp), (0, 0))).astype(jnp.bfloat16)

    # ConvTranspose weights -> spatially flipped forward-conv taps, zero padded.
    w1c = jnp.transpose(w1[:, :, ::-1, ::-1], (2, 3, 0, 1)).reshape(K * K, Cin, Cmid)
    w1c = jnp.pad(w1c, ((0, 0), (0, C1p - Cin), (0, 128 - Cmid))).astype(jnp.bfloat16)
    w2c = jnp.transpose(w2[:, :, ::-1, ::-1], (2, 3, 0, 1)).reshape(K2 * K2, Cmid, Cout)
    w2c = jnp.pad(w2c, ((0, 0), (0, 128 - Cmid), (0, Co2p - Cout))).astype(jnp.bfloat16)
    b2p = jnp.pad(b2.astype(jnp.float32), (0, Co2p - Cout)).reshape(1, Co2p)

    kernel = functools.partial(
        _fused_kernel, K=K, K2=K2, Wp=Wp, Wo1=Wo1, L1=L1, L1p=L1p, L2p=L2p,
        TL=TL, base=base, off=off, slope1=slope1, slope2=slope2)

    out = pl.pallas_call(
        kernel,
        out_shape=jax.ShapeDtypeStruct((N, L2p, Co2p), jnp.float32),
        grid=(N,),
        in_specs=[
            pl.BlockSpec((1, Lp1, C1p), lambda n: (n, 0, 0)),
            pl.BlockSpec((K * K, C1p, 128), lambda n: (0, 0, 0)),
            pl.BlockSpec((K2 * K2, 128, Co2p), lambda n: (0, 0, 0)),
            pl.BlockSpec((1, Co2p), lambda n: (0, 0)),
        ],
        out_specs=pl.BlockSpec((1, L2p, Co2p), lambda n: (n, 0, 0)),
        scratch_shapes=[
            pltpu.VMEM((K - 1, NR, C1p), jnp.bfloat16),    # kw-shifted x copies
            pltpu.VMEM((R2, 128), jnp.bfloat16),           # padded layer-2 plane
            pltpu.VMEM((K2 - 1, NR2, 128), jnp.bfloat16),  # shifted l2 copies
            pltpu.VMEM((L1p, 128), jnp.float32),           # layer-1 f32 acc
        ],
        compiler_params=pltpu.CompilerParams(
            dimension_semantics=("parallel",)),
    )(xf, w1c, w2c, b2p)

    # crop garbage columns / padded rows / padded channels, back to NCHW.
    out = out[:, :L2, :].reshape(N, Ho2, Wp, Co2p)[:, :, :Wo2, :Cout]
    return jnp.transpose(out, (0, 3, 1, 2))


def _np_conv_transpose2d(x, w, bias, stride, padding, output_padding):
    """Independent NumPy reference of torch.nn.ConvTranspose2d (NCHW)."""
    N, Ci, H, W = x.shape
    _, Co, K, _ = w.shape
    s, p, op = stride, padding, output_padding
    Hf, Wf = (H - 1) * s + K, (W - 1) * s + K
    y = np.zeros((N, Co, Hf, Wf), np.float64)
    for kh in range(K):
        for kw in range(K):
            contrib = np.einsum('nihw,io->nohw', x, w[:, :, kh, kw])
            y[:, :, kh:kh + s * H:s, kw:kw + s * W:s] += contrib
    Ho = (H - 1) * s - 2 * p + K + op
    Wo = (W - 1) * s - 2 * p + K + op
    y = y[:, :, p:p + Ho, p:p + Wo]
    if bias is not None:
        y = y + bias.reshape(1, Co, 1, 1)
    return y


if __name__ == "__main__":
    key = jax.random.PRNGKey(0)
    k_x, k_w1, k_w2, k_b2 = jax.random.split(key, 4)

    # channel counts fixed by the module (337 -> 99 -> 3); small batch/spatial.
    N, Cin, H, W = 2, 337, 8, 8
    x = jax.random.normal(k_x, (N, Cin, H, W), jnp.float32)
    params = {
        "w1": 0.05 * jax.random.normal(k_w1, (337, 99, 3, 3), jnp.float32),
        "w2": 0.05 * jax.random.normal(k_w2, (99, 3, 3, 3), jnp.float32),
        "b2": 0.05 * jax.random.normal(k_b2, (3,), jnp.float32),
    }

    out = jax.jit(model_forward)(x, params)
    out = jax.block_until_ready(out)

    Ho2 = (H - 1) * 2 - 2 * 3 + 3 + 1 + 2            # 14
    assert out.shape == (N, 3, Ho2, Ho2), out.shape
    assert out.dtype == jnp.float32

    # correctness check vs an independent NumPy ConvTranspose2d reference.
    xn = np.asarray(x, np.float64)
    r1 = _np_conv_transpose2d(xn, np.asarray(params["w1"], np.float64), None,
                              2, 3, 1)
    r4 = np.where(r1 > 0.0, r1, r1 * -0.08)
    r5 = _np_conv_transpose2d(r4, np.asarray(params["w2"], np.float64),
                              np.asarray(params["b2"], np.float64), 1, 0, 0)
    ref = np.where(r5 > 0.0, r5, r5 * -0.41)

    got = np.asarray(out, np.float64)
    assert np.isfinite(got).all()
    err = np.max(np.abs(got - ref))
    scale = np.max(np.abs(ref)) + 1e-6
    assert err <= 5e-2 * scale, (err, scale)     # bf16 inputs, f32 accumulation
    print("KERNEL_OK")
</pallas_src>

<mosaic_0001>
module attributes {stable_mosaic.version = 11 : i64} {
  func.func @_fused_kernel(%arg0: i32, %arg1: memref<1x304x352xbf16, #tpu.memory_space<vmem>>, %arg2: memref<9x352x128xbf16, #tpu.memory_space<vmem>>, %arg3: memref<9x128x8xbf16, #tpu.memory_space<vmem>>, %arg4: memref<1x8xf32, #tpu.memory_space<vmem>>, %arg5: memref<1x256x8xf32, #tpu.memory_space<vmem>>, %arg6: memref<2x288x352xbf16, #tpu.memory_space<vmem>>, %arg7: memref<304x128xbf16, #tpu.memory_space<vmem>>, %arg8: memref<2x288x128xbf16, #tpu.memory_space<vmem>>, %arg9: memref<256x128xf32, #tpu.memory_space<vmem>>) attributes {dimension_semantics = [#tpu.dimension_semantics<parallel>], iteration_bounds = array<i64: 2>, scalar_prefetch = 0 : i64, scratch_operands = 4 : i64, tpu.core_type = #tpu.core_type<tc>, window_params = [{transform_indices = @transform_0, window_bounds = array<i64: 1, 304, 352>}, {pipeline_mode = #tpu.pipeline_mode<synchronous>, transform_indices = @transform_1, window_bounds = array<i64: 9, 352, 128>}, {pipeline_mode = #tpu.pipeline_mode<synchronous>, transform_indices = @transform_2, window_bounds = array<i64: 9, 128, 8>}, {pipeline_mode = #tpu.pipeline_mode<synchronous>, transform_indices = @transform_3, window_bounds = array<i64: 1, 8>}, {transform_indices = @transform_4, window_bounds = array<i64: 1, 256, 8>}]} {
    %c0 = arith.constant 0 : index
    %c1 = arith.constant 1 : index
    %c0_0 = arith.constant 0 : index
    %0 = vector.load %arg1[%c0, %c1, %c0_0] : memref<1x304x352xbf16, #tpu.memory_space<vmem>>, vector<1x288x352xbf16>
    %1 = vector.shape_cast %0 : vector<1x288x352xbf16> to vector<288x352xbf16>
    %c0_1 = arith.constant 0 : index
    %c0_2 = arith.constant 0 : index
    %c0_3 = arith.constant 0 : index
    %2 = vector.load %arg6[%c0_1, %c0_2, %c0_3] : memref<2x288x352xbf16, #tpu.memory_space<vmem>>, vector<1x288x352xbf16>
    %3 = vector.shape_cast %2 : vector<1x288x352xbf16> to vector<288x352xbf16>
    %4 = vector.shape_cast %1 : vector<288x352xbf16> to vector<1x288x352xbf16>
    tpu.vector_store %arg6[%c0_1, %c0_2, %c0_3], %4 {strides = array<i32>} : memref<2x288x352xbf16, #tpu.memory_space<vmem>>, vector<1x288x352xbf16>,
    %c0_4 = arith.constant 0 : index
    %c2 = arith.constant 2 : index
    %c0_5 = arith.constant 0 : index
    %5 = vector.load %arg1[%c0_4, %c2, %c0_5] : memref<1x304x352xbf16, #tpu.memory_space<vmem>>, vector<1x288x352xbf16>
    %6 = vector.shape_cast %5 : vector<1x288x352xbf16> to vector<288x352xbf16>
    %c1_6 = arith.constant 1 : index
    %c0_7 = arith.constant 0 : index
    %c0_8 = arith.constant 0 : index
    %7 = vector.load %arg6[%c1_6, %c0_7, %c0_8] : memref<2x288x352xbf16, #tpu.memory_space<vmem>>, vector<1x288x352xbf16>
    %8 = vector.shape_cast %7 : vector<1x288x352xbf16> to vector<288x352xbf16>
    %9 = vector.shape_cast %6 : vector<288x352xbf16> to vector<1x288x352xbf16>
    tpu.vector_store %arg6[%c1_6, %c0_7, %c0_8], %9 {strides = array<i32>} : memref<2x288x352xbf16, #tpu.memory_space<vmem>>, vector<1x288x352xbf16>,
    %cst = arith.constant 0.000000e+00 : bf16
    %10 = vector.broadcast %cst : bf16 to vector<48x128xbf16>
    %c0_9 = arith.constant 0 : index
    %c0_10 = arith.constant 0 : index
    %11 = vector.load %arg7[%c0_9, %c0_10] : memref<304x128xbf16, #tpu.memory_space<vmem>>, vector<48x128xbf16>
    tpu.vector_store %arg7[%c0_9, %c0_10], %10 {strides = array<i32>} : memref<304x128xbf16, #tpu.memory_space<vmem>>, vector<48x128xbf16>,
    %c0_11 = arith.constant 0 : index
    %c0_12 = arith.constant 0 : index
    %c0_13 = arith.constant 0 : index
    %12 = vector.load %arg1[%c0_11, %c0_12, %c0_13] : memref<1x304x352xbf16, #tpu.memory_space<vmem>>, vector<1x256x352xbf16>
    %13 = vector.shape_cast %12 : vector<1x256x352xbf16> to vector<256x352xbf16>
    %c0_14 = arith.constant 0 : index
    %c0_15 = arith.constant 0 : index
    %c0_16 = arith.constant 0 : index
    %14 = vector.load %arg2[%c0_14, %c0_15, %c0_16] : memref<9x352x128xbf16, #tpu.memory_space<vmem>>, vector<1x352x128xbf16>
    %15 = vector.shape_cast %14 : vector<1x352x128xbf16> to vector<352x128xbf16>
    %cst_17 = arith.constant dense<0.000000e+00> : vector<256x128xf32>
    %16 = tpu.matmul %13, %15, %cst_17 {dimension_numbers = #tpu.dot_dimension_numbers<[1], [0], [0], [1], [0, 0, 1, 1], [], []>} : vector<256x352xbf16>, vector<352x128xbf16>, vector<256x128xf32> -> vector<256x128xf32>
    %c0_18 = arith.constant 0 : index
    %c0_19 = arith.constant 0 : index
    %17 = vector.load %arg9[%c0_18, %c0_19] : memref<256x128xf32, #tpu.memory_space<vmem>>, vector<256x128xf32>
    tpu.vector_store %arg9[%c0_18, %c0_19], %16 {strides = array<i32>} : memref<256x128xf32, #tpu.memory_space<vmem>>, vector<256x128xf32>,
    %c0_20 = arith.constant 0 : index
    %c16 = arith.constant 16 : index
    %c0_21 = arith.constant 0 : index
    %18 = vector.load %arg1[%c0_20, %c16, %c0_21] : memref<1x304x352xbf16, #tpu.memory_space<vmem>>, vector<1x256x352xbf16>
    %19 = vector.shape_cast %18 : vector<1x256x352xbf16> to vector<256x352xbf16>
    %c3 = arith.constant 3 : index
    %c0_22 = arith.constant 0 : index
    %c0_23 = arith.constant 0 : index
    %20 = vector.load %arg2[%c3, %c0_22, %c0_23] : memref<9x352x128xbf16, #tpu.memory_space<vmem>>, vector<1x352x128xbf16>
    %21 = vector.shape_cast %20 : vector<1x352x128xbf16> to vector<352x128xbf16>
    %cst_24 = arith.constant dense<0.000000e+00> : vector<256x128xf32>
    %22 = tpu.matmul %19, %21, %cst_24 {dimension_numbers = #tpu.dot_dimension_numbers<[1], [0], [0], [1], [0, 0, 1, 1], [], []>} : vector<256x352xbf16>, vector<352x128xbf16>, vector<256x128xf32> -> vector<256x128xf32>
    %c0_25 = arith.constant 0 : index
    %c0_26 = arith.constant 0 : index
    %23 = vector.load %arg9[%c0_25, %c0_26] : memref<256x128xf32, #tpu.memory_space<vmem>>, vector<256x128xf32>
    %24 = arith.addf %23, %22 : vector<256x128xf32>
    %c0_27 = arith.constant 0 : index
    %c0_28 = arith.constant 0 : index
    %25 = vector.load %arg9[%c0_27, %c0_28] : memref<256x128xf32, #tpu.memory_space<vmem>>, vector<256x128xf32>
    tpu.vector_store %arg9[%c0_27, %c0_28], %24 {strides = array<i32>} : memref<256x128xf32, #tpu.memory_space<vmem>>, vector<256x128xf32>,
    %c0_29 = arith.constant 0 : index
    %c32 = arith.constant 32 : index
    %c0_30 = arith.constant 0 : index
    %26 = vector.load %arg1[%c0_29, %c32, %c0_30] : memref<1x304x352xbf16, #tpu.memory_space<vmem>>, vector<1x256x352xbf16>
    %27 = vector.shape_cast %26 : vector<1x256x352xbf16> to vector<256x352xbf16>
    %c6 = arith.constant 6 : index
    %c0_31 = arith.constant 0 : index
    %c0_32 = arith.constant 0 : index
    %28 = vector.load %arg2[%c6, %c0_31, %c0_32] : memref<9x352x128xbf16, #tpu.memory_space<vmem>>, vector<1x352x128xbf16>
    %29 = vector.shape_cast %28 : vector<1x352x128xbf16> to vector<352x128xbf16>
    %cst_33 = arith.constant dense<0.000000e+00> : vector<256x128xf32>
    %30 = tpu.matmul %27, %29, %cst_33 {dimension_numbers = #tpu.dot_dimension_numbers<[1], [0], [0], [1], [0, 0, 1, 1], [], []>} : vector<256x352xbf16>, vector<352x128xbf16>, vector<256x128xf32> -> vector<256x128xf32>
    %c0_34 = arith.constant 0 : index
    %c0_35 = arith.constant 0 : index
    %31 = vector.load %arg9[%c0_34, %c0_35] : memref<256x128xf32, #tpu.memory_space<vmem>>, vector<256x128xf32>
    %32 = arith.addf %31, %30 : vector<256x128xf32>
    %c0_36 = arith.constant 0 : index
    %c0_37 = arith.constant 0 : index
    %33 = vector.load %arg9[%c0_36, %c0_37] : memref<256x128xf32, #tpu.memory_space<vmem>>, vector<256x128xf32>
    tpu.vector_store %arg9[%c0_36, %c0_37], %32 {strides = array<i32>} : memref<256x128xf32, #tpu.memory_space<vmem>>, vector<256x128xf32>,
    %c0_38 = arith.constant 0 : index
    %c0_39 = arith.constant 0 : index
    %c0_40 = arith.constant 0 : index
    %34 = vector.load %arg6[%c0_38, %c0_39, %c0_40] : memref<2x288x352xbf16, #tpu.memory_space<vmem>>, vector<1x256x352xbf16>
    %35 = vector.shape_cast %34 : vector<1x256x352xbf16> to vector<256x352xbf16>
    %c1_41 = arith.constant 1 : index
    %c0_42 = arith.constant 0 : index
    %c0_43 = arith.constant 0 : index
    %36 = vector.load %arg2[%c1_41, %c0_42, %c0_43] : memref<9x352x128xbf16, #tpu.memory_space<vmem>>, vector<1x352x128xbf16>
    %37 = vector.shape_cast %36 : vector<1x352x128xbf16> to vector<352x128xbf16>
    %cst_44 = arith.constant dense<0.000000e+00> : vector<256x128xf32>
    %38 = tpu.matmul %35, %37, %cst_44 {dimension_numbers = #tpu.dot_dimension_numbers<[1], [0], [0], [1], [0, 0, 1, 1], [], []>} : vector<256x352xbf16>, vector<352x128xbf16>, vector<256x128xf32> -> vector<256x128xf32>
    %c0_45 = arith.constant 0 : index
    %c0_46 = arith.constant 0 : index
    %39 = vector.load %arg9[%c0_45, %c0_46] : memref<256x128xf32, #tpu.memory_space<vmem>>, vector<256x128xf32>
    %40 = arith.addf %39, %38 : vector<256x128xf32>
    %c0_47 = arith.constant 0 : index
    %c0_48 = arith.constant 0 : index
    %41 = vector.load %arg9[%c0_47, %c0_48] : memref<256x128xf32, #tpu.memory_space<vmem>>, vector<256x128xf32>
    tpu.vector_store %arg9[%c0_47, %c0_48], %40 {strides = array<i32>} : memref<256x128xf32, #tpu.memory_space<vmem>>, vector<256x128xf32>,
    %c0_49 = arith.constant 0 : index
    %c16_50 = arith.constant 16 : index
    %c0_51 = arith.constant 0 : index
    %42 = vector.load %arg6[%c0_49, %c16_50, %c0_51] : memref<2x288x352xbf16, #tpu.memory_space<vmem>>, vector<1x256x352xbf16>
    %43 = vector.shape_cast %42 : vector<1x256x352xbf16> to vector<256x352xbf16>
    %c4 = arith.constant 4 : index
    %c0_52 = arith.constant 0 : index
    %c0_53 = arith.constant 0 : index
    %44 = vector.load %arg2[%c4, %c0_52, %c0_53] : memref<9x352x128xbf16, #tpu.memory_space<vmem>>, vector<1x352x128xbf16>
    %45 = vector.shape_cast %44 : vector<1x352x128xbf16> to vector<352x128xbf16>
    %cst_54 = arith.constant dense<0.000000e+00> : vector<256x128xf32>
    %46 = tpu.matmul %43, %45, %cst_54 {dimension_numbers = #tpu.dot_dimension_numbers<[1], [0], [0], [1], [0, 0, 1, 1], [], []>} : vector<256x352xbf16>, vector<352x128xbf16>, vector<256x128xf32> -> vector<256x128xf32>
    %c0_55 = arith.constant 0 : index
    %c0_56 = arith.constant 0 : index
    %47 = vector.load %arg9[%c0_55, %c0_56] : memref<256x128xf32, #tpu.memory_space<vmem>>, vector<256x128xf32>
    %48 = arith.addf %47, %46 : vector<256x128xf32>
    %c0_57 = arith.constant 0 : index
    %c0_58 = arith.constant 0 : index
    %49 = vector.load %arg9[%c0_57, %c0_58] : memref<256x128xf32, #tpu.memory_space<vmem>>, vector<256x128xf32>
    tpu.vector_store %arg9[%c0_57, %c0_58], %48 {strides = array<i32>} : memref<256x128xf32, #tpu.memory_space<vmem>>, vector<256x128xf32>,
    %c0_59 = arith.constant 0 : index
    %c32_60 = arith.constant 32 : index
    %c0_61 = arith.constant 0 : index
    %50 = vector.load %arg6[%c0_59, %c32_60, %c0_61] : memref<2x288x352xbf16, #tpu.memory_space<vmem>>, vector<1x256x352xbf16>
    %51 = vector.shape_cast %50 : vector<1x256x352xbf16> to vector<256x352xbf16>
    %c7 = arith.constant 7 : index
    %c0_62 = arith.constant 0 : index
    %c0_63 = arith.constant 0 : index
    %52 = vector.load %arg2[%c7, %c0_62, %c0_63] : memref<9x352x128xbf16, #tpu.memory_space<vmem>>, vector<1x352x128xbf16>
    %53 = vector.shape_cast %52 : vector<1x352x128xbf16> to vector<352x128xbf16>
    %cst_64 = arith.constant dense<0.000000e+00> : vector<256x128xf32>
    %54 = tpu.matmul %51, %53, %cst_64 {dimension_numbers = #tpu.dot_dimension_numbers<[1], [0], [0], [1], [0, 0, 1, 1], [], []>} : vector<256x352xbf16>, vector<352x128xbf16>, vector<256x128xf32> -> vector<256x128xf32>
    %c0_65 = arith.constant 0 : index
    %c0_66 = arith.constant 0 : index
    %55 = vector.load %arg9[%c0_65, %c0_66] : memref<256x128xf32, #tpu.memory_space<vmem>>, vector<256x128xf32>
    %56 = arith.addf %55, %54 : vector<256x128xf32>
    %c0_67 = arith.constant 0 : index
    %c0_68 = arith.constant 0 : index
    %57 = vector.load %arg9[%c0_67, %c0_68] : memref<256x128xf32, #tpu.memory_space<vmem>>, vector<256x128xf32>
    tpu.vector_store %arg9[%c0_67, %c0_68], %56 {strides = array<i32>} : memref<256x128xf32, #tpu.memory_space<vmem>>, vector<256x128xf32>,
    %c1_69 = arith.constant 1 : index
    %c0_70 = arith.constant 0 : index
    %c0_71 = arith.constant 0 : index
    %58 = vector.load %arg6[%c1_69, %c0_70, %c0_71] : memref<2x288x352xbf16, #tpu.memory_space<vmem>>, vector<1x256x352xbf16>
    %59 = vector.shape_cast %58 : vector<1x256x352xbf16> to vector<256x352xbf16>
    %c2_72 = arith.constant 2 : index
    %c0_73 = arith.constant 0 : index
    %c0_74 = arith.constant 0 : index
    %60 = vector.load %arg2[%c2_72, %c0_73, %c0_74] : memref<9x352x128xbf16, #tpu.memory_space<vmem>>, vector<1x352x128xbf16>
    %61 = vector.shape_cast %60 : vector<1x352x128xbf16> to vector<352x128xbf16>
    %cst_75 = arith.constant dense<0.000000e+00> : vector<256x128xf32>
    %62 = tpu.matmul %59, %61, %cst_75 {dimension_numbers = #tpu.dot_dimension_numbers<[1], [0], [0], [1], [0, 0, 1, 1], [], []>} : vector<256x352xbf16>, vector<352x128xbf16>, vector<256x128xf32> -> vector<256x128xf32>
    %c0_76 = arith.constant 0 : index
    %c0_77 = arith.constant 0 : index
    %63 = vector.load %arg9[%c0_76, %c0_77] : memref<256x128xf32, #tpu.memory_space<vmem>>, vector<256x128xf32>
    %64 = arith.addf %63, %62 : vector<256x128xf32>
    %c0_78 = arith.constant 0 : index
    %c0_79 = arith.constant 0 : index
    %65 = vector.load %arg9[%c0_78, %c0_79] : memref<256x128xf32, #tpu.memory_space<vmem>>, vector<256x128xf32>
    tpu.vector_store %arg9[%c0_78, %c0_79], %64 {strides = array<i32>} : memref<256x128xf32, #tpu.memory_space<vmem>>, vector<256x128xf32>,
    %c1_80 = arith.constant 1 : index
    %c16_81 = arith.constant 16 : index
    %c0_82 = arith.constant 0 : index
    %66 = vector.load %arg6[%c1_80, %c16_81, %c0_82] : memref<2x288x352xbf16, #tpu.memory_space<vmem>>, vector<1x256x352xbf16>
    %67 = vector.shape_cast %66 : vector<1x256x352xbf16> to vector<256x352xbf16>
    %c5 = arith.constant 5 : index
    %c0_83 = arith.constant 0 : index
    %c0_84 = arith.constant 0 : index
    %68 = vector.load %arg2[%c5, %c0_83, %c0_84] : memref<9x352x128xbf16, #tpu.memory_space<vmem>>, vector<1x352x128xbf16>
    %69 = vector.shape_cast %68 : vector<1x352x128xbf16> to vector<352x128xbf16>
    %cst_85 = arith.constant dense<0.000000e+00> : vector<256x128xf32>
    %70 = tpu.matmul %67, %69, %cst_85 {dimension_numbers = #tpu.dot_dimension_numbers<[1], [0], [0], [1], [0, 0, 1, 1], [], []>} : vector<256x352xbf16>, vector<352x128xbf16>, vector<256x128xf32> -> vector<256x128xf32>
    %c0_86 = arith.constant 0 : index
    %c0_87 = arith.constant 0 : index
    %71 = vector.load %arg9[%c0_86, %c0_87] : memref<256x128xf32, #tpu.memory_space<vmem>>, vector<256x128xf32>
    %72 = arith.addf %71, %70 : vector<256x128xf32>
    %c0_88 = arith.constant 0 : index
    %c0_89 = arith.constant 0 : index
    %73 = vector.load %arg9[%c0_88, %c0_89] : memref<256x128xf32, #tpu.memory_space<vmem>>, vector<256x128xf32>
    tpu.vector_store %arg9[%c0_88, %c0_89], %72 {strides = array<i32>} : memref<256x128xf32, #tpu.memory_space<vmem>>, vector<256x128xf32>,
    %c1_90 = arith.constant 1 : index
    %c32_91 = arith.constant 32 : index
    %c0_92 = arith.constant 0 : index
    %74 = vector.load %arg6[%c1_90, %c32_91, %c0_92] : memref<2x288x352xbf16, #tpu.memory_space<vmem>>, vector<1x256x352xbf16>
    %75 = vector.shape_cast %74 : vector<1x256x352xbf16> to vector<256x352xbf16>
    %c8 = arith.constant 8 : index
    %c0_93 = arith.constant 0 : index
    %c0_94 = arith.constant 0 : index
    %76 = vector.load %arg2[%c8, %c0_93, %c0_94] : memref<9x352x128xbf16, #tpu.memory_space<vmem>>, vector<1x352x128xbf16>
    %77 = vector.shape_cast %76 : vector<1x352x128xbf16> to vector<352x128xbf16>
    %cst_95 = arith.constant dense<0.000000e+00> : vector<256x128xf32>
    %78 = tpu.matmul %75, %77, %cst_95 {dimension_numbers = #tpu.dot_dimension_numbers<[1], [0], [0], [1], [0, 0, 1, 1], [], []>} : vector<256x352xbf16>, vector<352x128xbf16>, vector<256x128xf32> -> vector<256x128xf32>
    %c0_96 = arith.constant 0 : index
    %c0_97 = arith.constant 0 : index
    %79 = vector.load %arg9[%c0_96, %c0_97] : memref<256x128xf32, #tpu.memory_space<vmem>>, vector<256x128xf32>
    %80 = arith.addf %79, %78 : vector<256x128xf32>
    %c0_98 = arith.constant 0 : index
    %c0_99 = arith.constant 0 : index
    %81 = vector.load %arg9[%c0_98, %c0_99] : memref<256x128xf32, #tpu.memory_space<vmem>>, vector<256x128xf32>
    tpu.vector_store %arg9[%c0_98, %c0_99], %80 {strides = array<i32>} : memref<256x128xf32, #tpu.memory_space<vmem>>, vector<256x128xf32>,
    %c0_100 = arith.constant 0 : index
    %c0_101 = arith.constant 0 : index
    %82 = vector.load %arg9[%c0_100, %c0_101] : memref<256x128xf32, #tpu.memory_space<vmem>>, vector<128x128xf32>
    %cst_102 = arith.constant 0.000000e+00 : f32
    %83 = vector.broadcast %cst_102 : f32 to vector<128x128xf32>
    %84 = arith.cmpf ogt, %82, %83 : vector<128x128xf32>
    %cst_103 = arith.constant -8.000000e-02 : f32
    %85 = vector.broadcast %cst_103 : f32 to vector<128x128xf32>
    %86 = arith.mulf %82, %85 : vector<128x128xf32>
    %87 = arith.select %84, %82, %86 : vector<128x128xi1>, vector<128x128xf32>
    %88 = tpu.iota {dimensions = array<i32: 0>} : vector<128x1xi32>
    %c0_i32 = arith.constant 0 : i32
    %89 = vector.broadcast %c0_i32 : i32 to vector<128x1xi32>
    %90 = arith.addi %89, %88 : vector<128x1xi32>
    %c16_i32 = arith.constant 16 : i32
    %c0_i32_104 = arith.constant 0 : i32
    %91 = arith.cmpi eq, %c16_i32, %c0_i32_104 : i32
    %c1_i32 = arith.constant 1 : i32
    %92 = arith.select %91, %c1_i32, %c16_i32 : i32
    %93 = vector.broadcast %92 : i32 to vector<128x1xi32>
    %94 = arith.remsi %90, %93 : vector<128x1xi32>
    %c0_i32_105 = arith.constant 0 : i32
    %95 = vector.broadcast %c0_i32_105 : i32 to vector<128x1xi32>
    %96 = arith.cmpi ne, %94, %95 : vector<128x1xi32>
    %c0_i32_106 = arith.constant 0 : i32
    %97 = vector.broadcast %c0_i32_106 : i32 to vector<128x1xi32>
    %98 = arith.cmpi slt, %94, %97 : vector<128x1xi32>
    %c0_i32_107 = arith.constant 0 : i32
    %99 = arith.cmpi slt, %92, %c0_i32_107 : i32
    %100 = vector.broadcast %99 : i1 to vector<128x1xi1>
    %101 = vector.broadcast %100 : vector<128x1xi1> to vector<128x1xi1>
    %102 = arith.xori %98, %101 : vector<128x1xi1>
    %103 = arith.andi %102, %96 : vector<128x1xi1>
    %104 = vector.broadcast %92 : i32 to vector<128x1xi32>
    %105 = arith.addi %94, %104 : vector<128x1xi32>
    %106 = arith.select %103, %105, %94 : vector<128x1xi1>, vector<128x1xi32>
    %c12_i32 = arith.constant 12 : i32
    %107 = vector.broadcast %c12_i32 : i32 to vector<128x1xi32>
    %108 = arith.cmpi slt, %106, %107 : vector<128x1xi32>
    %c192_i32 = arith.constant 192 : i32
    %109 = vector.broadcast %c192_i32 : i32 to vector<128x1xi32>
    %110 = arith.cmpi slt, %90, %109 : vector<128x1xi32>
    %111 = arith.andi %108, %110 : vector<128x1xi1>
    %cst_108 = arith.constant 0.000000e+00 : f32
    %112 = vector.shape_cast %111 : vector<128x1xi1> to vector<128x1xi1>
    %113 = vector.broadcast %112 : vector<128x1xi1> to vector<128x128xi1>
    %114 = vector.broadcast %cst_108 : f32 to vector<128x128xf32>
    %115 = arith.select %113, %87, %114 : vector<128x128xi1>, vector<128x128xf32>
    %116 = arith.truncf %115 : vector<128x128xf32> to vector<128x128xbf16>
    %c48 = arith.constant 48 : index
    %c0_109 = arith.constant 0 : index
    %117 = vector.load %arg7[%c48, %c0_109] : memref<304x128xbf16, #tpu.memory_space<vmem>>, vector<128x128xbf16>
    tpu.vector_store %arg7[%c48, %c0_109], %116 {strides = array<i32>} : memref<304x128xbf16, #tpu.memory_space<vmem>>, vector<128x128xbf16>,
    %c128 = arith.constant 128 : index
    %c0_110 = arith.constant 0 : index
    %118 = vector.load %arg9[%c128, %c0_110] : memref<256x128xf32, #tpu.memory_space<vmem>>, vector<128x128xf32>
    %cst_111 = arith.constant 0.000000e+00 : f32
    %119 = vector.broadcast %cst_111 : f32 to vector<128x128xf32>
    %120 = arith.cmpf ogt, %118, %119 : vector<128x128xf32>
    %cst_112 = arith.constant -8.000000e-02 : f32
    %121 = vector.broadcast %cst_112 : f32 to vector<128x128xf32>
    %122 = arith.mulf %118, %121 : vector<128x128xf32>
    %123 = arith.select %120, %118, %122 : vector<128x128xi1>, vector<128x128xf32>
    %124 = tpu.iota {dimensions = array<i32: 0>} : vector<128x1xi32>
    %c128_i32 = arith.constant 128 : i32
    %125 = vector.broadcast %c128_i32 : i32 to vector<128x1xi32>
    %126 = arith.addi %125, %124 : vector<128x1xi32>
    %c16_i32_113 = arith.constant 16 : i32
    %c0_i32_114 = arith.constant 0 : i32
    %127 = arith.cmpi eq, %c16_i32_113, %c0_i32_114 : i32
    %c1_i32_115 = arith.constant 1 : i32
    %128 = arith.select %127, %c1_i32_115, %c16_i32_113 : i32
    %129 = vector.broadcast %128 : i32 to vector<128x1xi32>
    %130 = arith.remsi %126, %129 : vector<128x1xi32>
    %c0_i32_116 = arith.constant 0 : i32
    %131 = vector.broadcast %c0_i32_116 : i32 to vector<128x1xi32>
    %132 = arith.cmpi ne, %130, %131 : vector<128x1xi32>
    %c0_i32_117 = arith.constant 0 : i32
    %133 = vector.broadcast %c0_i32_117 : i32 to vector<128x1xi32>
    %134 = arith.cmpi slt, %130, %133 : vector<128x1xi32>
    %c0_i32_118 = arith.constant 0 : i32
    %135 = arith.cmpi slt, %128, %c0_i32_118 : i32
    %136 = vector.broadcast %135 : i1 to vector<128x1xi1>
    %137 = vector.broadcast %136 : vector<128x1xi1> to vector<128x1xi1>
    %138 = arith.xori %134, %137 : vector<128x1xi1>
    %139 = arith.andi %138, %132 : vector<128x1xi1>
    %140 = vector.broadcast %128 : i32 to vector<128x1xi32>
    %141 = arith.addi %130, %140 : vector<128x1xi32>
    %142 = arith.select %139, %141, %130 : vector<128x1xi1>, vector<128x1xi32>
    %c12_i32_119 = arith.constant 12 : i32
    %143 = vector.broadcast %c12_i32_119 : i32 to vector<128x1xi32>
    %144 = arith.cmpi slt, %142, %143 : vector<128x1xi32>
    %c192_i32_120 = arith.constant 192 : i32
    %145 = vector.broadcast %c192_i32_120 : i32 to vector<128x1xi32>
    %146 = arith.cmpi slt, %126, %145 : vector<128x1xi32>
    %147 = arith.andi %144, %146 : vector<128x1xi1>
    %cst_121 = arith.constant 0.000000e+00 : f32
    %148 = vector.shape_cast %147 : vector<128x1xi1> to vector<128x1xi1>
    %149 = vector.broadcast %148 : vector<128x1xi1> to vector<128x128xi1>
    %150 = vector.broadcast %cst_121 : f32 to vector<128x128xf32>
    %151 = arith.select %149, %123, %150 : vector<128x128xi1>, vector<128x128xf32>
    %152 = arith.truncf %151 : vector<128x128xf32> to vector<128x128xbf16>
    %c176 = arith.constant 176 : index
    %c0_122 = arith.constant 0 : index
    %153 = vector.load %arg7[%c176, %c0_122] : memref<304x128xbf16, #tpu.memory_space<vmem>>, vector<128x128xbf16>
    tpu.vector_store %arg7[%c176, %c0_122], %152 {strides = array<i32>} : memref<304x128xbf16, #tpu.memory_space<vmem>>, vector<128x128xbf16>,
    %c14 = arith.constant 14 : index
    %c0_123 = arith.constant 0 : index
    %154 = vector.load %arg7[%c14, %c0_123] : memref<304x128xbf16, #tpu.memory_space<vmem>>, vector<288x128xbf16>
    %c0_124 = arith.constant 0 : index
    %c0_125 = arith.constant 0 : index
    %c0_126 = arith.constant 0 : index
    %155 = vector.load %arg8[%c0_124, %c0_125, %c0_126] : memref<2x288x128xbf16, #tpu.memory_space<vmem>>, vector<1x288x128xbf16>
    %156 = vector.shape_cast %155 : vector<1x288x128xbf16> to vector<288x128xbf16>
    %157 = vector.shape_cast %154 : vector<288x128xbf16> to vector<1x288x128xbf16>
    tpu.vector_store %arg8[%c0_124, %c0_125, %c0_126], %157 {strides = array<i32>} : memref<2x288x128xbf16, #tpu.memory_space<vmem>>, vector<1x288x128xbf16>,
    %c15 = arith.constant 15 : index
    %c0_127 = arith.constant 0 : index
    %158 = vector.load %arg7[%c15, %c0_127] : memref<304x128xbf16, #tpu.memory_space<vmem>>, vector<288x128xbf16>
    %c1_128 = arith.constant 1 : index
    %c0_129 = arith.constant 0 : index
    %c0_130 = arith.constant 0 : index
    %159 = vector.load %arg8[%c1_128, %c0_129, %c0_130] : memref<2x288x128xbf16, #tpu.memory_space<vmem>>, vector<1x288x128xbf16>
    %160 = vector.shape_cast %159 : vector<1x288x128xbf16> to vector<288x128xbf16>
    %161 = vector.shape_cast %158 : vector<288x128xbf16> to vector<1x288x128xbf16>
    tpu.vector_store %arg8[%c1_128, %c0_129, %c0_130], %161 {strides = array<i32>} : memref<2x288x128xbf16, #tpu.memory_space<vmem>>, vector<1x288x128xbf16>,
    %c0_131 = arith.constant 0 : index
    %c0_132 = arith.constant 0 : index
    %162 = vector.load %arg4[%c0_131, %c0_132] : memref<1x8xf32, #tpu.memory_space<vmem>>, vector<1x8xf32>
    %163 = vector.shape_cast %162 : vector<1x8xf32> to vector<1x8xf32>
    %164 = vector.broadcast %163 : vector<1x8xf32> to vector<128x8xf32>
    %c0_133 = arith.constant 0 : index
    %c0_134 = arith.constant 0 : index
    %c0_135 = arith.constant 0 : index
    %165 = vector.load %arg8[%c0_133, %c0_134, %c0_135] : memref<2x288x128xbf16, #tpu.memory_space<vmem>>, vector<1x128x128xbf16>
    %166 = vector.shape_cast %165 : vector<1x128x128xbf16> to vector<128x128xbf16>
    %c0_136 = arith.constant 0 : index
    %c0_137 = arith.constant 0 : index
    %c0_138 = arith.constant 0 : index
    %167 = vector.load %arg3[%c0_136, %c0_137, %c0_138] : memref<9x128x8xbf16, #tpu.memory_space<vmem>>, vector<1x128x8xbf16>
    %168 = vector.shape_cast %167 : vector<1x128x8xbf16> to vector<128x8xbf16>
    %cst_139 = arith.constant dense<0.000000e+00> : vector<128x8xf32>
    %169 = tpu.matmul %166, %168, %cst_139 {dimension_numbers = #tpu.dot_dimension_numbers<[1], [0], [0], [1], [0, 0, 1, 1], [], []>} : vector<128x128xbf16>, vector<128x8xbf16>, vector<128x8xf32> -> vector<128x8xf32>
    %170 = arith.addf %164, %169 : vector<128x8xf32>
    %c1_140 = arith.constant 1 : index
    %c0_141 = arith.constant 0 : index
    %c0_142 = arith.constant 0 : index
    %171 = vector.load %arg8[%c1_140, %c0_141, %c0_142] : memref<2x288x128xbf16, #tpu.memory_space<vmem>>, vector<1x128x128xbf16>
    %172 = vector.shape_cast %171 : vector<1x128x128xbf16> to vector<128x128xbf16>
    %c1_143 = arith.constant 1 : index
    %c0_144 = arith.constant 0 : index
    %c0_145 = arith.constant 0 : index
    %173 = vector.load %arg3[%c1_143, %c0_144, %c0_145] : memref<9x128x8xbf16, #tpu.memory_space<vmem>>, vector<1x128x8xbf16>
    %174 = vector.shape_cast %173 : vector<1x128x8xbf16> to vector<128x8xbf16>
    %cst_146 = arith.constant dense<0.000000e+00> : vector<128x8xf32>
    %175 = tpu.matmul %172, %174, %cst_146 {dimension_numbers = #tpu.dot_dimension_numbers<[1], [0], [0], [1], [0, 0, 1, 1], [], []>} : vector<128x128xbf16>, vector<128x8xbf16>, vector<128x8xf32> -> vector<128x8xf32>
    %176 = arith.addf %170, %175 : vector<128x8xf32>
    %c16_147 = arith.constant 16 : index
    %c0_148 = arith.constant 0 : index
    %177 = vector.load %arg7[%c16_147, %c0_148] : memref<304x128xbf16, #tpu.memory_space<vmem>>, vector<128x128xbf16>
    %c2_149 = arith.constant 2 : index
    %c0_150 = arith.constant 0 : index
    %c0_151 = arith.constant 0 : index
    %178 = vector.load %arg3[%c2_149, %c0_150, %c0_151] : memref<9x128x8xbf16, #tpu.memory_space<vmem>>, vector<1x128x8xbf16>
    %179 = vector.shape_cast %178 : vector<1x128x8xbf16> to vector<128x8xbf16>
    %cst_152 = arith.constant dense<0.000000e+00> : vector<128x8xf32>
    %180 = tpu.matmul %177, %179, %cst_152 {dimension_numbers = #tpu.dot_dimension_numbers<[1], [0], [0], [1], [0, 0, 1, 1], [], []>} : vector<128x128xbf16>, vector<128x8xbf16>, vector<128x8xf32> -> vector<128x8xf32>
    %181 = arith.addf %176, %180 : vector<128x8xf32>
    %c0_153 = arith.constant 0 : index
    %c16_154 = arith.constant 16 : index
    %c0_155 = arith.constant 0 : index
    %182 = vector.load %arg8[%c0_153, %c16_154, %c0_155] : memref<2x288x128xbf16, #tpu.memory_space<vmem>>, vector<1x128x128xbf16>
    %183 = vector.shape_cast %182 : vector<1x128x128xbf16> to vector<128x128xbf16>
    %c3_156 = arith.constant 3 : index
    %c0_157 = arith.constant 0 : index
    %c0_158 = arith.constant 0 : index
    %184 = vector.load %arg3[%c3_156, %c0_157, %c0_158] : memref<9x128x8xbf16, #tpu.memory_space<vmem>>, vector<1x128x8xbf16>
    %185 = vector.shape_cast %184 : vector<1x128x8xbf16> to vector<128x8xbf16>
    %cst_159 = arith.constant dense<0.000000e+00> : vector<128x8xf32>
    %186 = tpu.matmul %183, %185, %cst_159 {dimension_numbers = #tpu.dot_dimension_numbers<[1], [0], [0], [1], [0, 0, 1, 1], [], []>} : vector<128x128xbf16>, vector<128x8xbf16>, vector<128x8xf32> -> vector<128x8xf32>
    %187 = arith.addf %181, %186 : vector<128x8xf32>
    %c1_160 = arith.constant 1 : index
    %c16_161 = arith.constant 16 : index
    %c0_162 = arith.constant 0 : index
    %188 = vector.load %arg8[%c1_160, %c16_161, %c0_162] : memref<2x288x128xbf16, #tpu.memory_space<vmem>>, vector<1x128x128xbf16>
    %189 = vector.shape_cast %188 : vector<1x128x128xbf16> to vector<128x128xbf16>
    %c4_163 = arith.constant 4 : index
    %c0_164 = arith.constant 0 : index
    %c0_165 = arith.constant 0 : index
    %190 = vector.load %arg3[%c4_163, %c0_164, %c0_165] : memref<9x128x8xbf16, #tpu.memory_space<vmem>>, vector<1x128x8xbf16>
    %191 = vector.shape_cast %190 : vector<1x128x8xbf16> to vector<128x8xbf16>
    %cst_166 = arith.constant dense<0.000000e+00> : vector<128x8xf32>
    %192 = tpu.matmul %189, %191, %cst_166 {dimension_numbers = #tpu.dot_dimension_numbers<[1], [0], [0], [1], [0, 0, 1, 1], [], []>} : vector<128x128xbf16>, vector<128x8xbf16>, vector<128x8xf32> -> vector<128x8xf32>
    %193 = arith.addf %187, %192 : vector<128x8xf32>
    %c32_167 = arith.constant 32 : index
    %c0_168 = arith.constant 0 : index
    %194 = vector.load %arg7[%c32_167, %c0_168] : memref<304x128xbf16, #tpu.memory_space<vmem>>, vector<128x128xbf16>
    %c5_169 = arith.constant 5 : index
    %c0_170 = arith.constant 0 : index
    %c0_171 = arith.constant 0 : index
    %195 = vector.load %arg3[%c5_169, %c0_170, %c0_171] : memref<9x128x8xbf16, #tpu.memory_space<vmem>>, vector<1x128x8xbf16>
    %196 = vector.shape_cast %195 : vector<1x128x8xbf16> to vector<128x8xbf16>
    %cst_172 = arith.constant dense<0.000000e+00> : vector<128x8xf32>
    %197 = tpu.matmul %194, %196, %cst_172 {dimension_numbers = #tpu.dot_dimension_numbers<[1], [0], [0], [1], [0, 0, 1, 1], [], []>} : vector<128x128xbf16>, vector<128x8xbf16>, vector<128x8xf32> -> vector<128x8xf32>
    %198 = arith.addf %193, %197 : vector<128x8xf32>
    %c0_173 = arith.constant 0 : index
    %c32_174 = arith.constant 32 : index
    %c0_175 = arith.constant 0 : index
    %199 = vector.load %arg8[%c0_173, %c32_174, %c0_175] : memref<2x288x128xbf16, #tpu.memory_space<vmem>>, vector<1x128x128xbf16>
    %200 = vector.shape_cast %199 : vector<1x128x128xbf16> to vector<128x128xbf16>
    %c6_176 = arith.constant 6 : index
    %c0_177 = arith.constant 0 : index
    %c0_178 = arith.constant 0 : index
    %201 = vector.load %arg3[%c6_176, %c0_177, %c0_178] : memref<9x128x8xbf16, #tpu.memory_space<vmem>>, vector<1x128x8xbf16>
    %202 = vector.shape_cast %201 : vector<1x128x8xbf16> to vector<128x8xbf16>
    %cst_179 = arith.constant dense<0.000000e+00> : vector<128x8xf32>
    %203 = tpu.matmul %200, %202, %cst_179 {dimension_numbers = #tpu.dot_dimension_numbers<[1], [0], [0], [1], [0, 0, 1, 1], [], []>} : vector<128x128xbf16>, vector<128x8xbf16>, vector<128x8xf32> -> vector<128x8xf32>
    %204 = arith.addf %198, %203 : vector<128x8xf32>
    %c1_180 = arith.constant 1 : index
    %c32_181 = arith.constant 32 : index
    %c0_182 = arith.constant 0 : index
    %205 = vector.load %arg8[%c1_180, %c32_181, %c0_182] : memref<2x288x128xbf16, #tpu.memory_space<vmem>>, vector<1x128x128xbf16>
    %206 = vector.shape_cast %205 : vector<1x128x128xbf16> to vector<128x128xbf16>
    %c7_183 = arith.constant 7 : index
    %c0_184 = arith.constant 0 : index
    %c0_185 = arith.constant 0 : index
    %207 = vector.load %arg3[%c7_183, %c0_184, %c0_185] : memref<9x128x8xbf16, #tpu.memory_space<vmem>>, vector<1x128x8xbf16>
    %208 = vector.shape_cast %207 : vector<1x128x8xbf16> to vector<128x8xbf16>
    %cst_186 = arith.constant dense<0.000000e+00> : vector<128x8xf32>
    %209 = tpu.matmul %206, %208, %cst_186 {dimension_numbers = #tpu.dot_dimension_numbers<[1], [0], [0], [1], [0, 0, 1, 1], [], []>} : vector<128x128xbf16>, vector<128x8xbf16>, vector<128x8xf32> -> vector<128x8xf32>
    %210 = arith.addf %204, %209 : vector<128x8xf32>
    %c48_187 = arith.constant 48 : index
    %c0_188 = arith.constant 0 : index
    %211 = vector.load %arg7[%c48_187, %c0_188] : memref<304x128xbf16, #tpu.memory_space<vmem>>, vector<128x128xbf16>
    %c8_189 = arith.constant 8 : index
    %c0_190 = arith.constant 0 : index
    %c0_191 = arith.constant 0 : index
    %212 = vector.load %arg3[%c8_189, %c0_190, %c0_191] : memref<9x128x8xbf16, #tpu.memory_space<vmem>>, vector<1x128x8xbf16>
    %213 = vector.shape_cast %212 : vector<1x128x8xbf16> to vector<128x8xbf16>
    %cst_192 = arith.constant dense<0.000000e+00> : vector<128x8xf32>
    %214 = tpu.matmul %211, %213, %cst_192 {dimension_numbers = #tpu.dot_dimension_numbers<[1], [0], [0], [1], [0, 0, 1, 1], [], []>} : vector<128x128xbf16>, vector<128x8xbf16>, vector<128x8xf32> -> vector<128x8xf32>
    %215 = arith.addf %210, %214 : vector<128x8xf32>
    %cst_193 = arith.constant 0.000000e+00 : f32
    %216 = vector.broadcast %cst_193 : f32 to vector<128x8xf32>
    %217 = arith.cmpf ogt, %215, %216 : vector<128x8xf32>
    %cst_194 = arith.constant -4.100000e-01 : f32
    %218 = vector.broadcast %cst_194 : f32 to vector<128x8xf32>
    %219 = arith.mulf %215, %218 : vector<128x8xf32>
    %220 = arith.select %217, %215, %219 : vector<128x8xi1>, vector<128x8xf32>
    %c0_195 = arith.constant 0 : index
    %c0_196 = arith.constant 0 : index
    %c0_197 = arith.constant 0 : index
    %221 = vector.load %arg5[%c0_195, %c0_196, %c0_197] : memref<1x256x8xf32, #tpu.memory_space<vmem>>, vector<1x128x8xf32>
    %222 = vector.shape_cast %221 : vector<1x128x8xf32> to vector<128x8xf32>
    %223 = vector.shape_cast %220 : vector<128x8xf32> to vector<1x128x8xf32>
    tpu.vector_store %arg5[%c0_195, %c0_196, %c0_197], %223 {strides = array<i32>} : memref<1x256x8xf32, #tpu.memory_space<vmem>>, vector<1x128x8xf32>,
    %c0_198 = arith.constant 0 : index
    %c128_199 = arith.constant 128 : index
    %c0_200 = arith.constant 0 : index
    %224 = vector.load %arg8[%c0_198, %c128_199, %c0_200] : memref<2x288x128xbf16, #tpu.memory_space<vmem>>, vector<1x128x128xbf16>
    %225 = vector.shape_cast %224 : vector<1x128x128xbf16> to vector<128x128xbf16>
    %c0_201 = arith.constant 0 : index
    %c0_202 = arith.constant 0 : index
    %c0_203 = arith.constant 0 : index
    %226 = vector.load %arg3[%c0_201, %c0_202, %c0_203] : memref<9x128x8xbf16, #tpu.memory_space<vmem>>, vector<1x128x8xbf16>
    %227 = vector.shape_cast %226 : vector<1x128x8xbf16> to vector<128x8xbf16>
    %cst_204 = arith.constant dense<0.000000e+00> : vector<128x8xf32>
    %228 = tpu.matmul %225, %227, %cst_204 {dimension_numbers = #tpu.dot_dimension_numbers<[1], [0], [0], [1], [0, 0, 1, 1], [], []>} : vector<128x128xbf16>, vector<128x8xbf16>, vector<128x8xf32> -> vector<128x8xf32>
    %229 = arith.addf %164, %228 : vector<128x8xf32>
    %c1_205 = arith.constant 1 : index
    %c128_206 = arith.constant 128 : index
    %c0_207 = arith.constant 0 : index
    %230 = vector.load %arg8[%c1_205, %c128_206, %c0_207] : memref<2x288x128xbf16, #tpu.memory_space<vmem>>, vector<1x128x128xbf16>
    %231 = vector.shape_cast %230 : vector<1x128x128xbf16> to vector<128x128xbf16>
    %c1_208 = arith.constant 1 : index
    %c0_209 = arith.constant 0 : index
    %c0_210 = arith.constant 0 : index
    %232 = vector.load %arg3[%c1_208, %c0_209, %c0_210] : memref<9x128x8xbf16, #tpu.memory_space<vmem>>, vector<1x128x8xbf16>
    %233 = vector.shape_cast %232 : vector<1x128x8xbf16> to vector<128x8xbf16>
    %cst_211 = arith.constant dense<0.000000e+00> : vector<128x8xf32>
    %234 = tpu.matmul %231, %233, %cst_211 {dimension_numbers = #tpu.dot_dimension_numbers<[1], [0], [0], [1], [0, 0, 1, 1], [], []>} : vector<128x128xbf16>, vector<128x8xbf16>, vector<128x8xf32> -> vector<128x8xf32>
    %235 = arith.addf %229, %234 : vector<128x8xf32>
    %c144 = arith.constant 144 : index
    %c0_212 = arith.constant 0 : index
    %236 = vector.load %arg7[%c144, %c0_212] : memref<304x128xbf16, #tpu.memory_space<vmem>>, vector<128x128xbf16>
    %c2_213 = arith.constant 2 : index
    %c0_214 = arith.constant 0 : index
    %c0_215 = arith.constant 0 : index
    %237 = vector.load %arg3[%c2_213, %c0_214, %c0_215] : memref<9x128x8xbf16, #tpu.memory_space<vmem>>, vector<1x128x8xbf16>
    %238 = vector.shape_cast %237 : vector<1x128x8xbf16> to vector<128x8xbf16>
    %cst_216 = arith.constant dense<0.000000e+00> : vector<128x8xf32>
    %239 = tpu.matmul %236, %238, %cst_216 {dimension_numbers = #tpu.dot_dimension_numbers<[1], [0], [0], [1], [0, 0, 1, 1], [], []>} : vector<128x128xbf16>, vector<128x8xbf16>, vector<128x8xf32> -> vector<128x8xf32>
    %240 = arith.addf %235, %239 : vector<128x8xf32>
    %c0_217 = arith.constant 0 : index
    %c144_218 = arith.constant 144 : index
    %c0_219 = arith.constant 0 : index
    %241 = vector.load %arg8[%c0_217, %c144_218, %c0_219] : memref<2x288x128xbf16, #tpu.memory_space<vmem>>, vector<1x128x128xbf16>
    %242 = vector.shape_cast %241 : vector<1x128x128xbf16> to vector<128x128xbf16>
    %c3_220 = arith.constant 3 : index
    %c0_221 = arith.constant 0 : index
    %c0_222 = arith.constant 0 : index
    %243 = vector.load %arg3[%c3_220, %c0_221, %c0_222] : memref<9x128x8xbf16, #tpu.memory_space<vmem>>, vector<1x128x8xbf16>
    %244 = vector.shape_cast %243 : vector<1x128x8xbf16> to vector<128x8xbf16>
    %cst_223 = arith.constant dense<0.000000e+00> : vector<128x8xf32>
    %245 = tpu.matmul %242, %244, %cst_223 {dimension_numbers = #tpu.dot_dimension_numbers<[1], [0], [0], [1], [0, 0, 1, 1], [], []>} : vector<128x128xbf16>, vector<128x8xbf16>, vector<128x8xf32> -> vector<128x8xf32>
    %246 = arith.addf %240, %245 : vector<128x8xf32>
    %c1_224 = arith.constant 1 : index
    %c144_225 = arith.constant 144 : index
    %c0_226 = arith.constant 0 : index
    %247 = vector.load %arg8[%c1_224, %c144_225, %c0_226] : memref<2x288x128xbf16, #tpu.memory_space<vmem>>, vector<1x128x128xbf16>
    %248 = vector.shape_cast %247 : vector<1x128x128xbf16> to vector<128x128xbf16>
    %c4_227 = arith.constant 4 : index
    %c0_228 = arith.constant 0 : index
    %c0_229 = arith.constant 0 : index
    %249 = vector.load %arg3[%c4_227, %c0_228, %c0_229] : memref<9x128x8xbf16, #tpu.memory_space<vmem>>, vector<1x128x8xbf16>
    %250 = vector.shape_cast %249 : vector<1x128x8xbf16> to vector<128x8xbf16>
    %cst_230 = arith.constant dense<0.000000e+00> : vector<128x8xf32>
    %251 = tpu.matmul %248, %250, %cst_230 {dimension_numbers = #tpu.dot_dimension_numbers<[1], [0], [0], [1], [0, 0, 1, 1], [], []>} : vector<128x128xbf16>, vector<128x8xbf16>, vector<128x8xf32> -> vector<128x8xf32>
    %252 = arith.addf %246, %251 : vector<128x8xf32>
    %c160 = arith.constant 160 : index
    %c0_231 = arith.constant 0 : index
    %253 = vector.load %arg7[%c160, %c0_231] : memref<304x128xbf16, #tpu.memory_space<vmem>>, vector<128x128xbf16>
    %c5_232 = arith.constant 5 : index
    %c0_233 = arith.constant 0 : index
    %c0_234 = arith.constant 0 : index
    %254 = vector.load %arg3[%c5_232, %c0_233, %c0_234] : memref<9x128x8xbf16, #tpu.memory_space<vmem>>, vector<1x128x8xbf16>
    %255 = vector.shape_cast %254 : vector<1x128x8xbf16> to vector<128x8xbf16>
    %cst_235 = arith.constant dense<0.000000e+00> : vector<128x8xf32>
    %256 = tpu.matmul %253, %255, %cst_235 {dimension_numbers = #tpu.dot_dimension_numbers<[1], [0], [0], [1], [0, 0, 1, 1], [], []>} : vector<128x128xbf16>, vector<128x8xbf16>, vector<128x8xf32> -> vector<128x8xf32>
    %257 = arith.addf %252, %256 : vector<128x8xf32>
    %c0_236 = arith.constant 0 : index
    %c160_237 = arith.constant 160 : index
    %c0_238 = arith.constant 0 : index
    %258 = vector.load %arg8[%c0_236, %c160_237, %c0_238] : memref<2x288x128xbf16, #tpu.memory_space<vmem>>, vector<1x128x128xbf16>
    %259 = vector.shape_cast %258 : vector<1x128x128xbf16> to vector<128x128xbf16>
    %c6_239 = arith.constant 6 : index
    %c0_240 = arith.constant 0 : index
    %c0_241 = arith.constant 0 : index
    %260 = vector.load %arg3[%c6_239, %c0_240, %c0_241] : memref<9x128x8xbf16, #tpu.memory_space<vmem>>, vector<1x128x8xbf16>
    %261 = vector.shape_cast %260 : vector<1x128x8xbf16> to vector<128x8xbf16>
    %cst_242 = arith.constant dense<0.000000e+00> : vector<128x8xf32>
    %262 = tpu.matmul %259, %261, %cst_242 {dimension_numbers = #tpu.dot_dimension_numbers<[1], [0], [0], [1], [0, 0, 1, 1], [], []>} : vector<128x128xbf16>, vector<128x8xbf16>, vector<128x8xf32> -> vector<128x8xf32>
    %263 = arith.addf %257, %262 : vector<128x8xf32>
    %c1_243 = arith.constant 1 : index
    %c160_244 = arith.constant 160 : index
    %c0_245 = arith.constant 0 : index
    %264 = vector.load %arg8[%c1_243, %c160_244, %c0_245] : memref<2x288x128xbf16, #tpu.memory_space<vmem>>, vector<1x128x128xbf16>
    %265 = vector.shape_cast %264 : vector<1x128x128xbf16> to vector<128x128xbf16>
    %c7_246 = arith.constant 7 : index
    %c0_247 = arith.constant 0 : index
    %c0_248 = arith.constant 0 : index
    %266 = vector.load %arg3[%c7_246, %c0_247, %c0_248] : memref<9x128x8xbf16, #tpu.memory_space<vmem>>, vector<1x128x8xbf16>
    %267 = vector.shape_cast %266 : vector<1x128x8xbf16> to vector<128x8xbf16>
    %cst_249 = arith.constant dense<0.000000e+00> : vector<128x8xf32>
    %268 = tpu.matmul %265, %267, %cst_249 {dimension_numbers = #tpu.dot_dimension_numbers<[1], [0], [0], [1], [0, 0, 1, 1], [], []>} : vector<128x128xbf16>, vector<128x8xbf16>, vector<128x8xf32> -> vector<128x8xf32>
    %269 = arith.addf %263, %268 : vector<128x8xf32>
    %c176_250 = arith.constant 176 : index
    %c0_251 = arith.constant 0 : index
    %270 = vector.load %arg7[%c176_250, %c0_251] : memref<304x128xbf16, #tpu.memory_space<vmem>>, vector<128x128xbf16>
    %c8_252 = arith.constant 8 : index
    %c0_253 = arith.constant 0 : index
    %c0_254 = arith.constant 0 : index
    %271 = vector.load %arg3[%c8_252, %c0_253, %c0_254] : memref<9x128x8xbf16, #tpu.memory_space<vmem>>, vector<1x128x8xbf16>
    %272 = vector.shape_cast %271 : vector<1x128x8xbf16> to vector<128x8xbf16>
    %cst_255 = arith.constant dense<0.000000e+00> : vector<128x8xf32>
    %273 = tpu.matmul %270, %272, %cst_255 {dimension_numbers = #tpu.dot_dimension_numbers<[1], [0], [0], [1], [0, 0, 1, 1], [], []>} : vector<128x128xbf16>, vector<128x8xbf16>, vector<128x8xf32> -> vector<128x8xf32>
    %274 = arith.addf %269, %273 : vector<128x8xf32>
    %cst_256 = arith.constant 0.000000e+00 : f32
    %275 = vector.broadcast %cst_256 : f32 to vector<128x8xf32>
    %276 = arith.cmpf ogt, %274, %275 : vector<128x8xf32>
    %cst_257 = arith.constant -4.100000e-01 : f32
    %277 = vector.broadcast %cst_257 : f32 to vector<128x8xf32>
    %278 = arith.mulf %274, %277 : vector<128x8xf32>
    %279 = arith.select %276, %274, %278 : vector<128x8xi1>, vector<128x8xf32>
    %c0_258 = arith.constant 0 : index
    %c128_259 = arith.constant 128 : index
    %c0_260 = arith.constant 0 : index
    %280 = vector.load %arg5[%c0_258, %c128_259, %c0_260] : memref<1x256x8xf32, #tpu.memory_space<vmem>>, vector<1x128x8xf32>
    %281 = vector.shape_cast %280 : vector<1x128x8xf32> to vector<128x8xf32>
    %282 = vector.shape_cast %279 : vector<128x8xf32> to vector<1x128x8xf32>
    tpu.vector_store %arg5[%c0_258, %c128_259, %c0_260], %282 {strides = array<i32>} : memref<1x256x8xf32, #tpu.memory_space<vmem>>, vector<1x128x8xf32>,
    return
  }
  func.func @transform_0(%arg0: i32) -> (i32, i32, i32) {
    %c0_i32 = arith.constant 0 : i32
    %c0_i32_0 = arith.constant 0 : i32
    %c0_i32_1 = arith.constant 0 : i32
    return %arg0, %c0_i32, %c0_i32_0 : i32, i32, i32
  }
  func.func @transform_1(%arg0: i32) -> (i32, i32, i32) {
    %c0_i32 = arith.constant 0 : i32
    %c0_i32_0 = arith.constant 0 : i32
    %c0_i32_1 = arith.constant 0 : i32
    %c0_i32_2 = arith.constant 0 : i32
    return %c0_i32, %c0_i32_0, %c0_i32_1 : i32, i32, i32
  }
  func.func @transform_2(%arg0: i32) -> (i32, i32, i32) {
    %c0_i32 = arith.constant 0 : i32
    %c0_i32_0 = arith.constant 0 : i32
    %c0_i32_1 = arith.constant 0 : i32
    %c0_i32_2 = arith.constant 0 : i32
    return %c0_i32, %c0_i32_0, %c0_i32_1 : i32, i32, i32
  }
  func.func @transform_3(%arg0: i32) -> (i32, i32) {
    %c0_i32 = arith.constant 0 : i32
    %c0_i32_0 = arith.constant 0 : i32
    %c0_i32_1 = arith.constant 0 : i32
    return %c0_i32, %c0_i32_0 : i32, i32
  }
  func.func @transform_4(%arg0: i32) -> (i32, i32, i32) {
    %c0_i32 = arith.constant 0 : i32
    %c0_i32_0 = arith.constant 0 : i32
    %c0_i32_1 = arith.constant 0 : i32
    return %arg0, %c0_i32, %c0_i32_0 : i32, i32, i32
  }
}

</mosaic_0001>

<bundles_post_ra>
// kernel: model_forward.1
= control target key start
LH: loop header
LB: loop body
LE: loop exit
PB: predicated region body
PF: predicated region fallthrough
CT: control target
= control target key end

     0   :  { %s21425_s15 = smov 0   ;;  %s26496_s0 = inlined_call_operand.vmem [shape: bf16[2,304,352], index: 0, kind: input, shape index: {}]   ;;  %s26497_s1 = inlined_call_operand.vmem [shape: bf16[9,352,128], index: 1, kind: input, shape index: {}]   ;;  %s26498_s2 = inlined_call_operand.vmem [shape: bf16[9,128,8], index: 2, kind: input, shape index: {}]   ;;  %s26499_s3 = inlined_call_operand.vmem [shape: f32[1,8], index: 3, kind: input, shape index: {}]   ;;  %s26500_s4 = inlined_call_operand.vmem [shape: f32[2,256,8], index: 4, kind: output, shape index: {}]  }
   0x1 LB: > { %s16261_s16 = sadd.s32 4294967295, %s21396_s15   ;;  %p16265_p0 = scmp.ge.s32.totalorder %s21396_s15, 1  ;;  %s21396_s15 = sphi %s21425_s15, %s14_s15  }
   0x2   : > { %p162_p1 = scmp.lt.s32.totalorder %s21396_s15, 3 }
   0x4   : > { %p163_p2 = pnand %p16265_p0, %p162_p1 }
   0x6   : > { %166 = sbr.rel (%p163_p2) target bundleno = 1573 (0x625), region = 36 }
   0xb   : > { %v20552_v0 = vld [vmem:[%s26497_s1 + $0x78] sm:$0xff]   ;;  %v20553_v1 = vld [vmem:[%s26497_s1 + $0xa8] sm:$0xff]   ;;  %v20555_v3 = vld [vmem:[%s26497_s1 + $0x70] sm:$0xff]   ;;  %p188_p3 = scmp.lt.s32.totalorder %s16261_s16, 1  ;;  %vm2149_vm0 = vcmask 785408   ;;  %vm1077_vm4 = vcmask 781312  }
   0xc   : > { %18075 = vmatprep.subr.bf16.mxu0 %v20552_v0  ;;  %v20554_v2 = vld [vmem:[%s26497_s1 + $0x38] sm:$0xff]   ;;  %19569 = vmatprep.subr.bf16.mxu1 %v20553_v1  ;;  %v20556_v4 = vld [vmem:[%s26497_s1 + $0xa0] sm:$0xff]   ;;  %v20557_v5 = vld [vmem:[%s26497_s1 + $0x30] sm:$0xff]   ;;  %vm273_vm1 = vsmask.f32 3328  ;;  %vm1297_vm5 = vcmask 1042432  }
   0xd   : > { %18076 = vmatpush3.bf16.msra.mxu0 %v20554_v2  ;;  %19570 = vmatpush3.bf16.msra.mxu1 %v20553_v1  ;;  %v20558_v6 = vld [vmem:[%s26497_s1 + $0x68] sm:$0xff]   ;;  %v20559_v7 = vld [vmem:[%s26497_s1 + $0x98] sm:$0xff]   ;;  %s26889_s16 = smov (!%p188_p3, %s16261_s16), 1  ;;  %v20561_v9 = vld [vmem:[%s26497_s1 + $0x60] sm:$0xff]   ;;  %vm274_vm2 = vsmask.f32 7440 }
   0xe   : > { %18077 = vmatprep.subr.bf16.mxu0 %v20555_v3  ;;  %19571 = vmatprep.subr.bf16.mxu1 %v20556_v4  ;;  %v20560_v8 = vld [vmem:[%s26497_s1 + $0x28] sm:$0xff]   ;;  %v20562_v10 = vld [vmem:[%s26497_s1 + $0x90] sm:$0xff]   ;;  %v20563_v11 = vld [vmem:[%s26497_s1 + $0x20] sm:$0xff]   ;;  %s20541_s17 = smul.u32 456, %s26889_s16  ;;  %vm1298_vm6 = vcmask 1046532   ;;  %vm11099_vm8 = vcmask 1040384  }
   0xf   : > { %v20564_v12 = vld [vmem:[%s26497_s1 + $0x58] sm:$0xff]   ;;  %v20565_v13 = vld [vmem:[%s26497_s1 + $0x88] sm:$0xff]   ;;  %v20567_v15 = vld [vmem:[%s26497_s1 + $0x50] sm:$0xff]   ;;  %vm11100_vm9 = vcmask 1044484   ;;  %vm11320_vm11 = vsmask.f32 256 }
  0x10   : > { %v20566_v14 = vld [vmem:[%s26497_s1 + $0x18] sm:$0xff]   ;;  %s21484_s26 = scalar_lea.vmem %s26496_s0, %s20541_s17  ;;  %v20568_v16 = vld [vmem:[%s26497_s1 + $0x80] sm:$0xff]   ;;  %v20569_v18 = vld [vmem:[%s26497_s1 + $0x10] sm:$0xff]   ;;  %vm11321_vm12 = vsmask.f32 4368  ;;  %s17978_s5 = sshll.u32 %s26889_s16, 8 }
  0x11   : > { %18078 = vmatpush3.bf16.msra.mxu0 %v20557_v5  ;;  %19572 = vmatpush3.bf16.msra.mxu1 %v20556_v4  ;;  %v20570_v17 = vld [vmem:[%s21484_s26 + $0x8] ss:$12 sps:$4 sm:$0xff]   ;;  %v20572_v21 = vld [vmem:[%s21484_s26 + $0x20] ss:$12 sps:$4 sm:$0xff]   ;;  %v20580_v26 = vld [vmem:[%s21484_s26 + $0x4] ss:$12 sps:$4 sm:$0xff]   ;;  %s26078_s7 = scalar_lea.vmem %s26500_s4, %s17978_s5 }
  0x12   : > { %18079 = vmatprep.subr.bf16.mxu0 %v20558_v6  ;;  %19573 = vmatprep.subr.bf16.mxu1 %v20559_v7  ;;  %v20571_v19 = vld [vmem:[%s26497_s1 + $0x48] sm:$0xff]   ;;  %v20576_v24 = vld [vmem:[%s26497_s1 + $0x40] sm:$0xff]   ;;  %v20582_v29 = vld [vmem:[%s21484_s26 + $0x50] ss:$12 sps:$4 sm:$0xff]  }
  0x13   : > { %v20573_v20 = vld [vmem:[%s26497_s1 + $0x288] sm:$0xff]   ;;  %19581 = vmatprep.mubr.msk.bf16.mxu1 %vm2149_vm0, %v20570_v17  ;;  %v20577_v25 = vld [vmem:[%s26497_s1] sm:$0xff]   ;;  %2230 = vmatprep.mubr.bf16.mxu0 %v20580_v26  ;;  %v20590_v34 = vld [vmem:[%s26497_s1 + $0x278] sm:$0xff]  }
  0x14   : > { %v20574_v22 = vld [vmem:[%s26497_s1 + $0x8] sm:$0xff]   ;;  %v20581_v27 = vld [vmem:[%s21484_s26 + $0x38] ss:$12 sps:$4 sm:$0xff]   ;;  %v21546_v38 = vld [vmem:[%s21484_s26 + $0x34] ss:$12 sps:$4 sm:$0xff]  }
  0x15   : > { %18080 = vmatpush3.bf16.msra.mxu0 %v20560_v8  ;;  %19574 = vmatpush3.bf16.msra.mxu1 %v20559_v7  ;;  %v20575_v23 = vld [vmem:[%s26497_s1 + $0x248] sm:$0xff]   ;;  %v20583_v30 = vld [vmem:[%s26497_s1 + $0x280] sm:$0xff]   ;;  %v20591_v35 = vld [vmem:[%s26497_s1 + $0x238] sm:$0xff]  }
  0x16   : > { %18081 = vmatprep.subr.bf16.mxu0 %v20561_v9  ;;  %19575 = vmatprep.subr.bf16.mxu1 %v20562_v10  ;;  %v20578_v28 = vld [vmem:[%s21484_s26] ss:$12 sps:$4 sm:$0xff]   ;;  %v21529_v32 = vld [vmem:[%s21484_s26 + $0x1c] ss:$12 sps:$4 sm:$0xff]   ;;  %v21542_v36 = vld [vmem:[%s21484_s26 + $0x18] ss:$12 sps:$4 sm:$0xff]  }
  0x17   : > { %v20584_v31 = vld [vmem:[%s26497_s1 + $0x240] sm:$0xff]   ;;  %v20587_v33 = vld [vmem:[%s21484_s26 + $0x68] ss:$12 sps:$4 sm:$0xff]   ;;  %v20599_v42 = vld [vmem:[%s26497_s1 + $0x2b8] sm:$0xff]  }
  0x18   : > { %v20589_v37 = vld [vmem:[%s21484_s26 + $0x80] ss:$12 sps:$4 sm:$0xff]   ;;  %v20594_v39 = vld [vmem:[%s21484_s26 + $0x98] ss:$12 sps:$4 sm:$0xff]   ;;  %v20597_v40 = vld [vmem:[%s26497_s1 + $0x270] sm:$0xff]  }
  0x19   : > { %18082 = vmatpush3.bf16.msra.mxu0 %v20563_v11  ;;  %19576 = vmatpush3.bf16.msra.mxu1 %v20562_v10  ;;  %v20598_v41 = vld [vmem:[%s26497_s1 + $0x230] sm:$0xff]   ;;  %v21567_v45 = vld [vmem:[%s21484_s26 + $0x4c] ss:$12 sps:$4 sm:$0xff]   ;;  %v20612_v49 = vld [vmem:[%s26497_s1 + $0x260] sm:$0xff]  }
  0x1a   : > { %18083 = vmatprep.subr.bf16.mxu0 %v20564_v12  ;;  %19577 = vmatprep.subr.bf16.mxu1 %v20565_v13  ;;  %v21563_v43 = vld [vmem:[%s21484_s26 + $0x30] ss:$12 sps:$4 sm:$0xff]   ;;  %v20602_v46 = vld [vmem:[%s21484_s26 + $0xc8] ss:$12 sps:$4 sm:$0xff]   ;;  %v20613_v51 = vld [vmem:[%s26497_s1 + $0x220] sm:$0xff]  }
  0x1b   : > { %v20596_v44 = vld [vmem:[%s21484_s26 + $0xb0] ss:$12 sps:$4 sm:$0xff]   ;;  %v20605_v47 = vld [vmem:[%s26497_s1 + $0x268] sm:$0xff]   ;;  %v20609_v54 = vld [vmem:[%s21484_s26 + $0xf8] ss:$12 sps:$4 sm:$0xff]  }
  0x1c   : > { %v20606_v48 = vld [vmem:[%s26497_s1 + $0x228] sm:$0xff]   ;;  %v21591_v53 = vld [vmem:[%s21484_s26 + $0x64] ss:$12 sps:$4 sm:$0xff]   ;;  %v20620_v56 = vld [vmem:[%s26497_s1 + $0x258] sm:$0xff]  }
  0x1d   : > { %18084 = vmatpush3.bf16.msra.mxu0 %v20566_v14  ;;  %19578 = vmatpush3.bf16.msra.mxu1 %v20565_v13  ;;  %v21584_v50 = vld [vmem:[%s21484_s26 + $0x48] ss:$12 sps:$4 sm:$0xff]   ;;  %v20604_v52 = vld [vmem:[%s21484_s26 + $0xe0] ss:$12 sps:$4 sm:$0xff]   ;;  %v20621_v57 = vld [vmem:[%s26497_s1 + $0x218] sm:$0xff]  }
  0x1e   : > { %18085 = vmatprep.subr.bf16.mxu0 %v20567_v15  ;;  %19579 = vmatprep.subr.bf16.mxu1 %v20568_v16  ;;  %v20617_v55 = vld [vmem:[%s26497_s1 + $0x2b0] sm:$0xff]   ;;  %v21608_v58 = vld [vmem:[%s21484_s26 + $0x60] ss:$12 sps:$4 sm:$0xff]   ;;  %v21612_v60 = vld [vmem:[%s21484_s26 + $0x7c] ss:$12 sps:$4 sm:$0xff]  }
  0x1f   : > { %v20611_v59 = vld [vmem:[%s21484_s26 + $0x110] ss:$12 sps:$4 sm:$0xff]   ;;  %v20616_v61 = vld [vmem:[%s21484_s26 + $0x128] ss:$12 sps:$4 sm:$0xff]   ;;  %v21632_v2 = vld [vmem:[%s21484_s26 + $0x78] ss:$12 sps:$4 sm:$0xff]  }
  0x20   : > { %v20627_v62 = vld [vmem:[%s26497_s1 + $0x250] sm:$0xff]   ;;  %v20632_v0 = vld [vmem:[%s26497_s1 + $0x498] sm:$0xff]   ;;  %v20634_v1 = vld [vmem:[%s26497_s1 + $0x2a8] sm:$0xff]  }
  0x21   : > { %18086 = vmatpush3.bf16.msra.mxu0 %v20569_v18  ;;  %19580 = vmatpush3.bf16.msra.mxu1 %v20568_v16  ;;  %v20628_v63 = vld [vmem:[%s26497_s1 + $0x210] sm:$0xff]   ;;  %v20619_v3 = vld [vmem:[%s21484_s26 + $0x140] ss:$12 sps:$4 sm:$0xff]   ;;  %v20624_v5 = vld [vmem:[%s21484_s26 + $0x158] ss:$12 sps:$4 sm:$0xff]  }
  0x22   : > { %18087 = vmatprep.subr.bf16.mxu0 %v20571_v19  ;;  %18209 = vmatprep.subr.bf16.mxu1 %v20573_v20  ;;  %v21636_v4 = vld [vmem:[%s21484_s26 + $0x94] ss:$12 sps:$4 sm:$0xff]   ;;  %v21647_v7 = vld [vmem:[%s21484_s26 + $0x90] ss:$12 sps:$4 sm:$0xff]   ;;  %v21651_v9 = vld [vmem:[%s21484_s26 + $0xac] ss:$12 sps:$4 sm:$0xff]  }
  0x23   : > { %v20646_v6 = vld [vmem:[%s26497_s1 + $0x2a0] sm:$0xff]   ;;  %v20626_v8 = vld [vmem:[%s21484_s26 + $0x170] ss:$12 sps:$4 sm:$0xff]   ;;  %v21661_v11 = vld [vmem:[%s21484_s26 + $0xa8] ss:$12 sps:$4 sm:$0xff]  }
  0x24   : > { %19582 = vmatmul.mubr.msk.bf16.vlgmr.msra.gmra.mxu1 %vm2149_vm0, %v20572_v21  ;;  %v20657_v10 = vld [vmem:[%s26497_s1 + $0x298] sm:$0xff]   ;;  %v21667_v13 = vld [vmem:[%s21484_s26 + $0xc4] ss:$12 sps:$4 sm:$0xff]   ;;  %v20650_v17 = vld [vmem:[%s26497_s1 + $0x488] sm:$0xff]  }
  0x25   : > { %18088 = vmatpush3.bf16.msra.mxu0 %v20574_v22  ;;  %18210 = vmatpush3.bf16.msra.mxu1 %v20575_v23  ;;  %v20633_v12 = vld [vmem:[%s26497_s1 + $0x458] sm:$0xff]   ;;  %v20641_v14 = vld [vmem:[%s26497_s1 + $0x490] sm:$0xff]   ;;  %v21686_v18 = vld [vmem:[%s21484_s26 + $0xc0] ss:$12 sps:$4 sm:$0xff]  }
  0x26   : > { %18089 = vmatprep.subr.bf16.mxu0 %v20576_v24  ;;  %19585 = vmatprep.mubr.msk.bf16.mxu1 %vm2149_vm0, %v20581_v27  ;;  %v20669_v15 = vld [vmem:[%s26497_s1 + $0x290] sm:$0xff]   ;;  %v21689_v19 = vld [vmem:[%s21484_s26 + $0xdc] ss:$12 sps:$4 sm:$0xff]   ;;  %v20659_v21 = vld [vmem:[%s26497_s1 + $0x480] sm:$0xff]  }
  0x27   : > { %18211 = vmatprep.subr.bf16.mxu1 %v20583_v30  ;;  %v20642_v16 = vld [vmem:[%s26497_s1 + $0x450] sm:$0xff]   ;;  %v20651_v20 = vld [vmem:[%s26497_s1 + $0x448] sm:$0xff]   ;;  %v20660_v23 = vld [vmem:[%s26497_s1 + $0x440] sm:$0xff]  }
  0x28   : > { %v21704_v22 = vld [vmem:[%s26497_s1 + $0x4c8] sm:$0xff]   ;;  %v20667_v24 = vld [vmem:[%s26497_s1 + $0x478] sm:$0xff]   ;;  %v20643_v26 = vld [vmem:[%s21484_s26 + $0xf4] ss:$12 sps:$4 sm:$0xff]  }
  0x29   : > { %18090 = vmatpush3.bf16.msra.mxu0 %v20577_v25  ;;  %18212 = vmatpush3.bf16.msra.mxu1 %v20584_v31  ;;  %v20640_v25 = vld [vmem:[%s21484_s26 + $0xd8] ss:$12 sps:$4 sm:$0xff]   ;;  %v20681_v30 = vld [vmem:[%s26497_s1 + $0x468] sm:$0xff]   ;;  %v21730_v31 = vld [vmem:[%s21484_s26 + $0xf0] ss:$12 sps:$4 sm:$0xff]  }
  0x2a   : > { %18213 = vmatprep.subr.bf16.mxu1 %v20590_v34  ;;  %19613 = vmatprep.subr.bf16.mxu0 %v20599_v42  ;;  %v20668_v27 = vld [vmem:[%s26497_s1 + $0x438] sm:$0xff]   ;;  %v20689_v34 = vld [vmem:[%s26497_s1 + $0x460] sm:$0xff]   ;;  %vm21814_vm3 = vmor %vm273_vm1, %vm274_vm2 }
  0x2b   : > { %vm23204_vm7 = vmor %vm1297_vm5, %vm1298_vm6 }
  0x2c   : > { %2231 = vmatmul.mubr.bf16.vlgmr.msra.gmra.mxu0 %v20578_v28  ;;  %19586 = vmatmul.mubr.msk.bf16.gmra.mxu1 %vm2149_vm0, %v20582_v29  ;;  %v20674_v28 = vld [vmem:[%s26497_s1 + $0x470] sm:$0xff]   ;;  %vm24552_vm10 = vmor %vm11099_vm8, %vm11100_vm9 }
  0x2d   : > { %2238 = vmatprep.mubr.bf16.mxu0 %v21529_v32  ;;  %19589 = vmatprep.mubr.msk.bf16.mxu1 %vm2149_vm0, %v20587_v33  ;;  %v20675_v29 = vld [vmem:[%s26497_s1 + $0x430] sm:$0xff]   ;;  %v20682_v33 = vld [vmem:[%s26497_s1 + $0x428] sm:$0xff]   ;;  %vm24675_vm13 = vmor %vm11320_vm11, %vm11321_vm12 }
  0x2e   : > { %18214 = vmatpush3.bf16.msra.mxu1 %v20591_v35  ;;  %19614 = vmatpush3.bf16.msra.mxu0 %v20599_v42  ;;  %v20690_v35 = vld [vmem:[%s26497_s1 + $0x420] sm:$0xff]  }
  0x2f   : > { %18215 = vmatprep.subr.bf16.mxu1 %v20597_v40  ;;  %19615 = vmatprep.subr.bf16.mxu0 %v20617_v55  ;;  %v21768_v40 = vld [vmem:[%s21484_s26 + $0x13c] ss:$12 sps:$4 sm:$0xff]   ;;  %v21778_v42 = vld [vmem:[%s21484_s26 + $0x154] ss:$12 sps:$4 sm:$0xff]  }
  0x32   : > { %18216 = vmatpush3.bf16.msra.mxu1 %v20598_v41  ;;  %19616 = vmatpush3.bf16.msra.mxu0 %v20617_v55  ;;  %v21775_v41 = vld [vmem:[%s21484_s26 + $0x138] ss:$12 sps:$4 sm:$0xff]  }
  0x33   : > { %18217 = vmatprep.subr.bf16.mxu1 %v20605_v47  ;;  %19617 = vmatprep.subr.bf16.mxu0 %v20634_v1  ;;  %v20671_v47 = vld [vmem:[%s21484_s26 + $0x38] ss:$12 sps:$4 sm:$0xff]  }
  0x34   : > { %2239 = vmatmul.mubr.bf16.gmra.mxu0 %v21542_v36  ;;  %19590 = vmatmul.mubr.msk.bf16.gmra.mxu1 %vm2149_vm0, %v20589_v37  ;;  %v21752_v37 = vld [vmem:[%s21484_s26 + $0x124] ss:$12 sps:$4 sm:$0xff]  }
  0x35   : > { %2246 = vmatprep.mubr.bf16.mxu0 %v21546_v38  ;;  %19593 = vmatprep.mubr.msk.bf16.mxu1 %vm2149_vm0, %v20594_v39  ;;  %v21765_v39 = vld [vmem:[%s21484_s26 + $0x120] ss:$12 sps:$4 sm:$0xff]  }
  0x36   : > { %18218 = vmatpush3.bf16.msra.mxu1 %v20606_v48  ;;  %19618 = vmatpush3.bf16.msra.mxu0 %v20634_v1  ;;  %v199_v48 = vld [vmem:[%s21484_s26] sm:$0xff]  ;;  %v207_v1 = vld [vmem:[%s21484_s26 + $0x30] sm:$0xff] }
  0x37   : > { %18219 = vmatprep.subr.bf16.mxu1 %v20612_v49  ;;  %19619 = vmatprep.subr.bf16.mxu0 %v20646_v6  ;;  %v201_v49 = vld [vmem:[%s21484_s26 + $0xc] sm:$0xff] }
  0x38   : > { %v304_v55 = vshrl.u32 %v201_v49, 16 }
  0x3a   : > { %18220 = vmatpush3.bf16.msra.mxu1 %v20613_v51  ;;  %19620 = vmatpush3.bf16.msra.mxu0 %v20646_v6  ;;  %v277_v51 = vshrl.u32 %v199_v48, 16 }
  0x3b   : > { %18221 = vmatprep.subr.bf16.mxu1 %v20620_v56  ;;  %19621 = vmatprep.subr.bf16.mxu0 %v20657_v10 }
  0x3c   : > { %2247 = vmatmul.mubr.bf16.gmra.mxu0 %v21563_v43  ;;  %19594 = vmatmul.mubr.msk.bf16.gmra.mxu1 %vm2149_vm0, %v20596_v44  ;;  %v21788_v44 = vld [vmem:[%s21484_s26 + $0x16c] ss:$12 sps:$4 sm:$0xff]  }
  0x3d   : > { %2254 = vmatprep.mubr.bf16.mxu0 %v21567_v45  ;;  %19597 = vmatprep.mubr.msk.bf16.mxu1 %vm2149_vm0, %v20602_v46  ;;  %v20670_v46 = vld [vmem:[%s21484_s26 + $0x20] ss:$12 sps:$4 sm:$0xff]  }
  0x3e   : > { %18222 = vmatpush3.bf16.msra.mxu1 %v20621_v57  ;;  %19622 = vmatpush3.bf16.msra.mxu0 %v20657_v10  ;;  %v20673_v10 = vld [vmem:[%s21484_s26 + $0x68] ss:$12 sps:$4 sm:$0xff]  }
  0x3f   : > { %18223 = vmatprep.subr.bf16.mxu1 %v20627_v62  ;;  %19623 = vmatprep.subr.bf16.mxu0 %v20669_v15  ;;  %v306_v62 = vrot.slane %v304_v55, 4 }
  0x42   : > { %18224 = vmatpush3.bf16.msra.mxu1 %v20628_v63  ;;  %19624 = vmatpush3.bf16.msra.mxu0 %v20669_v15 }
  0x43   : > { %18343 = vmatprep.subr.bf16.mxu1 %v20632_v0  ;;  %19657 = vmatprep.subr.bf16.mxu0 %v21704_v22  ;;  %v205_v0 = vld [vmem:[%s21484_s26 + $0x24] sm:$0xff] }
  0x44   : > { %2255 = vmatmul.mubr.bf16.gmra.mxu0 %v21584_v50  ;;  %19598 = vmatmul.mubr.msk.bf16.gmra.mxu1 %vm2149_vm0, %v20604_v52  ;;  %v280_v52 = vshll.u32 %v199_v48, 16  ;;  %v344_v6 = vshrl.u32 %v205_v0, 16  ;;  %v20699_v48 = vld [vmem:[%s26497_s1 + $0x4a8] sm:$0xff]  }
  0x45   : > { %2262 = vmatprep.mubr.bf16.mxu0 %v21591_v53  ;;  %19601 = vmatprep.mubr.msk.bf16.mxu1 %vm2149_vm0, %v20609_v54  ;;  %v286_v54 = vshll.u32 %v201_v49, 16 }
  0x4c   : > { %2263 = vmatmul.mubr.bf16.gmra.mxu0 %v21608_v58  ;;  %19602 = vmatmul.mubr.msk.bf16.gmra.mxu1 %vm2149_vm0, %v20611_v59  ;;  %v279_v59 = vrot.slane %v277_v51, 4  ;;  %v20677_v51 = vld [vmem:[%s21484_s26 + $0x98] ss:$12 sps:$4 sm:$0xff]  }
  0x4d   : > { %2270 = vmatprep.mubr.bf16.mxu0 %v21612_v60  ;;  %19605 = vmatprep.mubr.msk.bf16.mxu1 %vm2149_vm0, %v20616_v61  ;;  %v288_v61 = vrot.slane %v286_v54, 5  ;;  %v213_v54 = vld [vmem:[%s21484_s26 + $0x54] sm:$0xff] }
  0x54   : > { %2271 = vmatmul.mubr.bf16.gmra.mxu0 %v21632_v2  ;;  %19606 = vmatmul.mubr.msk.bf16.gmra.mxu1 %vm2149_vm0, %v20619_v3  ;;  %v1155_v3 = vld [vmem:[%s21484_s26 + $0x24] sm:$0xff] }
  0x55   : > { %2278 = vmatprep.mubr.bf16.mxu0 %v21636_v4  ;;  %19609 = vmatprep.mubr.msk.bf16.mxu1 %vm2149_vm0, %v20624_v5  ;;  %v330_v5 = vshll.u32 %v205_v0, 16 }
  0x5c   : > { %2279 = vmatmul.mubr.bf16.gmra.mxu0 %v21647_v7  ;;  %19610 = vmatmul.mubr.msk.bf16.gmra.mxu1 %vm2149_vm0, %v20626_v8  ;;  %v307_v8 = vor.u32 %v306_v62, %v288_v61 }
  0x5d   : > { %2286 = vmatprep.mubr.bf16.mxu0 %v21651_v9  ;;  %3113 = vmatprep.mubr.bf16.mxu1 %v21529_v32  ;;  %v21733_v32 = vld [vmem:[%s21484_s26 + $0x10c] ss:$12 sps:$4 sm:$0xff]  }
  0x5e   : > { %v308_v15 = vrot.slane %v307_v8, 4 }
  0x64   : > { %2287 = vmatmul.mubr.bf16.gmra.mxu0 %v21661_v11  ;;  %3114 = vmatmul.mubr.bf16.vlgmr.msra.gmra.mxu1 %v21542_v36  ;;  %v21749_v36 = vld [vmem:[%s21484_s26 + $0x108] ss:$12 sps:$4 sm:$0xff]  }
  0x65   : > { %18344 = vmatpush3.bf16.msra.mxu1 %v20633_v12  ;;  %2294 = vmatprep.mubr.bf16.mxu0 %v21667_v13 }
  0x66   : > { %3121 = vmatprep.mubr.bf16.mxu1 %v21546_v38  ;;  %18345 = vmatprep.subr.bf16.mxu1 %v20641_v14  ;;  %v21757_v38 = vld [vmem:[%s26497_s1 + $0x158] sm:$0xff]   ;;  %v346_v14 = vrot.slane %v344_v6, 4 }
  0x69   : > { %18346 = vmatpush3.bf16.msra.mxu1 %v20642_v16 }
  0x6a   : > { %18347 = vmatprep.subr.bf16.mxu1 %v20650_v17 }
  0x6c   : > { %2295 = vmatmul.mubr.bf16.gmra.mxu0 %v21686_v18  ;;  %3122 = vmatmul.mubr.bf16.gmra.mxu1 %v21563_v43  ;;  %v21785_v43 = vld [vmem:[%s21484_s26 + $0x150] ss:$12 sps:$4 sm:$0xff]  }
  0x6d   : > { %2302 = vmatprep.mubr.bf16.mxu0 %v21689_v19  ;;  %3129 = vmatprep.mubr.bf16.mxu1 %v21567_v45  ;;  %v21795_v45 = vld [vmem:[%s21484_s26 + $0x168] ss:$12 sps:$4 sm:$0xff]  }
  0x6e   : > { %18348 = vmatpush3.bf16.msra.mxu1 %v20651_v20 }
  0x6f   : > { %18349 = vmatprep.subr.bf16.mxu1 %v20659_v21  ;;  %v364_v21 = vshrl.u32 %v207_v1, 16 }
  0x72   : > { %18350 = vmatpush3.bf16.msra.mxu1 %v20660_v23  ;;  %v20676_v23 = vld [vmem:[%s21484_s26 + $0x80] ss:$12 sps:$4 sm:$0xff]  }
  0x73   : > { %18351 = vmatprep.subr.bf16.mxu1 %v20667_v24 }
  0x74   : > { %2303 = vmatmul.mubr.bf16.gmra.mxu0 %v20640_v25  ;;  %3130 = vmatmul.mubr.bf16.gmra.mxu1 %v21584_v50  ;;  %v203_v50 = vld [vmem:[%s21484_s26 + $0x18] sm:$0xff] }
  0x75   : > { %2310 = vmatprep.mubr.bf16.mxu0 %v20643_v26  ;;  %3137 = vmatprep.mubr.bf16.mxu1 %v21591_v53  ;;  %v20672_v53 = vld [vmem:[%s21484_s26 + $0x50] ss:$12 sps:$4 sm:$0xff]   ;;  %v310_v56 = vshll.u32 %v203_v50, 16  ;;  %v324_v57 = vshrl.u32 %v203_v50, 16 }
  0x76   : > { %18352 = vmatpush3.bf16.msra.mxu1 %v20668_v27  ;;  %v20696_v27 = vld [vmem:[%s26497_s1 + $0x4b0] sm:$0xff]  }
  0x77   : > { %18353 = vmatprep.subr.bf16.mxu1 %v20674_v28  ;;  %v312_v63 = vrot.slane %v310_v56, 5  ;;  %v228_v28 = vld [vmem:[%s21484_s26 + $0xb0] sm:$0xf] }
  0x79   : > { %v21833_v24 = vsel %vm21814_vm3, %v308_v15, %v312_v63 }
  0x7a   : > { %18354 = vmatpush3.bf16.msra.mxu1 %v20675_v29 }
  0x7b   : > { %18355 = vmatprep.subr.bf16.mxu1 %v20681_v30 }
  0x7c   : > { %2311 = vmatmul.mubr.bf16.gmra.mxu0 %v21730_v31  ;;  %3138 = vmatmul.mubr.bf16.gmra.mxu1 %v21608_v58  ;;  %v20683_v58 = vld [vmem:[%s26497_s1 + $0x4c0] sm:$0xff]  }
  0x7d   : > { %2318 = vmatprep.mubr.bf16.mxu0 %v21733_v32  ;;  %3145 = vmatprep.mubr.bf16.mxu1 %v21612_v60  ;;  %v282_v60 = vrot.slane %v280_v52, 5 }
  0x7e   : > { %18356 = vmatpush3.bf16.msra.mxu1 %v20682_v33 }
  0x7f   : > { %18357 = vmatprep.subr.bf16.mxu1 %v20689_v34 }
  0x82   : > { %18358 = vmatpush3.bf16.msra.mxu1 %v20690_v35 }
  0x83   : > { %19701 = vmatprep.subr.bf16.mxu1 %v21757_v38 }
  0x84   : > { %2319 = vmatmul.mubr.bf16.gmra.mxu0 %v21749_v36  ;;  %3146 = vmatmul.mubr.bf16.gmra.mxu1 %v21632_v2  ;;  %v326_v2 = vrot.slane %v324_v57, 4  ;;  %v410_v57 = vshll.u32 %v213_v54, 16 }
  0x85   : > { %2326 = vmatprep.mubr.bf16.mxu0 %v21752_v37  ;;  %3153 = vmatprep.mubr.bf16.mxu1 %v21636_v4  ;;  %v283_v4 = vor.u32 %v282_v60, %v279_v59  ;;  %v20679_v59 = vld [vmem:[%s21484_s26 + $0xb0] ss:$12 sps:$4 sm:$0xff]  }
  0x87   : > { %v284_v12 = vrot.slane %v283_v4, 4 }
  0x8c   : > { %2327 = vmatmul.mubr.bf16.gmra.mxu0 %v21765_v39  ;;  %3154 = vmatmul.mubr.bf16.gmra.mxu1 %v21647_v7  ;;  %v350_v7 = vshll.u32 %v207_v1, 16  ;;  %v412_v1 = vrot.slane %v410_v57, 5  ;;  %v223_v57 = vld [vmem:[%s21484_s26 + $0x90] sm:$0xff] }
  0x8d   : > { %2334 = vmatprep.mubr.bf16.mxu0 %v21768_v40  ;;  %3161 = vmatprep.mubr.bf16.mxu1 %v21651_v9  ;;  %v327_v9 = vor.u32 %v326_v2, %v312_v63  ;;  %v215_v2 = vld [vmem:[%s21484_s26 + $0x60] sm:$0xff] }
  0x8e   : > { %v352_v17 = vrot.slane %v350_v7, 5  ;;  %v430_v6 = vshll.u32 %v215_v2, 16  ;;  %v20709_v7 = vld [vmem:[%s26497_s1 + $0x128] sm:$0xff]  }
  0x8f   : > { %v328_v16 = vrot.slane %v327_v9, 4  ;;  %v20680_v9 = vld [vmem:[%s21484_s26 + $0xc8] ss:$12 sps:$4 sm:$0xff]  }
  0x94   : > { %2335 = vmatmul.mubr.bf16.gmra.mxu0 %v21775_v41  ;;  %3162 = vmatmul.mubr.bf16.gmra.mxu1 %v21661_v11  ;;  %v20687_v11 = vld [vmem:[%s26497_s1 + $0x4b8] sm:$0xff]  }
  0x95   : > { %2342 = vmatprep.mubr.bf16.mxu0 %v21778_v42  ;;  %3169 = vmatprep.mubr.bf16.mxu1 %v21667_v13  ;;  %v332_v13 = vrot.slane %v330_v5, 5 }
  0x97   : > { %v347_v20 = vor.u32 %v346_v14, %v332_v13 }
  0x99   : > { %v348_v30 = vrot.slane %v347_v20, 4  ;;  %v22201_v20 = vld [vmem:[%s21484_s26 + $0x108] sm:$0xff] }
  0x9b   : > { %v21852_v35 = vsel %vm21814_vm3, %v348_v30, %v352_v17 }
  0x9c   : > { %2343 = vmatmul.mubr.bf16.gmra.mxu0 %v21785_v43  ;;  %3170 = vmatmul.mubr.bf16.gmra.mxu1 %v21686_v18  ;;  %v209_v18 = vld [vmem:[%s21484_s26 + $0x3c] sm:$0xff]  ;;  %1083 = vst [vmem:[#allocation2 + $0x24] sm:$0xff] %v21852_v35 }
  0x9d   : > { %2350 = vmatprep.mubr.bf16.mxu0 %v21788_v44  ;;  %3177 = vmatprep.mubr.bf16.mxu1 %v21689_v19  ;;  %v21828_v19 = vsel %vm21814_vm3, %v284_v12, %v288_v61  ;;  %v20701_v61 = vld [vmem:[%s26497_s1 + $0x4a0] sm:$0xff]   ;;  %v217_v12 = vld [vmem:[%s21484_s26 + $0x6c] sm:$0xff] }
  0x9e   : > { %v450_v14 = vshll.u32 %v217_v12, 16  ;;  %v464_v15 = vshrl.u32 %v217_v12, 16  ;;  %v202_v12 = vld [vmem:[%s21484_s26 + $0x14] sm:$0xf] }
  0xa4   : > { %2351 = vmatmul.mubr.bf16.gmra.mxu0 %v21795_v45  ;;  %3178 = vmatmul.mubr.bf16.gmra.mxu1 %v20640_v25  ;;  %v21837_v25 = vsel %vm21814_vm3, %v328_v16, %v332_v13  ;;  %v20684_v16 = vld [vmem:[%s21484_s26 + $0xe0] ss:$12 sps:$4 sm:$0xff]  }
  0xa5   : > { %3185 = vmatprep.mubr.bf16.mxu1 %v20643_v26  ;;  %19625 = vmatprep.mubr.msk.bf16.mxu0 %vm2149_vm0, %v20670_v46  ;;  %v384_v26 = vshrl.u32 %v209_v18, 16  ;;  %1081 = vst [vmem:[#allocation2 + $0x18] sm:$0xff] %v21837_v25 }
  0xa7   : > { %v386_v34 = vrot.slane %v384_v26, 4  ;;  %v466_v26 = vrot.slane %v464_v15, 4 }
  0xac   : > { %3186 = vmatmul.mubr.bf16.gmra.mxu1 %v21730_v31  ;;  %19626 = vmatmul.mubr.msk.bf16.vlgmr.msra.gmra.mxu0 %vm2149_vm0, %v20671_v47  ;;  %v366_v31 = vrot.slane %v364_v21, 4 }
  0xad   : > { %3193 = vmatprep.mubr.bf16.mxu1 %v21733_v32  ;;  %19629 = vmatprep.mubr.msk.bf16.mxu0 %vm2149_vm0, %v20672_v53  ;;  %v211_v32 = vld [vmem:[%s21484_s26 + $0x48] sm:$0xff] }
  0xae   : > { %19658 = vmatpush3.bf16.msra.mxu0 %v21704_v22  ;;  %v370_v22 = vshll.u32 %v209_v18, 16  ;;  %v367_v46 = vor.u32 %v366_v31, %v352_v17  ;;  %v390_v47 = vshll.u32 %v211_v32, 16  ;;  %v404_v56 = vshrl.u32 %v211_v32, 16  ;;  %v20685_v32 = vld [vmem:[%s21484_s26 + $0xf8] ss:$12 sps:$4 sm:$0xff]  }
  0xaf   : > { %19659 = vmatprep.subr.bf16.mxu0 %v20683_v58 }
  0xb0   : > { %v372_v33 = vrot.slane %v370_v22, 5  ;;  %v368_v52 = vrot.slane %v367_v46, 4  ;;  %v406_v0 = vrot.slane %v404_v56, 4  ;;  %v452_v22 = vrot.slane %v450_v14, 5  ;;  %v22120_v14 = vld [vmem:[%s21484_s26 + $0x8c] sm:$0xf] }
  0xb2   : > { %19660 = vmatpush3.bf16.msra.mxu0 %v20683_v58  ;;  %v387_v50 = vor.u32 %v386_v34, %v372_v33  ;;  %v21868_v55 = vsel %vm21814_vm3, %v368_v52, %v372_v33  ;;  %v424_v58 = vshrl.u32 %v213_v54, 16  ;;  %v467_v31 = vor.u32 %v466_v26, %v452_v22  ;;  %v20686_v52 = vld [vmem:[%s21484_s26 + $0x110] ss:$12 sps:$4 sm:$0xff]  }
  0xb3   : > { %19661 = vmatprep.subr.bf16.mxu0 %v20687_v11  ;;  %1085 = vst [vmem:[#allocation2 + $0x30] sm:$0xff] %v21868_v55 }
  0xb4   : > { %3194 = vmatmul.mubr.bf16.gmra.mxu1 %v21749_v36  ;;  %19630 = vmatmul.mubr.msk.bf16.gmra.mxu0 %vm2149_vm0, %v20673_v10  ;;  %v388_v53 = vrot.slane %v387_v50, 4  ;;  %v426_v4 = vrot.slane %v424_v58, 4  ;;  %v468_v46 = vrot.slane %v467_v31, 4  ;;  %v300_v31 = vshll.u32 %v202_v12, 16 }
  0xb5   : > { %3201 = vmatprep.mubr.bf16.mxu1 %v21752_v37  ;;  %19633 = vmatprep.mubr.msk.bf16.mxu0 %vm2149_vm0, %v20676_v23  ;;  %v392_v37 = vrot.slane %v390_v47, 5  ;;  %v219_v23 = vld [vmem:[%s21484_s26 + $0x78] sm:$0xff]  ;;  %v221_v47 = vld [vmem:[%s21484_s26 + $0x84] sm:$0xff] }
  0xb6   : > { %19662 = vmatpush3.bf16.msra.mxu0 %v20687_v11  ;;  %v427_v8 = vor.u32 %v426_v4, %v412_v1  ;;  %v432_v11 = vrot.slane %v430_v6, 5  ;;  %v470_v30 = vshll.u32 %v219_v23, 16  ;;  %v490_v50 = vshll.u32 %v221_v47, 16 }
  0xb7   : > { %19663 = vmatprep.subr.bf16.mxu0 %v20696_v27  ;;  %v21873_v60 = vsel %vm21814_vm3, %v388_v53, %v392_v37  ;;  %v407_v5 = vor.u32 %v406_v0, %v392_v37 }
  0xb8   : > { %1087 = vst [vmem:[#allocation2 + $0x3c] sm:$0xff] %v21873_v60  ;;  %v472_v34 = vrot.slane %v470_v30, 5  ;;  %v492_v56 = vrot.slane %v490_v50, 5 }
  0xb9   : > { %v408_v10 = vrot.slane %v407_v5, 4  ;;  %v20691_v5 = vld [vmem:[%s21484_s26 + $0x184] ss:$12 sps:$4 sm:$0xff]  }
  0xba   : > { %19664 = vmatpush3.bf16.msra.mxu0 %v20696_v27 }
  0xbb   : > { %19665 = vmatprep.subr.bf16.mxu0 %v20699_v48  ;;  %v21896_v13 = vsel %vm21814_vm3, %v408_v10, %v412_v1  ;;  %v20688_v1 = vld [vmem:[%s21484_s26 + $0x128] ss:$12 sps:$4 sm:$0xff]  }
  0xbc   : > { %3202 = vmatmul.mubr.bf16.gmra.mxu1 %v21765_v39  ;;  %19634 = vmatmul.mubr.msk.bf16.gmra.mxu0 %vm2149_vm0, %v20677_v51  ;;  %v428_v39 = vrot.slane %v427_v8, 4  ;;  %1089 = vst [vmem:[#allocation2 + $0x48] sm:$0xff] %v21896_v13  ;;  %v504_v51 = vshrl.u32 %v221_v47, 16  ;;  %v524_v8 = vshrl.u32 %v223_v57, 16  ;;  %v200_v10 = vld [vmem:[%s21484_s26 + $0x8] sm:$0xf] }
  0xbd   : > { %3209 = vmatprep.mubr.bf16.mxu1 %v21768_v40  ;;  %19637 = vmatprep.mubr.msk.bf16.mxu0 %vm2149_vm0, %v20679_v59  ;;  %v444_v40 = vshrl.u32 %v215_v2, 16  ;;  %v294_v30 = vshll.u32 %v200_v10, 16 }
  0xbe   : > { %19666 = vmatpush3.bf16.msra.mxu0 %v20699_v48  ;;  %v21901_v17 = vsel %vm21814_vm3, %v428_v39, %v432_v11  ;;  %v506_v58 = vrot.slane %v504_v51, 4  ;;  %v302_v51 = vrot.slane %v300_v31, 5 }
  0xbf   : > { %19667 = vmatprep.subr.bf16.mxu0 %v20701_v61  ;;  %1091 = vst [vmem:[#allocation2 + $0x54] sm:$0xff] %v21901_v17  ;;  %v446_v21 = vrot.slane %v444_v40, 4  ;;  %v204_v40 = vld [vmem:[%s21484_s26 + $0x20] sm:$0xf]  ;;  %v296_v50 = vrot.slane %v294_v30, 5 }
  0xc0   : > { %v507_v0 = vor.u32 %v506_v58, %v492_v56 }
  0xc1   : > { %v447_v27 = vor.u32 %v446_v21, %v432_v11  ;;  %v20693_v11 = vld [vmem:[%s21484_s26 + $0x140] ss:$12 sps:$4 sm:$0xff]  }
  0xc2   : > { %19668 = vmatpush3.bf16.msra.mxu0 %v20701_v61  ;;  %v510_v61 = vshll.u32 %v223_v57, 16  ;;  %v508_v6 = vrot.slane %v507_v0, 4  ;;  %v334_v0 = vshrl.u32 %v204_v40, 16 }
  0xc3   : > { %18477 = vmatprep.subr.bf16.mxu0 %v20709_v7  ;;  %v448_v33 = vrot.slane %v447_v27, 4  ;;  %v225_v7 = vld [vmem:[%s21484_s26 + $0x9c] sm:$0xff]  ;;  %v291_v27 = vshrl.u32 %v200_v10, 16 }
  0xc4   : > { %3210 = vmatmul.mubr.bf16.gmra.mxu1 %v21775_v41  ;;  %19638 = vmatmul.mubr.msk.bf16.gmra.mxu0 %vm2149_vm0, %v20680_v9  ;;  %v484_v41 = vshrl.u32 %v219_v23, 16  ;;  %v512_v4 = vrot.slane %v510_v61, 5  ;;  %v530_v9 = vshll.u32 %v225_v7, 16  ;;  %v227_v23 = vld [vmem:[%s21484_s26 + $0xa8] sm:$0xff] }
  0xc5   : > { %3217 = vmatprep.mubr.bf16.mxu1 %v21778_v42  ;;  %19641 = vmatprep.mubr.msk.bf16.mxu0 %vm2149_vm0, %v20684_v16  ;;  %v21918_v48 = vsel %vm21814_vm3, %v448_v33, %v452_v22  ;;  %v21923_v42 = vsel %vm21814_vm3, %v468_v46, %v472_v34  ;;  %v526_v16 = vrot.slane %v524_v8, 4  ;;  %v21958_v22 = vld [vmem:[%s21484_s26 + $0x2c] sm:$0xf]  ;;  %v550_v33 = vshll.u32 %v227_v23, 16  ;;  %v20697_v8 = vld [vmem:[%s21484_s26 + $0x170] ss:$12 sps:$4 sm:$0xff]  }
  0xc6   : > { %1093 = vst [vmem:[#allocation2 + $0x60] sm:$0xff] %v21918_v48  ;;  %1095 = vst [vmem:[#allocation2 + $0x6c] sm:$0xff] %v21923_v42  ;;  %v486_v54 = vrot.slane %v484_v41, 4  ;;  %v21947_v39 = vsel %vm21814_vm3, %v508_v6, %v512_v4  ;;  %v532_v21 = vrot.slane %v530_v9, 5  ;;  %v320_v46 = vshll.u32 %v204_v40, 16 }
  0xc7   : > { %1099 = vst [vmem:[#allocation2 + $0x84] sm:$0xff] %v21947_v39  ;;  %v293_v41 = vrot.slane %v291_v27, 4  ;;  %v231_v27 = vld [vmem:[%s21484_s26 + $0xc0] sm:$0xff] }
  0xc8   : > { %v487_v59 = vor.u32 %v486_v54, %v472_v34  ;;  %v314_v34 = vshrl.u32 %v202_v12, 16  ;;  %v322_v57 = vrot.slane %v320_v46, 5  ;;  %v590_v46 = vshll.u32 %v231_v27, 16  ;;  %v22111_v12 = vld [vmem:[%s26497_s1 + $0x138] sm:$0xff]  }
  0xc9   : > { %v297_v61 = vor.u32 %v296_v50, %v293_v41  ;;  %v354_v41 = vshrl.u32 %v21958_v22, 16  ;;  %v21353_v50 = vld [vmem:[%s21484_s26 + $0x34] ss:$12 sps:$4 sm:$0xff]  }
  0xca   : > { %v488_v2 = vrot.slane %v487_v59, 4  ;;  %v229_v59 = vld [vmem:[%s21484_s26 + $0xb4] sm:$0xff] }
  0xcb   : > { %v570_v6 = vshll.u32 %v229_v59, 16 }
  0xcc   : > { %3218 = vmatmul.mubr.bf16.gmra.mxu1 %v21785_v43  ;;  %19642 = vmatmul.mubr.msk.bf16.gmra.mxu0 %vm2149_vm0, %v20685_v32  ;;  %v21941_v43 = vsel %vm21814_vm3, %v488_v2, %v492_v56  ;;  %v527_v32 = vor.u32 %v526_v16, %v512_v4  ;;  %v552_v56 = vrot.slane %v550_v33, 5  ;;  %v20695_v2 = vld [vmem:[%s21484_s26 + $0x158] ss:$12 sps:$4 sm:$0xff]  }
  0xcd   : > { %3225 = vmatprep.mubr.bf16.mxu1 %v21788_v44  ;;  %19645 = vmatprep.mubr.msk.bf16.mxu0 %vm2149_vm0, %v20686_v52  ;;  %v544_v44 = vshrl.u32 %v225_v7, 16  ;;  %1097 = vst [vmem:[#allocation2 + $0x78] sm:$0xff] %v21941_v43  ;;  %v20694_v52 = vld [vmem:[%s21484_s26 + $0x180] ss:$12 sps:$4 sm:$0xff]   ;;  %v584_v7 = vshrl.u32 %v229_v59, 16  ;;  %v592_v59 = vrot.slane %v590_v46, 5 }
  0xce   : > { %v528_v54 = vrot.slane %v527_v32, 4 }
  0xcf   : > { %v546_v26 = vrot.slane %v544_v44, 4  ;;  %v298_v44 = vrot.slane %v297_v61, 4  ;;  %v586_v30 = vrot.slane %v584_v7, 4  ;;  %v604_v7 = vshrl.u32 %v231_v27, 16  ;;  %v21356_v27 = vld [vmem:[%s21484_s26 + $0x48] ss:$12 sps:$4 sm:$0xff]  }
  0xd0   : > { %v21970_v4 = vsel %vm21814_vm3, %v528_v54, %v532_v21 }
  0xd1   : > { %v547_v47 = vor.u32 %v546_v26, %v532_v21  ;;  %1101 = vst [vmem:[#allocation2 + $0x90] sm:$0xff] %v21970_v4  ;;  %v572_v21 = vrot.slane %v570_v6, 5  ;;  %v21985_v26 = vld [vmem:[%s21484_s26 + $0x44] sm:$0xf]  ;;  %v303_v31 = vsel %vm21814_vm3, %v298_v44, %v302_v51 }
  0xd2   : > { %1078 = vst.msk [vmem:[#allocation2 + $0x8] sm:$0xf] %vm1077_vm4, %v303_v31 }
  0xd3   : > { %v548_v58 = vrot.slane %v547_v47, 4  ;;  %v587_v54 = vor.u32 %v586_v30, %v572_v21  ;;  %v21357_v30 = vld [vmem:[%s21484_s26 + $0x64] ss:$12 sps:$4 sm:$0xff]  }
  0xd4   : > { %3226 = vmatmul.mubr.bf16.gmra.mxu1 %v21795_v45  ;;  %19646 = vmatmul.mubr.msk.bf16.gmra.mxu0 %vm2149_vm0, %v20688_v1  ;;  %v316_v45 = vrot.slane %v314_v34, 4  ;;  %v340_v1 = vshll.u32 %v21958_v22, 16 }
  0xd5   : > { %3233 = vmatprep.mubr.bf16.mxu1 %v20691_v5  ;;  %19649 = vmatprep.mubr.msk.bf16.mxu0 %vm2149_vm0, %v20693_v11  ;;  %v564_v5 = vshrl.u32 %v227_v23, 16  ;;  %v21975_v9 = vsel %vm21814_vm3, %v548_v58, %v552_v56  ;;  %v336_v11 = vrot.slane %v334_v0, 4  ;;  %v208_v23 = vld [vmem:[%s21484_s26 + $0x38] sm:$0xf]  ;;  %v588_v61 = vrot.slane %v587_v54, 4 }
  0xd6   : > { %v317_v10 = vor.u32 %v316_v45, %v302_v51  ;;  %1103 = vst [vmem:[#allocation2 + $0x9c] sm:$0xff] %v21975_v9  ;;  %v342_v47 = vrot.slane %v340_v1, 5  ;;  %v360_v22 = vshll.u32 %v208_v23, 16  ;;  %v233_v1 = vld [vmem:[%s21484_s26 + $0xcc] sm:$0xff] }
  0xd7   : > { %v566_v16 = vrot.slane %v564_v5, 4  ;;  %v337_v33 = vor.u32 %v336_v11, %v322_v57  ;;  %v380_v5 = vshll.u32 %v21985_v26, 16  ;;  %v22014_v11 = vsel %vm21814_vm3, %v588_v61, %v592_v59  ;;  %v214_v61 = vld [vmem:[%s21484_s26 + $0x5c] sm:$0xf] }
  0xd8   : > { %v318_v32 = vrot.slane %v317_v10, 4  ;;  %v362_v44 = vrot.slane %v360_v22, 5  ;;  %v20706_v10 = vld [vmem:[%s26497_s1 + $0x150] sm:$0xff]   ;;  %1107 = vst [vmem:[#allocation2 + $0xb4] sm:$0xff] %v22014_v11  ;;  %v394_v22 = vshrl.u32 %v21985_v26, 16 }
  0xd9   : > { %v567_v34 = vor.u32 %v566_v16, %v552_v56  ;;  %v338_v45 = vrot.slane %v337_v33, 4  ;;  %v356_v56 = vrot.slane %v354_v41, 4  ;;  %v610_v16 = vshll.u32 %v233_v1, 16  ;;  %v212_v33 = vld [vmem:[%s21484_s26 + $0x50] sm:$0xf] }
  0xda   : > { %v323_v51 = vsel %vm21814_vm3, %v318_v32, %v322_v57  ;;  %v20702_v57 = vld [vmem:[%s21484_s26 + $0x38] ss:$12 sps:$4 sm:$0xff]   ;;  %v606_v32 = vrot.slane %v604_v7, 4 }
  0xdb   : > { %v568_v58 = vrot.slane %v567_v34, 4  ;;  %1080 = vst.msk [vmem:[#allocation2 + $0x14] sm:$0xf] %vm1077_vm4, %v323_v51  ;;  %v343_v0 = vsel %vm21814_vm3, %v338_v45, %v342_v47  ;;  %v235_v34 = vld [vmem:[%s21484_s26 + $0xd8] sm:$0xff]  ;;  %v612_v46 = vrot.slane %v610_v16, 5  ;;  %v420_v16 = vshll.u32 %v214_v61, 16 }
  0xdc   : > { %3234 = vmatmul.mubr.bf16.gmra.mxu1 %v20694_v52  ;;  %19650 = vmatmul.mubr.msk.bf16.gmra.mxu0 %vm2149_vm0, %v20695_v2  ;;  %v20698_v52 = vld [vmem:[%s21484_s26 + $0x188] ss:$12 sps:$4 sm:$0xff]   ;;  %v374_v2 = vshrl.u32 %v208_v23, 16  ;;  %1082 = vst.msk [vmem:[#allocation2 + $0x20] sm:$0xf] %vm1077_vm4, %v343_v0 }
  0xdd   : > { %19653 = vmatprep.mubr.msk.bf16.mxu0 %vm2149_vm0, %v20697_v8  ;;  %4060 = vmatprep.mubr.bf16.mxu1 %v21353_v50  ;;  %v22006_v6 = vsel %vm21814_vm3, %v568_v58, %v572_v21  ;;  %v357_v8 = vor.u32 %v356_v56, %v342_v47  ;;  %v624_v21 = vshrl.u32 %v233_v1, 16  ;;  %v382_v50 = vrot.slane %v380_v5, 5  ;;  %v21354_v51 = vld [vmem:[%s21484_s26 + $0x30] ss:$12 sps:$4 sm:$0xff]   ;;  %v21355_v0 = vld [vmem:[%s21484_s26 + $0x4c] ss:$12 sps:$4 sm:$0xff]  }
  0xde   : > { %1105 = vst [vmem:[#allocation2 + $0xa8] sm:$0xff] %v22006_v6  ;;  %v376_v23 = vrot.slane %v374_v2, 4  ;;  %v607_v58 = vor.u32 %v606_v32, %v592_v59  ;;  %v630_v56 = vshll.u32 %v235_v34, 16  ;;  %v396_v5 = vrot.slane %v394_v22, 4 }
  0xdf   : > { %v358_v31 = vrot.slane %v357_v8, 4  ;;  %v626_v47 = vrot.slane %v624_v21, 4  ;;  %v400_v8 = vshll.u32 %v212_v33, 16 }
  0xe0   : > { %v377_v41 = vor.u32 %v376_v23, %v362_v44  ;;  %v608_v26 = vrot.slane %v607_v58, 4 }
  0xe1   : > { %v363_v45 = vsel %vm21814_vm3, %v358_v31, %v362_v44  ;;  %v627_v1 = vor.u32 %v626_v47, %v612_v46  ;;  %v414_v44 = vshrl.u32 %v212_v33, 16  ;;  %v644_v31 = vshrl.u32 %v235_v34, 16 }
  0xe2   : > { %1084 = vst.msk [vmem:[#allocation2 + $0x2c] sm:$0xf] %vm1077_vm4, %v363_v45  ;;  %v378_v59 = vrot.slane %v377_v41, 4  ;;  %v22048_v23 = vsel %vm21814_vm3, %v608_v26, %v612_v46  ;;  %v397_v47 = vor.u32 %v396_v5, %v382_v50  ;;  %v237_v41 = vld [vmem:[%s21484_s26 + $0xe4] sm:$0xff]  ;;  %v402_v58 = vrot.slane %v400_v8, 5  ;;  %v22082_v8 = vld [vmem:[%s21484_s26 + $0xf0] sm:$0xff] }
  0xe3   : > { %v628_v7 = vrot.slane %v627_v1, 4  ;;  %v20704_v45 = vld [vmem:[%s21484_s26 + $0x68] ss:$12 sps:$4 sm:$0xff]   ;;  %1109 = vst [vmem:[#allocation2 + $0xc0] sm:$0xff] %v22048_v23  ;;  %v416_v46 = vrot.slane %v414_v44, 4  ;;  %v422_v34 = vrot.slane %v420_v16, 5 }
  0xe4   : > { %v22024_v54 = vpop.f32.mrf.mxu1  ;;  %19654 = vmatmul.mubr.msk.bf16.gmra.mxu0 %vm2149_vm0, %v20698_v52  ;;  %4061 = vmatmul.mubr.bf16.vlgmr.msra.gmra.mxu1 %v21354_v51  ;;  %v20719_v52 = vld [vmem:[%s26497_s1 + $0x148] sm:$0xff]   ;;  %v383_v32 = vsel %vm21814_vm3, %v378_v59, %v382_v50  ;;  %v398_v1 = vrot.slane %v397_v47, 4  ;;  %v434_v26 = vshrl.u32 %v214_v61, 16  ;;  %v20736_v59 = vld [vmem:[%s26497_s1 + $0x140] sm:$0xff]   ;;  %v646_v44 = vrot.slane %v644_v31, 4 }
  0xe5   : > { %19702 = vmatpush3.bf16.msra.mxu1 %v21757_v38  ;;  %4068 = vmatprep.mubr.bf16.mxu1 %v21355_v0  ;;  %v22041_v38 = vrot.slane %v630_v56, 5  ;;  %v22053_v51 = vld [vmem:[%s21484_s26 + $0x68] sm:$0xf]  ;;  %1086 = vst.msk [vmem:[#allocation2 + $0x38] sm:$0xf] %vm1077_vm4, %v383_v32  ;;  %v417_v5 = vor.u32 %v416_v46, %v402_v58  ;;  %v650_v16 = vshll.u32 %v237_v41, 16 }
  0xe6   : > { %v22035_v2 = vpop.f32.mrf.mxu1  ;;  %19669 = vmatprep.mubr.msk.bf16.mxu0 %vm2149_vm0, %v20702_v57  ;;  %19703 = vmatprep.subr.bf16.mxu1 %v20706_v10  ;;  %v20703_v57 = vld [vmem:[%s21484_s26 + $0x50] ss:$12 sps:$4 sm:$0xff]   ;;  %v20710_v50 = vld [vmem:[%s26497_s1 + $0xe8] sm:$0xff]   ;;  %v403_v61 = vsel %vm21814_vm3, %v398_v1, %v402_v58  ;;  %v436_v47 = vrot.slane %v434_v26, 4  ;;  %v664_v0 = vshrl.u32 %v237_v41, 16  ;;  %v20714_v31 = vld [vmem:[%s26497_s1 + $0xe0] sm:$0xff]  }
  0xe7   : > { %v22060_v33 = vsel %vm21814_vm3, %v628_v7, %v22041_v38  ;;  %v440_v7 = vshll.u32 %v22053_v51, 16  ;;  %v22091_v46 = vld [vmem:[%s21484_s26 + $0x74] sm:$0xf]  ;;  %1088 = vst.msk [vmem:[#allocation2 + $0x44] sm:$0xf] %vm1077_vm4, %v403_v61  ;;  %v647_v41 = vor.u32 %v646_v44, %v22041_v38  ;;  %v652_v1 = vrot.slane %v650_v16, 5 }
  0xe8   : > { %v22043_v21 = vpop.f32.mrf.mxu1  ;;  %1111 = vst [vmem:[#allocation2 + $0xcc] sm:$0xff] %v22060_v33  ;;  %v666_v61 = vrot.slane %v664_v0, 4  ;;  %v454_v38 = vshrl.u32 %v22053_v51, 16  ;;  %v460_v40 = vshll.u32 %v22091_v46, 16 }
  0xe9   : > { %19704 = vmatpush3.bf16.msra.mxu1 %v20706_v10  ;;  %v20713_v10 = vld [vmem:[%s26497_s1 + $0x120] sm:$0xff]   ;;  %v22102_v58 = vrot.slane %v440_v7, 5  ;;  %v670_v7 = vshll.u32 %v22082_v8, 16 }
  0xea   : > { %v22064_v56 = vpop.f32.mrf.mxu1  ;;  %19705 = vmatprep.subr.bf16.mxu1 %v20719_v52  ;;  %v667_v51 = vor.u32 %v666_v61, %v652_v1  ;;  %v462_v37 = vrot.slane %v460_v40, 5 }
  0xec   : > { %v18091_v32 = vpop.f32.mrf.mxu0  ;;  %v22084_v22 = vpop.f32.mrf.mxu1  ;;  %4069 = vmatmul.mubr.bf16.gmra.mxu1 %v21356_v27  ;;  %19670 = vmatmul.mubr.msk.bf16.vlgmr.msra.gmra.mxu0 %vm2149_vm0, %v20703_v57  ;;  %v20717_v27 = vld [vmem:[%s26497_s1 + $0x118] sm:$0xff]   ;;  %v418_v57 = vrot.slane %v417_v5, 4  ;;  %v437_v5 = vor.u32 %v436_v47, %v422_v34 }
  0xed   : > { %4076 = vmatprep.mubr.bf16.mxu1 %v21357_v30  ;;  %19673 = vmatprep.mubr.msk.bf16.mxu0 %vm2149_vm0, %v20704_v45  ;;  %v20705_v45 = vld [vmem:[%s21484_s26 + $0x80] ss:$12 sps:$4 sm:$0xff]  }
  0xee   : > { %v18092_v30 = vpop.f32.mrf.mxu0  ;;  %v22105_v26 = vpop.f32.mrf.mxu1  ;;  %18478 = vmatpush3.bf16.msra.mxu0 %v20710_v50  ;;  %19706 = vmatpush3.bf16.msra.mxu1 %v20719_v52  ;;  %v423_v16 = vsel %vm21814_vm3, %v418_v57, %v422_v34  ;;  %v648_v50 = vrot.slane %v647_v41, 4  ;;  %v220_v52 = vld [vmem:[%s21484_s26 + $0x80] sm:$0xf]  ;;  %v438_v0 = vrot.slane %v437_v5, 4  ;;  %v20707_v34 = vld [vmem:[%s21484_s26 + $0x98] ss:$12 sps:$4 sm:$0xff]  }
  0xef   : > { %v18093_v44 = vadd.f32 %v18092_v30, %v18091_v32  ;;  %18479 = vmatprep.subr.bf16.mxu0 %v20713_v10  ;;  %19707 = vmatprep.subr.bf16.mxu1 %v20736_v59  ;;  %1090 = vst.msk [vmem:[#allocation2 + $0x50] sm:$0xf] %vm1077_vm4, %v423_v16  ;;  %v22125_v32 = vrot.slane %v670_v7, 5  ;;  %v684_v10 = vshrl.u32 %v22082_v8, 16  ;;  %v456_v41 = vrot.slane %v454_v38, 4  ;;  %v20718_v5 = vld [vmem:[%s26497_s1 + $0xd8] sm:$0xff]  }
  0xf0   : > { %v18094_v15 = vpop.f32.mrf.mxu0  ;;  %v22122_v47 = vpop.f32.mrf.mxu1  ;;  %v22134_v57 = vsel %vm21814_vm3, %v648_v50, %v652_v1  ;;  %v668_v8 = vrot.slane %v667_v51, 4  ;;  %v474_v1 = vshrl.u32 %v22091_v46, 16  ;;  %v480_v40 = vshll.u32 %v220_v52, 16  ;;  %v21358_v38 = vld [vmem:[%s21484_s26 + $0x60] ss:$12 sps:$4 sm:$0xff]  }
  0xf1   : > { %v22129_v30 = vadd.f32 %v18093_v44, %v22035_v2  ;;  %26550 = vst [vmem:[#allocation7_spill] sm:$0xff] %v22134_v57  ;;  %v443_v2 = vsel %vm21814_vm3, %v438_v0, %v22102_v58  ;;  %1113 = vst [vmem:[#allocation2 + $0xd8] sm:$0xff] %v22134_v57  ;;  %v457_v7 = vor.u32 %v456_v41, %v22102_v58  ;;  %v494_v46 = vshrl.u32 %v220_v52, 16  ;;  %v22166_v58 = vld [vmem:[%s21484_s26 + $0x98] sm:$0xf] }
  0xf2   : > { %v18095_v53 = vpop.f32.mrf.mxu0  ;;  %v22136_v18 = vpop.f32.mrf.mxu1  ;;  %18480 = vmatpush3.bf16.msra.mxu0 %v20714_v31  ;;  %19708 = vmatpush3.bf16.msra.mxu1 %v20736_v59  ;;  %v20722_v31 = vld [vmem:[%s26497_s1 + $0x110] sm:$0xff]   ;;  %1092 = vst.msk [vmem:[#allocation2 + $0x5c] sm:$0xf] %vm1077_vm4, %v443_v2  ;;  %v22163_v44 = vsel %vm21814_vm3, %v668_v8, %v22125_v32  ;;  %v476_v16 = vrot.slane %v474_v1, 4  ;;  %v482_v50 = vrot.slane %v480_v40, 5  ;;  %v241_v2 = vld [vmem:[%s21484_s26 + $0xfc] sm:$0xff] }
  0xf3   : > { %26549 = vst [vmem:[#allocation6_spill] sm:$0xff] %v22129_v30  ;;  %v18096_v61 = vadd.f32 %v18095_v53, %v18094_v15  ;;  %18481 = vmatprep.subr.bf16.mxu0 %v20717_v27  ;;  %19709 = vmatprep.subr.bf16.mxu1 %v22111_v12  ;;  %v20757_v59 = vld [vmem:[%s26497_s1 + $0x130] sm:$0xff]   ;;  %v500_v53 = vshll.u32 %v22120_v14, 16  ;;  %26551 = vst [vmem:[#allocation8_spill] sm:$0xff] %v22163_v44  ;;  %v21359_v0 = vld [vmem:[%s21484_s26 + $0x7c] ss:$12 sps:$4 sm:$0xff]  }
  0xf4   : > { %v18097_v15 = vpop.f32.mrf.mxu0  ;;  %v22156_v27 = vpop.f32.mrf.mxu1  ;;  %4077 = vmatmul.mubr.bf16.gmra.mxu1 %v21358_v38  ;;  %19674 = vmatmul.mubr.msk.bf16.gmra.mxu0 %vm2149_vm0, %v20705_v45  ;;  %1115 = vst [vmem:[#allocation2 + $0xe4] sm:$0xff] %v22163_v44  ;;  %v458_v41 = vrot.slane %v457_v7, 4  ;;  %v20708_v40 = vld [vmem:[%s21484_s26 + $0xb0] ss:$12 sps:$4 sm:$0xff]   ;;  %v20726_v45 = vld [vmem:[%s26497_s1 + $0x108] sm:$0xff]   ;;  %v690_v62 = vshll.u32 %v241_v2, 16 }
  0xf5   : > { %v22169_v52 = vadd.f32 %v18096_v61, %v22064_v56  ;;  %4084 = vmatprep.mubr.bf16.mxu1 %v21359_v0  ;;  %19677 = vmatprep.mubr.msk.bf16.mxu0 %vm2149_vm0, %v20707_v34  ;;  %v20723_v56 = vld [vmem:[%s26497_s1 + $0xd0] sm:$0xff]   ;;  %v477_v34 = vor.u32 %v476_v16, %v462_v37  ;;  %v496_v61 = vrot.slane %v494_v46, 4  ;;  %v502_v38 = vrot.slane %v500_v53, 5  ;;  %v21366_v57 = vld [vmem:[%s21484_s26 + $0xc0] ss:$12 sps:$4 sm:$0xff]  }
  0xf6   : > { %v18098_v8 = vpop.f32.mrf.mxu0  ;;  %v22179_v1 = vpop.f32.mrf.mxu1  ;;  %18482 = vmatpush3.bf16.msra.mxu0 %v20718_v5  ;;  %19710 = vmatpush3.bf16.msra.mxu1 %v22111_v12  ;;  %v514_v0 = vshrl.u32 %v22120_v14, 16  ;;  %v20767_v5 = vld [vmem:[%s26497_s1 + $0x338] sm:$0xff]   ;;  %v463_v12 = vsel %vm21814_vm3, %v458_v41, %v462_v37  ;;  %v520_v46 = vshll.u32 %v22166_v58, 16  ;;  %v686_v53 = vrot.slane %v684_v10, 4  ;;  %v20727_v37 = vld [vmem:[%s26497_s1 + $0xc8] sm:$0xff]  }
  0xf7   : > { %26552 = vst [vmem:[#allocation9_spill] sm:$0xff] %v22169_v52  ;;  %v18099_v7 = vadd.f32 %v18098_v8, %v18097_v15  ;;  %18483 = vmatprep.subr.bf16.mxu0 %v20722_v31  ;;  %19711 = vmatprep.subr.bf16.mxu1 %v20757_v59  ;;  %v20711_v31 = vld [vmem:[%s21484_s26 + $0xc8] ss:$12 sps:$4 sm:$0xff]   ;;  %v478_v15 = vrot.slane %v477_v34, 4  ;;  %v497_v8 = vor.u32 %v496_v61, %v482_v50  ;;  %1094 = vst.msk [vmem:[#allocation2 + $0x68] sm:$0xf] %vm1077_vm4, %v463_v12 }
  0xf8   : > { %v18100_v14 = vpop.f32.mrf.mxu0  ;;  %v22196_v16 = vpop.f32.mrf.mxu1  ;;  %v516_v51 = vrot.slane %v514_v0, 4  ;;  %v22209_v10 = vrot.slane %v520_v46, 5  ;;  %v687_v41 = vor.u32 %v686_v53, %v22125_v32  ;;  %v704_v34 = vshrl.u32 %v241_v2, 16  ;;  %v226_v61 = vld [vmem:[%s21484_s26 + $0xa4] sm:$0xf] }
  0xf9   : > { %v22204_v63 = vadd.f32 %v22024_v54, %v18099_v7  ;;  %v483_v54 = vsel %vm21814_vm3, %v478_v15, %v482_v50  ;;  %v498_v0 = vrot.slane %v497_v8, 4  ;;  %v692_v49 = vrot.slane %v690_v62, 5  ;;  %v20728_v32 = vld [vmem:[%s26497_s1 + $0x100] sm:$0xff]   ;;  %v230_v8 = vld [vmem:[%s21484_s26 + $0xbc] sm:$0xf] }
  0xfa   : > { %v18101_v36 = vpop.f32.mrf.mxu0  ;;  %v22213_v12 = vpop.f32.mrf.mxu1  ;;  %18484 = vmatpush3.bf16.msra.mxu0 %v20723_v56  ;;  %19712 = vmatpush3.bf16.msra.mxu1 %v20757_v59  ;;  %v517_v7 = vor.u32 %v516_v51, %v502_v38  ;;  %1096 = vst.msk [vmem:[#allocation2 + $0x74] sm:$0xf] %vm1077_vm4, %v483_v54  ;;  %v688_v2 = vrot.slane %v687_v41, 4  ;;  %v706_v59 = vrot.slane %v704_v34, 4  ;;  %v710_v56 = vshll.u32 %v22201_v20, 16 }
  0xfb   : > { %26553 = vst [vmem:[#allocation10_spill] sm:$0xff] %v22204_v63  ;;  %v18102_v29 = vadd.f32 %v18101_v36, %v18100_v14  ;;  %18485 = vmatprep.subr.bf16.mxu0 %v20726_v45  ;;  %18611 = vmatprep.subr.bf16.mxu1 %v20767_v5  ;;  %v21360_v62 = vld [vmem:[%s21484_s26 + $0x78] ss:$12 sps:$4 sm:$0xff]   ;;  %v503_v36 = vsel %vm21814_vm3, %v498_v0, %v502_v38  ;;  %v534_v5 = vshrl.u32 %v22166_v58, 16  ;;  %v21361_v14 = vld [vmem:[%s21484_s26 + $0x94] ss:$12 sps:$4 sm:$0xff]  }
  0xfc   : > { %v18103_v46 = vpop.f32.mrf.mxu0  ;;  %v22223_v50 = vpop.f32.mrf.mxu1  ;;  %4085 = vmatmul.mubr.bf16.gmra.mxu1 %v21360_v62  ;;  %19678 = vmatmul.mubr.msk.bf16.gmra.mxu0 %vm2149_vm0, %v20708_v40  ;;  %v518_v45 = vrot.slane %v517_v7, 4  ;;  %1098 = vst.msk [vmem:[#allocation2 + $0x80] sm:$0xf] %vm1077_vm4, %v503_v36  ;;  %v22239_v40 = vsel %vm21814_vm3, %v688_v2, %v692_v49  ;;  %v707_v15 = vor.u32 %v706_v59, %v692_v49  ;;  %v22241_v38 = vrot.slane %v710_v56, 5  ;;  %v20712_v62 = vld [vmem:[%s21484_s26 + $0xe0] ss:$12 sps:$4 sm:$0xff]  }
  0xfd   : > { %v22232_v53 = vadd.f32 %v22043_v21, %v18102_v29  ;;  %4092 = vmatprep.mubr.bf16.mxu1 %v21361_v14  ;;  %19681 = vmatprep.mubr.msk.bf16.mxu0 %vm2149_vm0, %v20711_v31  ;;  %26555 = vst [vmem:[#allocation12_spill] sm:$0xff] %v22239_v40  ;;  %v20729_v29 = vld [vmem:[%s26497_s1 + $0xc0] sm:$0xff]   ;;  %1117 = vst [vmem:[#allocation2 + $0xf0] sm:$0xff] %v22239_v40  ;;  %v536_v58 = vrot.slane %v534_v5, 4  ;;  %v540_v49 = vshll.u32 %v226_v61, 16  ;;  %v554_v31 = vshrl.u32 %v226_v61, 16 }
  0xfe   : > { %v18104_v41 = vpop.f32.mrf.mxu0  ;;  %v22244_v34 = vpop.f32.mrf.mxu1  ;;  %18486 = vmatpush3.bf16.msra.mxu0 %v20727_v37  ;;  %v523_v21 = vsel %vm21814_vm3, %v518_v45, %v22209_v10  ;;  %v20735_v37 = vld [vmem:[%s26497_s1 + $0xf8] sm:$0xff]   ;;  %v708_v0 = vrot.slane %v707_v15, 4  ;;  %v560_v7 = vshll.u32 %v228_v28, 16  ;;  %v574_v2 = vshrl.u32 %v228_v28, 16 }
  0xff   : > { %26554 = vst [vmem:[#allocation11_spill] sm:$0xff] %v22232_v53  ;;  %v18105_v54 = vadd.f32 %v18104_v41, %v18103_v46  ;;  %18487 = vmatprep.subr.bf16.mxu0 %v20728_v32  ;;  %1100 = vst.msk [vmem:[#allocation2 + $0x8c] sm:$0xf] %vm1077_vm4, %v523_v21  ;;  %v537_v36 = vor.u32 %v536_v58, %v22209_v10  ;;  %v542_v61 = vrot.slane %v540_v49, 5  ;;  %v556_v45 = vrot.slane %v554_v31, 4 }
 0x100   : > { %v18106_v59 = vpop.f32.mrf.mxu0  ;;  %v22257_v56 = vpop.f32.mrf.mxu1  ;;  %v580_v46 = vshll.u32 %v230_v8, 16  ;;  %v20715_v5 = vld [vmem:[%s21484_s26 + $0xf8] ss:$12 sps:$4 sm:$0xff]   ;;  %v22268_v14 = vsel %vm21814_vm3, %v708_v0, %v22241_v38  ;;  %v562_v28 = vrot.slane %v560_v7, 5  ;;  %v576_v15 = vrot.slane %v574_v2, 4 }
 0x101   : > { %v22262_v32 = vadd.f32 %v18105_v54, %v22105_v26  ;;  %26557 = vst [vmem:[#allocation14_spill] sm:$0xff] %v22268_v14  ;;  %v22271_v41 = vld [vmem:[%s21484_s26 + $0xc8] sm:$0xf]  ;;  %v20737_v26 = vld [vmem:[%s26497_s1 + $0xb8] sm:$0xff]   ;;  %1119 = vst [vmem:[#allocation2 + $0xfc] sm:$0xff] %v22268_v14  ;;  %v538_v49 = vrot.slane %v537_v36, 4  ;;  %v557_v31 = vor.u32 %v556_v45, %v542_v61 }
 0x102   : > { %v18107_v21 = vpop.f32.mrf.mxu0  ;;  %v22273_v51 = vpop.f32.mrf.mxu1  ;;  %18488 = vmatpush3.bf16.msra.mxu0 %v20729_v29  ;;  %v245_v54 = vld [vmem:[%s21484_s26 + $0x114] sm:$0xff]  ;;  %v577_v7 = vor.u32 %v576_v15, %v562_v28  ;;  %v582_v2 = vrot.slane %v580_v46, 5  ;;  %v21362_v10 = vld [vmem:[%s21484_s26 + $0x90] ss:$12 sps:$4 sm:$0xff]   ;;  %v26558_v45 = vshrl.u32 %v22201_v20, 16 }
 0x103   : > { %26556 = vst [vmem:[#allocation13_spill] sm:$0xff] %v22262_v32  ;;  %v18108_v0 = vadd.f32 %v18107_v21, %v18106_v59  ;;  %18489 = vmatprep.subr.bf16.mxu0 %v20735_v37  ;;  %v20738_v29 = vld [vmem:[%s26497_s1 + $0xf0] sm:$0xff]   ;;  %v594_v32 = vshrl.u32 %v230_v8, 16  ;;  %v543_v59 = vsel %vm21814_vm3, %v538_v49, %v542_v61  ;;  %v558_v36 = vrot.slane %v557_v31, 4  ;;  %v21363_v8 = vld [vmem:[%s21484_s26 + $0xac] ss:$12 sps:$4 sm:$0xff]  }
 0x104   : > { %v18109_v52 = vpop.f32.mrf.mxu0  ;;  %v22287_v53 = vpop.f32.mrf.mxu1  ;;  %4093 = vmatmul.mubr.bf16.gmra.mxu1 %v21362_v10  ;;  %19682 = vmatmul.mubr.msk.bf16.gmra.mxu0 %vm2149_vm0, %v20712_v62  ;;  %v600_v37 = vshll.u32 %v22271_v41, 16  ;;  %v726_v21 = vrot.slane %v26558_v45, 4  ;;  %v20739_v62 = vld [vmem:[%s26497_s1 + $0xb0] sm:$0xff]   ;;  %v578_v61 = vrot.slane %v577_v7, 4  ;;  %1102 = vst.msk [vmem:[#allocation2 + $0x98] sm:$0xf] %vm1077_vm4, %v543_v59 }
 0x105   : > { %v22297_v46 = vadd.f32 %v18108_v0, %v22136_v18  ;;  %4100 = vmatprep.mubr.bf16.mxu1 %v21363_v8  ;;  %19685 = vmatprep.mubr.msk.bf16.mxu0 %vm2149_vm0, %v20715_v5  ;;  %v596_v15 = vrot.slane %v594_v32, 4  ;;  %v22306_v10 = vld [vmem:[%s21484_s26 + $0x120] sm:$0xff]  ;;  %v730_v20 = vshll.u32 %v245_v54, 16  ;;  %v563_v5 = vsel %vm21814_vm3, %v558_v36, %v562_v28  ;;  %v234_v7 = vld [vmem:[%s21484_s26 + $0xd4] sm:$0xf]  ;;  %v22320_v32 = vld [vmem:[%s26497_s1 + $0x368] sm:$0xff]  }
 0x106   : > { %v18110_v49 = vpop.f32.mrf.mxu0  ;;  %v22308_v18 = vpop.f32.mrf.mxu1  ;;  %18490 = vmatpush3.bf16.msra.mxu0 %v20737_v26  ;;  %v22312_v31 = vrot.slane %v600_v37, 5  ;;  %v727_v0 = vor.u32 %v726_v21, %v22241_v38  ;;  %v744_v45 = vshrl.u32 %v245_v54, 16  ;;  %v20716_v59 = vld [vmem:[%s21484_s26 + $0x110] ss:$12 sps:$4 sm:$0xff]   ;;  %1104 = vst.msk [vmem:[#allocation2 + $0xa4] sm:$0xf] %vm1077_vm4, %v563_v5  ;;  %v583_v28 = vsel %vm21814_vm3, %v578_v61, %v582_v2 }
 0x107   : > { %26559 = vst [vmem:[#allocation15_spill] sm:$0xff] %v22297_v46  ;;  %v18111_v8 = vadd.f32 %v18110_v49, %v18109_v52  ;;  %18491 = vmatprep.subr.bf16.mxu0 %v20738_v29  ;;  %v597_v26 = vor.u32 %v596_v15, %v582_v2  ;;  %v732_v36 = vrot.slane %v730_v20, 5  ;;  %v20720_v54 = vld [vmem:[%s21484_s26 + $0x128] ss:$12 sps:$4 sm:$0xff]   ;;  %1106 = vst.msk [vmem:[#allocation2 + $0xb0] sm:$0xf] %vm1077_vm4, %v583_v28 }
 0x108   : > { %v18112_v37 = vpop.f32.mrf.mxu0  ;;  %v22325_v38 = vpop.f32.mrf.mxu1  ;;  %v728_v52 = vrot.slane %v727_v0, 4  ;;  %v746_v29 = vrot.slane %v744_v45, 4  ;;  %v750_v21 = vshll.u32 %v22306_v10, 16  ;;  %v764_v49 = vshrl.u32 %v22306_v10, 16  ;;  %v236_v61 = vld [vmem:[%s21484_s26 + $0xe0] sm:$0xf] }
 0x109   : > { %v22332_v5 = vadd.f32 %v22084_v22, %v18111_v8  ;;  %v598_v58 = vrot.slane %v597_v26, 4  ;;  %v614_v2 = vshrl.u32 %v22271_v41, 16  ;;  %v620_v15 = vshll.u32 %v234_v7, 16  ;;  %v238_v22 = vld [vmem:[%s21484_s26 + $0xec] sm:$0xf] }
 0x10a   : > { %v18113_v20 = vpop.f32.mrf.mxu0  ;;  %v22336_v46 = vpop.f32.mrf.mxu1  ;;  %18492 = vmatpush3.bf16.msra.mxu0 %v20739_v62  ;;  %v22340_v0 = vsel %vm21814_vm3, %v728_v52, %v732_v36  ;;  %v747_v45 = vor.u32 %v746_v29, %v732_v36  ;;  %v22342_v28 = vrot.slane %v750_v21, 5  ;;  %v634_v10 = vshrl.u32 %v234_v7, 16  ;;  %v21364_v36 = vld [vmem:[%s21484_s26 + $0xa8] ss:$12 sps:$4 sm:$0xff]  }
 0x10b   : > { %26560 = vst [vmem:[#allocation16_spill] sm:$0xff] %v22332_v5  ;;  %26561 = vst [vmem:[#allocation17_spill] sm:$0xff] %v22340_v0  ;;  %v18114_v8 = vadd.f32 %v18113_v20, %v18112_v37  ;;  %19745 = vmatprep.subr.bf16.mxu0 %v22320_v32  ;;  %v603_v41 = vsel %vm21814_vm3, %v598_v58, %v22312_v31  ;;  %v616_v62 = vrot.slane %v614_v2, 4  ;;  %v622_v26 = vrot.slane %v620_v15, 5  ;;  %v21365_v2 = vld [vmem:[%s21484_s26 + $0xc4] ss:$12 sps:$4 sm:$0xff]  }
 0x10c   : > { %1121 = vst [vmem:[#allocation2 + $0x108] sm:$0xff] %v22340_v0  ;;  %v18115_v5 = vpop.f32.mrf.mxu0  ;;  %v22350_v52 = vpop.f32.mrf.mxu1  ;;  %4101 = vmatmul.mubr.bf16.gmra.mxu1 %v21364_v36  ;;  %19686 = vmatmul.mubr.msk.bf16.gmra.mxu0 %vm2149_vm0, %v20716_v59  ;;  %1108 = vst.msk [vmem:[#allocation2 + $0xbc] sm:$0xf] %vm1077_vm4, %v603_v41  ;;  %v748_v7 = vrot.slane %v747_v45, 4  ;;  %v636_v37 = vrot.slane %v634_v10, 4  ;;  %v640_v29 = vshll.u32 %v236_v61, 16 }
 0x10d   : > { %v654_v21 = vshrl.u32 %v236_v61, 16  ;;  %v22356_v58 = vadd.f32 %v22122_v47, %v18114_v8  ;;  %4108 = vmatprep.mubr.bf16.mxu1 %v21365_v2  ;;  %19689 = vmatprep.mubr.msk.bf16.mxu0 %vm2149_vm0, %v20720_v54  ;;  %v617_v15 = vor.u32 %v616_v62, %v22312_v31  ;;  %v660_v20 = vshll.u32 %v238_v22, 16  ;;  %v20721_v45 = vld [vmem:[%s21484_s26 + $0x140] ss:$12 sps:$4 sm:$0xff]   ;;  %v22370_v2 = vld [vmem:[%s21484_s26 + $0xf8] sm:$0xf] }
 0x10e   : > { %v674_v59 = vshrl.u32 %v238_v22, 16  ;;  %v18116_v36 = vpop.f32.mrf.mxu0  ;;  %v22361_v41 = vpop.f32.mrf.mxu1  ;;  %v22367_v61 = vsel %vm21814_vm3, %v748_v7, %v22342_v28  ;;  %v637_v47 = vor.u32 %v636_v37, %v622_v26  ;;  %v642_v10 = vrot.slane %v640_v29, 5  ;;  %v20724_v31 = vld [vmem:[%s21484_s26 + $0x158] ss:$12 sps:$4 sm:$0xff]   ;;  %v249_v7 = vld [vmem:[%s21484_s26 + $0x12c] sm:$0xff] }
 0x10f   : > { %26562 = vst [vmem:[#allocation18_spill] sm:$0xff] %v22356_v58  ;;  %26563 = vst [vmem:[#allocation19_spill] sm:$0xff] %v22367_v61  ;;  %v656_v8 = vrot.slane %v654_v21, 4  ;;  %v18117_v54 = vadd.f32 %v18116_v36, %v18115_v5  ;;  %v618_v58 = vrot.slane %v617_v15, 4  ;;  %v662_v40 = vrot.slane %v660_v20, 5  ;;  %v22382_v5 = vld [vmem:[%s21484_s26 + $0x138] sm:$0xff] }
 0x110   : > { %1123 = vst [vmem:[#allocation2 + $0x114] sm:$0xff] %v22367_v61  ;;  %v18118_v14 = vpop.f32.mrf.mxu0  ;;  %v22379_v37 = vpop.f32.mrf.mxu1  ;;  %v638_v29 = vrot.slane %v637_v47, 4  ;;  %v676_v30 = vrot.slane %v674_v59, 4  ;;  %v680_v62 = vshll.u32 %v22370_v2, 16  ;;  %v766_v15 = vrot.slane %v764_v49, 4 }
 0x111   : > { %v657_v21 = vor.u32 %v656_v8, %v642_v10  ;;  %v22385_v36 = vadd.f32 %v18117_v54, %v22179_v1  ;;  %v623_v22 = vsel %vm21814_vm3, %v618_v58, %v622_v26  ;;  %v242_v61 = vld [vmem:[%s21484_s26 + $0x104] sm:$0xf]  ;;  %v770_v47 = vshll.u32 %v249_v7, 16  ;;  %v244_v54 = vld [vmem:[%s21484_s26 + $0x110] sm:$0xf] }
 0x112   : > { %v18119_v0 = vpop.f32.mrf.mxu0  ;;  %v22391_v63 = vpop.f32.mrf.mxu1  ;;  %v643_v20 = vsel %vm21814_vm3, %v638_v29, %v642_v10  ;;  %1110 = vst.msk [vmem:[#allocation2 + $0xc8] sm:$0xf] %vm1077_vm4, %v623_v22  ;;  %v677_v1 = vor.u32 %v676_v30, %v662_v40  ;;  %v22397_v26 = vrot.slane %v680_v62, 5  ;;  %v767_v49 = vor.u32 %v766_v15, %v22342_v28  ;;  %v21367_v28 = vld [vmem:[%s21484_s26 + $0xdc] ss:$12 sps:$4 sm:$0xff]  }
 0x113   : > { %26564 = vst [vmem:[#allocation20_spill] sm:$0xff] %v22385_v36  ;;  %v658_v59 = vrot.slane %v657_v21, 4  ;;  %v18120_v8 = vadd.f32 %v18119_v0, %v18118_v14  ;;  %1112 = vst.msk [vmem:[#allocation2 + $0xd4] sm:$0xf] %vm1077_vm4, %v643_v20  ;;  %v784_v58 = vshrl.u32 %v249_v7, 16  ;;  %v772_v0 = vrot.slane %v770_v47, 5 }
 0x114   : > { %v18121_v36 = vpop.f32.mrf.mxu0  ;;  %v19607_v44 = vpop.f32.mrf.mxu1  ;;  %4109 = vmatmul.mubr.bf16.gmra.mxu1 %v21366_v57  ;;  %19690 = vmatmul.mubr.msk.bf16.gmra.mxu0 %vm2149_vm0, %v20721_v45  ;;  %v678_v14 = vrot.slane %v677_v1, 4  ;;  %v790_v10 = vshll.u32 %v22382_v5, 16  ;;  %v768_v57 = vrot.slane %v767_v49, 4  ;;  %v22413_v45 = vld [vmem:[%s21484_s26 + $0x11c] sm:$0xf]  ;;  %v694_v21 = vshrl.u32 %v22370_v2, 16 }
 0x115   : > { %v663_v30 = vsel %vm21814_vm3, %v658_v59, %v662_v40  ;;  %v22407_v22 = vadd.f32 %v18120_v8, %v22213_v12  ;;  %4116 = vmatprep.mubr.bf16.mxu1 %v21367_v28  ;;  %19693 = vmatprep.mubr.msk.bf16.mxu0 %vm2149_vm0, %v20724_v31  ;;  %v786_v44 = vrot.slane %v784_v58, 4  ;;  %v20725_v7 = vld [vmem:[%s21484_s26 + $0x170] ss:$12 sps:$4 sm:$0xff]   ;;  %v700_v15 = vshll.u32 %v242_v61, 16  ;;  %v20732_v20 = vld [vmem:[%s21484_s26 + $0xf4] ss:$12 sps:$4 sm:$0xff]  }
 0x116   : > { %1114 = vst.msk [vmem:[#allocation2 + $0xe0] sm:$0xf] %vm1077_vm4, %v663_v30  ;;  %v18122_v40 = vpop.f32.mrf.mxu0  ;;  %v2489_v62 = vpop.f32.mrf.mxu1  ;;  %v683_v12 = vsel %vm21814_vm3, %v678_v14, %v22397_v26  ;;  %v22419_v29 = vrot.slane %v790_v10, 5  ;;  %v20733_v59 = vld [vmem:[%s21484_s26 + $0x188] ss:$12 sps:$4 sm:$0xff]   ;;  %v22427_v1 = vsel %vm21814_vm3, %v768_v57, %v772_v0  ;;  %v714_v8 = vshrl.u32 %v242_v61, 16 }
 0x117   : > { %26565 = vst [vmem:[#allocation21_spill] sm:$0xff] %v22407_v22  ;;  %v18123_v31 = vadd.f32 %v18122_v40, %v18121_v36  ;;  %1116 = vst.msk [vmem:[#allocation2 + $0xec] sm:$0xf] %vm1077_vm4, %v683_v12  ;;  %v787_v47 = vor.u32 %v786_v44, %v772_v0  ;;  %v696_v30 = vrot.slane %v694_v21, 4  ;;  %v702_v14 = vrot.slane %v700_v15, 5 }
 0x118   : > { %v18124_v49 = vpop.f32.mrf.mxu0  ;;  %v19608_v58 = vpop.f32.mrf.mxu1  ;;  %1125 = vst [vmem:[#allocation2 + $0x120] sm:$0xff] %v22427_v1  ;;  %v720_v2 = vshll.u32 %v244_v54, 16  ;;  %v734_v10 = vshrl.u32 %v244_v54, 16  ;;  %v22431_v28 = vld [vmem:[%s21484_s26 + $0x128] sm:$0xf]  ;;  %v716_v62 = vrot.slane %v714_v8, 4 }
 0x119   : > { %v22434_v36 = vadd.f32 %v22156_v27, %v18123_v31  ;;  %v788_v40 = vrot.slane %v787_v47, 4  ;;  %v740_v57 = vshll.u32 %v22413_v45, 16  ;;  %v804_v44 = vshrl.u32 %v22382_v5, 16  ;;  %v21368_v22 = vld [vmem:[%s21484_s26 + $0xd8] ss:$12 sps:$4 sm:$0xff]  }
 0x11a   : > { %v18125_v0 = vpop.f32.mrf.mxu0  ;;  %v2492_v61 = vpop.f32.mrf.mxu1  ;;  %v697_v12 = vor.u32 %v696_v30, %v22397_v26  ;;  %v722_v21 = vrot.slane %v720_v2, 5  ;;  %v736_v15 = vrot.slane %v734_v10, 4  ;;  %v717_v27 = vor.u32 %v716_v62, %v702_v14 }
 0x11b   : > { %v18126_v58 = vadd.f32 %v18125_v0, %v18124_v49  ;;  %v22442_v54 = vsel %vm21814_vm3, %v788_v40, %v22419_v29  ;;  %v742_v31 = vrot.slane %v740_v57, 5  ;;  %v760_v10 = vshll.u32 %v22431_v28, 16  ;;  %v253_v40 = vld [vmem:[%s21484_s26 + $0x144] sm:$0xff]  ;;  %v20730_v0 = vld [vmem:[%s21484_s26 + $0xf0] ss:$12 sps:$4 sm:$0xff]  }
 0x11c   : > { %v18127_v47 = vpop.f32.mrf.mxu0  ;;  %v19611_v8 = vpop.f32.mrf.mxu1  ;;  %4117 = vmatmul.mubr.bf16.gmra.mxu1 %v21368_v22  ;;  %19694 = vmatmul.mubr.msk.bf16.gmra.mxu0 %vm2149_vm0, %v20725_v7  ;;  %1127 = vst [vmem:[#allocation2 + $0x12c] sm:$0xff] %v22442_v54  ;;  %v698_v49 = vrot.slane %v697_v12, 4  ;;  %v737_v30 = vor.u32 %v736_v15, %v722_v21  ;;  %v718_v22 = vrot.slane %v717_v27, 4  ;;  %v754_v7 = vshrl.u32 %v22413_v45, 16  ;;  %v20734_v61 = vld [vmem:[%s21484_s26 + $0x1a0] ss:$12 sps:$4 sm:$0xff]  }
 0x11d   : > { %v22452_v2 = vadd.f32 %v22196_v16, %v18126_v58  ;;  %4124 = vmatprep.mubr.bf16.mxu1 %v20732_v20  ;;  %19697 = vmatprep.mubr.msk.bf16.mxu0 %vm2149_vm0, %v20733_v59  ;;  %v22463_v16 = vld [vmem:[%s21484_s26 + $0x150] sm:$0xff]  ;;  %v806_v20 = vrot.slane %v804_v44, 4  ;;  %v20742_v59 = vld [vmem:[%s21484_s26 + $0x10c] ss:$12 sps:$4 sm:$0xff]  }
 0x11e   : > { %v18128_v62 = vpop.f32.mrf.mxu0  ;;  %v2505_v57 = vpop.f32.mrf.mxu1  ;;  %v703_v12 = vsel %vm21814_vm3, %v698_v49, %v702_v14  ;;  %v738_v15 = vrot.slane %v737_v30, 4  ;;  %v250_v58 = vld [vmem:[%s21484_s26 + $0x134] sm:$0xf]  ;;  %v723_v45 = vsel %vm21814_vm3, %v718_v22, %v722_v21  ;;  %v756_v27 = vrot.slane %v754_v7, 4  ;;  %v252_v7 = vld [vmem:[%s21484_s26 + $0x140] sm:$0xf] }
 0x11f   : > { %v18129_v8 = vadd.f32 %v18128_v62, %v18127_v47  ;;  %1118 = vst.msk [vmem:[#allocation2 + $0xf8] sm:$0xf] %vm1077_vm4, %v703_v12  ;;  %v762_v57 = vrot.slane %v760_v10, 5  ;;  %1120 = vst.msk [vmem:[#allocation2 + $0x104] sm:$0xf] %vm1077_vm4, %v723_v45  ;;  %v807_v44 = vor.u32 %v806_v20, %v22419_v29  ;;  %v810_v47 = vshll.u32 %v253_v40, 16 }
 0x120   : > { %v18130_v5 = vpop.f32.mrf.mxu0  ;;  %v19612_v26 = vpop.f32.mrf.mxu1  ;;  %v743_v14 = vsel %vm21814_vm3, %v738_v15, %v742_v31  ;;  %v824_v49 = vshrl.u32 %v253_v40, 16  ;;  %v757_v21 = vor.u32 %v756_v27, %v742_v31  ;;  %v830_v22 = vshll.u32 %v22463_v16, 16  ;;  %v22483_v20 = vld [vmem:[%s21484_s26 + $0x14c] sm:$0xf] }
 0x121   : > { %v22475_v30 = vadd.f32 %v18129_v8, %v22244_v34  ;;  %1122 = vst.msk [vmem:[#allocation2 + $0x110] sm:$0xf] %vm1077_vm4, %v743_v14  ;;  %v808_v12 = vrot.slane %v807_v44, 4  ;;  %v812_v15 = vrot.slane %v810_v47, 5  ;;  %v774_v29 = vshrl.u32 %v22431_v28, 16 }
 0x122   : > { %v18131_v10 = vpop.f32.mrf.mxu0  ;;  %v2508_v62 = vpop.f32.mrf.mxu1  ;;  %v826_v45 = vrot.slane %v824_v49, 4  ;;  %v758_v34 = vrot.slane %v757_v21, 4  ;;  %v22485_v8 = vrot.slane %v830_v22, 5  ;;  %v780_v31 = vshll.u32 %v250_v58, 16 }
 0x123   : > { %26566 = vst [vmem:[#allocation22_spill] sm:$0xff] %v22475_v30  ;;  %v18132_v40 = vadd.f32 %v18131_v10, %v18130_v5  ;;  %v22490_v44 = vsel %vm21814_vm3, %v808_v12, %v812_v15  ;;  %v776_v49 = vrot.slane %v774_v29, 4  ;;  %v794_v28 = vshrl.u32 %v250_v58, 16  ;;  %v20740_v12 = vld [vmem:[%s21484_s26 + $0x108] ss:$12 sps:$4 sm:$0xff]  }
 0x124   : > { %v18133_v27 = vpop.f32.mrf.mxu0  ;;  %v18225_v14 = vpop.f32.mrf.mxu1  ;;  %4125 = vmatmul.mubr.bf16.gmra.mxu1 %v20730_v0  ;;  %19698 = vmatmul.mubr.msk.bf16.gmra.mxu0 %vm2149_vm0, %v20734_v61  ;;  %26567 = vst [vmem:[#allocation23_spill] sm:$0xff] %v22490_v44  ;;  %v827_v47 = vor.u32 %v826_v45, %v812_v15  ;;  %v26569_v5 = vcombine.high %v21828_v19, %v21833_v24  ;;  %1129 = vst [vmem:[#allocation2 + $0x138] sm:$0xff] %v22490_v44  ;;  %v782_v61 = vrot.slane %v780_v31, 5 }
 0x125   : > { %v22493_v62 = vadd.f32 %v18132_v40, %v22273_v51  ;;  %4132 = vmatprep.mubr.bf16.mxu1 %v20742_v59  ;;  %v763_v0 = vsel %vm21814_vm3, %v758_v34, %v762_v57  ;;  %v800_v21 = vshll.u32 %v252_v7, 16  ;;  %v777_v58 = vor.u32 %v776_v49, %v762_v57  ;;  %v22506_v34 = vld [vmem:[%s21484_s26 + $0x158] sm:$0xf]  ;;  %v22531_v49 = vld [vmem:[%s21484_s26 + $0x168] sm:$0xff] }
 0x126   : > { %5007 = vmatprep.mubr.bf16.mxu0 %v26569_v5  ;;  %v18134_v22 = vpop.f32.mrf.mxu0  ;;  %v18226_v10 = vpop.f32.mrf.mxu1  ;;  %1124 = vst.msk [vmem:[#allocation2 + $0x11c] sm:$0xf] %vm1077_vm4, %v763_v0  ;;  %v828_v51 = vrot.slane %v827_v47, 4  ;;  %v796_v59 = vrot.slane %v794_v28, 4  ;;  %v814_v15 = vshrl.u32 %v252_v7, 16  ;;  %v820_v31 = vshll.u32 %v22483_v20, 16 }
 0x127   : > { %26568 = vst [vmem:[#allocation24_spill] sm:$0xff] %v22493_v62  ;;  %v18135_v45 = vadd.f32 %v18134_v22, %v18133_v27  ;;  %v22503_v29 = vadd.f32 %v18226_v10, %v18225_v14  ;;  %v802_v40 = vrot.slane %v800_v21, 5  ;;  %v778_v47 = vrot.slane %v777_v58, 4  ;;  %v20745_v14 = vld [vmem:[%s21484_s26 + $0x124] ss:$12 sps:$4 sm:$0xff]   ;;  %v257_v22 = vld [vmem:[%s21484_s26 + $0x15c] sm:$0xff] }
 0x128   : > { %v18136_v5 = vpop.f32.mrf.mxu0  ;;  %v18228_v26 = vpop.f32.mrf.mxu1  ;;  %v22512_v0 = vsel %vm21814_vm3, %v828_v51, %v22485_v8  ;;  %v797_v57 = vor.u32 %v796_v59, %v782_v61  ;;  %v816_v7 = vrot.slane %v814_v15, 4  ;;  %v822_v21 = vrot.slane %v820_v31, 5  ;;  %v20761_v58 = vld [vmem:[%s26497_s1 + $0x360] sm:$0xff]  }
 0x129   : > { %26570 = vst [vmem:[#allocation25_spill] sm:$0xff] %v22512_v0  ;;  %v22515_v27 = vadd.f32 %v22223_v50, %v18135_v45  ;;  %1131 = vst [vmem:[#allocation2 + $0x144] sm:$0xff] %v22512_v0  ;;  %v783_v50 = vsel %vm21814_vm3, %v778_v47, %v782_v61  ;;  %v834_v45 = vshrl.u32 %v22483_v20, 16  ;;  %v840_v31 = vshll.u32 %v22506_v34, 16 }
 0x12a   : > { %v18137_v10 = vpop.f32.mrf.mxu0  ;;  %v18229_v51 = vpop.f32.mrf.mxu1  ;;  %v798_v59 = vrot.slane %v797_v57, 4  ;;  %v817_v15 = vor.u32 %v816_v7, %v802_v40  ;;  %1126 = vst.msk [vmem:[#allocation2 + $0x128] sm:$0xf] %vm1077_vm4, %v783_v50  ;;  %v26572_v0 = vshrl.u32 %v22463_v16, 16  ;;  %v26573_v61 = vcombine.low %v21828_v19, %v21833_v24  ;;  %v258_v57 = vld [vmem:[%s21484_s26 + $0x164] sm:$0xf] }
 0x12b   : > { %26571 = vst [vmem:[#allocation26_spill] sm:$0xff] %v22515_v27  ;;  %v18138_v62 = vadd.f32 %v18137_v10, %v18136_v5  ;;  %v22533_v28 = vadd.f32 %v18229_v51, %v18228_v26  ;;  %v836_v5 = vrot.slane %v834_v45, 4  ;;  %v850_v47 = vshll.u32 %v257_v22, 16  ;;  %v22554_v19 = vld [vmem:[%s26497_s1 + $0x358] sm:$0xff]  }
 0x12c   : > { %v846_v44 = vrot.slane %v26572_v0, 4  ;;  %v18139_v30 = vpop.f32.mrf.mxu0  ;;  %v18231_v27 = vpop.f32.mrf.mxu1  ;;  %4133 = vmatmul.mubr.bf16.gmra.mxu1 %v20740_v12  ;;  %5008 = vmatmul.mubr.bf16.vlgmr.msra.gmra.mxu0 %v26573_v61  ;;  %v803_v20 = vsel %vm21814_vm3, %v798_v59, %v802_v40  ;;  %v818_v26 = vrot.slane %v817_v15, 4  ;;  %v26574_v16 = vcombine.high %v21837_v25, %v21852_v35  ;;  %v22561_v0 = vld [vmem:[%s21484_s26 + $0x170] sm:$0xf] }
 0x12d   : > { %v22546_v7 = vadd.f32 %v22257_v56, %v18138_v62  ;;  %4140 = vmatprep.mubr.bf16.mxu1 %v20745_v14  ;;  %1128 = vst.msk [vmem:[#allocation2 + $0x134] sm:$0xf] %vm1077_vm4, %v803_v20  ;;  %v22557_v24 = vrot.slane %v840_v31, 5  ;;  %v864_v40 = vshrl.u32 %v257_v22, 16  ;;  %v20743_v14 = vld [vmem:[%s21484_s26 + $0x120] ss:$12 sps:$4 sm:$0xff]   ;;  %19746 = vmatpush3.bf16.msra.mxu0 %v22320_v32  ;;  %v837_v51 = vor.u32 %v836_v5, %v822_v21 }
 0x12e   : > { %5015 = vmatprep.mubr.bf16.mxu0 %v26574_v16  ;;  %v847_v12 = vor.u32 %v846_v44, %v22485_v8  ;;  %v18140_v56 = vpop.f32.mrf.mxu0  ;;  %v18232_v62 = vpop.f32.mrf.mxu1  ;;  %v823_v10 = vsel %vm21814_vm3, %v818_v26, %v822_v21  ;;  %v852_v50 = vrot.slane %v850_v47, 5  ;;  %v870_v59 = vshll.u32 %v22531_v49, 16  ;;  %19747 = vmatprep.subr.bf16.mxu0 %v20761_v58  ;;  %v20749_v26 = vld [vmem:[%s21484_s26 + $0x13c] ss:$12 sps:$4 sm:$0xff]  }
 0x12f   : > { %v18141_v15 = vadd.f32 %v18140_v56, %v18139_v30  ;;  %v22568_v45 = vadd.f32 %v18232_v62, %v18231_v27  ;;  %1130 = vst.msk [vmem:[#allocation2 + $0x140] sm:$0xf] %vm1077_vm4, %v823_v10  ;;  %v866_v44 = vrot.slane %v864_v40, 4  ;;  %v838_v32 = vrot.slane %v837_v51, 4  ;;  %v22583_v47 = vld [vmem:[%s21484_s26 + $0x17c] sm:$0xf] }
 0x130   : > { %v848_v8 = vrot.slane %v847_v12, 4  ;;  %v18142_v22 = vpop.f32.mrf.mxu0  ;;  %v18234_v31 = vpop.f32.mrf.mxu1  ;;  %v22571_v61 = vrot.slane %v870_v59, 5  ;;  %v854_v20 = vshrl.u32 %v22506_v34, 16  ;;  %v860_v5 = vshll.u32 %v258_v57, 16  ;;  %v20782_v51 = vld [vmem:[%s26497_s1 + $0x350] sm:$0xff]  }
 0x131   : > { %v22575_v21 = vadd.f32 %v18141_v15, %v22308_v18  ;;  %v867_v27 = vor.u32 %v866_v44, %v852_v50  ;;  %19748 = vmatpush3.bf16.msra.mxu0 %v20761_v58  ;;  %v843_v34 = vsel %vm21814_vm3, %v838_v32, %v22557_v24  ;;  %v874_v40 = vshrl.u32 %v258_v57, 16  ;;  %v22598_v59 = vld [vmem:[%s21484_s26 + $0x188] sm:$0xf] }
 0x132   : > { %v22580_v30 = vsel %vm21814_vm3, %v848_v8, %v852_v50  ;;  %v18143_v16 = vpop.f32.mrf.mxu0  ;;  %v18235_v12 = vpop.f32.mrf.mxu1  ;;  %v856_v18 = vrot.slane %v854_v20, 4  ;;  %v880_v56 = vshll.u32 %v22561_v0, 16  ;;  %19749 = vmatprep.subr.bf16.mxu0 %v22554_v19  ;;  %1132 = vst.msk [vmem:[#allocation2 + $0x14c] sm:$0xf] %vm1077_vm4, %v843_v34  ;;  %v862_v50 = vrot.slane %v860_v5, 5 }
 0x133   : > { %1133 = vst [vmem:[#allocation2 + $0x150] sm:$0xff] %v22580_v30  ;;  %v18144_v62 = vadd.f32 %v18143_v16, %v18142_v22  ;;  %v22590_v10 = vadd.f32 %v18235_v12, %v18234_v31  ;;  %v868_v58 = vrot.slane %v867_v27, 4  ;;  %v26575_v8 = vcombine.low %v21837_v25, %v21852_v35  ;;  %v20747_v5 = vld [vmem:[%s21484_s26 + $0x138] ss:$12 sps:$4 sm:$0xff]  }
 0x134   : > { %v18145_v15 = vpop.f32.mrf.mxu0  ;;  %v18237_v57 = vpop.f32.mrf.mxu1  ;;  %4141 = vmatmul.mubr.bf16.gmra.mxu1 %v20743_v14  ;;  %v884_v44 = vshrl.u32 %v22531_v49, 16  ;;  %v857_v22 = vor.u32 %v856_v18, %v22557_v24  ;;  %v876_v31 = vrot.slane %v874_v40, 4  ;;  %v882_v32 = vrot.slane %v880_v56, 5 }
 0x135   : > { %5016 = vmatmul.mubr.bf16.gmra.mxu0 %v26575_v8  ;;  %v22606_v20 = vadd.f32 %v18144_v62, %v22336_v46  ;;  %4148 = vmatprep.mubr.bf16.mxu1 %v20749_v26  ;;  %v26576_v27 = vcombine.high %v21868_v55, %v21873_v60  ;;  %v22614_v14 = vsel %vm21814_vm3, %v868_v58, %v22571_v61  ;;  %v894_v25 = vshrl.u32 %v22561_v0, 16  ;;  %v20792_v46 = vld [vmem:[%s26497_s1 + $0x348] sm:$0xff]  }
 0x136   : > { %v900_v35 = vshll.u32 %v22583_v47, 16  ;;  %v18146_v49 = vpop.f32.mrf.mxu0  ;;  %v18238_v24 = vpop.f32.mrf.mxu1  ;;  %19750 = vmatpush3.bf16.msra.mxu0 %v22554_v19  ;;  %1135 = vst [vmem:[#allocation2 + $0x15c] sm:$0xff] %v22614_v14  ;;  %v858_v16 = vrot.slane %v857_v22, 4  ;;  %v877_v12 = vor.u32 %v876_v31, %v862_v50  ;;  %v920_v26 = vshll.u32 %v22598_v59, 16 }
 0x137   : > { %5023 = vmatprep.mubr.bf16.mxu0 %v26576_v27  ;;  %v18147_v34 = vadd.f32 %v18146_v49, %v18145_v15  ;;  %v22628_v18 = vadd.f32 %v18238_v24, %v18237_v57  ;;  %19751 = vmatprep.subr.bf16.mxu0 %v20782_v51  ;;  %v896_v19 = vrot.slane %v894_v25, 4  ;;  %v914_v27 = vshrl.u32 %v22583_v47, 16  ;;  %v20753_v15 = vld [vmem:[%s21484_s26 + $0x154] ss:$12 sps:$4 sm:$0xff]  }
 0x138   : > { %v902_v40 = vrot.slane %v900_v35, 5  ;;  %v18148_v56 = vpop.f32.mrf.mxu0  ;;  %v18240_v62 = vpop.f32.mrf.mxu1  ;;  %v863_v58 = vsel %vm21814_vm3, %v858_v16, %v862_v50  ;;  %v878_v8 = vrot.slane %v877_v12, 4  ;;  %v261_v57 = vld [vmem:[%s21484_s26 + $0x174] sm:$0xff]  ;;  %v22641_v25 = vld [vmem:[%s21484_s26 + $0x180] sm:$0xff]  ;;  %v886_v35 = vrot.slane %v884_v44, 4 }
 0x139   : > { %v22635_v22 = vadd.f32 %v22287_v53, %v18147_v34  ;;  %v897_v31 = vor.u32 %v896_v19, %v882_v32  ;;  %1134 = vst.msk [vmem:[#allocation2 + $0x158] sm:$0xf] %vm1077_vm4, %v863_v58  ;;  %v916_v47 = vrot.slane %v914_v27, 4  ;;  %v22645_v16 = vrot.slane %v920_v26, 5  ;;  %v20804_v44 = vld [vmem:[%s26497_s1 + $0x340] sm:$0xff]  }
 0x13a   : > { %v18149_v49 = vpop.f32.mrf.mxu0  ;;  %v18241_v24 = vpop.f32.mrf.mxu1  ;;  %19752 = vmatpush3.bf16.msra.mxu0 %v20782_v51  ;;  %v883_v50 = vsel %vm21814_vm3, %v878_v8, %v882_v32  ;;  %v887_v19 = vor.u32 %v886_v35, %v22571_v61  ;;  %v26577_v32 = vcombine.low %v21868_v55, %v21873_v60  ;;  %v910_v8 = vshll.u32 %v22641_v25, 16 }
 0x13b   : > { %v18150_v12 = vadd.f32 %v18149_v49, %v18148_v56  ;;  %v22647_v53 = vadd.f32 %v18241_v24, %v18240_v62  ;;  %19753 = vmatprep.subr.bf16.mxu0 %v20792_v46  ;;  %v898_v34 = vrot.slane %v897_v31, 4  ;;  %1136 = vst.msk [vmem:[#allocation2 + $0x164] sm:$0xf] %vm1077_vm4, %v883_v50  ;;  %v917_v26 = vor.u32 %v916_v47, %v902_v40 }
 0x13c   : > { %v18151_v51 = vpop.f32.mrf.mxu0  ;;  %v18243_v58 = vpop.f32.mrf.mxu1  ;;  %4149 = vmatmul.mubr.bf16.gmra.mxu1 %v20747_v5  ;;  %v890_v56 = vshll.u32 %v261_v57, 16  ;;  %v904_v62 = vshrl.u32 %v261_v57, 16  ;;  %v26578_v61 = vcombine.high %v21896_v13, %v21901_v17  ;;  %v888_v31 = vrot.slane %v887_v19, 4 }
 0x13d   : > { %5024 = vmatmul.mubr.bf16.gmra.mxu0 %v26577_v32  ;;  %v22659_v27 = vadd.f32 %v22325_v38, %v18150_v12  ;;  %4156 = vmatprep.mubr.bf16.mxu1 %v20753_v15  ;;  %v903_v5 = vsel %vm21814_vm3, %v898_v34, %v902_v40  ;;  %v918_v35 = vrot.slane %v917_v26, 4  ;;  %v20751_v15 = vld [vmem:[%s21484_s26 + $0x150] ss:$12 sps:$4 sm:$0xff]   ;;  %v22670_v50 = vrot.slane %v910_v8, 5  ;;  %v20821_v40 = vld [vmem:[%s26497_s1 + $0x548] sm:$0xff]  }
 0x13e   : > { %5031 = vmatprep.mubr.bf16.mxu0 %v26578_v61  ;;  %v18152_v55 = vpop.f32.mrf.mxu0  ;;  %v18244_v60 = vpop.f32.mrf.mxu1  ;;  %19754 = vmatpush3.bf16.msra.mxu0 %v20792_v46  ;;  %1138 = vst.msk [vmem:[#allocation2 + $0x170] sm:$0xf] %vm1077_vm4, %v903_v5  ;;  %v892_v57 = vrot.slane %v890_v56, 5  ;;  %v906_v49 = vrot.slane %v904_v62, 4 }
 0x13f   : > { %v18153_v38 = vadd.f32 %v18152_v55, %v18151_v51  ;;  %v22667_v24 = vadd.f32 %v18244_v60, %v18243_v58  ;;  %19755 = vmatprep.subr.bf16.mxu0 %v20804_v44  ;;  %v923_v46 = vsel %vm21814_vm3, %v918_v35, %v22645_v16  ;;  %v20756_v58 = vld [vmem:[%s21484_s26 + $0x16c] ss:$12 sps:$4 sm:$0xff]  }
 0x140   : > { %v18154_v47 = vpop.f32.mrf.mxu0  ;;  %v18246_v12 = vpop.f32.mrf.mxu1  ;;  %v893_v34 = vsel %vm21814_vm3, %v888_v31, %v892_v57  ;;  %v907_v19 = vor.u32 %v906_v49, %v892_v57  ;;  %1140 = vst.msk [vmem:[#allocation2 + $0x17c] sm:$0xf] %vm1077_vm4, %v923_v46 }
 0x141   : > { %v22681_v51 = vadd.f32 %v18153_v38, %v22361_v41  ;;  %1137 = vst [vmem:[#allocation2 + $0x168] sm:$0xff] %v893_v34  ;;  %v26579_v41 = vcombine.low %v21896_v13, %v21901_v17 }
 0x142   : > { %v18155_v32 = vpop.f32.mrf.mxu0  ;;  %v18247_v26 = vpop.f32.mrf.mxu1  ;;  %v908_v56 = vrot.slane %v907_v19, 4  ;;  %19756 = vmatpush3.bf16.msra.mxu0 %v20804_v44  ;;  %v26580_v44 = vcombine.high %v21918_v48, %v21923_v42 }
 0x143   : > { %v18156_v62 = vadd.f32 %v18155_v32, %v18154_v47  ;;  %v22685_v8 = vadd.f32 %v18247_v26, %v18246_v12  ;;  %18745 = vmatprep.subr.bf16.mxu0 %v20821_v40  ;;  %v20754_v40 = vld [vmem:[%s21484_s26 + $0x168] ss:$12 sps:$4 sm:$0xff]   ;;  %v20760_v47 = vld [vmem:[%s21484_s26 + $0x184] ss:$12 sps:$4 sm:$0xff]   ;;  %v26581_v26 = vcombine.low %v21918_v48, %v21923_v42 }
 0x144   : > { %v18157_v61 = vpop.f32.mrf.mxu0  ;;  %v18249_v5 = vpop.f32.mrf.mxu1  ;;  %4157 = vmatmul.mubr.bf16.gmra.mxu1 %v20751_v15  ;;  %v913_v31 = vsel %vm21814_vm3, %v908_v56, %v22670_v50  ;;  %v20764_v42 = vld [vmem:[%s21484_s26 + $0x19c] ss:$12 sps:$4 sm:$0xff]  }
 0x145   : > { %5032 = vmatmul.mubr.bf16.gmra.mxu0 %v26579_v41  ;;  %v22694_v55 = vadd.f32 %v18156_v62, %v22391_v63  ;;  %4164 = vmatprep.mubr.bf16.mxu1 %v20756_v58  ;;  %1139 = vst [vmem:[#allocation2 + $0x174] sm:$0xff] %v913_v31  ;;  %v22699_v60 = vcombine.low %v893_v34, %v913_v31  ;;  %v934_v62 = vshrl.u32 %v22598_v59, 16  ;;  %v20758_v41 = vld [vmem:[%s21484_s26 + $0x180] ss:$12 sps:$4 sm:$0xff]  }
 0x146   : > { %5039 = vmatprep.mubr.bf16.mxu0 %v26580_v44  ;;  %v22701_v35 = vcombine.high %v893_v34, %v913_v31  ;;  %v18158_v13 = vpop.f32.mrf.mxu0  ;;  %v18250_v17 = vpop.f32.mrf.mxu1  ;;  %v26583_v59 = vcombine.low %v21941_v43, %v21947_v39 }
 0x147   : > { %v18159_v57 = vadd.f32 %v18158_v13, %v18157_v61  ;;  %v22703_v49 = vadd.f32 %v18250_v17, %v18249_v5 }
 0x148   : > { %v18160_v38 = vpop.f32.mrf.mxu0  ;;  %v18252_v15 = vpop.f32.mrf.mxu1 }
 0x149   : > { %v22707_v63 = vadd.f32 %v22350_v52, %v18159_v57  ;;  %v26582_v52 = vcombine.high %v21941_v43, %v21947_v39  ;;  %v266_v57 = vld [vmem:[%s21484_s26 + $0x194] sm:$0xf]  ;;  %v20762_v43 = vld [vmem:[%s21484_s26 + $0x198] ss:$12 sps:$4 sm:$0xff]  }
 0x14a   : > { %v18161_v12 = vpop.f32.mrf.mxu0  ;;  %v18253_v46 = vpop.f32.mrf.mxu1 }
 0x14b   : > { %v18162_v19 = vadd.f32 %v18161_v12, %v18160_v38  ;;  %v22710_v58 = vadd.f32 %v18253_v46, %v18252_v15  ;;  %v954_v12 = vshrl.u32 %v266_v57, 16  ;;  %v26584_v46 = vcombine.high %v21970_v4, %v21975_v9 }
 0x14c   : > { %v18163_v34 = vpop.f32.mrf.mxu0  ;;  %v18255_v32 = vpop.f32.mrf.mxu1  ;;  %4165 = vmatmul.mubr.bf16.gmra.mxu1 %v20754_v40  ;;  %v936_v40 = vrot.slane %v934_v62, 4 }
 0x14d   : > { %5040 = vmatmul.mubr.bf16.gmra.mxu0 %v26581_v26  ;;  %v22716_v56 = vadd.f32 %v22379_v37, %v18162_v19  ;;  %4172 = vmatprep.mubr.bf16.mxu1 %v20760_v47  ;;  %v940_v47 = vshll.u32 %v266_v57, 16  ;;  %v268_v19 = vld [vmem:[%s21484_s26 + $0x1a0] sm:$0xf] }
 0x14e   : > { %5047 = vmatprep.mubr.bf16.mxu0 %v26582_v52  ;;  %v18164_v61 = vpop.f32.mrf.mxu0  ;;  %v18256_v5 = vpop.f32.mrf.mxu1  ;;  %v937_v26 = vor.u32 %v936_v40, %v22645_v16 }
 0x14f   : > { %v22723_v31 = vadd.f32 %v18256_v5, %v18255_v32  ;;  %v942_v52 = vrot.slane %v940_v47, 5  ;;  %v956_v61 = vrot.slane %v954_v12, 4  ;;  %v960_v5 = vshll.u32 %v268_v19, 16 }
 0x150   : > { %v18166_v44 = vpop.f32.mrf.mxu0  ;;  %v18258_v48 = vpop.f32.mrf.mxu1  ;;  %v26585_v47 = vcombine.low %v21970_v4, %v21975_v9  ;;  %v20768_v9 = vld [vmem:[%s26497_s1 + $0x2f8] sm:$0xff]  }
 0x151   : > { %v938_v44 = vrot.slane %v937_v26, 4  ;;  %v20766_v26 = vld [vmem:[#allocation2 + $0x20] ss:$12 sps:$4 sm:$0xff]  }
 0x152   : > { %v18167_v13 = vpop.f32.mrf.mxu0  ;;  %v18259_v17 = vpop.f32.mrf.mxu1 }
 0x153   : > { %v22726_v37 = vadd.f32 %v18259_v17, %v18258_v48  ;;  %v957_v48 = vor.u32 %v956_v61, %v942_v52  ;;  %v20765_v13 = vld [vmem:[#allocation2 + $0x8] ss:$12 sps:$4 sm:$0xff]  }
 0x154   : > { %v18169_v38 = vpop.f32.mrf.mxu0  ;;  %v18261_v15 = vpop.f32.mrf.mxu1  ;;  %4173 = vmatmul.mubr.bf16.gmra.mxu1 %v20758_v41 }
 0x155   : > { %5048 = vmatmul.mubr.bf16.gmra.mxu0 %v26583_v59  ;;  %4180 = vmatprep.mubr.bf16.mxu1 %v20764_v42  ;;  %v22740_v42 = vrot.slane %v960_v5, 5  ;;  %v943_v38 = vsel %vm21814_vm3, %v938_v44, %v942_v52  ;;  %v958_v59 = vrot.slane %v957_v48, 4 }
 0x156   : > { %5055 = vmatprep.mubr.bf16.mxu0 %v26584_v46  ;;  %v18170_v34 = vpop.f32.mrf.mxu0  ;;  %v18262_v32 = vpop.f32.mrf.mxu1  ;;  %1142 = vst.msk [vmem:[#allocation2 + $0x188] sm:$0xf] %vm1077_vm4, %v943_v38  ;;  %v26586_v46 = vcombine.high %v22006_v6, %v22014_v11 }
 0x157   : > { %v22737_v41 = vadd.f32 %v18262_v32, %v18261_v15  ;;  %v963_v12 = vsel %vm21814_vm3, %v958_v59, %v22740_v42 }
 0x158   : > { %v18172_v39 = vpop.f32.mrf.mxu0  ;;  %v18264_v62 = vpop.f32.mrf.mxu1  ;;  %1144 = vst.msk [vmem:[#allocation2 + $0x194] sm:$0xf] %vm1077_vm4, %v963_v12  ;;  %v20777_v12 = vld [vmem:[%s26497_s1 + $0x2e8] sm:$0xff]  }
 0x159   : > { %v20772_v39 = vld [vmem:[%s26497_s1 + $0x330] sm:$0xff]  }
 0x15a   : > { %v18173_v17 = vpop.f32.mrf.mxu0  ;;  %v18265_v57 = vpop.f32.mrf.mxu1 }
 0x15b   : > { %v22744_v16 = vadd.f32 %v18265_v57, %v18264_v62  ;;  %v26588_v17 = vcombine.high %v22048_v23, %v22060_v33  ;;  %v20773_v57 = vld [vmem:[%s26497_s1 + $0x2f0] sm:$0xff]  }
 0x15c   : > { %v18175_v15 = vpop.f32.mrf.mxu0  ;;  %v18267_v40 = vpop.f32.mrf.mxu1  ;;  %4181 = vmatmul.mubr.bf16.gmra.mxu1 %v20762_v43  ;;  %v20770_v43 = vld [vmem:[#allocation2 + $0x38] ss:$12 sps:$4 sm:$0xff]  }
 0x15d   : > { %5056 = vmatmul.mubr.bf16.gmra.mxu0 %v26585_v47  ;;  %19713 = vmatprep.mubr.msk.bf16.mxu1 %vm2149_vm0, %v20765_v13  ;;  %v26587_v13 = vcombine.low %v22006_v6, %v22014_v11  ;;  %v20776_v6 = vld [vmem:[%s26497_s1 + $0x328] sm:$0xff]   ;;  %v20771_v15 = vld [vmem:[#allocation2 + $0x50] ss:$12 sps:$4 sm:$0xff]  }
 0x15e   : > { %5063 = vmatprep.mubr.bf16.mxu0 %v26586_v46  ;;  %v18176_v19 = vpop.f32.mrf.mxu0  ;;  %v18268_v34 = vpop.f32.mrf.mxu1  ;;  %v20774_v46 = vld [vmem:[#allocation2 + $0x68] ss:$12 sps:$4 sm:$0xff]  }
 0x15f   : > { %v22758_v32 = vadd.f32 %v18268_v34, %v18267_v40 }
 0x160   : > { %v18178_v52 = vpop.f32.mrf.mxu0  ;;  %v18270_v4 = vpop.f32.mrf.mxu1 }
 0x162   : > { %v18179_v61 = vpop.f32.mrf.mxu0  ;;  %v18271_v5 = vpop.f32.mrf.mxu1 }
 0x163   : > { %v22766_v62 = vadd.f32 %v18271_v5, %v18270_v4  ;;  %v26589_v61 = vcombine.low %v22048_v23, %v22060_v33  ;;  %v20781_v5 = vld [vmem:[%s26497_s1 + $0x2e0] sm:$0xff]  }
 0x164   : > { %v18181_v44 = vpop.f32.mrf.mxu0  ;;  %v18273_v48 = vpop.f32.mrf.mxu1  ;;  %19714 = vmatmul.mubr.msk.bf16.vlgmr.msra.gmra.mxu1 %vm2149_vm0, %v20766_v26  ;;  %v20780_v26 = vld [vmem:[%s26497_s1 + $0x320] sm:$0xff]  }
 0x165   : > { %5064 = vmatmul.mubr.bf16.gmra.mxu0 %v26587_v13  ;;  %18612 = vmatpush3.bf16.msra.mxu1 %v20768_v9  ;;  %v26591_v44 = vld [vmem:[#allocation8_spill] sm:$0xff]  ;;  %v20785_v13 = vld [vmem:[%s26497_s1 + $0x318] sm:$0xff]  }
 0x166   : > { %5071 = vmatprep.mubr.bf16.mxu0 %v26588_v17  ;;  %v18182_v38 = vpop.f32.mrf.mxu0  ;;  %v18274_v59 = vpop.f32.mrf.mxu1  ;;  %19717 = vmatprep.mubr.msk.bf16.mxu1 %vm2149_vm0, %v20770_v43  ;;  %v20775_v17 = vld [vmem:[#allocation2 + $0x80] ss:$12 sps:$4 sm:$0xff]  }
 0x167   : > { %18613 = vmatprep.subr.bf16.mxu1 %v20772_v39  ;;  %v22782_v11 = vadd.f32 %v18274_v59, %v18273_v48  ;;  %v26590_v39 = vld [vmem:[#allocation7_spill] sm:$0xff] }
 0x168   : > { %v18184_v40 = vpop.f32.mrf.mxu0  ;;  %v18276_v47 = vpop.f32.mrf.mxu1  ;;  %v26592_v48 = vcombine.high %v26590_v39, %v26591_v44 }
 0x169   : > { %18614 = vmatpush3.bf16.msra.mxu1 %v20773_v57  ;;  %v26593_v57 = vld [vmem:[#allocation10_spill] sm:$0xff] }
 0x16a   : > { %v18185_v19 = vpop.f32.mrf.mxu0  ;;  %v18277_v34 = vpop.f32.mrf.mxu1  ;;  %18615 = vmatprep.subr.bf16.mxu1 %v20776_v6  ;;  %v20786_v40 = vld [vmem:[%s26497_s1 + $0x2d8] sm:$0xff]  }
 0x16b   : > { %v22790_v52 = vadd.f32 %v18277_v34, %v18276_v47  ;;  %v26594_v47 = vld [vmem:[#allocation6_spill] sm:$0xff] }
 0x16c   : > { %v18279_v4 = vpop.f32.mrf.mxu1  ;;  %v19627_v9 = vpop.f32.mrf.mxu0  ;;  %19718 = vmatmul.mubr.msk.bf16.gmra.mxu1 %vm2149_vm0, %v20771_v15 }
 0x16d   : > { %5072 = vmatmul.mubr.bf16.gmra.mxu0 %v26589_v61  ;;  %v3285_v43 = vadd.f32 %v19627_v9, %v22568_v45  ;;  %19721 = vmatprep.mubr.msk.bf16.mxu1 %vm2149_vm0, %v20774_v46 }
 0x16e   : > { %5079 = vmatprep.mubr.bf16.mxu0 %v26592_v48  ;;  %v18280_v23 = vpop.f32.mrf.mxu1  ;;  %v3276_v33 = vpop.f32.mrf.mxu0  ;;  %18616 = vmatpush3.bf16.msra.mxu1 %v20777_v12  ;;  %v20778_v12 = vld [vmem:[#allocation2 + $0x98] ss:$12 sps:$4 sm:$0xff]  }
 0x16f   : > { %v22808_v38 = vadd.f32 %v3285_v43, %v26593_v57  ;;  %v22810_v59 = vadd.f32 %v18280_v23, %v18279_v4  ;;  %v3277_v45 = vadd.f32 %v22503_v29, %v3276_v33  ;;  %18617 = vmatprep.subr.bf16.mxu1 %v20780_v26  ;;  %v20789_v29 = vld [vmem:[%s26497_s1 + $0x310] sm:$0xff]   ;;  %v26595_v26 = vld [vmem:[#allocation11_spill] sm:$0xff] }
 0x170   : > { %v18282_v6 = vpop.f32.mrf.mxu1  ;;  %v19628_v15 = vpop.f32.mrf.mxu0  ;;  %v26597_v33 = vld [vmem:[#allocation9_spill] sm:$0xff] }
 0x171   : > { %v22817_v46 = vadd.f32 %v3277_v45, %v26594_v47  ;;  %v3288_v19 = vadd.f32 %v19628_v15, %v22590_v10  ;;  %v26596_v10 = vcombine.low %v26590_v39, %v26591_v44  ;;  %v20794_v39 = vld [vmem:[%s26497_s1 + $0x308] sm:$0xff]   ;;  %v20779_v15 = vld [vmem:[#allocation2 + $0xb0] ss:$12 sps:$4 sm:$0xff]  }
 0x172   : > { %v18283_v34 = vpop.f32.mrf.mxu1  ;;  %v3279_v9 = vpop.f32.mrf.mxu0  ;;  %18618 = vmatpush3.bf16.msra.mxu1 %v20781_v5  ;;  %v20790_v5 = vld [vmem:[%s26497_s1 + $0x2d0] sm:$0xff]   ;;  %v26601_v47 = vld [vmem:[#allocation16_spill] sm:$0xff] }
 0x173   : > { %v22824_v4 = vadd.f32 %v3288_v19, %v26595_v26  ;;  %v22826_v61 = vadd.f32 %v18283_v34, %v18282_v6  ;;  %v3280_v43 = vadd.f32 %v22533_v28, %v3279_v9  ;;  %18619 = vmatprep.subr.bf16.mxu1 %v20785_v13  ;;  %v26598_v6 = vld [vmem:[#allocation12_spill] sm:$0xff]  ;;  %v26599_v28 = vld [vmem:[#allocation14_spill] sm:$0xff] }
 0x174   : > { %v18285_v48 = vpop.f32.mrf.mxu1  ;;  %v19631_v23 = vpop.f32.mrf.mxu0  ;;  %19722 = vmatmul.mubr.msk.bf16.gmra.mxu1 %vm2149_vm0, %v20775_v17  ;;  %v26600_v13 = vcombine.high %v26598_v6, %v26599_v28 }
 0x175   : > { %5080 = vmatmul.mubr.bf16.gmra.mxu0 %v26596_v10  ;;  %v22837_v57 = vadd.f32 %v3280_v43, %v26597_v33  ;;  %v3301_v45 = vadd.f32 %v19631_v23, %v22667_v24  ;;  %19725 = vmatprep.mubr.msk.bf16.mxu1 %vm2149_vm0, %v20778_v12  ;;  %v20795_v12 = vld [vmem:[%s26497_s1 + $0x2c8] sm:$0xff]   ;;  %v26602_v43 = vld [vmem:[#allocation13_spill] sm:$0xff] }
 0x176   : > { %5087 = vmatprep.mubr.bf16.mxu0 %v26600_v13  ;;  %v18286_v44 = vpop.f32.mrf.mxu1  ;;  %v3292_v17 = vpop.f32.mrf.mxu0  ;;  %18620 = vmatpush3.bf16.msra.mxu1 %v20786_v40  ;;  %v20783_v40 = vld [vmem:[#allocation2 + $0xc8] ss:$12 sps:$4 sm:$0xff]  }
 0x177   : > { %v22848_v19 = vadd.f32 %v3301_v45, %v26601_v47  ;;  %v22850_v34 = vadd.f32 %v18286_v44, %v18285_v48  ;;  %v3293_v24 = vadd.f32 %v22628_v18, %v3292_v17  ;;  %18621 = vmatprep.subr.bf16.mxu1 %v20789_v29  ;;  %v20798_v18 = vld [vmem:[%s26497_s1 + $0x300] sm:$0xff]   ;;  %v26603_v29 = vld [vmem:[#allocation18_spill] sm:$0xff] }
 0x178   : > { %v18288_v9 = vpop.f32.mrf.mxu1  ;;  %v19632_v26 = vpop.f32.mrf.mxu0 }
 0x179   : > { %v22857_v23 = vadd.f32 %v3293_v24, %v26602_v43  ;;  %v3304_v10 = vadd.f32 %v19632_v26, %v22685_v8  ;;  %v26604_v8 = vcombine.low %v26598_v6, %v26599_v28  ;;  %v26606_v43 = vld [vmem:[#allocation17_spill] sm:$0xff]  ;;  %v22887_v6 = vld [vmem:[%s26497_s1 + $0x578] sm:$0xff]  }
 0x17a   : > { %v18289_v33 = vpop.f32.mrf.mxu1  ;;  %v3295_v45 = vpop.f32.mrf.mxu0  ;;  %18622 = vmatpush3.bf16.msra.mxu1 %v20790_v5  ;;  %v26605_v5 = vld [vmem:[#allocation15_spill] sm:$0xff] }
 0x17b   : > { %v22864_v48 = vadd.f32 %v3304_v10, %v26603_v29  ;;  %v22866_v13 = vadd.f32 %v18289_v33, %v18288_v9  ;;  %v3296_v44 = vadd.f32 %v22647_v53, %v3295_v45  ;;  %18623 = vmatprep.subr.bf16.mxu1 %v20794_v39  ;;  %v26607_v10 = vld [vmem:[#allocation19_spill] sm:$0xff] }
 0x17c   : > { %v18291_v17 = vpop.f32.mrf.mxu1  ;;  %v19635_v47 = vpop.f32.mrf.mxu0  ;;  %19726 = vmatmul.mubr.msk.bf16.gmra.mxu1 %vm2149_vm0, %v20779_v15  ;;  %v26608_v9 = vcombine.high %v26606_v43, %v26607_v10  ;;  %v20799_v53 = vld [vmem:[%s26497_s1 + $0x2c0] sm:$0xff]  }
 0x17d   : > { %5088 = vmatmul.mubr.bf16.gmra.mxu0 %v26604_v8  ;;  %v22874_v24 = vadd.f32 %v3296_v44, %v26605_v5  ;;  %v3317_v26 = vadd.f32 %v19635_v47, %v22723_v31  ;;  %19729 = vmatprep.mubr.msk.bf16.mxu1 %vm2149_vm0, %v20783_v40  ;;  %v20784_v15 = vld [vmem:[#allocation2 + $0xe0] ss:$12 sps:$4 sm:$0xff]   ;;  %v20787_v5 = vld [vmem:[#allocation2 + $0xf8] ss:$12 sps:$4 sm:$0xff]  }
 0x17e   : > { %5095 = vmatprep.mubr.bf16.mxu0 %v26608_v9  ;;  %v18292_v28 = vpop.f32.mrf.mxu1  ;;  %v3308_v39 = vpop.f32.mrf.mxu0  ;;  %18624 = vmatpush3.bf16.msra.mxu1 %v20795_v12  ;;  %v26609_v44 = vld [vmem:[#allocation20_spill] sm:$0xff] }
 0x17f   : > { %v22890_v31 = vadd.f32 %v3317_v26, %v22434_v36  ;;  %v22892_v33 = vadd.f32 %v18292_v28, %v18291_v17  ;;  %v3309_v40 = vadd.f32 %v22703_v49, %v3308_v39  ;;  %18625 = vmatprep.subr.bf16.mxu1 %v20798_v18  ;;  %v26610_v26 = vcombine.low %v26606_v43, %v26607_v10  ;;  %v20788_v39 = vld [vmem:[#allocation2 + $0x110] ss:$12 sps:$4 sm:$0xff]  }
 0x180   : > { %v18294_v45 = vpop.f32.mrf.mxu1  ;;  %v19636_v29 = vpop.f32.mrf.mxu0 }
 0x181   : > { %v22896_v47 = vadd.f32 %v3309_v40, %v26609_v44  ;;  %v3320_v8 = vadd.f32 %v19636_v29, %v22726_v37  ;;  %v26611_v37 = vld [vmem:[#allocation21_spill] sm:$0xff]  ;;  %v26613_v40 = vld [vmem:[#allocation26_spill] sm:$0xff] }
 0x182   : > { %v18295_v9 = vpop.f32.mrf.mxu1  ;;  %v3311_v0 = vpop.f32.mrf.mxu0  ;;  %18626 = vmatpush3.bf16.msra.mxu1 %v20799_v53  ;;  %v26612_v53 = vcombine.high %v22427_v1, %v22442_v54  ;;  %v26614_v29 = vld [vmem:[#allocation22_spill] sm:$0xff] }
 0x183   : > { %v22900_v12 = vadd.f32 %v3320_v8, %v22452_v2  ;;  %v22902_v36 = vadd.f32 %v18295_v9, %v18294_v45  ;;  %v3312_v17 = vadd.f32 %v22710_v58, %v3311_v0  ;;  %19789 = vmatprep.subr.bf16.mxu1 %v22887_v6  ;;  %v20791_v8 = vld [vmem:[#allocation2 + $0x128] ss:$12 sps:$4 sm:$0xff]  }
 0x184   : > { %v18297_v49 = vpop.f32.mrf.mxu1  ;;  %v19639_v18 = vpop.f32.mrf.mxu0  ;;  %19730 = vmatmul.mubr.msk.bf16.gmra.mxu1 %vm2149_vm0, %v20784_v15 }
 0x185   : > { %5096 = vmatmul.mubr.bf16.gmra.mxu0 %v26610_v26  ;;  %v22911_v28 = vadd.f32 %v3312_v17, %v26611_v37  ;;  %v3333_v2 = vadd.f32 %v19639_v18, %v22758_v32  ;;  %19733 = vmatprep.mubr.msk.bf16.mxu1 %vm2149_vm0, %v20787_v5  ;;  %v924_v5 = vshrl.u32 %v22641_v25, 16  ;;  %v26615_v37 = vcombine.low %v22427_v1, %v22442_v54  ;;  %v26617_v25 = vld [vmem:[#allocation23_spill] sm:$0xff] }
 0x186   : > { %5103 = vmatprep.mubr.bf16.mxu0 %v26612_v53  ;;  %v18298_v0 = vpop.f32.mrf.mxu1  ;;  %v3324_v58 = vpop.f32.mrf.mxu0  ;;  %v20796_v54 = vld [vmem:[#allocation2 + $0x158] ss:$12 sps:$4 sm:$0xff]  }
 0x187   : > { %v22919_v45 = vadd.f32 %v3333_v2, %v26613_v40  ;;  %v3325_v43 = vadd.f32 %v22737_v41, %v3324_v58  ;;  %v26618_v0 = vld [vmem:[#allocation25_spill] sm:$0xff]  ;;  %v20793_v40 = vld [vmem:[#allocation2 + $0x140] ss:$12 sps:$4 sm:$0xff]  }
 0x188   : > { %v18300_v10 = vpop.f32.mrf.mxu1  ;;  %v19640_v15 = vpop.f32.mrf.mxu0 }
 0x189   : > { %v22923_v44 = vadd.f32 %v3325_v43, %v26614_v29  ;;  %v3336_v32 = vadd.f32 %v19640_v15, %v22766_v62  ;;  %v26616_v62 = vld [vmem:[#allocation24_spill] sm:$0xff] }
 0x18a   : > { %v18301_v9 = vpop.f32.mrf.mxu1  ;;  %v3327_v17 = vpop.f32.mrf.mxu0 }
 0x18b   : > { %v22928_v49 = vadd.f32 %v3336_v32, %v22546_v7  ;;  %v3328_v18 = vadd.f32 %v22744_v16, %v3327_v17  ;;  %v26619_v7 = vcombine.high %v26617_v25, %v26618_v0 }
 0x18c   : > { %v18303_v26 = vpop.f32.mrf.mxu1  ;;  %v19643_v41 = vpop.f32.mrf.mxu0  ;;  %19734 = vmatmul.mubr.msk.bf16.gmra.mxu1 %vm2149_vm0, %v20788_v39  ;;  %v265_v39 = vld [vmem:[%s21484_s26 + $0x18c] sm:$0xff] }
 0x18d   : > { %5104 = vmatmul.mubr.bf16.gmra.mxu0 %v26615_v37  ;;  %v22936_v2 = vadd.f32 %v3328_v18, %v26616_v62  ;;  %v3349_v53 = vadd.f32 %v19643_v41, %v22810_v59  ;;  %19737 = vmatprep.mubr.msk.bf16.mxu1 %vm2149_vm0, %v20791_v8  ;;  %v930_v59 = vshll.u32 %v265_v39, 16  ;;  %v944_v29 = vshrl.u32 %v265_v39, 16  ;;  %v22957_v37 = vld [vmem:[%s21484_s26 + $0x198] sm:$0xff] }
 0x18e   : > { %5111 = vmatprep.mubr.bf16.mxu0 %v26619_v7  ;;  %v18304_v16 = vpop.f32.mrf.mxu1  ;;  %v3340_v58 = vpop.f32.mrf.mxu0  ;;  %v926_v18 = vrot.slane %v924_v5, 4  ;;  %v950_v7 = vshll.u32 %v22957_v37, 16 }
 0x18f   : > { %v22944_v43 = vadd.f32 %v3349_v53, %v22635_v22  ;;  %v3341_v1 = vadd.f32 %v22782_v11, %v3340_v58  ;;  %v932_v26 = vrot.slane %v930_v59, 5  ;;  %v946_v22 = vrot.slane %v944_v29, 4  ;;  %v20797_v58 = vld [vmem:[#allocation2 + $0x170] ss:$12 sps:$4 sm:$0xff]  }
 0x190   : > { %v18306_v10 = vpop.f32.mrf.mxu1  ;;  %v19644_v15 = vpop.f32.mrf.mxu0  ;;  %v26621_v16 = vcombine.high %v22580_v30, %v22614_v14 }
 0x191   : > { %v22949_v32 = vadd.f32 %v3341_v1, %v22575_v21  ;;  %v3352_v8 = vadd.f32 %v19644_v15, %v22826_v61  ;;  %v26620_v21 = vcombine.low %v26617_v25, %v26618_v0  ;;  %v927_v61 = vor.u32 %v926_v18, %v22670_v50  ;;  %v20802_v10 = vld [vmem:[#allocation2 + $0x1c] ss:$12 sps:$4 sm:$0xff]  }
 0x192   : > { %v18307_v9 = vpop.f32.mrf.mxu1  ;;  %v3343_v17 = vpop.f32.mrf.mxu0  ;;  %v947_v5 = vor.u32 %v946_v22, %v932_v26  ;;  %v22973_v50 = vrot.slane %v950_v7, 5 }
 0x193   : > { %v22953_v41 = vadd.f32 %v3352_v8, %v22659_v27  ;;  %v3344_v11 = vadd.f32 %v22790_v52, %v3343_v17 }
 0x194   : > { %v18309_v62 = vpop.f32.mrf.mxu1  ;;  %v19647_v53 = vpop.f32.mrf.mxu0  ;;  %19738 = vmatmul.mubr.msk.bf16.gmra.mxu1 %vm2149_vm0, %v20793_v40  ;;  %v928_v40 = vrot.slane %v927_v61, 4  ;;  %v948_v1 = vrot.slane %v947_v5, 4  ;;  %v20808_v5 = vld [vmem:[#allocation2 + $0x20] ss:$12 sps:$4 sm:$0xff]  }
 0x195   : > { %5112 = vmatmul.mubr.bf16.gmra.mxu0 %v26620_v21  ;;  %v22966_v27 = vadd.f32 %v3344_v11, %v22606_v20  ;;  %v3365_v52 = vadd.f32 %v19647_v53, %v22892_v33  ;;  %19741 = vmatprep.mubr.msk.bf16.mxu1 %vm2149_vm0, %v20796_v54  ;;  %v26622_v62 = vcombine.low %v22580_v30, %v22614_v14  ;;  %v23004_v21 = vld [vmem:[#allocation2 + $0x34] ss:$12 sps:$4 sm:$0xff]  }
 0x196   : > { %5119 = vmatprep.mubr.bf16.mxu0 %v26621_v16  ;;  %v18310_v25 = vpop.f32.mrf.mxu1  ;;  %v3356_v0 = vpop.f32.mrf.mxu0  ;;  %v933_v59 = vsel %vm21814_vm3, %v928_v40, %v932_v26  ;;  %v953_v54 = vsel %vm21814_vm3, %v948_v1, %v22973_v50  ;;  %v20815_v30 = vld [vmem:[%s26497_s1 + $0x570] sm:$0xff]   ;;  %v20837_v16 = vld [vmem:[%s26497_s1 + $0x568] sm:$0xff]   ;;  %v20809_v40 = vld [vmem:[#allocation2 + $0x38] ss:$12 sps:$4 sm:$0xff]  }
 0x197   : > { %v22976_v39 = vadd.f32 %v3365_v52, %v22707_v63  ;;  %v3357_v20 = vadd.f32 %v22850_v34, %v3356_v0  ;;  %v22988_v9 = vcombine.high %v933_v59, %v953_v54  ;;  %v22990_v34 = vcombine.low %v933_v59, %v953_v54 }
 0x198   : > { %v18312_v33 = vpop.f32.mrf.mxu1  ;;  %v19648_v15 = vpop.f32.mrf.mxu0 }
 0x199   : > { %v22985_v29 = vadd.f32 %v3357_v20, %v22681_v51  ;;  %v3368_v8 = vadd.f32 %v19648_v15, %v22902_v36  ;;  %v23018_v20 = vld [vmem:[#allocation2 + $0x4c] ss:$12 sps:$4 sm:$0xff]  }
 0x19a   : > { %v18313_v63 = vpop.f32.mrf.mxu1  ;;  %v3359_v17 = vpop.f32.mrf.mxu0 }
 0x19b   : > { %v22993_v18 = vadd.f32 %v3368_v8, %v22716_v56  ;;  %v3360_v26 = vadd.f32 %v22866_v13, %v3359_v17  ;;  %v20800_v56 = vld [vmem:[#allocation2 + $0x18] ss:$12 sps:$4 sm:$0xff]  }
 0x19c   : > { %v18315_v22 = vpop.f32.mrf.mxu1  ;;  %v19651_v11 = vpop.f32.mrf.mxu0  ;;  %19742 = vmatmul.mubr.msk.bf16.gmra.mxu1 %vm2149_vm0, %v20797_v58  ;;  %v23015_v58 = vld [vmem:[#allocation2 + $0x30] ss:$12 sps:$4 sm:$0xff]   ;;  %v20828_v8 = vld [vmem:[%s26497_s1 + $0x540] sm:$0xff]  }
 0x19d   : > { %5120 = vmatmul.mubr.bf16.gmra.mxu0 %v26622_v62  ;;  %v23001_v51 = vadd.f32 %v3360_v26, %v22694_v55  ;;  %5954 = vmatprep.mubr.bf16.mxu1 %v20802_v10  ;;  %v20813_v10 = vld [vmem:[#allocation2 + $0x50] ss:$12 sps:$4 sm:$0xff]   ;;  %v20860_v17 = vld [vmem:[%s26497_s1 + $0x560] sm:$0xff]  }
 0x19e   : > { %5127 = vmatprep.mubr.bf16.mxu0 %v22701_v35  ;;  %v18316_v36 = vpop.f32.mrf.mxu1  ;;  %v3372_v53 = vpop.f32.mrf.mxu0  ;;  %v20829_v11 = vld [vmem:[%s26497_s1 + $0x500] sm:$0xff]  }
 0x19f   : > { %v23036_v53 = vld [vmem:[#allocation2 + $0x48] ss:$12 sps:$4 sm:$0xff]  }
 0x1a0   : > { %v18318_v13 = vpop.f32.mrf.mxu1  ;;  %v19652_v61 = vpop.f32.mrf.mxu0 }
 0x1a2   : > { %v18319_v7 = vpop.f32.mrf.mxu1  ;;  %v3375_v52 = vpop.f32.mrf.mxu0 }
 0x1a3   : > { %v20819_v7 = vld [vmem:[#allocation2 + $0x80] ss:$12 sps:$4 sm:$0xff]   ;;  %v20835_v52 = vld [vmem:[%s26497_s1 + $0x538] sm:$0xff]  }
 0x1a4   : > { %v19655_v14 = vpop.f32.mrf.mxu0  ;;  %v18359_v55 = vpop.f32.mrf.mxu1  ;;  %5955 = vmatmul.mubr.bf16.vlgmr.msra.gmra.mxu1 %v20800_v56  ;;  %v20814_v56 = vld [vmem:[#allocation2 + $0x68] ss:$12 sps:$4 sm:$0xff]  }
 0x1a5   : > { %5128 = vmatmul.mubr.bf16.gmra.mxu0 %v22699_v60  ;;  %19790 = vmatpush3.bf16.msra.mxu1 %v22887_v6  ;;  %v20822_v6 = vld [vmem:[%s26497_s1 + $0x508] sm:$0xff]  }
 0x1a6   : > { %5962 = vmatprep.mubr.bf16.mxu1 %v23004_v21  ;;  %v3388_v25 = vpop.f32.mrf.mxu0  ;;  %v18360_v0 = vpop.f32.mrf.mxu1  ;;  %19757 = vmatprep.mubr.msk.bf16.mxu0 %vm2149_vm0, %v20808_v5  ;;  %v23038_v5 = vld [vmem:[#allocation2 + $0x64] ss:$12 sps:$4 sm:$0xff]  }
 0x1a7   : > { %19791 = vmatprep.subr.bf16.mxu1 %v20815_v30  ;;  %v18361_v1 = vadd.f32 %v18360_v0, %v18359_v55 }
 0x1a8   : > { %v19656_v33 = vpop.f32.mrf.mxu0  ;;  %v18362_v15 = vpop.f32.mrf.mxu1 }
 0x1a9   : > { %19792 = vmatpush3.bf16.msra.mxu1 %v20815_v30  ;;  %v20870_v30 = vld [vmem:[%s26497_s1 + $0x558] sm:$0xff]   ;;  %v20881_v33 = vld [vmem:[%s26497_s1 + $0x550] sm:$0xff]  }
 0x1aa   : > { %v3391_v59 = vpop.f32.mrf.mxu0  ;;  %v18363_v54 = vpop.f32.mrf.mxu1  ;;  %19793 = vmatprep.subr.bf16.mxu1 %v20837_v16 }
 0x1ab   : > { %v18364_v63 = vadd.f32 %v18363_v54, %v18362_v15 }
 0x1ac   : > { %v18365_v26 = vpop.f32.mrf.mxu1  ;;  %v19671_v22 = vpop.f32.mrf.mxu0  ;;  %5963 = vmatmul.mubr.bf16.gmra.mxu1 %v23015_v58 }
 0x1ad   : > { %19758 = vmatmul.mubr.msk.bf16.vlgmr.msra.gmra.mxu0 %vm2149_vm0, %v20809_v40  ;;  %5970 = vmatprep.mubr.bf16.mxu1 %v23018_v20  ;;  %v20843_v40 = vld [vmem:[%s26497_s1 + $0x530] sm:$0xff]  }
 0x1ae   : > { %19761 = vmatprep.mubr.msk.bf16.mxu0 %vm2149_vm0, %v20813_v10  ;;  %v18366_v62 = vpop.f32.mrf.mxu1  ;;  %v4223_v36 = vpop.f32.mrf.mxu0  ;;  %18746 = vmatpush3.bf16.msra.mxu0 %v20822_v6 }
 0x1af   : > { %19794 = vmatpush3.bf16.msra.mxu1 %v20837_v16  ;;  %v18367_v13 = vadd.f32 %v18366_v62, %v18365_v26  ;;  %v4224_v61 = vadd.f32 %v18361_v1, %v4223_v36  ;;  %18747 = vmatprep.subr.bf16.mxu0 %v20828_v8  ;;  %v20836_v16 = vld [vmem:[%s26497_s1 + $0x4f8] sm:$0xff]   ;;  %v20844_v8 = vld [vmem:[%s26497_s1 + $0x4f0] sm:$0xff]  }
 0x1b0   : > { %19795 = vmatprep.subr.bf16.mxu1 %v20860_v17  ;;  %v18368_v14 = vpop.f32.mrf.mxu1  ;;  %v19672_v55 = vpop.f32.mrf.mxu0  ;;  %v23073_v36 = vld [vmem:[#allocation2 + $0x7c] ss:$12 sps:$4 sm:$0xff]  }
 0x1b1   : > { %v4232_v25 = vadd.f32 %v19671_v22, %v18367_v13  ;;  %v23050_v0 = vadd.f32 %v4224_v61, %v22817_v46  ;;  %v23071_v22 = vld [vmem:[#allocation2 + $0x60] ss:$12 sps:$4 sm:$0xff]   ;;  %v20885_v13 = vld [vmem:[%s26497_s1 + $0x1d8] sm:$0xff]  }
 0x1b2   : > { %v18369_v1 = vpop.f32.mrf.mxu1  ;;  %v4226_v10 = vpop.f32.mrf.mxu0  ;;  %18748 = vmatpush3.bf16.msra.mxu0 %v20829_v11  ;;  %v20820_v11 = vld [vmem:[#allocation2 + $0x98] ss:$12 sps:$4 sm:$0xff]  }
 0x1b3   : > { %19796 = vmatpush3.bf16.msra.mxu1 %v20860_v17  ;;  %v18370_v15 = vadd.f32 %v18369_v1, %v18368_v14  ;;  %v4227_v6 = vadd.f32 %v18364_v63, %v4226_v10  ;;  %18749 = vmatprep.subr.bf16.mxu0 %v20835_v52  ;;  %v23059_v59 = vadd.f32 %v4232_v25, %v22808_v38  ;;  %v20851_v14 = vld [vmem:[%s26497_s1 + $0x4e8] sm:$0xff]   ;;  %v20852_v25 = vld [vmem:[%s26497_s1 + $0x520] sm:$0xff]  }
 0x1b4   : > { %19797 = vmatprep.subr.bf16.mxu1 %v20870_v30  ;;  %v18371_v46 = vpop.f32.mrf.mxu1  ;;  %v19675_v54 = vpop.f32.mrf.mxu0  ;;  %5971 = vmatmul.mubr.bf16.gmra.mxu1 %v23036_v53 }
 0x1b5   : > { %19762 = vmatmul.mubr.msk.bf16.gmra.mxu0 %vm2149_vm0, %v20814_v56  ;;  %v4235_v17 = vadd.f32 %v19672_v55, %v18370_v15  ;;  %v23067_v26 = vadd.f32 %v4227_v6, %v22837_v57  ;;  %5978 = vmatprep.mubr.bf16.mxu1 %v23038_v5  ;;  %v20826_v56 = vld [vmem:[#allocation2 + $0xb0] ss:$12 sps:$4 sm:$0xff]   ;;  %v20850_v57 = vld [vmem:[%s26497_s1 + $0x528] sm:$0xff]   ;;  %v20853_v15 = vld [vmem:[%s26497_s1 + $0x4e0] sm:$0xff]  }
 0x1b6   : > { %19765 = vmatprep.mubr.msk.bf16.mxu0 %vm2149_vm0, %v20819_v7  ;;  %v18372_v38 = vpop.f32.mrf.mxu1  ;;  %v4239_v63 = vpop.f32.mrf.mxu0  ;;  %18750 = vmatpush3.bf16.msra.mxu0 %v20836_v16 }
 0x1b7   : > { %26623 = vst [vmem:[#allocation7_spill] sm:$0xff] %v23067_v26  ;;  %19798 = vmatpush3.bf16.msra.mxu1 %v20870_v30  ;;  %v18373_v62 = vadd.f32 %v18372_v38, %v18371_v46  ;;  %18751 = vmatprep.subr.bf16.mxu0 %v20843_v40  ;;  %v23082_v61 = vadd.f32 %v4235_v17, %v22824_v4  ;;  %v20823_v46 = vld [vmem:[#allocation2 + $0x78] ss:$12 sps:$4 sm:$0xff]   ;;  %v20848_v26 = vld [vmem:[#allocation2 + $0x140] ss:$12 sps:$4 sm:$0xff]  }
 0x1b8   : > { %19799 = vmatprep.subr.bf16.mxu1 %v20881_v33  ;;  %v18374_v7 = vpop.f32.mrf.mxu1  ;;  %v19676_v52 = vpop.f32.mrf.mxu0 }
 0x1b9   : > { %26624 = vst [vmem:[#allocation8_spill] sm:$0xff] %v23082_v61  ;;  %v4240_v30 = vadd.f32 %v18373_v62, %v4239_v63  ;;  %v20832_v63 = vld [vmem:[#allocation2 + $0x94] ss:$12 sps:$4 sm:$0xff]   ;;  %v20859_v62 = vld [vmem:[%s26497_s1 + $0x518] sm:$0xff]  }
 0x1ba   : > { %v18375_v55 = vpop.f32.mrf.mxu1  ;;  %v4242_v16 = vpop.f32.mrf.mxu0  ;;  %18752 = vmatpush3.bf16.msra.mxu0 %v20844_v8  ;;  %v20827_v8 = vld [vmem:[#allocation2 + $0xc8] ss:$12 sps:$4 sm:$0xff]  }
 0x1bb   : > { %19800 = vmatpush3.bf16.msra.mxu1 %v20881_v33  ;;  %v23091_v40 = vadd.f32 %v4240_v30, %v22857_v23  ;;  %v18376_v4 = vadd.f32 %v18375_v55, %v18374_v7  ;;  %18753 = vmatprep.subr.bf16.mxu0 %v20850_v57  ;;  %v20861_v7 = vld [vmem:[%s26497_s1 + $0x4d8] sm:$0xff]  }
 0x1bc   : > { %18879 = vmatprep.subr.bf16.mxu1 %v20885_v13  ;;  %v18377_v1 = vpop.f32.mrf.mxu1  ;;  %v23093_v10 = vpop.f32.mrf.mxu0  ;;  %5979 = vmatmul.mubr.bf16.gmra.mxu1 %v23071_v22 }
 0x1bd   : > { %26625 = vst [vmem:[#allocation10_spill] sm:$0xff] %v23091_v40  ;;  %19766 = vmatmul.mubr.msk.bf16.gmra.mxu0 %vm2149_vm0, %v20820_v11  ;;  %v4243_v6 = vadd.f32 %v18376_v4, %v4242_v16  ;;  %5986 = vmatprep.mubr.bf16.mxu1 %v23073_v36  ;;  %v20833_v11 = vld [vmem:[#allocation2 + $0xe0] ss:$12 sps:$4 sm:$0xff]  }
 0x1be   : > { %19769 = vmatprep.mubr.msk.bf16.mxu0 %vm2149_vm0, %v20826_v56  ;;  %v18378_v23 = vpop.f32.mrf.mxu1  ;;  %v4255_v33 = vpop.f32.mrf.mxu0  ;;  %18754 = vmatpush3.bf16.msra.mxu0 %v20851_v14 }
 0x1bf   : > { %v23103_v17 = vadd.f32 %v4243_v6, %v22874_v24  ;;  %v18379_v38 = vadd.f32 %v18378_v23, %v18377_v1  ;;  %18755 = vmatprep.subr.bf16.mxu0 %v20852_v25  ;;  %v20862_v24 = vld [vmem:[%s26497_s1 + $0x510] sm:$0xff]   ;;  %v20834_v23 = vld [vmem:[#allocation2 + $0xf8] ss:$12 sps:$4 sm:$0xff]  }
 0x1c0   : > { %v18380_v57 = vpop.f32.mrf.mxu1  ;;  %v23108_v13 = vpop.f32.mrf.mxu0 }
 0x1c1   : > { %26626 = vst [vmem:[#allocation6_spill] sm:$0xff] %v23103_v17  ;;  %v4248_v56 = vadd.f32 %v19675_v54, %v18379_v38  ;;  %v20863_v54 = vld [vmem:[%s26497_s1 + $0x4d0] sm:$0xff]  }
 0x1c2   : > { %v18381_v30 = vpop.f32.mrf.mxu1  ;;  %v4258_v14 = vpop.f32.mrf.mxu0  ;;  %18756 = vmatpush3.bf16.msra.mxu0 %v20853_v15 }
 0x1c3   : > { %v18382_v55 = vadd.f32 %v18381_v30, %v18380_v57  ;;  %18757 = vmatprep.subr.bf16.mxu0 %v20859_v62  ;;  %v23117_v16 = vadd.f32 %v4248_v56, %v22848_v19  ;;  %v20830_v19 = vld [vmem:[#allocation2 + $0x90] ss:$12 sps:$4 sm:$0xff]   ;;  %v20840_v62 = vld [vmem:[#allocation2 + $0xac] ss:$12 sps:$4 sm:$0xff]  }
 0x1c4   : > { %v18383_v25 = vpop.f32.mrf.mxu1  ;;  %v23119_v4 = vpop.f32.mrf.mxu0  ;;  %5987 = vmatmul.mubr.bf16.gmra.mxu1 %v20823_v46  ;;  %v21369_v46 = vld [vmem:[%s21484_s26 + $0x1a0] sm:$0xf]  ;;  %v20841_v30 = vld [vmem:[#allocation2 + $0x110] ss:$12 sps:$4 sm:$0xff]  }
 0x1c5   : > { %26627 = vst [vmem:[#allocation11_spill] sm:$0xff] %v23117_v16  ;;  %19770 = vmatmul.mubr.msk.bf16.gmra.mxu0 %vm2149_vm0, %v20827_v8  ;;  %v4251_v1 = vadd.f32 %v19676_v52, %v18382_v55  ;;  %5994 = vmatprep.mubr.bf16.mxu1 %v20832_v63  ;;  %v974_v57 = vshrl.u32 %v21369_v46, 16  ;;  %v23132_v8 = vld [vmem:[%s26497_s1 + $0x208] sm:$0xff]  }
 0x1c6   : > { %19773 = vmatprep.mubr.msk.bf16.mxu0 %vm2149_vm0, %v20833_v11  ;;  %v18384_v15 = vpop.f32.mrf.mxu1  ;;  %v23126_v6 = vpop.f32.mrf.mxu0  ;;  %18758 = vmatpush3.bf16.msra.mxu0 %v20861_v7  ;;  %v270_v55 = vld [vmem:[%s21484_s26 + $0x1ac] sm:$0xf]  ;;  %v20838_v16 = vld [vmem:[#allocation2 + $0xa8] ss:$12 sps:$4 sm:$0xff]  }
 0x1c7   : > { %v18385_v38 = vadd.f32 %v18384_v15, %v18383_v25  ;;  %18759 = vmatprep.subr.bf16.mxu0 %v20862_v24  ;;  %v23135_v52 = vadd.f32 %v4251_v1, %v22864_v48  ;;  %v980_v24 = vshll.u32 %v270_v55, 16  ;;  %v994_v15 = vshrl.u32 %v270_v55, 16 }
 0x1c8   : > { %v18386_v63 = vpop.f32.mrf.mxu1  ;;  %v23137_v11 = vpop.f32.mrf.mxu0 }
 0x1c9   : > { %26628 = vst [vmem:[#allocation9_spill] sm:$0xff] %v23135_v52  ;;  %v4256_v56 = vadd.f32 %v18385_v38, %v4255_v33  ;;  %v976_v33 = vrot.slane %v974_v57, 4  ;;  %v982_v38 = vrot.slane %v980_v24, 5  ;;  %v996_v52 = vrot.slane %v994_v15, 4 }
 0x1ca   : > { %v18387_v7 = vpop.f32.mrf.mxu1  ;;  %v23140_v25 = vpop.f32.mrf.mxu0  ;;  %18760 = vmatpush3.bf16.msra.mxu0 %v20863_v54  ;;  %v272_v54 = vld [vmem:[%s21484_s26 + $0x1b8] sm:$0x1] }
 0x1cb   : > { %v18388_v46 = vadd.f32 %v18387_v7, %v18386_v63  ;;  %19833 = vmatprep.subr.bf16.mxu0 %v23132_v8  ;;  %v23144_v17 = vadd.f32 %v4256_v56, %v22896_v47  ;;  %v977_v47 = vor.u32 %v976_v33, %v22740_v42  ;;  %v997_v56 = vor.u32 %v996_v52, %v982_v38 }
 0x1cc   : > { %v18389_v48 = vpop.f32.mrf.mxu1  ;;  %v23146_v1 = vpop.f32.mrf.mxu0  ;;  %5995 = vmatmul.mubr.bf16.gmra.mxu1 %v20830_v19  ;;  %v1000_v7 = vshll.u32 %v272_v54, 16  ;;  %v20842_v19 = vld [vmem:[#allocation2 + $0x128] ss:$12 sps:$4 sm:$0xff]   ;;  %v20849_v54 = vld [vmem:[#allocation2 + $0x158] ss:$12 sps:$4 sm:$0xff]  }
 0x1cd   : > { %26629 = vst [vmem:[#allocation12_spill] sm:$0xff] %v23144_v17  ;;  %19774 = vmatmul.mubr.msk.bf16.gmra.mxu0 %vm2149_vm0, %v20834_v23  ;;  %v4259_v40 = vadd.f32 %v18388_v46, %v4258_v14  ;;  %6002 = vmatprep.mubr.bf16.mxu1 %v20840_v62  ;;  %v978_v14 = vrot.slane %v977_v47, 4  ;;  %v998_v62 = vrot.slane %v997_v56, 4  ;;  %v20847_v46 = vld [vmem:[#allocation2 + $0xc4] ss:$12 sps:$4 sm:$0xff]   ;;  %v964_v56 = vshrl.u32 %v22957_v37, 16 }
 0x1ce   : > { %19777 = vmatprep.mubr.msk.bf16.mxu0 %vm2149_vm0, %v20841_v30  ;;  %v18390_v63 = vpop.f32.mrf.mxu1  ;;  %v23151_v55 = vpop.f32.mrf.mxu0  ;;  %v1002_v30 = vrot.slane %v1000_v7, 5  ;;  %v20856_v47 = vld [vmem:[#allocation2 + $0xdc] ss:$12 sps:$4 sm:$0xff]   ;;  %v271_v37 = vld [vmem:[%s21484_s26 + $0x1b0] sm:$0x11] }
 0x1cf   : > { %v18391_v17 = vadd.f32 %v18390_v63, %v18389_v48  ;;  %v23155_v23 = vadd.f32 %v4259_v40, %v22911_v28  ;;  %v983_v52 = vsel %vm21814_vm3, %v978_v14, %v982_v38  ;;  %v269_v7 = vld [vmem:[%s21484_s26 + $0x1a4] sm:$0xff] }
 0x1d0   : > { %v18392_v57 = vpop.f32.mrf.mxu1  ;;  %v23157_v24 = vpop.f32.mrf.mxu0  ;;  %v1003_v28 = vsel %vm21814_vm3, %v998_v62, %v1002_v30  ;;  %1146 = vst.msk [vmem:[#allocation2 + $0x1a0] sm:$0xf] %vm1077_vm4, %v983_v52  ;;  %v20857_v62 = vld [vmem:[#allocation2 + $0x170] ss:$12 sps:$4 sm:$0xff]  }
 0x1d1   : > { %26630 = vst [vmem:[#allocation14_spill] sm:$0xff] %v23155_v23  ;;  %v4264_v15 = vadd.f32 %v23093_v10, %v18391_v17  ;;  %1148 = vst.msk [vmem:[#allocation2 + $0x1ac] sm:$0xf] %vm1077_vm4, %v1003_v28 }
 0x1d2   : > { %v18393_v61 = vpop.f32.mrf.mxu1  ;;  %v23160_v42 = vpop.f32.mrf.mxu0 }
 0x1d3   : > { %v18394_v40 = vadd.f32 %v18393_v61, %v18392_v57  ;;  %v23167_v48 = vadd.f32 %v4264_v15, %v22890_v31  ;;  %v20845_v31 = vld [vmem:[#allocation2 + $0xc0] ss:$12 sps:$4 sm:$0xff]   ;;  %v970_v57 = vshll.u32 %v269_v7, 16 }
 0x1d4   : > { %v18395_v10 = vpop.f32.mrf.mxu1  ;;  %v23171_v17 = vpop.f32.mrf.mxu0  ;;  %6003 = vmatmul.mubr.bf16.gmra.mxu1 %v20838_v16 }
 0x1d5   : > { %26631 = vst [vmem:[#allocation16_spill] sm:$0xff] %v23167_v48  ;;  %19778 = vmatmul.mubr.msk.bf16.gmra.mxu0 %vm2149_vm0, %v20842_v19  ;;  %v4267_v33 = vadd.f32 %v23108_v13, %v18394_v40  ;;  %6010 = vmatprep.mubr.bf16.mxu1 %v20847_v46  ;;  %v972_v28 = vrot.slane %v970_v57, 5  ;;  %v1151_v40 = vld [vmem:[%s21484_s26 + $0xc] sm:$0xff]  ;;  %v1152_v57 = vld [vmem:[%s21484_s26 + $0x14] sm:$0xf] }
 0x1d6   : > { %19781 = vmatprep.mubr.msk.bf16.mxu0 %vm2149_vm0, %v20848_v26  ;;  %v18396_v61 = vpop.f32.mrf.mxu1  ;;  %v23176_v38 = vpop.f32.mrf.mxu0  ;;  %v984_v26 = vshrl.u32 %v269_v7, 16 }
 0x1d7   : > { %v18397_v63 = vadd.f32 %v18396_v61, %v18395_v10  ;;  %v23180_v16 = vadd.f32 %v4267_v33, %v22900_v12  ;;  %v966_v12 = vrot.slane %v964_v56, 4  ;;  %v990_v61 = vshll.u32 %v271_v37, 16  ;;  %v1149_v56 = vld [vmem:[%s21484_s26] sm:$0xee] }
 0x1d8   : > { %v18398_v19 = vpop.f32.mrf.mxu1  ;;  %v23183_v13 = vpop.f32.mrf.mxu0 }
 0x1d9   : > { %26632 = vst [vmem:[#allocation13_spill] sm:$0xff] %v23180_v16  ;;  %v4272_v14 = vadd.f32 %v18397_v63, %v23126_v6  ;;  %v986_v6 = vrot.slane %v984_v26, 4  ;;  %v1302_v63 = vrot.slane %v1151_v40, 5  ;;  %v992_v37 = vrot.slane %v990_v61, 5  ;;  %v1150_v40 = vld [vmem:[%s21484_s26 + $0x8] sm:$0xe] }
 0x1da   : > { %v18399_v30 = vpop.f32.mrf.mxu1  ;;  %v23186_v15 = vpop.f32.mrf.mxu0  ;;  %v16270_v48 = vrot.slane %v1150_v40, 9 }
 0x1db   : > { %v18400_v46 = vadd.f32 %v18399_v30, %v18398_v19  ;;  %v23189_v52 = vadd.f32 %v4272_v14, %v22923_v44  ;;  %v967_v44 = vor.u32 %v966_v12, %v22973_v50  ;;  %v1153_v19 = vld [vmem:[%s21484_s26 + $0x18] sm:$0xff]  ;;  %v987_v26 = vor.u32 %v986_v6, %v972_v28  ;;  %v1154_v12 = vld [vmem:[%s21484_s26 + $0x20] sm:$0xf] }
 0x1dc   : > { %v18401_v10 = vpop.f32.mrf.mxu1  ;;  %v19695_v33 = vpop.f32.mrf.mxu0  ;;  %6011 = vmatmul.mubr.bf16.gmra.mxu1 %v20845_v31  ;;  %v20854_v30 = vld [vmem:[#allocation2 + $0xd8] ss:$12 sps:$4 sm:$0xff]   ;;  %v26634_v50 = vmov 0  ;;  %v20866_v6 = vld [vmem:[#allocation2 + $0xf4] ss:$12 sps:$4 sm:$0xff]   ;;  %v1308_v23 = vrot.slane %v1302_v63, 4 }
 0x1dd   : > { %26633 = vst [vmem:[#allocation18_spill] sm:$0xff] %v23189_v52  ;;  %19782 = vmatmul.mubr.msk.bf16.gmra.mxu0 %vm2149_vm0, %v20849_v54  ;;  %v4275_v7 = vadd.f32 %v18400_v46, %v23140_v25  ;;  %6018 = vmatprep.mubr.bf16.mxu1 %v20856_v47  ;;  %v20858_v54 = vld [vmem:[#allocation2 + $0x188] ss:$12 sps:$4 sm:$0xff]   ;;  %v26635_v50 = vsel %vm23204_vm7, 4294967295, %v26634_v50  ;;  %v16269_v46 = vrot.slane %v1149_v56, 9  ;;  %v988_v61 = vrot.slane %v987_v26, 4 }
 0x1de   : > { %19785 = vmatprep.mubr.msk.bf16.mxu0 %vm2149_vm0, %v20857_v62  ;;  %v18402_v14 = vpop.f32.mrf.mxu1  ;;  %v4319_v31 = vpop.f32.mrf.mxu0  ;;  %v968_v62 = vrot.slane %v967_v44, 4  ;;  %26636 = vst [vmem:[#allocation15_spill] sm:$0xff] %v26635_v50  ;;  %v1156_v33 = vld [vmem:[%s21484_s26 + $0x2c] sm:$0xf]  ;;  %v1309_v16 = vrot.slane %v1153_v19, 5  ;;  %v1306_v44 = vrot.slane %v1152_v57, 5 }
 0x1df   : > { %v18403_v25 = vadd.f32 %v18402_v14, %v18401_v10  ;;  %v23202_v47 = vadd.f32 %v4275_v7, %v22936_v2  ;;  %v23217_v7 = vsel %vm23204_vm7, %v16269_v46, %v1302_v63  ;;  %v1158_v56 = vld [vmem:[%s21484_s26 + $0x38] sm:$0xf]  ;;  %v23222_v26 = vsel %vm21814_vm3, %v988_v61, %v992_v37 }
 0x1e0   : > { %v18404_v31 = vpop.f32.mrf.mxu1  ;;  %v19696_v52 = vpop.f32.mrf.mxu0  ;;  %v23213_v10 = vsel %vm21814_vm3, %v968_v62, %v972_v28  ;;  %v23226_v19 = vsel %vm23204_vm7, %v1308_v23, %v1309_v16  ;;  %v1318_v40 = vrot.slane %v1156_v33, 5  ;;  %v1315_v46 = vrot.slane %v1155_v3, 5  ;;  %v20864_v3 = vld [vmem:[#allocation2 + $0xf0] ss:$12 sps:$4 sm:$0xff]   ;;  %v20869_v23 = vld [vmem:[#allocation2 + $0x10c] ss:$12 sps:$4 sm:$0xff]  }
 0x1e1   : > { %v4280_v2 = vadd.f32 %v23119_v4, %v18403_v25  ;;  %v1312_v4 = vrot.slane %v1154_v12, 5  ;;  %v1307_v12 = vsel %vm23204_vm7, %v16270_v48, %v1306_v44  ;;  %v1314_v48 = vrot.slane %v1309_v16, 4 }
 0x1e2   : > { %v18405_v14 = vpop.f32.mrf.mxu1  ;;  %v4322_v52 = vpop.f32.mrf.mxu0  ;;  %v1323_v61 = vrot.slane %v1318_v40, 4  ;;  %1592 = vst.msk [vmem:[#allocation2 + $0x1b8] sm:$0xf] %vm1077_vm4, %v1307_v12 }
 0x1e3   : > { %v18406_v28 = vadd.f32 %v18405_v14, %v18404_v31  ;;  %v23229_v25 = vadd.f32 %v4280_v2, %v22919_v45  ;;  %v23246_v31 = vld [vmem:[%s21484_s26 + $0x30] sm:$0xff]  ;;  %v1160_v2 = vld [vmem:[%s21484_s26 + $0x44] sm:$0xf]  ;;  %v1164_v45 = vld [vmem:[%s21484_s26 + $0x5c] sm:$0xf] }
 0x1e4   : > { %v18407_v37 = vpop.f32.mrf.mxu1  ;;  %v19699_v62 = vpop.f32.mrf.mxu0  ;;  %6019 = vmatmul.mubr.bf16.gmra.mxu1 %v20854_v30  ;;  %v1311_v30 = vrot.slane %v1306_v44, 4 }
 0x1e5   : > { %19786 = vmatmul.mubr.msk.bf16.gmra.mxu0 %vm2149_vm0, %v20858_v54  ;;  %v4283_v33 = vadd.f32 %v23137_v11, %v18406_v28  ;;  %6026 = vmatprep.mubr.bf16.mxu1 %v20866_v6  ;;  %v1317_v54 = vrot.slane %v1312_v4, 4  ;;  %v1320_v62 = vrot.slane %v1315_v46, 4  ;;  %v1321_v11 = vrot.slane %v23246_v31, 5  ;;  %v1162_v28 = vld [vmem:[%s21484_s26 + $0x50] sm:$0xf] }
 0x1e6   : > { %6901 = vmatprep.mubr.bf16.mxu0 %v23004_v21  ;;  %v18408_v14 = vpop.f32.mrf.mxu1  ;;  %v4335_v52 = vpop.f32.mrf.mxu0  ;;  %v1324_v6 = vrot.slane %v1158_v56, 5  ;;  %v1313_v63 = vsel %vm23204_vm7, %v1311_v30, %v1312_v4  ;;  %v23265_v56 = vsel %vm23204_vm7, %v1314_v48, %v1315_v46  ;;  %v1330_v46 = vrot.slane %v1160_v2, 5 }
 0x1e7   : > { %v18409_v21 = vadd.f32 %v18408_v14, %v18407_v37  ;;  %v23253_v44 = vadd.f32 %v4283_v33, %v22928_v49  ;;  %v1319_v12 = vsel %vm23204_vm7, %v1317_v54, %v1318_v40  ;;  %v23261_v52 = vld [vmem:[%s21484_s26 + $0x68] sm:$0xf]  ;;  %v23269_v37 = vsel %vm23204_vm7, %v1320_v62, %v1321_v11  ;;  %1594 = vst.msk [vmem:[#allocation2 + $0x1c4] sm:$0xf] %vm1077_vm4, %v1313_v63  ;;  %v1159_v62 = vld [vmem:[%s21484_s26 + $0x3c] sm:$0xff] }
 0x1e8   : > { %v18410_v16 = vpop.f32.mrf.mxu1  ;;  %v19700_v57 = vpop.f32.mrf.mxu0  ;;  %1596 = vst.msk [vmem:[#allocation2 + $0x1d0] sm:$0xf] %vm1077_vm4, %v1319_v12  ;;  %v1325_v49 = vsel %vm23204_vm7, %v1323_v61, %v1324_v6  ;;  %v1329_v4 = vrot.slane %v1324_v6, 4  ;;  %1595 = vst [vmem:[#allocation2 + $0x1c8] sm:$0xff] %v23265_v56  ;;  %v1336_v33 = vrot.slane %v1162_v28, 5  ;;  %v1342_v54 = vrot.slane %v1164_v45, 5 }
 0x1e9   : > { %v4288_v40 = vadd.f32 %v18409_v21, %v23151_v55  ;;  %v23279_v57 = vld [vmem:[%s26497_s1 + $0x200] sm:$0xff]   ;;  %1597 = vst [vmem:[#allocation2 + $0x1d4] sm:$0xff] %v23269_v37  ;;  %1598 = vst.msk [vmem:[#allocation2 + $0x1dc] sm:$0xf] %vm1077_vm4, %v1325_v49  ;;  %v1348_v61 = vrot.slane %v23261_v52, 5  ;;  %v1335_v2 = vrot.slane %v1330_v46, 4 }
 0x1ea   : > { %v18411_v31 = vpop.f32.mrf.mxu1  ;;  %v4338_v30 = vpop.f32.mrf.mxu0  ;;  %v1331_v6 = vsel %vm23204_vm7, %v1329_v4, %v1330_v46  ;;  %v1327_v45 = vrot.slane %v1159_v62, 5  ;;  %v1341_v12 = vrot.slane %v1336_v33, 4  ;;  %v1347_v52 = vrot.slane %v1342_v54, 4  ;;  %v1168_v4 = vld [vmem:[%s21484_s26 + $0x74] sm:$0xf] }
 0x1eb   : > { %v18412_v14 = vadd.f32 %v18411_v31, %v18410_v16  ;;  %v23290_v48 = vadd.f32 %v4288_v40, %v22949_v32  ;;  %1600 = vst.msk [vmem:[#allocation2 + $0x1e8] sm:$0xf] %vm1077_vm4, %v1331_v6  ;;  %v23300_v16 = vld [vmem:[%s21484_s26 + $0x48] sm:$0xff]  ;;  %v1337_v49 = vsel %vm23204_vm7, %v1335_v2, %v1336_v33  ;;  %v1326_v31 = vrot.slane %v1321_v11, 4  ;;  %v20887_v33 = vld [vmem:[%s26497_s1 + $0x1f8] sm:$0xff]  }
 0x1ec   : > { %v18413_v28 = vpop.f32.mrf.mxu1  ;;  %v18493_v21 = vpop.f32.mrf.mxu0  ;;  %6027 = vmatmul.mubr.bf16.gmra.mxu1 %v20864_v3  ;;  %v1170_v3 = vld [vmem:[%s21484_s26 + $0x80] sm:$0xf]  ;;  %v20867_v46 = vld [vmem:[#allocation2 + $0x108] ss:$12 sps:$4 sm:$0xff]   ;;  %v1332_v30 = vrot.slane %v1327_v45, 4  ;;  %v1349_v11 = vsel %vm23204_vm7, %v1347_v52, %v1348_v61 }
 0x1ed   : > { %6902 = vmatmul.mubr.bf16.vlgmr.msra.gmra.mxu0 %v23015_v58  ;;  %v4291_v32 = vadd.f32 %v18412_v14, %v23160_v42  ;;  %6034 = vmatprep.mubr.bf16.mxu1 %v20869_v23  ;;  %v1333_v42 = vrot.slane %v23300_v16, 5  ;;  %1602 = vst.msk [vmem:[#allocation2 + $0x1f4] sm:$0xf] %vm1077_vm4, %v1337_v49  ;;  %v1172_v23 = vld [vmem:[%s21484_s26 + $0x8c] sm:$0xf]  ;;  %v1360_v16 = vrot.slane %v1170_v3, 5 }
 0x1ee   : > { %6909 = vmatprep.mubr.bf16.mxu0 %v23018_v20  ;;  %v18414_v40 = vpop.f32.mrf.mxu1  ;;  %v18494_v58 = vpop.f32.mrf.mxu0  ;;  %19834 = vmatpush3.bf16.msra.mxu0 %v23132_v8  ;;  %v1343_v20 = vsel %vm23204_vm7, %v1341_v12, %v1342_v54  ;;  %v20873_v2 = vld [vmem:[#allocation2 + $0x124] ss:$12 sps:$4 sm:$0xff]   ;;  %1606 = vst.msk [vmem:[#allocation2 + $0x20c] sm:$0xf] %vm1077_vm4, %v1349_v11  ;;  %v1354_v12 = vrot.slane %v1168_v4, 5 }
 0x1ef   : > { %v18415_v14 = vadd.f32 %v18414_v40, %v18413_v28  ;;  %v23312_v62 = vadd.f32 %v18494_v58, %v18493_v21  ;;  %19835 = vmatprep.subr.bf16.mxu0 %v23279_v57  ;;  %v23319_v8 = vadd.f32 %v4291_v32, %v22966_v27  ;;  %1604 = vst.msk [vmem:[#allocation2 + $0x200] sm:$0xf] %vm1077_vm4, %v1343_v20  ;;  %v1353_v27 = vrot.slane %v1348_v61, 4  ;;  %v23337_v32 = vld [vmem:[%s26497_s1 + $0x1f0] sm:$0xff]   ;;  %v1174_v49 = vld [vmem:[%s21484_s26 + $0x98] sm:$0xf] }
 0x1f0   : > { %v18416_v54 = vpop.f32.mrf.mxu1  ;;  %v18496_v6 = vpop.f32.mrf.mxu0  ;;  %v23326_v28 = vsel %vm23204_vm7, %v1326_v31, %v1327_v45  ;;  %v23330_v21 = vsel %vm23204_vm7, %v1332_v30, %v1333_v42  ;;  %v1366_v40 = vrot.slane %v1172_v23, 5  ;;  %v1359_v31 = vrot.slane %v1354_v12, 4  ;;  %v1163_v23 = vld [vmem:[%s21484_s26 + $0x54] sm:$0xff]  ;;  %v1167_v45 = vld [vmem:[%s21484_s26 + $0x6c] sm:$0xff]  ;;  %v1212_v63 = vld [vmem:[%s21484_s26 + $0x17c] sm:$0xf] }
 0x1f1   : > { %v4296_v52 = vadd.f32 %v23146_v1, %v18415_v14  ;;  %1599 = vst [vmem:[#allocation2 + $0x1e0] sm:$0xff] %v23326_v28  ;;  %1601 = vst [vmem:[#allocation2 + $0x1ec] sm:$0xff] %v23330_v21  ;;  %v1355_v58 = vsel %vm23204_vm7, %v1353_v27, %v1354_v12  ;;  %v1372_v30 = vrot.slane %v1174_v49, 5  ;;  %v1365_v11 = vrot.slane %v1360_v16, 4  ;;  %v1176_v12 = vld [vmem:[%s21484_s26 + $0xa4] sm:$0xf] }
 0x1f2   : > { %v18417_v61 = vpop.f32.mrf.mxu1  ;;  %v18497_v4 = vpop.f32.mrf.mxu0  ;;  %19836 = vmatpush3.bf16.msra.mxu0 %v23279_v57  ;;  %1608 = vst.msk [vmem:[#allocation2 + $0x218] sm:$0xf] %vm1077_vm4, %v1355_v58  ;;  %v1339_v27 = vrot.slane %v1163_v23, 5 }
 0x1f3   : > { %v18418_v20 = vadd.f32 %v18417_v61, %v18416_v54  ;;  %v23349_v14 = vadd.f32 %v18497_v4, %v18496_v6  ;;  %19837 = vmatprep.subr.bf16.mxu0 %v20887_v33  ;;  %v23352_v3 = vadd.f32 %v4296_v52, %v22944_v43  ;;  %v1361_v54 = vsel %vm23204_vm7, %v1359_v31, %v1360_v16  ;;  %v23363_v43 = vld [vmem:[%s21484_s26 + $0x60] sm:$0xff] }
 0x1f4   : > { %v18419_v57 = vpop.f32.mrf.mxu1  ;;  %6035 = vmatmul.mubr.bf16.gmra.mxu1 %v20867_v46  ;;  %v1371_v6 = vrot.slane %v1366_v40, 4  ;;  %1610 = vst.msk [vmem:[#allocation2 + $0x224] sm:$0xf] %vm1077_vm4, %v1361_v54  ;;  %v1367_v46 = vsel %vm23204_vm7, %v1365_v11, %v1366_v40  ;;  %v1378_v52 = vrot.slane %v1176_v12, 5  ;;  %v20871_v4 = vld [vmem:[#allocation2 + $0x120] ss:$12 sps:$4 sm:$0xff]  }
 0x1f5   : > { %v18499_v1 = vpop.f32.mrf.mxu0  ;;  %6910 = vmatmul.mubr.bf16.gmra.mxu0 %v23036_v53  ;;  %v4299_v49 = vadd.f32 %v23157_v24, %v18418_v20  ;;  %6042 = vmatprep.mubr.bf16.mxu1 %v20873_v2  ;;  %v1338_v16 = vrot.slane %v1333_v42, 4  ;;  %v1344_v58 = vrot.slane %v1339_v27, 4  ;;  %v1345_v24 = vrot.slane %v23363_v43, 5  ;;  %1612 = vst.msk [vmem:[#allocation2 + $0x230] sm:$0xf] %vm1077_vm4, %v1367_v46  ;;  %v20913_v42 = vld [vmem:[%s26497_s1 + $0x1e8] sm:$0xff]  }
 0x1f6   : > { %6917 = vmatprep.mubr.bf16.mxu0 %v23038_v5  ;;  %v18420_v53 = vpop.f32.mrf.mxu1  ;;  %19838 = vmatpush3.bf16.msra.mxu0 %v20887_v33  ;;  %v1373_v5 = vsel %vm23204_vm7, %v1371_v6, %v1372_v30  ;;  %v20877_v40 = vld [vmem:[#allocation2 + $0x13c] ss:$12 sps:$4 sm:$0xff]   ;;  %v1178_v33 = vld [vmem:[%s21484_s26 + $0xb0] sm:$0xf]  ;;  %v1377_v54 = vrot.slane %v1372_v30, 4  ;;  %v1383_v6 = vrot.slane %v1378_v52, 4 }
 0x1f7   : > { %v18500_v61 = vpop.f32.mrf.mxu0  ;;  %v18421_v2 = vadd.f32 %v18420_v53, %v18419_v57  ;;  %19839 = vmatprep.subr.bf16.mxu0 %v23337_v32  ;;  %v23376_v20 = vadd.f32 %v4299_v49, %v22953_v41  ;;  %1614 = vst.msk [vmem:[#allocation2 + $0x23c] sm:$0xf] %vm1077_vm4, %v1373_v5  ;;  %v1340_v57 = vsel %vm23204_vm7, %v1338_v16, %v1339_v27  ;;  %v1180_v12 = vld [vmem:[%s21484_s26 + $0xbc] sm:$0xf]  ;;  %v1182_v41 = vld [vmem:[%s21484_s26 + $0xc8] sm:$0xf] }
 0x1f8   : > { %v23372_v31 = vadd.f32 %v18500_v61, %v18499_v1  ;;  %v18422_v23 = vpop.f32.mrf.mxu1  ;;  %v1346_v1 = vsel %vm23204_vm7, %v1344_v58, %v1345_v24  ;;  %v23393_v43 = vld [vmem:[%s26497_s1 + $0x1e0] sm:$0xff]   ;;  %1603 = vst [vmem:[#allocation2 + $0x1f8] sm:$0xff] %v1340_v57  ;;  %v1384_v27 = vrot.slane %v1178_v33, 5  ;;  %v1390_v53 = vrot.slane %v1180_v12, 5 }
 0x1f9   : > { %v18502_v11 = vpop.f32.mrf.mxu0  ;;  %v4304_v49 = vadd.f32 %v18421_v2, %v23176_v38  ;;  %1605 = vst [vmem:[#allocation2 + $0x204] sm:$0xff] %v1346_v1  ;;  %v23395_v46 = vcombine.high %v1340_v57, %v1346_v1  ;;  %v23398_v30 = vcombine.low %v1340_v57, %v1346_v1  ;;  %v1379_v38 = vsel %vm23204_vm7, %v1377_v54, %v1378_v52  ;;  %v23416_v1 = vld [vmem:[%s21484_s26 + $0x78] sm:$0xff] }
 0x1fa   : > { %v18423_v61 = vpop.f32.mrf.mxu1  ;;  %19840 = vmatpush3.bf16.msra.mxu0 %v23337_v32  ;;  %v1385_v33 = vsel %vm23204_vm7, %v1383_v6, %v1384_v27  ;;  %1616 = vst.msk [vmem:[#allocation2 + $0x248] sm:$0xf] %vm1077_vm4, %v1379_v38  ;;  %v1351_v52 = vrot.slane %v1167_v45, 5  ;;  %v1395_v54 = vrot.slane %v1390_v53, 4  ;;  %v1184_v6 = vld [vmem:[%s21484_s26 + $0xd4] sm:$0xf] }
 0x1fb   : > { %v18503_v16 = vpop.f32.mrf.mxu0  ;;  %v18424_v58 = vadd.f32 %v18423_v61, %v18422_v23  ;;  %v23405_v2 = vadd.f32 %v4304_v49, %v22985_v29  ;;  %19841 = vmatprep.subr.bf16.mxu0 %v20913_v42  ;;  %v1389_v23 = vrot.slane %v1384_v27, 4  ;;  %1618 = vst.msk [vmem:[#allocation2 + $0x254] sm:$0xf] %vm1077_vm4, %v1385_v33  ;;  %v1396_v29 = vrot.slane %v1182_v41, 5 }
 0x1fc   : > { %v23402_v5 = vadd.f32 %v18503_v16, %v18502_v11  ;;  %v18425_v32 = vpop.f32.mrf.mxu1  ;;  %6043 = vmatmul.mubr.bf16.gmra.mxu1 %v20871_v4  ;;  %v20875_v4 = vld [vmem:[#allocation2 + $0x138] ss:$12 sps:$4 sm:$0xff]   ;;  %v1356_v45 = vrot.slane %v1351_v52, 4  ;;  %v1402_v33 = vrot.slane %v1184_v6, 5 }
 0x1fd   : > { %v18505_v57 = vpop.f32.mrf.mxu0  ;;  %6918 = vmatmul.mubr.bf16.gmra.mxu0 %v23071_v22  ;;  %v4307_v11 = vadd.f32 %v18424_v58, %v23186_v15  ;;  %6050 = vmatprep.mubr.bf16.mxu1 %v20877_v40  ;;  %v1350_v22 = vrot.slane %v1345_v24, 4  ;;  %v1391_v27 = vsel %vm23204_vm7, %v1389_v23, %v1390_v53  ;;  %v1357_v24 = vrot.slane %v23416_v1, 5  ;;  %v1186_v53 = vld [vmem:[%s21484_s26 + $0xe0] sm:$0xf] }
 0x1fe   : > { %6925 = vmatprep.mubr.bf16.mxu0 %v23073_v36  ;;  %v18426_v12 = vpop.f32.mrf.mxu1  ;;  %19842 = vmatpush3.bf16.msra.mxu0 %v20913_v42  ;;  %v20880_v36 = vld [vmem:[#allocation2 + $0x154] ss:$12 sps:$4 sm:$0xff]   ;;  %v20930_v42 = vld [vmem:[%s26497_s1 + $0x3e8] sm:$0xff]   ;;  %1620 = vst.msk [vmem:[#allocation2 + $0x260] sm:$0xf] %vm1077_vm4, %v1391_v27  ;;  %v1401_v58 = vrot.slane %v1396_v29, 4 }
 0x1ff   : > { %v18506_v49 = vpop.f32.mrf.mxu0  ;;  %v18427_v41 = vadd.f32 %v18426_v12, %v18425_v32  ;;  %v23424_v40 = vadd.f32 %v4307_v11, %v23001_v51  ;;  %19843 = vmatprep.subr.bf16.mxu0 %v23393_v43  ;;  %v1352_v38 = vsel %vm23204_vm7, %v1350_v22, %v1351_v52  ;;  %v1397_v51 = vsel %vm23204_vm7, %v1395_v54, %v1396_v29  ;;  %v1188_v32 = vld [vmem:[%s21484_s26 + $0xec] sm:$0xf] }
 0x200   : > { %v23421_v15 = vadd.f32 %v18506_v49, %v18505_v57  ;;  %v18428_v61 = vpop.f32.mrf.mxu1  ;;  %v1190_v57 = vld [vmem:[%s21484_s26 + $0xf8] sm:$0xf]  ;;  %v1358_v11 = vsel %vm23204_vm7, %v1356_v45, %v1357_v24  ;;  %1607 = vst [vmem:[#allocation2 + $0x210] sm:$0xff] %v1352_v38  ;;  %1622 = vst.msk [vmem:[#allocation2 + $0x26c] sm:$0xf] %vm1077_vm4, %v1397_v51  ;;  %v1408_v1 = vrot.slane %v1186_v53, 5 }
 0x201   : > { %v18508_v16 = vpop.f32.mrf.mxu0  ;;  %v4312_v23 = vadd.f32 %v23171_v17, %v18427_v41  ;;  %v1414_v12 = vrot.slane %v1188_v32, 5  ;;  %1609 = vst [vmem:[#allocation2 + $0x21c] sm:$0xff] %v1358_v11  ;;  %v23444_v29 = vcombine.low %v1352_v38, %v1358_v11  ;;  %v23446_v54 = vcombine.high %v1352_v38, %v1358_v11  ;;  %v1171_v41 = vld [vmem:[%s21484_s26 + $0x84] sm:$0xff]  ;;  %v21371_v32 = vld [vmem:[#allocation2 + $0x94] ss:$12 sps:$4 sm:$0xff]  }
 0x202   : > { %v18429_v49 = vpop.f32.mrf.mxu1  ;;  %19844 = vmatpush3.bf16.msra.mxu0 %v23393_v43  ;;  %v1403_v17 = vsel %vm23204_vm7, %v1401_v58, %v1402_v33  ;;  %v1407_v6 = vrot.slane %v1402_v33, 4  ;;  %v1413_v53 = vrot.slane %v1408_v1, 4  ;;  %v21370_v51 = vld [vmem:[#allocation2 + $0x78] ss:$12 sps:$4 sm:$0xff]   ;;  %v1363_v58 = vrot.slane %v1171_v41, 5 }
 0x203   : > { %v18509_v52 = vpop.f32.mrf.mxu0  ;;  %26637 = vst [vmem:[#allocation17_spill] sm:$0xff] %v23444_v29  ;;  %v18430_v22 = vadd.f32 %v18429_v49, %v18428_v61  ;;  %v23453_v27 = vadd.f32 %v4312_v23, %v22976_v39  ;;  %19013 = vmatprep.subr.bf16.mxu0 %v20930_v42  ;;  %1624 = vst.msk [vmem:[#allocation2 + $0x278] sm:$0xf] %vm1077_vm4, %v1403_v17  ;;  %v1420_v33 = vrot.slane %v1190_v57, 5  ;;  %v1192_v39 = vld [vmem:[%s21484_s26 + $0x104] sm:$0xf] }
 0x204   : > { %v23450_v45 = vadd.f32 %v18509_v52, %v18508_v16  ;;  %v18431_v43 = vpop.f32.mrf.mxu1  ;;  %6051 = vmatmul.mubr.bf16.gmra.mxu1 %v20875_v4  ;;  %v1409_v61 = vsel %vm23204_vm7, %v1407_v6, %v1408_v1  ;;  %v1419_v16 = vrot.slane %v1414_v12, 4  ;;  %v1173_v23 = vld [vmem:[%s21484_s26 + $0x90] sm:$0xff]  ;;  %v1415_v4 = vsel %vm23204_vm7, %v1413_v53, %v1414_v12  ;;  %v1196_v53 = vld [vmem:[%s21484_s26 + $0x11c] sm:$0xf] }
 0x205   : > { %v18511_v38 = vpop.f32.mrf.mxu0  ;;  %6926 = vmatmul.mubr.bf16.gmra.mxu0 %v21370_v51  ;;  %v4315_v42 = vadd.f32 %v23183_v13, %v18430_v22  ;;  %6058 = vmatprep.mubr.bf16.mxu1 %v20880_v36  ;;  %1626 = vst.msk [vmem:[#allocation2 + $0x284] sm:$0xf] %vm1077_vm4, %v1409_v61  ;;  %v1194_v11 = vld [vmem:[%s21484_s26 + $0x110] sm:$0xf]  ;;  %v1426_v49 = vrot.slane %v1192_v39, 5  ;;  %v1362_v17 = vrot.slane %v1357_v24, 4 }
 0x206   : > { %6933 = vmatprep.mubr.bf16.mxu0 %v21371_v32  ;;  %v18432_v52 = vpop.f32.mrf.mxu1  ;;  %v1368_v57 = vrot.slane %v1363_v58, 4  ;;  %v1369_v6 = vrot.slane %v1173_v23, 5  ;;  %v1421_v13 = vsel %vm23204_vm7, %v1419_v16, %v1420_v33  ;;  %1628 = vst.msk [vmem:[#allocation2 + $0x290] sm:$0xf] %vm1077_vm4, %v1415_v4  ;;  %v1425_v12 = vrot.slane %v1420_v33, 4 }
 0x207   : > { %v18512_v1 = vpop.f32.mrf.mxu0  ;;  %v23472_v22 = vadd.f32 %v4315_v42, %v22993_v18  ;;  %1630 = vst.msk [vmem:[#allocation2 + $0x29c] sm:$0xf] %vm1077_vm4, %v1421_v13  ;;  %v1431_v41 = vrot.slane %v1426_v49, 4  ;;  %v1198_v43 = vld [vmem:[%s21484_s26 + $0x128] sm:$0xf]  ;;  %v1364_v16 = vsel %vm23204_vm7, %v1362_v17, %v1363_v58  ;;  %v1432_v39 = vrot.slane %v1194_v11, 5 }
 0x208   : > { %v23469_v36 = vadd.f32 %v18512_v1, %v18511_v38  ;;  %v18434_v51 = vpop.f32.mrf.mxu1  ;;  %v23477_v61 = vld [vmem:[#allocation2 + $0x150] ss:$12 sps:$4 sm:$0xff]   ;;  %v1370_v38 = vsel %vm23204_vm7, %v1368_v57, %v1369_v6  ;;  %v1438_v18 = vrot.slane %v1196_v53, 5  ;;  %1611 = vst [vmem:[#allocation2 + $0x228] sm:$0xff] %v1364_v16  ;;  %v1427_v33 = vsel %vm23204_vm7, %v1425_v12, %v1426_v49 }
 0x209   : > { %v18514_v24 = vpop.f32.mrf.mxu0  ;;  %1613 = vst [vmem:[#allocation2 + $0x234] sm:$0xff] %v1370_v38  ;;  %v23483_v42 = vcombine.high %v1364_v16, %v1370_v38  ;;  %v1444_v32 = vrot.slane %v1198_v43, 5  ;;  %v23487_v52 = vcombine.low %v1364_v16, %v1370_v38  ;;  %v1433_v58 = vsel %vm23204_vm7, %v1431_v41, %v1432_v39  ;;  %1632 = vst.msk [vmem:[#allocation2 + $0x2a8] sm:$0xf] %vm1077_vm4, %v1427_v33  ;;  %v1175_v57 = vld [vmem:[%s21484_s26 + $0x9c] sm:$0xff] }
 0x20a   : > { %v18435_v23 = vpop.f32.mrf.mxu1  ;;  %v1437_v1 = vrot.slane %v1432_v39, 4  ;;  %v1443_v11 = vrot.slane %v1438_v18, 4  ;;  %1634 = vst.msk [vmem:[#allocation2 + $0x2b4] sm:$0xf] %vm1077_vm4, %v1433_v58  ;;  %v21372_v12 = vld [vmem:[#allocation2 + $0x90] ss:$12 sps:$4 sm:$0xff]  }
 0x20b   : > { %26638 = vst [vmem:[#allocation19_spill] sm:$0xff] %v23483_v42  ;;  %v18515_v4 = vpop.f32.mrf.mxu0  ;;  %26639 = vst [vmem:[#allocation20_spill] sm:$0xff] %v23487_v52  ;;  %v1375_v53 = vrot.slane %v1175_v57, 5  ;;  %v21373_v51 = vld [vmem:[#allocation2 + $0xac] ss:$12 sps:$4 sm:$0xff]   ;;  %v1374_v39 = vrot.slane %v1369_v6, 4 }
 0x20c   : > { %v23492_v17 = vadd.f32 %v18515_v4, %v18514_v24  ;;  %v18437_v13 = vpop.f32.mrf.mxu1  ;;  %6059 = vmatmul.mubr.bf16.gmra.mxu1 %v23477_v61  ;;  %v1439_v41 = vsel %vm23204_vm7, %v1437_v1, %v1438_v18  ;;  %v1445_v43 = vsel %vm23204_vm7, %v1443_v11, %v1444_v32  ;;  %v1177_v24 = vld [vmem:[%s21484_s26 + $0xa8] sm:$0xff]  ;;  %v1200_v4 = vld [vmem:[%s21484_s26 + $0x134] sm:$0xf]  ;;  %v1202_v58 = vld [vmem:[%s21484_s26 + $0x140] sm:$0xf]  ;;  %v1449_v1 = vrot.slane %v1444_v32, 4 }
 0x20d   : > { %v18517_v49 = vpop.f32.mrf.mxu0  ;;  %6934 = vmatmul.mubr.bf16.gmra.mxu0 %v21372_v12  ;;  %6066 = vmatprep.mubr.bf16.mxu1 %v22701_v35  ;;  %1636 = vst.msk [vmem:[#allocation2 + $0x2c0] sm:$0xf] %vm1077_vm4, %v1439_v41  ;;  %1638 = vst.msk [vmem:[#allocation2 + $0x2cc] sm:$0xf] %vm1077_vm4, %v1445_v43  ;;  %v1380_v33 = vrot.slane %v1375_v53, 4  ;;  %v1381_v18 = vrot.slane %v1177_v24, 5  ;;  %v1376_v57 = vsel %vm23204_vm7, %v1374_v39, %v1375_v53 }
 0x20e   : > { %6941 = vmatprep.mubr.bf16.mxu0 %v21373_v51  ;;  %v18438_v16 = vpop.f32.mrf.mxu1  ;;  %v1450_v13 = vrot.slane %v1200_v4, 5  ;;  %v1456_v12 = vrot.slane %v1202_v58, 5  ;;  %v1204_v41 = vld [vmem:[%s21484_s26 + $0x14c] sm:$0xf]  ;;  %v1206_v43 = vld [vmem:[%s21484_s26 + $0x158] sm:$0xf] }
 0x20f   : > { %v18518_v38 = vpop.f32.mrf.mxu0  ;;  %v1382_v6 = vsel %vm23204_vm7, %v1380_v33, %v1381_v18  ;;  %1615 = vst [vmem:[#allocation2 + $0x240] sm:$0xff] %v1376_v57  ;;  %v1468_v51 = vrot.slane %v1206_v43, 5  ;;  %v1179_v58 = vld [vmem:[%s21484_s26 + $0xb4] sm:$0xff] }
 0x210   : > { %v23505_v23 = vadd.f32 %v18518_v38, %v18517_v49  ;;  %v18440_v35 = vpop.f32.mrf.mxu1  ;;  %v1462_v49 = vrot.slane %v1204_v41, 5  ;;  %1617 = vst [vmem:[#allocation2 + $0x24c] sm:$0xff] %v1382_v6  ;;  %v23515_v32 = vcombine.low %v1376_v57, %v1382_v6  ;;  %v23517_v38 = vcombine.high %v1376_v57, %v1382_v6 }
 0x211   : > { %v18520_v11 = vpop.f32.mrf.mxu0  ;;  %v1451_v53 = vsel %vm23204_vm7, %v1449_v1, %v1450_v13  ;;  %v1455_v39 = vrot.slane %v1450_v13, 4  ;;  %v1461_v35 = vrot.slane %v1456_v12, 4  ;;  %v21375_v1 = vld [vmem:[#allocation2 + $0xc4] ss:$12 sps:$4 sm:$0xff]   ;;  %v1387_v13 = vrot.slane %v1179_v58, 5 }
 0x212   : > { %v18441_v24 = vpop.f32.mrf.mxu1  ;;  %26640 = vst [vmem:[#allocation21_spill] sm:$0xff] %v23515_v32  ;;  %26641 = vst [vmem:[#allocation26_spill] sm:$0xff] %v23517_v38  ;;  %v1467_v33 = vrot.slane %v1462_v49, 4  ;;  %v1210_v58 = vld [vmem:[%s21484_s26 + $0x170] sm:$0xf] }
 0x213   : > { %v18521_v16 = vpop.f32.mrf.mxu0  ;;  %1640 = vst.msk [vmem:[#allocation2 + $0x2d8] sm:$0xf] %vm1077_vm4, %v1451_v53  ;;  %v21374_v24 = vld [vmem:[#allocation2 + $0xa8] ss:$12 sps:$4 sm:$0xff]   ;;  %v1457_v57 = vsel %vm23204_vm7, %v1455_v39, %v1456_v12  ;;  %v1463_v6 = vsel %vm23204_vm7, %v1461_v35, %v1462_v49  ;;  %v1386_v12 = vrot.slane %v1381_v18, 4  ;;  %v1392_v49 = vrot.slane %v1387_v13, 4 }
 0x214   : > { %v23521_v4 = vadd.f32 %v18521_v16, %v18520_v11  ;;  %v18443_v41 = vpop.f32.mrf.mxu1  ;;  %6067 = vmatmul.mubr.bf16.gmra.mxu1 %v22699_v60  ;;  %v1181_v11 = vld [vmem:[%s21484_s26 + $0xc0] sm:$0xff]  ;;  %1642 = vst.msk [vmem:[#allocation2 + $0x2e4] sm:$0xf] %vm1077_vm4, %v1457_v57  ;;  %v1469_v60 = vsel %vm23204_vm7, %v1467_v33, %v1468_v51  ;;  %1644 = vst.msk [vmem:[#allocation2 + $0x2f0] sm:$0xf] %vm1077_vm4, %v1463_v6  ;;  %v1473_v35 = vrot.slane %v1468_v51, 4 }
 0x215   : > { %v18523_v43 = vpop.f32.mrf.mxu0  ;;  %6942 = vmatmul.mubr.bf16.gmra.mxu0 %v21374_v24  ;;  %6074 = vmatprep.mubr.bf16.mxu1 %v22988_v9  ;;  %v1208_v16 = vld [vmem:[%s21484_s26 + $0x164] sm:$0xf]  ;;  %v1393_v39 = vrot.slane %v1181_v11, 5  ;;  %1646 = vst.msk [vmem:[#allocation2 + $0x2fc] sm:$0xf] %vm1077_vm4, %v1469_v60  ;;  %v1480_v55 = vrot.slane %v1210_v58, 5  ;;  %v1388_v18 = vsel %vm23204_vm7, %v1386_v12, %v1387_v13 }
 0x216   : > { %6949 = vmatprep.mubr.bf16.mxu0 %v21375_v1  ;;  %v18444_v53 = vpop.f32.mrf.mxu1  ;;  %v1474_v24 = vrot.slane %v1208_v16, 5  ;;  %v20883_v1 = vld [vmem:[#allocation2 + $0x38] ss:$12 sps:$4 sm:$0xff]   ;;  %v23545_v11 = vld [vmem:[%s21484_s26 + $0x188] sm:$0xf]  ;;  %v1486_v6 = vrot.slane %v1212_v63, 5 }
 0x217   : > { %v18524_v41 = vpop.f32.mrf.mxu0  ;;  %26642 = vst [vmem:[#allocation22_spill] sm:$0xff] %v23545_v11  ;;  %v1394_v60 = vsel %vm23204_vm7, %v1392_v49, %v1393_v39  ;;  %1619 = vst [vmem:[#allocation2 + $0x258] sm:$0xff] %v1388_v18  ;;  %v1485_v51 = vrot.slane %v1480_v55, 4  ;;  %v26519_v16 = vrot.slane %v23545_v11, 5  ;;  %v1183_v38 = vld [vmem:[%s21484_s26 + $0xcc] sm:$0xff] }
 0x218   : > { %v23539_v57 = vadd.f32 %v18524_v41, %v18523_v43  ;;  %v18446_v33 = vpop.f32.mrf.mxu1  ;;  %v1479_v53 = vrot.slane %v1474_v24, 4  ;;  %v1475_v43 = vsel %vm23204_vm7, %v1473_v35, %v1474_v24  ;;  %1621 = vst [vmem:[#allocation2 + $0x264] sm:$0xff] %v1394_v60  ;;  %v23554_v13 = vcombine.high %v1388_v18, %v1394_v60 }
 0x219   : > { %v18526_v32 = vpop.f32.mrf.mxu0  ;;  %v23552_v33 = vcombine.low %v1388_v18, %v1394_v60  ;;  %1648 = vst.msk [vmem:[#allocation2 + $0x308] sm:$0xf] %vm1077_vm4, %v1475_v43  ;;  %v1491_v12 = vrot.slane %v1486_v6, 4  ;;  %v1487_v24 = vsel %vm23204_vm7, %v1485_v51, %v1486_v6  ;;  %v21376_v18 = vld [vmem:[#allocation2 + $0xc0] ss:$12 sps:$4 sm:$0xff]   ;;  %v1399_v60 = vrot.slane %v1183_v38, 5 }
 0x21a   : > { %v18447_v41 = vpop.f32.mrf.mxu1  ;;  %26644 = vst [vmem:[#allocation23_spill] sm:$0xff] %v23554_v13  ;;  %v1481_v63 = vsel %vm23204_vm7, %v1479_v53, %v1480_v55  ;;  %1652 = vst.msk [vmem:[#allocation2 + $0x320] sm:$0xf] %vm1077_vm4, %v1487_v24  ;;  %v20884_v43 = vld [vmem:[#allocation2 + $0x50] ss:$12 sps:$4 sm:$0xff]  }
 0x21b   : > { %v18527_v58 = vpop.f32.mrf.mxu0  ;;  %26643 = vst [vmem:[#allocation24_spill] sm:$0xff] %v23552_v33  ;;  %1650 = vst.msk [vmem:[#allocation2 + $0x314] sm:$0xf] %vm1077_vm4, %v1481_v63  ;;  %v1493_v55 = vsel %vm23204_vm7, %v1491_v12, %v26519_v16  ;;  %v1185_v51 = vld [vmem:[%s21484_s26 + $0xd8] sm:$0xff]  ;;  %v1404_v63 = vrot.slane %v1399_v60, 4 }
 0x21c   : > { %v23559_v49 = vadd.f32 %v18527_v58, %v18526_v32  ;;  %v18449_v35 = vpop.f32.mrf.mxu1  ;;  %6075 = vmatmul.mubr.bf16.gmra.mxu1 %v22990_v34  ;;  %v21377_v32 = vld [vmem:[#allocation2 + $0xdc] ss:$12 sps:$4 sm:$0xff]   ;;  %1654 = vst.msk [vmem:[#allocation2 + $0x32c] sm:$0xf] %vm1077_vm4, %v1493_v55  ;;  %v1398_v58 = vrot.slane %v1393_v39, 4  ;;  %v1405_v24 = vrot.slane %v1185_v51, 5 }
 0x21d   : > { %v18529_v41 = vpop.f32.mrf.mxu0  ;;  %6950 = vmatmul.mubr.bf16.gmra.mxu0 %v21376_v18  ;;  %19801 = vmatprep.mubr.msk.bf16.mxu1 %vm2149_vm0, %v20883_v1  ;;  %v20886_v12 = vld [vmem:[%s26497_s1 + $0x198] sm:$0xff]   ;;  %v21379_v13 = vld [vmem:[#allocation2 + $0xf4] ss:$12 sps:$4 sm:$0xff]  }
 0x21e   : > { %6957 = vmatprep.mubr.bf16.mxu0 %v21377_v32  ;;  %v18450_v53 = vpop.f32.mrf.mxu1  ;;  %v1400_v1 = vsel %vm23204_vm7, %v1398_v58, %v1399_v60  ;;  %v1406_v55 = vsel %vm23204_vm7, %v1404_v63, %v1405_v24  ;;  %v1187_v60 = vld [vmem:[%s21484_s26 + $0xe4] sm:$0xff] }
 0x21f   : > { %v18530_v6 = vpop.f32.mrf.mxu0  ;;  %1623 = vst [vmem:[#allocation2 + $0x270] sm:$0xff] %v1400_v1  ;;  %v20888_v53 = vld [vmem:[#allocation2 + $0x68] ss:$12 sps:$4 sm:$0xff]   ;;  %1625 = vst [vmem:[#allocation2 + $0x27c] sm:$0xff] %v1406_v55  ;;  %v23588_v51 = vcombine.high %v1400_v1, %v1406_v55  ;;  %v21378_v63 = vld [vmem:[#allocation2 + $0xd8] ss:$12 sps:$4 sm:$0xff]  }
 0x220   : > { %v23574_v38 = vadd.f32 %v18530_v6, %v18529_v41  ;;  %v18452_v35 = vpop.f32.mrf.mxu1  ;;  %v20890_v41 = vld [vmem:[%s26497_s1 + $0x1d0] sm:$0xff]   ;;  %v23586_v6 = vcombine.low %v1400_v1, %v1406_v55 }
 0x221   : > { %v18532_v18 = vpop.f32.mrf.mxu0  ;;  %26646 = vst [vmem:[#allocation27_spill] sm:$0xff] %v23588_v51  ;;  %v20891_v1 = vld [vmem:[%s26497_s1 + $0x190] sm:$0xff]   ;;  %v20892_v51 = vld [vmem:[#allocation2 + $0x98] ss:$12 sps:$4 sm:$0xff]  }
 0x222   : > { %v18453_v32 = vpop.f32.mrf.mxu1  ;;  %26645 = vst [vmem:[#allocation25_spill] sm:$0xff] %v23586_v6  ;;  %v1189_v55 = vld [vmem:[%s21484_s26 + $0xf0] sm:$0xff]  ;;  %v20889_v6 = vld [vmem:[#allocation2 + $0x80] ss:$12 sps:$4 sm:$0xff]  }
 0x223   : > { %v18533_v39 = vpop.f32.mrf.mxu0  ;;  %v1411_v32 = vrot.slane %v1187_v60, 5  ;;  %v1410_v60 = vrot.slane %v1405_v24, 4 }
 0x224   : > { %v23590_v35 = vadd.f32 %v18533_v39, %v18532_v18  ;;  %v19715_v16 = vpop.f32.mrf.mxu1  ;;  %19802 = vmatmul.mubr.msk.bf16.vlgmr.msra.gmra.mxu1 %vm2149_vm0, %v20884_v43  ;;  %v20894_v43 = vld [vmem:[%s26497_s1 + $0x1c8] sm:$0xff]  }
 0x225   : > { %v18535_v58 = vpop.f32.mrf.mxu0  ;;  %6958 = vmatmul.mubr.bf16.gmra.mxu0 %v21378_v63  ;;  %v5179_v33 = vadd.f32 %v19715_v16, %v23372_v31  ;;  %18880 = vmatpush3.bf16.msra.mxu1 %v20886_v12  ;;  %v1416_v31 = vrot.slane %v1411_v32, 4  ;;  %v1417_v16 = vrot.slane %v1189_v55, 5  ;;  %v20898_v55 = vld [vmem:[%s26497_s1 + $0x1c0] sm:$0xff]  }
 0x226   : > { %6965 = vmatprep.mubr.bf16.mxu0 %v21379_v13  ;;  %v5170_v39 = vpop.f32.mrf.mxu1  ;;  %19805 = vmatprep.mubr.msk.bf16.mxu1 %vm2149_vm0, %v20888_v53  ;;  %v1412_v53 = vsel %vm23204_vm7, %v1410_v60, %v1411_v32 }
 0x227   : > { %v18536_v18 = vpop.f32.mrf.mxu0  ;;  %18881 = vmatprep.subr.bf16.mxu1 %v20890_v41  ;;  %v23604_v13 = vadd.f32 %v5179_v33, %v23059_v59  ;;  %v5171_v63 = vadd.f32 %v23312_v62, %v5170_v39  ;;  %v1418_v41 = vsel %vm23204_vm7, %v1416_v31, %v1417_v16  ;;  %v20895_v62 = vld [vmem:[%s26497_s1 + $0x188] sm:$0xff]   ;;  %1627 = vst [vmem:[#allocation2 + $0x288] sm:$0xff] %v1412_v53  ;;  %v1191_v39 = vld [vmem:[%s21484_s26 + $0xfc] sm:$0xff] }
 0x228   : > { %v23606_v12 = vadd.f32 %v18536_v18, %v18535_v58  ;;  %v19716_v52 = vpop.f32.mrf.mxu1  ;;  %1629 = vst [vmem:[#allocation2 + $0x294] sm:$0xff] %v1418_v41  ;;  %v23620_v33 = vcombine.high %v1412_v53, %v1418_v41  ;;  %v26649_v18 = vld [vmem:[#allocation8_spill] sm:$0xff] }
 0x229   : > { %v18538_v11 = vpop.f32.mrf.mxu0  ;;  %v23614_v24 = vadd.f32 %v5171_v63, %v23050_v0  ;;  %v5182_v59 = vadd.f32 %v19716_v52, %v23402_v5  ;;  %18882 = vmatpush3.bf16.msra.mxu1 %v20891_v1  ;;  %v23625_v0 = vcombine.low %v1412_v53, %v1418_v41  ;;  %v21380_v63 = vld [vmem:[#allocation2 + $0xf0] ss:$12 sps:$4 sm:$0xff]   ;;  %v1423_v53 = vrot.slane %v1191_v39, 5  ;;  %v26650_v41 = vld [vmem:[#allocation7_spill] sm:$0xff] }
 0x22a   : > { %26647 = vst [vmem:[#allocation28_spill] sm:$0xff] %v23620_v33  ;;  %v5173_v32 = vpop.f32.mrf.mxu1  ;;  %18883 = vmatprep.subr.bf16.mxu1 %v20894_v43  ;;  %v20899_v43 = vld [vmem:[%s26497_s1 + $0x180] sm:$0xff]  }
 0x22b   : > { %v18539_v58 = vpop.f32.mrf.mxu0  ;;  %26648 = vst [vmem:[#allocation29_spill] sm:$0xff] %v23625_v0  ;;  %v23628_v5 = vadd.f32 %v5182_v59, %v26649_v18  ;;  %v5174_v1 = vadd.f32 %v23349_v14, %v5173_v32  ;;  %v1193_v14 = vld [vmem:[%s21484_s26 + $0x108] sm:$0xff]  ;;  %v1422_v0 = vrot.slane %v1417_v16, 4  ;;  %v1428_v39 = vrot.slane %v1423_v53, 4  ;;  %v26652_v16 = vld [vmem:[#allocation10_spill] sm:$0xff] }
 0x22c   : > { %v23630_v52 = vadd.f32 %v18539_v58, %v18538_v11  ;;  %v19719_v31 = vpop.f32.mrf.mxu1  ;;  %19806 = vmatmul.mubr.msk.bf16.gmra.mxu1 %vm2149_vm0, %v20889_v6  ;;  %v21381_v58 = vld [vmem:[#allocation2 + $0x10c] ss:$12 sps:$4 sm:$0xff]   ;;  %v1429_v33 = vrot.slane %v1193_v14, 5 }
 0x22d   : > { %v18541_v60 = vpop.f32.mrf.mxu0  ;;  %6966 = vmatmul.mubr.bf16.gmra.mxu0 %v21380_v63  ;;  %v23639_v59 = vadd.f32 %v5174_v1, %v26650_v41  ;;  %v5195_v11 = vadd.f32 %v19719_v31, %v23469_v36  ;;  %19809 = vmatprep.mubr.msk.bf16.mxu1 %vm2149_vm0, %v20892_v51  ;;  %v20893_v63 = vld [vmem:[#allocation2 + $0xb0] ss:$12 sps:$4 sm:$0xff]   ;;  %v26651_v1 = vld [vmem:[#allocation11_spill] sm:$0xff]  ;;  %v20896_v51 = vld [vmem:[#allocation2 + $0xc8] ss:$12 sps:$4 sm:$0xff]  }
 0x22e   : > { %6973 = vmatprep.mubr.bf16.mxu0 %v21381_v58  ;;  %v5186_v18 = vpop.f32.mrf.mxu1  ;;  %18884 = vmatpush3.bf16.msra.mxu1 %v20895_v62  ;;  %v20903_v6 = vld [vmem:[%s26497_s1 + $0x1b8] sm:$0xff]   ;;  %v1424_v62 = vsel %vm23204_vm7, %v1422_v0, %v1423_v53  ;;  %v1430_v29 = vsel %vm23204_vm7, %v1428_v39, %v1429_v33  ;;  %v20907_v0 = vld [vmem:[%s26497_s1 + $0x1b0] sm:$0xff]  }
 0x22f   : > { %v18542_v32 = vpop.f32.mrf.mxu0  ;;  %v23648_v41 = vadd.f32 %v5195_v11, %v26651_v1  ;;  %v5187_v31 = vadd.f32 %v23421_v15, %v5186_v18  ;;  %18885 = vmatprep.subr.bf16.mxu1 %v20898_v55  ;;  %v20904_v15 = vld [vmem:[%s26497_s1 + $0x178] sm:$0xff]   ;;  %1631 = vst [vmem:[#allocation2 + $0x2a0] sm:$0xff] %v1424_v62  ;;  %1633 = vst [vmem:[#allocation2 + $0x2ac] sm:$0xff] %v1430_v29  ;;  %v23664_v55 = vcombine.high %v1424_v62, %v1430_v29  ;;  %v26655_v18 = vld [vmem:[#allocation9_spill] sm:$0xff] }
 0x230   : > { %v23650_v36 = vadd.f32 %v18542_v32, %v18541_v60  ;;  %v19720_v42 = vpop.f32.mrf.mxu1  ;;  %v23669_v53 = vcombine.low %v1424_v62, %v1430_v29  ;;  %v1195_v1 = vld [vmem:[%s21484_s26 + $0x114] sm:$0xff] }
 0x231   : > { %v18544_v58 = vpop.f32.mrf.mxu0  ;;  %v23658_v14 = vadd.f32 %v5187_v31, %v26652_v16  ;;  %v5198_v11 = vadd.f32 %v19720_v42, %v23492_v17  ;;  %26653 = vst [vmem:[#allocation8_spill] sm:$0xff] %v23664_v55  ;;  %v21382_v55 = vld [vmem:[#allocation2 + $0x108] ss:$12 sps:$4 sm:$0xff]   ;;  %v26657_v62 = vld [vmem:[#allocation6_spill] sm:$0xff] }
 0x232   : > { %v5189_v32 = vpop.f32.mrf.mxu1  ;;  %18886 = vmatpush3.bf16.msra.mxu1 %v20899_v43  ;;  %26654 = vst [vmem:[#allocation7_spill] sm:$0xff] %v23669_v53  ;;  %v20908_v29 = vld [vmem:[%s26497_s1 + $0x170] sm:$0xff]   ;;  %v1435_v43 = vrot.slane %v1195_v1, 5 }
 0x233   : > { %v18545_v60 = vpop.f32.mrf.mxu0  ;;  %v23672_v39 = vadd.f32 %v5198_v11, %v26655_v18  ;;  %v5190_v17 = vadd.f32 %v23450_v45, %v5189_v32  ;;  %18887 = vmatprep.subr.bf16.mxu1 %v20903_v6  ;;  %v1197_v45 = vld [vmem:[%s21484_s26 + $0x120] sm:$0xff]  ;;  %v1434_v18 = vrot.slane %v1429_v33, 4 }
 0x234   : > { %v23674_v42 = vadd.f32 %v18545_v60, %v18544_v58  ;;  %v19723_v16 = vpop.f32.mrf.mxu1  ;;  %19810 = vmatmul.mubr.msk.bf16.gmra.mxu1 %vm2149_vm0, %v20893_v63  ;;  %v21383_v60 = vld [vmem:[#allocation2 + $0x124] ss:$12 sps:$4 sm:$0xff]   ;;  %v20915_v63 = vld [vmem:[%s26497_s1 + $0x1a8] sm:$0xff]   ;;  %v1440_v1 = vrot.slane %v1435_v43, 4  ;;  %v1441_v53 = vrot.slane %v1197_v45, 5 }
 0x235   : > { %26656 = vst [vmem:[#allocation11_spill] sm:$0xff] %v23672_v39  ;;  %v18547_v31 = vpop.f32.mrf.mxu0  ;;  %6974 = vmatmul.mubr.bf16.gmra.mxu0 %v21382_v55  ;;  %v23683_v11 = vadd.f32 %v5190_v17, %v26657_v62  ;;  %v5211_v58 = vadd.f32 %v19723_v16, %v23539_v57  ;;  %19813 = vmatprep.mubr.msk.bf16.mxu1 %vm2149_vm0, %v20896_v51  ;;  %v20897_v55 = vld [vmem:[#allocation2 + $0xe0] ss:$12 sps:$4 sm:$0xff]   ;;  %v20901_v51 = vld [vmem:[#allocation2 + $0xf8] ss:$12 sps:$4 sm:$0xff]  }
 0x236   : > { %6981 = vmatprep.mubr.bf16.mxu0 %v21383_v60  ;;  %v5202_v32 = vpop.f32.mrf.mxu1  ;;  %18888 = vmatpush3.bf16.msra.mxu1 %v20904_v15  ;;  %v26658_v17 = vld [vmem:[#allocation16_spill] sm:$0xff]  ;;  %v1436_v33 = vsel %vm23204_vm7, %v1434_v18, %v1435_v43  ;;  %v26664_v18 = vld [vmem:[#allocation13_spill] sm:$0xff] }
 0x237   : > { %v18548_v6 = vpop.f32.mrf.mxu0  ;;  %v23692_v62 = vadd.f32 %v5211_v58, %v26658_v17  ;;  %v5203_v16 = vadd.f32 %v23505_v23, %v5202_v32  ;;  %18889 = vmatprep.subr.bf16.mxu1 %v20907_v0  ;;  %v20916_v15 = vld [vmem:[%s26497_s1 + $0x168] sm:$0xff]   ;;  %v1442_v58 = vsel %vm23204_vm7, %v1440_v1, %v1441_v53  ;;  %v20919_v0 = vld [vmem:[%s26497_s1 + $0x1a0] sm:$0xff]   ;;  %1635 = vst [vmem:[#allocation2 + $0x2b8] sm:$0xff] %v1436_v33 }
 0x238   : > { %v23694_v57 = vadd.f32 %v18548_v6, %v18547_v31  ;;  %v19724_v39 = vpop.f32.mrf.mxu1  ;;  %v26660_v45 = vld [vmem:[#allocation12_spill] sm:$0xff]  ;;  %1637 = vst [vmem:[#allocation2 + $0x2c4] sm:$0xff] %v1442_v58  ;;  %v23711_v6 = vcombine.high %v1436_v33, %v1442_v58  ;;  %v23713_v43 = vcombine.low %v1436_v33, %v1442_v58 }
 0x239   : > { %26659 = vst [vmem:[#allocation10_spill] sm:$0xff] %v23692_v62  ;;  %v18550_v60 = vpop.f32.mrf.mxu0  ;;  %v23705_v31 = vadd.f32 %v5203_v16, %v26660_v45  ;;  %v5214_v23 = vadd.f32 %v19724_v39, %v23559_v49  ;;  %v1199_v39 = vld [vmem:[%s21484_s26 + $0x12c] sm:$0xff] }
 0x23a   : > { %26662 = vst [vmem:[#allocation6_spill] sm:$0xff] %v23711_v6  ;;  %v5205_v17 = vpop.f32.mrf.mxu1  ;;  %18890 = vmatpush3.bf16.msra.mxu1 %v20908_v29  ;;  %26663 = vst [vmem:[#allocation16_spill] sm:$0xff] %v23713_v43  ;;  %v1447_v6 = vrot.slane %v1199_v39, 5  ;;  %v26665_v29 = vld [vmem:[#allocation14_spill] sm:$0xff]  ;;  %v20905_v39 = vld [vmem:[#allocation2 + $0x128] ss:$12 sps:$4 sm:$0xff]  }
 0x23b   : > { %26661 = vst [vmem:[#allocation9_spill] sm:$0xff] %v23705_v31  ;;  %v18551_v32 = vpop.f32.mrf.mxu0  ;;  %v23716_v1 = vadd.f32 %v5214_v23, %v26664_v18  ;;  %v5206_v49 = vadd.f32 %v23521_v4, %v5205_v17  ;;  %18891 = vmatprep.subr.bf16.mxu1 %v20915_v63  ;;  %v21384_v31 = vld [vmem:[#allocation2 + $0x120] ss:$12 sps:$4 sm:$0xff]   ;;  %v21385_v23 = vld [vmem:[#allocation2 + $0x13c] ss:$12 sps:$4 sm:$0xff]   ;;  %v1446_v17 = vrot.slane %v1441_v53, 4 }
 0x23c   : > { %v23718_v16 = vadd.f32 %v18551_v32, %v18550_v60  ;;  %v19727_v62 = vpop.f32.mrf.mxu1  ;;  %19814 = vmatmul.mubr.msk.bf16.gmra.mxu1 %vm2149_vm0, %v20897_v55  ;;  %v20920_v4 = vld [vmem:[%s26497_s1 + $0x160] sm:$0xff]   ;;  %v1201_v63 = vld [vmem:[%s21484_s26 + $0x138] sm:$0xff] }
 0x23d   : > { %v18553_v45 = vpop.f32.mrf.mxu0  ;;  %6982 = vmatmul.mubr.bf16.gmra.mxu0 %v21384_v31  ;;  %v23724_v33 = vadd.f32 %v5206_v49, %v26665_v29  ;;  %v5227_v58 = vadd.f32 %v19727_v62, %v23606_v12  ;;  %19817 = vmatprep.mubr.msk.bf16.mxu1 %vm2149_vm0, %v20901_v51  ;;  %v20902_v31 = vld [vmem:[#allocation2 + $0x110] ss:$12 sps:$4 sm:$0xff]   ;;  %v1452_v12 = vrot.slane %v1447_v6, 4  ;;  %v1453_v62 = vrot.slane %v1201_v63, 5 }
 0x23e   : > { %6989 = vmatprep.mubr.bf16.mxu0 %v21385_v23  ;;  %v5218_v32 = vpop.f32.mrf.mxu1  ;;  %18892 = vmatpush3.bf16.msra.mxu1 %v20916_v15  ;;  %v23735_v55 = vld [vmem:[%s26497_s1 + $0x418] sm:$0xff]   ;;  %v1448_v15 = vsel %vm23204_vm7, %v1446_v17, %v1447_v6 }
 0x23f   : > { %v18554_v60 = vpop.f32.mrf.mxu0  ;;  %v23738_v18 = vadd.f32 %v5227_v58, %v23229_v25  ;;  %v5219_v49 = vadd.f32 %v23574_v38, %v5218_v32  ;;  %18893 = vmatprep.subr.bf16.mxu1 %v20919_v0  ;;  %v1454_v53 = vsel %vm23204_vm7, %v1452_v12, %v1453_v62  ;;  %v26666_v43 = vld [vmem:[#allocation18_spill] sm:$0xff]  ;;  %1639 = vst [vmem:[#allocation2 + $0x2d0] sm:$0xff] %v1448_v15 }
 0x240   : > { %v23740_v51 = vadd.f32 %v18554_v60, %v18553_v45  ;;  %v19728_v23 = vpop.f32.mrf.mxu1  ;;  %1641 = vst [vmem:[#allocation2 + $0x2dc] sm:$0xff] %v1454_v53  ;;  %v23751_v45 = vcombine.high %v1448_v15, %v1454_v53  ;;  %v23753_v58 = vcombine.low %v1448_v15, %v1454_v53  ;;  %v21386_v12 = vld [vmem:[#allocation2 + $0x138] ss:$12 sps:$4 sm:$0xff]   ;;  %v20906_v53 = vld [vmem:[#allocation2 + $0x140] ss:$12 sps:$4 sm:$0xff]  }
 0x241   : > { %v18556_v29 = vpop.f32.mrf.mxu0  ;;  %v23748_v63 = vadd.f32 %v5219_v49, %v26666_v43  ;;  %v5230_v25 = vadd.f32 %v19728_v23, %v23630_v52  ;;  %v1203_v52 = vld [vmem:[%s21484_s26 + $0x144] sm:$0xff]  ;;  %v21387_v23 = vld [vmem:[#allocation2 + $0x154] ss:$12 sps:$4 sm:$0xff]  }
 0x242   : > { %v5221_v0 = vpop.f32.mrf.mxu1  ;;  %18894 = vmatpush3.bf16.msra.mxu1 %v20920_v4  ;;  %v1459_v4 = vrot.slane %v1203_v52, 5  ;;  %v20912_v52 = vld [vmem:[#allocation2 + $0x158] ss:$12 sps:$4 sm:$0xff]  }
 0x243   : > { %v18557_v38 = vpop.f32.mrf.mxu0  ;;  %v23756_v60 = vadd.f32 %v5230_v25, %v23253_v44  ;;  %v5222_v43 = vadd.f32 %v23590_v35, %v5221_v0  ;;  %19877 = vmatprep.subr.bf16.mxu1 %v23735_v55  ;;  %v1205_v35 = vld [vmem:[%s21484_s26 + $0x150] sm:$0xff]  ;;  %v1458_v25 = vrot.slane %v1453_v62, 4 }
 0x244   : > { %v23758_v6 = vadd.f32 %v18557_v38, %v18556_v29  ;;  %v19731_v17 = vpop.f32.mrf.mxu1  ;;  %19818 = vmatmul.mubr.msk.bf16.gmra.mxu1 %vm2149_vm0, %v20902_v31  ;;  %v1464_v38 = vrot.slane %v1459_v4, 4  ;;  %v1465_v0 = vrot.slane %v1205_v35, 5 }
 0x245   : > { %v18559_v32 = vpop.f32.mrf.mxu0  ;;  %6990 = vmatmul.mubr.bf16.gmra.mxu0 %v21386_v12  ;;  %v23765_v49 = vadd.f32 %v5222_v43, %v23202_v47  ;;  %v5243_v44 = vadd.f32 %v19731_v17, %v23694_v57  ;;  %19821 = vmatprep.mubr.msk.bf16.mxu1 %vm2149_vm0, %v20905_v39  ;;  %v20911_v43 = vld [vmem:[#allocation2 + $0x16c] ss:$12 sps:$4 sm:$0xff]   ;;  %v1460_v39 = vsel %vm23204_vm7, %v1458_v25, %v1459_v4  ;;  %v1207_v25 = vld [vmem:[%s21484_s26 + $0x15c] sm:$0xff] }
 0x246   : > { %6997 = vmatprep.mubr.bf16.mxu0 %v21387_v23  ;;  %v5234_v15 = vpop.f32.mrf.mxu1  ;;  %v1466_v23 = vsel %vm23204_vm7, %v1464_v38, %v1465_v0  ;;  %1643 = vst [vmem:[#allocation2 + $0x2e8] sm:$0xff] %v1460_v39 }
 0x247   : > { %v18560_v29 = vpop.f32.mrf.mxu0  ;;  %v23771_v12 = vadd.f32 %v5243_v44, %v23352_v3  ;;  %v5235_v47 = vadd.f32 %v23650_v36, %v5234_v15  ;;  %1645 = vst [vmem:[#allocation2 + $0x2f4] sm:$0xff] %v1466_v23  ;;  %v23784_v35 = vcombine.low %v1460_v39, %v1466_v23 }
 0x248   : > { %v18561_v31 = vadd.f32 %v18560_v29, %v18559_v32  ;;  %v19732_v17 = vpop.f32.mrf.mxu1  ;;  %v23782_v32 = vcombine.high %v1460_v39, %v1466_v23  ;;  %v20909_v23 = vld [vmem:[#allocation2 + $0x168] ss:$12 sps:$4 sm:$0xff]  }
 0x249   : > { %v18562_v57 = vpop.f32.mrf.mxu0  ;;  %v23779_v62 = vadd.f32 %v5235_v47, %v23290_v48  ;;  %v5246_v3 = vadd.f32 %v19732_v17, %v23718_v16  ;;  %v1471_v16 = vrot.slane %v1207_v25, 5 }
 0x24a   : > { %v5237_v44 = vpop.f32.mrf.mxu1 }
 0x24b   : > { %v18563_v36 = vpop.f32.mrf.mxu0  ;;  %v23787_v29 = vadd.f32 %v5246_v3, %v23376_v20  ;;  %v5238_v15 = vadd.f32 %v23674_v42, %v5237_v44  ;;  %v1209_v20 = vld [vmem:[%s21484_s26 + $0x168] sm:$0xff]  ;;  %v20914_v42 = vld [vmem:[#allocation2 + $0x170] ss:$12 sps:$4 sm:$0xff]   ;;  %v1470_v3 = vrot.slane %v1465_v0, 4 }
 0x24c   : > { %v18564_v4 = vadd.f32 %v18563_v36, %v18562_v57  ;;  %v19735_v38 = vpop.f32.mrf.mxu1  ;;  %19822 = vmatmul.mubr.msk.bf16.gmra.mxu1 %vm2149_vm0, %v20906_v53  ;;  %v1476_v36 = vrot.slane %v1471_v16, 4  ;;  %v1477_v44 = vrot.slane %v1209_v20, 5  ;;  %v1211_v20 = vld [vmem:[%s21484_s26 + $0x174] sm:$0xff] }
 0x24d   : > { %v18565_v48 = vpop.f32.mrf.mxu0  ;;  %6998 = vmatmul.mubr.bf16.gmra.mxu0 %v23477_v61  ;;  %v23794_v47 = vadd.f32 %v5238_v15, %v23319_v8  ;;  %v5259_v17 = vadd.f32 %v19735_v38, %v18561_v31  ;;  %19825 = vmatprep.mubr.msk.bf16.mxu1 %vm2149_vm0, %v20912_v52  ;;  %v20917_v8 = vld [vmem:[#allocation2 + $0x188] ss:$12 sps:$4 sm:$0xff]  }
 0x24e   : > { %7005 = vmatprep.mubr.bf16.mxu0 %v20911_v43  ;;  %v5250_v57 = vpop.f32.mrf.mxu1  ;;  %v1472_v43 = vsel %vm23204_vm7, %v1470_v3, %v1471_v16  ;;  %v1478_v52 = vsel %vm23204_vm7, %v1476_v36, %v1477_v44  ;;  %v23825_v3 = vld [vmem:[%s21484_s26 + $0x180] sm:$0xff] }
 0x24f   : > { %v18566_v39 = vpop.f32.mrf.mxu0  ;;  %v23799_v61 = vadd.f32 %v5259_v17, %v23453_v27  ;;  %v5251_v53 = vadd.f32 %v23740_v51, %v5250_v57  ;;  %1647 = vst [vmem:[#allocation2 + $0x300] sm:$0xff] %v1472_v43  ;;  %1649 = vst [vmem:[#allocation2 + $0x30c] sm:$0xff] %v1478_v52  ;;  %v23809_v27 = vcombine.high %v1472_v43, %v1478_v52 }
 0x250   : > { %v19736_v31 = vpop.f32.mrf.mxu1  ;;  %v23811_v38 = vcombine.low %v1472_v43, %v1478_v52 }
 0x251   : > { %v18568_v15 = vpop.f32.mrf.mxu0  ;;  %v23807_v25 = vadd.f32 %v5251_v53, %v23405_v2  ;;  %v5262_v0 = vadd.f32 %v19736_v31, %v18564_v4  ;;  %v1483_v2 = vrot.slane %v1211_v20, 5  ;;  %v20918_v53 = vld [vmem:[#allocation2 + $0x1a0] ss:$12 sps:$4 sm:$0xff]   ;;  %v26534_v31 = vrot.slane %v23825_v3, 5 }
 0x252   : > { %v5253_v48 = vpop.f32.mrf.mxu1 }
 0x253   : > { %v18569_v51 = vpop.f32.mrf.mxu0  ;;  %v23814_v17 = vadd.f32 %v5262_v0, %v23472_v22  ;;  %v5254_v16 = vadd.f32 %v23758_v6, %v5253_v48  ;;  %v1482_v6 = vrot.slane %v1477_v44, 4  ;;  %v1488_v15 = vrot.slane %v1483_v2, 4 }
 0x254   : > { %v19739_v57 = vpop.f32.mrf.mxu1  ;;  %19826 = vmatmul.mubr.msk.bf16.gmra.mxu1 %vm2149_vm0, %v20914_v42  ;;  %v26667_v48 = vcombine.high %v23213_v10, %v23222_v26 }
 0x255   : > { %v18571_v39 = vpop.f32.mrf.mxu0  ;;  %7006 = vmatmul.mubr.bf16.gmra.mxu0 %v20909_v23  ;;  %v23820_v4 = vadd.f32 %v5254_v16, %v23424_v40  ;;  %19829 = vmatprep.mubr.msk.bf16.mxu1 %vm2149_vm0, %v20917_v8  ;;  %v1484_v42 = vsel %vm23204_vm7, %v1482_v6, %v1483_v2  ;;  %v26668_v16 = vcombine.high %v23217_v7, %v23226_v19  ;;  %v20923_v6 = vld [vmem:[#allocation2 + $0x1b8] ss:$12 sps:$4 sm:$0xff]  }
 0x256   : > { %7013 = vmatprep.mubr.bf16.mxu0 %v22988_v9  ;;  %v5266_v36 = vpop.f32.mrf.mxu1  ;;  %v1490_v9 = vsel %vm23204_vm7, %v1488_v15, %v26534_v31  ;;  %1651 = vst [vmem:[#allocation2 + $0x318] sm:$0xff] %v1484_v42 }
 0x257   : > { %v18572_v22 = vpop.f32.mrf.mxu0  ;;  %1653 = vst [vmem:[#allocation2 + $0x324] sm:$0xff] %v1490_v9  ;;  %v23834_v40 = vcombine.high %v1484_v42, %v1490_v9  ;;  %v23836_v44 = vcombine.low %v1484_v42, %v1490_v9  ;;  %v26671_v42 = vcombine.high %v23265_v56, %v23269_v37 }
 0x258   : > { %v19740_v43 = vpop.f32.mrf.mxu1 }
 0x259   : > { %v18574_v23 = vpop.f32.mrf.mxu0  ;;  %v26670_v43 = vcombine.low %v23217_v7, %v23226_v19  ;;  %v20924_v7 = vld [vmem:[#allocation2 + $0x1d0] ss:$12 sps:$4 sm:$0xff]   ;;  %v20925_v19 = vld [vmem:[#allocation2 + $0x1e8] ss:$12 sps:$4 sm:$0xff]  }
 0x25a   : > { %v5269_v52 = vpop.f32.mrf.mxu1  ;;  %v26669_v23 = vcombine.low %v23213_v10, %v23222_v26  ;;  %v20940_v10 = vld [vmem:[%s26497_s1 + $0x408] sm:$0xff]  }
 0x25b   : > { %v18575_v8 = vpop.f32.mrf.mxu0 }
 0x25c   : > { %v19743_v51 = vpop.f32.mrf.mxu1  ;;  %19830 = vmatmul.mubr.msk.bf16.gmra.mxu1 %vm2149_vm0, %v20918_v53 }
 0x25d   : > { %v18577_v0 = vpop.f32.mrf.mxu0  ;;  %7014 = vmatmul.mubr.bf16.gmra.mxu0 %v22990_v34  ;;  %7848 = vmatprep.mubr.bf16.mxu1 %v26668_v16  ;;  %v20927_v34 = vld [vmem:[%s26497_s1 + $0x410] sm:$0xff]  }
 0x25e   : > { %7021 = vmatprep.mubr.bf16.mxu0 %v26667_v48  ;;  %v5282_v39 = vpop.f32.mrf.mxu1  ;;  %v20931_v48 = vld [vmem:[%s26497_s1 + $0x3a8] sm:$0xff]  }
 0x25f   : > { %v18578_v20 = vpop.f32.mrf.mxu0  ;;  %v20954_v39 = vld [vmem:[%s26497_s1 + $0x400] sm:$0xff]  }
 0x260   : > { %v19744_v2 = vpop.f32.mrf.mxu1  ;;  %v20934_v20 = vld [vmem:[%s26497_s1 + $0x3e0] sm:$0xff]  }
 0x261   : > { %v18580_v57 = vpop.f32.mrf.mxu0 }
 0x262   : > { %v5285_v36 = vpop.f32.mrf.mxu1 }
 0x263   : > { %v18581_v22 = vpop.f32.mrf.mxu0  ;;  %v26673_v36 = vcombine.high %v23326_v28, %v23330_v21 }
 0x264   : > { %v18627_v15 = vpop.f32.mrf.mxu1  ;;  %7849 = vmatmul.mubr.bf16.vlgmr.msra.gmra.mxu1 %v26670_v43  ;;  %v26672_v22 = vcombine.low %v23265_v56, %v23269_v37  ;;  %v20938_v56 = vld [vmem:[%s26497_s1 + $0x3d8] sm:$0xff]  }
 0x265   : > { %v18583_v53 = vpop.f32.mrf.mxu0  ;;  %7022 = vmatmul.mubr.bf16.gmra.mxu0 %v26669_v23  ;;  %19878 = vmatpush3.bf16.msra.mxu1 %v23735_v55  ;;  %v20964_v37 = vld [vmem:[%s26497_s1 + $0x3f8] sm:$0xff]  }
 0x266   : > { %7856 = vmatprep.mubr.bf16.mxu1 %v26671_v42  ;;  %v18628_v8 = vpop.f32.mrf.mxu1  ;;  %19845 = vmatprep.mubr.msk.bf16.mxu0 %vm2149_vm0, %v20923_v6  ;;  %v20935_v53 = vld [vmem:[%s26497_s1 + $0x3a0] sm:$0xff]  }
 0x267   : > { %v18584_v9 = vpop.f32.mrf.mxu0  ;;  %19879 = vmatprep.subr.bf16.mxu1 %v20927_v34  ;;  %v18629_v26 = vadd.f32 %v18628_v8, %v18627_v15 }
 0x268   : > { %v18630_v0 = vpop.f32.mrf.mxu1  ;;  %v20926_v9 = vld [vmem:[#allocation2 + $0x200] ss:$12 sps:$4 sm:$0xff]  }
 0x269   : > { %v18586_v52 = vpop.f32.mrf.mxu0  ;;  %19880 = vmatpush3.bf16.msra.mxu1 %v20927_v34 }
 0x26a   : > { %v18631_v51 = vpop.f32.mrf.mxu1  ;;  %19881 = vmatprep.subr.bf16.mxu1 %v20940_v10 }
 0x26b   : > { %v18587_v55 = vpop.f32.mrf.mxu0  ;;  %v18632_v16 = vadd.f32 %v18631_v51, %v18630_v0  ;;  %v20943_v51 = vld [vmem:[%s26497_s1 + $0x3d0] sm:$0xff]  }
 0x26c   : > { %v18633_v57 = vpop.f32.mrf.mxu1  ;;  %7857 = vmatmul.mubr.bf16.gmra.mxu1 %v26672_v22 }
 0x26d   : > { %v19759_v2 = vpop.f32.mrf.mxu0  ;;  %19846 = vmatmul.mubr.msk.bf16.vlgmr.msra.gmra.mxu0 %vm2149_vm0, %v20924_v7  ;;  %7864 = vmatprep.mubr.bf16.mxu1 %v26673_v36  ;;  %v20939_v7 = vld [vmem:[%s26497_s1 + $0x398] sm:$0xff]  }
 0x26e   : > { %19849 = vmatprep.mubr.msk.bf16.mxu0 %vm2149_vm0, %v20925_v19  ;;  %v18634_v6 = vpop.f32.mrf.mxu1  ;;  %19014 = vmatpush3.bf16.msra.mxu0 %v20931_v48 }
 0x26f   : > { %v6117_v34 = vpop.f32.mrf.mxu0  ;;  %19882 = vmatpush3.bf16.msra.mxu1 %v20940_v10  ;;  %v18635_v15 = vadd.f32 %v18634_v6, %v18633_v57  ;;  %19015 = vmatprep.subr.bf16.mxu0 %v20934_v20  ;;  %v20928_v10 = vld [vmem:[#allocation2 + $0x218] ss:$12 sps:$4 sm:$0xff]  }
 0x270   : > { %v6118_v23 = vadd.f32 %v18629_v26, %v6117_v34  ;;  %19883 = vmatprep.subr.bf16.mxu1 %v20954_v39  ;;  %v18636_v43 = vpop.f32.mrf.mxu1 }
 0x271   : > { %v19760_v42 = vpop.f32.mrf.mxu0  ;;  %v6126_v8 = vadd.f32 %v19759_v2, %v18635_v15  ;;  %v20929_v15 = vld [vmem:[#allocation2 + $0x230] ss:$12 sps:$4 sm:$0xff]  }
 0x272   : > { %v23890_v52 = vadd.f32 %v6118_v23, %v23614_v24  ;;  %v18637_v0 = vpop.f32.mrf.mxu1  ;;  %19016 = vmatpush3.bf16.msra.mxu0 %v20935_v53  ;;  %v20966_v24 = vld [vmem:[%s26497_s1 + $0x3f0] sm:$0xff]  }
 0x273   : > { %v6120_v26 = vpop.f32.mrf.mxu0  ;;  %19884 = vmatpush3.bf16.msra.mxu1 %v20954_v39  ;;  %v18638_v19 = vadd.f32 %v18637_v0, %v18636_v43  ;;  %19017 = vmatprep.subr.bf16.mxu0 %v20938_v56  ;;  %v23902_v48 = vadd.f32 %v6126_v8, %v23604_v13  ;;  %v26674_v39 = vcombine.low %v23326_v28, %v23330_v21  ;;  %v20944_v13 = vld [vmem:[%s26497_s1 + $0x390] sm:$0xff]   ;;  %v20947_v21 = vld [vmem:[%s26497_s1 + $0x3c8] sm:$0xff]  }
 0x274   : > { %v6121_v55 = vadd.f32 %v18632_v16, %v6120_v26  ;;  %19885 = vmatprep.subr.bf16.mxu1 %v20964_v37  ;;  %v18639_v20 = vpop.f32.mrf.mxu1  ;;  %v20932_v56 = vld [vmem:[#allocation2 + $0x248] ss:$12 sps:$4 sm:$0xff]  }
 0x275   : > { %v19763_v57 = vpop.f32.mrf.mxu0  ;;  %7865 = vmatmul.mubr.bf16.gmra.mxu1 %v26674_v39  ;;  %19850 = vmatmul.mubr.msk.bf16.gmra.mxu0 %vm2149_vm0, %v20926_v9  ;;  %v6129_v16 = vadd.f32 %v19760_v42, %v18638_v19  ;;  %v20948_v42 = vld [vmem:[%s26497_s1 + $0x388] sm:$0xff]   ;;  %v20950_v19 = vld [vmem:[%s26497_s1 + $0x380] sm:$0xff]  }
 0x276   : > { %v23909_v2 = vadd.f32 %v6121_v55, %v23639_v59  ;;  %7872 = vmatprep.mubr.bf16.mxu1 %v23395_v46  ;;  %19853 = vmatprep.mubr.msk.bf16.mxu0 %vm2149_vm0, %v20928_v10  ;;  %v18640_v22 = vpop.f32.mrf.mxu1  ;;  %v20970_v59 = vld [vmem:[%s26497_s1 + $0x5f8] sm:$0xff]  }
 0x277   : > { %v6133_v36 = vpop.f32.mrf.mxu0  ;;  %19018 = vmatpush3.bf16.msra.mxu0 %v20939_v7  ;;  %19886 = vmatpush3.bf16.msra.mxu1 %v20964_v37  ;;  %v18641_v28 = vadd.f32 %v18640_v22, %v18639_v20  ;;  %v23923_v6 = vadd.f32 %v6129_v16, %v23628_v5  ;;  %v20949_v5 = vld [vmem:[%s26497_s1 + $0x3c0] sm:$0xff]  }
 0x278   : > { %19019 = vmatprep.subr.bf16.mxu0 %v20943_v51  ;;  %19887 = vmatprep.subr.bf16.mxu1 %v20966_v24  ;;  %v18642_v34 = vpop.f32.mrf.mxu1  ;;  %v20933_v16 = vld [vmem:[#allocation2 + $0x260] ss:$12 sps:$4 sm:$0xff]  }
 0x279   : > { %v19764_v53 = vpop.f32.mrf.mxu0  ;;  %v6134_v23 = vadd.f32 %v18641_v28, %v6133_v36  ;;  %v20936_v36 = vld [vmem:[#allocation2 + $0x278] ss:$12 sps:$4 sm:$0xff]  }
 0x27a   : > { %v18643_v37 = vpop.f32.mrf.mxu1 }
 0x27b   : > { %v6136_v43 = vpop.f32.mrf.mxu0  ;;  %19020 = vmatpush3.bf16.msra.mxu0 %v20944_v13  ;;  %19888 = vmatpush3.bf16.msra.mxu1 %v20966_v24  ;;  %v23929_v9 = vadd.f32 %v6134_v23, %v23658_v14  ;;  %v18644_v8 = vadd.f32 %v18643_v37, %v18642_v34  ;;  %v20953_v24 = vld [vmem:[%s26497_s1 + $0x3b8] sm:$0xff]   ;;  %v26679_v37 = vld [vmem:[#allocation19_spill] sm:$0xff] }
 0x27c   : > { %19021 = vmatprep.subr.bf16.mxu0 %v20947_v21  ;;  %19147 = vmatprep.subr.bf16.mxu1 %v20970_v59  ;;  %v18645_v10 = vpop.f32.mrf.mxu1  ;;  %v20956_v59 = vld [vmem:[%s26497_s1 + $0x3b0] sm:$0xff]  }
 0x27d   : > { %26675 = vst [vmem:[#allocation12_spill] sm:$0xff] %v23929_v9  ;;  %v23934_v0 = vpop.f32.mrf.mxu0  ;;  %7873 = vmatmul.mubr.bf16.gmra.mxu1 %v23398_v30  ;;  %19854 = vmatmul.mubr.msk.bf16.gmra.mxu0 %vm2149_vm0, %v20929_v15  ;;  %v6137_v26 = vadd.f32 %v18644_v8, %v6136_v43 }
 0x27e   : > { %7880 = vmatprep.mubr.bf16.mxu1 %v23446_v54  ;;  %19857 = vmatprep.mubr.msk.bf16.mxu0 %vm2149_vm0, %v20932_v56  ;;  %v18646_v14 = vpop.f32.mrf.mxu1 }
 0x27f   : > { %v6149_v7 = vpop.f32.mrf.mxu0  ;;  %19022 = vmatpush3.bf16.msra.mxu0 %v20948_v42  ;;  %v23944_v55 = vadd.f32 %v6137_v26, %v23683_v11  ;;  %v18647_v51 = vadd.f32 %v18646_v14, %v18645_v10  ;;  %v20955_v11 = vld [vmem:[%s26497_s1 + $0x378] sm:$0xff]   ;;  %v26680_v10 = vld [vmem:[#allocation11_spill] sm:$0xff] }
 0x280   : > { %19023 = vmatprep.subr.bf16.mxu0 %v20949_v5  ;;  %v18648_v20 = vpop.f32.mrf.mxu1  ;;  %v23972_v5 = vld [vmem:[%s26497_s1 + $0x628] sm:$0xff]  }
 0x281   : > { %26676 = vst [vmem:[#allocation13_spill] sm:$0xff] %v23944_v55  ;;  %v23949_v39 = vpop.f32.mrf.mxu0  ;;  %v6142_v22 = vadd.f32 %v19763_v57, %v18647_v51  ;;  %v26678_v57 = vld [vmem:[#allocation17_spill] sm:$0xff] }
 0x282   : > { %v18649_v13 = vpop.f32.mrf.mxu1 }
 0x283   : > { %v6152_v28 = vpop.f32.mrf.mxu0  ;;  %19024 = vmatpush3.bf16.msra.mxu0 %v20950_v19  ;;  %v18650_v21 = vadd.f32 %v18649_v13, %v18648_v20  ;;  %v23958_v34 = vadd.f32 %v6142_v22, %v23648_v41  ;;  %v20957_v41 = vld [vmem:[%s26497_s1 + $0x370] sm:$0xff]  }
 0x284   : > { %19025 = vmatprep.subr.bf16.mxu0 %v20953_v24  ;;  %v18651_v15 = vpop.f32.mrf.mxu1  ;;  %v20937_v19 = vld [vmem:[#allocation2 + $0x290] ss:$12 sps:$4 sm:$0xff]   ;;  %v20941_v24 = vld [vmem:[#allocation2 + $0x2a8] ss:$12 sps:$4 sm:$0xff]  }
 0x285   : > { %26677 = vst [vmem:[#allocation14_spill] sm:$0xff] %v23958_v34  ;;  %v23960_v23 = vpop.f32.mrf.mxu0  ;;  %7881 = vmatmul.mubr.bf16.gmra.mxu1 %v26678_v57  ;;  %19858 = vmatmul.mubr.msk.bf16.gmra.mxu0 %vm2149_vm0, %v20933_v16  ;;  %v6145_v56 = vadd.f32 %v19764_v53, %v18650_v21 }
 0x286   : > { %7888 = vmatprep.mubr.bf16.mxu1 %v26679_v37  ;;  %19861 = vmatprep.mubr.msk.bf16.mxu0 %vm2149_vm0, %v20936_v36  ;;  %v18652_v43 = vpop.f32.mrf.mxu1  ;;  %v26682_v36 = vld [vmem:[#allocation9_spill] sm:$0xff] }
 0x287   : > { %v6165_v42 = vpop.f32.mrf.mxu0  ;;  %19026 = vmatpush3.bf16.msra.mxu0 %v20955_v11  ;;  %v18653_v8 = vadd.f32 %v18652_v43, %v18651_v15  ;;  %v23975_v53 = vadd.f32 %v6145_v56, %v26680_v10  ;;  %v1216_v56 = vld [vmem:[%s21484_s26 + $0x194] sm:$0xf] }
 0x288   : > { %19027 = vmatprep.subr.bf16.mxu0 %v20956_v59  ;;  %v18654_v26 = vpop.f32.mrf.mxu1  ;;  %v26684_v59 = vld [vmem:[#allocation20_spill] sm:$0xff] }
 0x289   : > { %26681 = vst [vmem:[#allocation18_spill] sm:$0xff] %v23975_v53  ;;  %v23977_v14 = vpop.f32.mrf.mxu0  ;;  %v6150_v51 = vadd.f32 %v18653_v8, %v6149_v7  ;;  %v26685_v7 = vld [vmem:[#allocation26_spill] sm:$0xff]  ;;  %v1498_v8 = vrot.slane %v1216_v56, 5 }
 0x28a   : > { %v18655_v20 = vpop.f32.mrf.mxu1  ;;  %v20945_v53 = vld [vmem:[#allocation2 + $0x2d8] ss:$12 sps:$4 sm:$0xff]  }
 0x28b   : > { %v6168_v16 = vpop.f32.mrf.mxu0  ;;  %19028 = vmatpush3.bf16.msra.mxu0 %v20957_v41  ;;  %v18656_v22 = vadd.f32 %v18655_v20, %v18654_v26  ;;  %v23981_v13 = vadd.f32 %v6150_v51, %v26682_v36  ;;  %v23996_v51 = vld [vmem:[%s21484_s26 + $0x1a0] sm:$0xf] }
 0x28c   : > { %19921 = vmatprep.subr.bf16.mxu0 %v23972_v5  ;;  %v18657_v11 = vpop.f32.mrf.mxu1  ;;  %26687 = vst [vmem:[#allocation11_spill] sm:$0xff] %v23996_v51 }
 0x28d   : > { %26683 = vst [vmem:[#allocation17_spill] sm:$0xff] %v23981_v13  ;;  %v23983_v21 = vpop.f32.mrf.mxu0  ;;  %7889 = vmatmul.mubr.bf16.gmra.mxu1 %v26684_v59  ;;  %19862 = vmatmul.mubr.msk.bf16.gmra.mxu0 %vm2149_vm0, %v20937_v19  ;;  %v6153_v15 = vadd.f32 %v18656_v22, %v6152_v28  ;;  %v20942_v19 = vld [vmem:[#allocation2 + $0x2c0] ss:$12 sps:$4 sm:$0xff]   ;;  %v26688_v28 = vld [vmem:[#allocation22_spill] sm:$0xff]  ;;  %v1503_v13 = vrot.slane %v1498_v8, 4 }
 0x28e   : > { %7896 = vmatprep.mubr.bf16.mxu1 %v26685_v7  ;;  %19865 = vmatprep.mubr.msk.bf16.mxu0 %vm2149_vm0, %v20941_v24  ;;  %v18658_v43 = vpop.f32.mrf.mxu1  ;;  %v26689_v22 = vrot.slane %v26688_v28, 5  ;;  %v26535_v24 = vrot.slane %v23996_v51, 5  ;;  %v26690_v28 = vld [vmem:[#allocation10_spill] sm:$0xff] }
 0x28f   : > { %v23990_v41 = vpop.f32.mrf.mxu0  ;;  %v18659_v10 = vadd.f32 %v18658_v43, %v18657_v11  ;;  %v23993_v26 = vadd.f32 %v6153_v15, %v23724_v33 }
 0x290   : > { %v18660_v20 = vpop.f32.mrf.mxu1  ;;  %v1497_v31 = vrot.slane %v26689_v22, 4  ;;  %v1505_v15 = vsel %vm23204_vm7, %v1503_v13, %v26535_v24  ;;  %v20951_v24 = vld [vmem:[#allocation2 + $0x308] ss:$12 sps:$4 sm:$0xff]  }
 0x291   : > { %26686 = vst [vmem:[#allocation19_spill] sm:$0xff] %v23993_v26  ;;  %v23998_v36 = vpop.f32.mrf.mxu0  ;;  %v6158_v55 = vadd.f32 %v23934_v0, %v18659_v10  ;;  %1658 = vst.msk [vmem:[#allocation2 + $0x344] sm:$0xf] %vm1077_vm4, %v1505_v15  ;;  %v26692_v26 = vld [vmem:[#allocation21_spill] sm:$0xff] }
 0x292   : > { %v18661_v56 = vpop.f32.mrf.mxu1  ;;  %v1499_v33 = vsel %vm23204_vm7, %v1497_v31, %v1498_v8  ;;  %v26693_v8 = vld [vmem:[#allocation23_spill] sm:$0xff] }
 0x293   : > { %v24004_v11 = vpop.f32.mrf.mxu0  ;;  %v18662_v43 = vadd.f32 %v18661_v56, %v18660_v20  ;;  %v24013_v22 = vadd.f32 %v6158_v55, %v26690_v28  ;;  %1656 = vst.msk [vmem:[#allocation2 + $0x338] sm:$0xf] %vm1077_vm4, %v1499_v33  ;;  %v20946_v28 = vld [vmem:[#allocation2 + $0x2f0] ss:$12 sps:$4 sm:$0xff]  }
 0x294   : > { %v18663_v0 = vpop.f32.mrf.mxu1 }
 0x295   : > { %26691 = vst [vmem:[#allocation9_spill] sm:$0xff] %v24013_v22  ;;  %v24017_v10 = vpop.f32.mrf.mxu0  ;;  %7897 = vmatmul.mubr.bf16.gmra.mxu1 %v26692_v26  ;;  %19866 = vmatmul.mubr.msk.bf16.gmra.mxu0 %vm2149_vm0, %v20942_v19  ;;  %v6161_v31 = vadd.f32 %v23949_v39, %v18662_v43  ;;  %v1215_v22 = vld [vmem:[%s21484_s26 + $0x18c] sm:$0xff] }
 0x296   : > { %7904 = vmatprep.mubr.bf16.mxu1 %v26693_v8  ;;  %19869 = vmatprep.mubr.msk.bf16.mxu0 %vm2149_vm0, %v20945_v53  ;;  %v18664_v55 = vpop.f32.mrf.mxu1 }
 0x297   : > { %v24024_v13 = vpop.f32.mrf.mxu0  ;;  %v18665_v20 = vadd.f32 %v18664_v55, %v18663_v0  ;;  %v24027_v56 = vadd.f32 %v6161_v31, %v23716_v1  ;;  %v26696_v55 = vld [vmem:[#allocation24_spill] sm:$0xff]  ;;  %v1495_v1 = vrot.slane %v1215_v22, 5 }
 0x298   : > { %v18666_v33 = vpop.f32.mrf.mxu1 }
 0x299   : > { %26694 = vst [vmem:[#allocation20_spill] sm:$0xff] %v24027_v56  ;;  %v24029_v15 = vpop.f32.mrf.mxu0  ;;  %v6166_v19 = vadd.f32 %v18665_v20, %v6165_v42  ;;  %v26697_v56 = vld [vmem:[#allocation27_spill] sm:$0xff]  ;;  %v24042_v42 = vld [vmem:[%s21484_s26 + $0x198] sm:$0xff] }
 0x29a   : > { %v18667_v39 = vpop.f32.mrf.mxu1  ;;  %26698 = vst [vmem:[#allocation22_spill] sm:$0xff] %v24042_v42 }
 0x29b   : > { %v24031_v43 = vpop.f32.mrf.mxu0  ;;  %v18668_v51 = vadd.f32 %v18667_v39, %v18666_v33  ;;  %v24034_v53 = vadd.f32 %v6166_v19, %v23748_v63  ;;  %v26699_v63 = vrot.slane %v23825_v3, 5  ;;  %v1500_v39 = vrot.slane %v1495_v1, 4 }
 0x29c   : > { %v18669_v9 = vpop.f32.mrf.mxu1 }
 0x29d   : > { %26695 = vst [vmem:[#allocation26_spill] sm:$0xff] %v24034_v53  ;;  %v19783_v0 = vpop.f32.mrf.mxu0  ;;  %7905 = vmatmul.mubr.bf16.gmra.mxu1 %v26696_v55  ;;  %19870 = vmatmul.mubr.msk.bf16.gmra.mxu0 %vm2149_vm0, %v20946_v28  ;;  %v6169_v31 = vadd.f32 %v18668_v51, %v6168_v16  ;;  %v1494_v19 = vrot.slane %v26699_v63, 4  ;;  %v20952_v51 = vld [vmem:[#allocation2 + $0x320] ss:$12 sps:$4 sm:$0xff]  }
 0x29e   : > { %7912 = vmatprep.mubr.bf16.mxu1 %v26697_v56  ;;  %19873 = vmatprep.mubr.msk.bf16.mxu0 %vm2149_vm0, %v20951_v24  ;;  %v18670_v20 = vpop.f32.mrf.mxu1  ;;  %v26537_v0 = vrot.slane %v24042_v42, 5 }
 0x29f   : > { %v6213_v33 = vpop.f32.mrf.mxu0  ;;  %v18671_v53 = vadd.f32 %v18670_v20, %v18669_v9  ;;  %v24048_v34 = vadd.f32 %v6169_v31, %v23765_v49  ;;  %v24052_v24 = vsel %vm23204_vm7, %v1494_v19, %v1495_v1 }
 0x2a0   : > { %v18672_v22 = vpop.f32.mrf.mxu1  ;;  %v24058_v3 = vsel %vm23204_vm7, %v1500_v39, %v26537_v0  ;;  %v20960_v33 = vld [vmem:[#allocation2 + $0x1cc] ss:$12 sps:$4 sm:$0xff]   ;;  %1655 = vst [vmem:[#allocation2 + $0x330] sm:$0xff] %v24052_v24 }
 0x2a1   : > { %v19784_v16 = vpop.f32.mrf.mxu0  ;;  %v6174_v28 = vadd.f32 %v23960_v23, %v18671_v53  ;;  %1657 = vst [vmem:[#allocation2 + $0x33c] sm:$0xff] %v24058_v3  ;;  %v26700_v23 = vld [vmem:[#allocation25_spill] sm:$0xff] }
 0x2a2   : > { %v18673_v9 = vpop.f32.mrf.mxu1  ;;  %v26701_v16 = vld [vmem:[#allocation28_spill] sm:$0xff] }
 0x2a3   : > { %v6216_v31 = vpop.f32.mrf.mxu0  ;;  %v18674_v20 = vadd.f32 %v18673_v9, %v18672_v22  ;;  %v24068_v63 = vadd.f32 %v6174_v28, %v23738_v18  ;;  %v20958_v28 = vld [vmem:[#allocation2 + $0x1c8] ss:$12 sps:$4 sm:$0xff]  }
 0x2a4   : > { %v18675_v19 = vpop.f32.mrf.mxu1 }
 0x2a5   : > { %v19787_v39 = vpop.f32.mrf.mxu0  ;;  %7913 = vmatmul.mubr.bf16.gmra.mxu1 %v26700_v23  ;;  %19874 = vmatmul.mubr.msk.bf16.gmra.mxu0 %vm2149_vm0, %v20952_v51  ;;  %v6177_v53 = vadd.f32 %v23977_v14, %v18674_v20  ;;  %v20967_v14 = vld [vmem:[%s26497_s1 + $0x620] sm:$0xff]  }
 0x2a6   : > { %7920 = vmatprep.mubr.bf16.mxu1 %v26701_v16  ;;  %8795 = vmatprep.mubr.bf16.mxu0 %v20960_v33  ;;  %v18676_v0 = vpop.f32.mrf.mxu1  ;;  %v20963_v39 = vld [vmem:[#allocation2 + $0x1e4] ss:$12 sps:$4 sm:$0xff]  }
 0x2a7   : > { %v6229_v31 = vpop.f32.mrf.mxu0  ;;  %v18677_v49 = vadd.f32 %v18676_v0, %v18675_v19  ;;  %v24075_v1 = vadd.f32 %v6177_v53, %v23756_v60  ;;  %v26702_v60 = vld [vmem:[#allocation29_spill] sm:$0xff]  ;;  %v26703_v53 = vld [vmem:[#allocation8_spill] sm:$0xff] }
 0x2a8   : > { %v18678_v22 = vpop.f32.mrf.mxu1 }
 0x2a9   : > { %v19788_v18 = vpop.f32.mrf.mxu0  ;;  %v6182_v9 = vadd.f32 %v18677_v49, %v23990_v41 }
 0x2aa   : > { %v18679_v50 = vpop.f32.mrf.mxu1  ;;  %v20961_v18 = vld [vmem:[#allocation2 + $0x1e0] ss:$12 sps:$4 sm:$0xff]  }
 0x2ab   : > { %v6232_v42 = vpop.f32.mrf.mxu0  ;;  %v18680_v51 = vadd.f32 %v18679_v50, %v18678_v22  ;;  %v24082_v33 = vadd.f32 %v6182_v9, %v23779_v62  ;;  %v20972_v62 = vld [vmem:[%s26497_s1 + $0x618] sm:$0xff]  }
 0x2ac   : > { %v18681_v0 = vpop.f32.mrf.mxu1 }
 0x2ad   : > { %v18761_v20 = vpop.f32.mrf.mxu0  ;;  %7921 = vmatmul.mubr.bf16.gmra.mxu1 %v26702_v60  ;;  %8796 = vmatmul.mubr.bf16.vlgmr.msra.gmra.mxu0 %v20958_v28  ;;  %v6185_v19 = vadd.f32 %v18680_v51, %v24004_v11 }
 0x2ae   : > { %7928 = vmatprep.mubr.bf16.mxu1 %v26703_v53  ;;  %8803 = vmatprep.mubr.bf16.mxu0 %v20963_v39  ;;  %v18682_v41 = vpop.f32.mrf.mxu1 }
 0x2af   : > { %v18762_v42 = vpop.f32.mrf.mxu0  ;;  %19922 = vmatpush3.bf16.msra.mxu0 %v23972_v5  ;;  %v18683_v50 = vadd.f32 %v18682_v41, %v18681_v0  ;;  %v24094_v31 = vadd.f32 %v6185_v19, %v23794_v47  ;;  %v20985_v0 = vld [vmem:[%s26497_s1 + $0x610] sm:$0xff]   ;;  %v26704_v41 = vld [vmem:[#allocation7_spill] sm:$0xff] }
 0x2b0   : > { %v24088_v49 = vadd.f32 %v18762_v42, %v18761_v20  ;;  %19923 = vmatprep.subr.bf16.mxu0 %v20967_v14  ;;  %v18684_v22 = vpop.f32.mrf.mxu1  ;;  %v26705_v42 = vld [vmem:[#allocation6_spill] sm:$0xff] }
 0x2b1   : > { %v18764_v11 = vpop.f32.mrf.mxu0  ;;  %v6190_v28 = vadd.f32 %v23983_v21, %v18683_v50 }
 0x2b2   : > { %v18685_v9 = vpop.f32.mrf.mxu1 }
 0x2b3   : > { %v18765_v39 = vpop.f32.mrf.mxu0  ;;  %19924 = vmatpush3.bf16.msra.mxu0 %v20967_v14  ;;  %v18686_v5 = vadd.f32 %v18685_v9, %v18684_v22  ;;  %v24103_v20 = vadd.f32 %v6190_v28, %v23771_v12 }
 0x2b4   : > { %v24097_v51 = vadd.f32 %v18765_v39, %v18764_v11  ;;  %19925 = vmatprep.subr.bf16.mxu0 %v20972_v62  ;;  %v18687_v47 = vpop.f32.mrf.mxu1 }
 0x2b5   : > { %v18767_v19 = vpop.f32.mrf.mxu0  ;;  %7929 = vmatmul.mubr.bf16.gmra.mxu1 %v26704_v41  ;;  %8804 = vmatmul.mubr.bf16.gmra.mxu0 %v20961_v18  ;;  %v6193_v21 = vadd.f32 %v23998_v36, %v18686_v5  ;;  %v20995_v18 = vld [vmem:[%s26497_s1 + $0x608] sm:$0xff]  }
 0x2b6   : > { %7936 = vmatprep.mubr.bf16.mxu1 %v26705_v42  ;;  %8811 = vmatprep.mubr.bf16.mxu0 %v23395_v46  ;;  %v18688_v14 = vpop.f32.mrf.mxu1 }
 0x2b7   : > { %v18768_v50 = vpop.f32.mrf.mxu0  ;;  %19926 = vmatpush3.bf16.msra.mxu0 %v20972_v62  ;;  %v18689_v22 = vadd.f32 %v18688_v14, %v18687_v47  ;;  %v24112_v12 = vadd.f32 %v6193_v21, %v23787_v29  ;;  %v21006_v29 = vld [vmem:[%s26497_s1 + $0x600] sm:$0xff]   ;;  %v26706_v14 = vld [vmem:[#allocation16_spill] sm:$0xff] }
 0x2b8   : > { %v24109_v11 = vadd.f32 %v18768_v50, %v18767_v19  ;;  %19927 = vmatprep.subr.bf16.mxu0 %v20985_v0  ;;  %v18690_v28 = vpop.f32.mrf.mxu1 }
 0x2b9   : > { %v18770_v36 = vpop.f32.mrf.mxu0  ;;  %v6198_v9 = vadd.f32 %v18689_v22, %v24024_v13 }
 0x2ba   : > { %v18691_v39 = vpop.f32.mrf.mxu1 }
 0x2bb   : > { %v18771_v46 = vpop.f32.mrf.mxu0  ;;  %19928 = vmatpush3.bf16.msra.mxu0 %v20985_v0  ;;  %v18692_v5 = vadd.f32 %v18691_v39, %v18690_v28  ;;  %v24121_v47 = vadd.f32 %v6198_v9, %v23807_v25 }
 0x2bc   : > { %v24118_v62 = vadd.f32 %v18771_v46, %v18770_v36  ;;  %19929 = vmatprep.subr.bf16.mxu0 %v20995_v18  ;;  %v18693_v19 = vpop.f32.mrf.mxu1 }
 0x2bd   : > { %v18773_v21 = vpop.f32.mrf.mxu0  ;;  %7937 = vmatmul.mubr.bf16.gmra.mxu1 %v26706_v14  ;;  %8812 = vmatmul.mubr.bf16.gmra.mxu0 %v23398_v30  ;;  %v6201_v13 = vadd.f32 %v18692_v5, %v24031_v43 }
 0x2be   : > { %7944 = vmatprep.mubr.bf16.mxu1 %v23751_v45  ;;  %8819 = vmatprep.mubr.bf16.mxu0 %v23446_v54  ;;  %v18694_v0 = vpop.f32.mrf.mxu1 }
 0x2bf   : > { %v18774_v25 = vpop.f32.mrf.mxu0  ;;  %19930 = vmatpush3.bf16.msra.mxu0 %v20995_v18  ;;  %v18695_v50 = vadd.f32 %v18694_v0, %v18693_v19  ;;  %v24134_v28 = vadd.f32 %v6201_v13, %v23820_v4 }
 0x2c0   : > { %v24131_v22 = vadd.f32 %v18774_v25, %v18773_v21  ;;  %19931 = vmatprep.subr.bf16.mxu0 %v21006_v29  ;;  %v18696_v36 = vpop.f32.mrf.mxu1 }
 0x2c1   : > { %v18776_v9 = vpop.f32.mrf.mxu0  ;;  %v6206_v30 = vadd.f32 %v24017_v10, %v18695_v50 }
 0x2c2   : > { %v18697_v39 = vpop.f32.mrf.mxu1 }
 0x2c3   : > { %v18777_v43 = vpop.f32.mrf.mxu0  ;;  %19932 = vmatpush3.bf16.msra.mxu0 %v21006_v29  ;;  %v18698_v46 = vadd.f32 %v18697_v39, %v18696_v36  ;;  %v24140_v54 = vadd.f32 %v6206_v30, %v23799_v61 }
 0x2c4   : > { %v24137_v5 = vadd.f32 %v18777_v43, %v18776_v9  ;;  %v18699_v18 = vpop.f32.mrf.mxu1 }
 0x2c5   : > { %v18779_v19 = vpop.f32.mrf.mxu0  ;;  %7945 = vmatmul.mubr.bf16.gmra.mxu1 %v23753_v58  ;;  %8820 = vmatmul.mubr.bf16.gmra.mxu0 %v26678_v57  ;;  %v6209_v4 = vadd.f32 %v24029_v15, %v18698_v46 }
 0x2c6   : > { %7952 = vmatprep.mubr.bf16.mxu1 %v23782_v32  ;;  %8827 = vmatprep.mubr.bf16.mxu0 %v26679_v37  ;;  %v18700_v10 = vpop.f32.mrf.mxu1 }
 0x2c7   : > { %v18780_v29 = vpop.f32.mrf.mxu0  ;;  %v24150_v13 = vadd.f32 %v6209_v4, %v23814_v17 }
 0x2c8   : > { %v24147_v21 = vadd.f32 %v18780_v29, %v18779_v19  ;;  %v18702_v61 = vpop.f32.mrf.mxu1 }
 0x2c9   : > { %v18782_v0 = vpop.f32.mrf.mxu0 }
 0x2ca   : > { %v18703_v25 = vpop.f32.mrf.mxu1 }
 0x2cb   : > { %v18783_v50 = vpop.f32.mrf.mxu0 }
 0x2cc   : > { %v24152_v36 = vadd.f32 %v18783_v50, %v18782_v0  ;;  %v18705_v57 = vpop.f32.mrf.mxu1  ;;  %v20968_v0 = vld [vmem:[#allocation2 + $0x1d0] ss:$12 sps:$4 sm:$0xff]  }
 0x2cd   : > { %v18785_v9 = vpop.f32.mrf.mxu0  ;;  %7953 = vmatmul.mubr.bf16.gmra.mxu1 %v23784_v35  ;;  %8828 = vmatmul.mubr.bf16.gmra.mxu0 %v26684_v59 }
 0x2ce   : > { %7960 = vmatprep.mubr.bf16.mxu1 %v23809_v27  ;;  %8835 = vmatprep.mubr.bf16.mxu0 %v26685_v7  ;;  %v18706_v37 = vpop.f32.mrf.mxu1 }
 0x2cf   : > { %v18786_v15 = vpop.f32.mrf.mxu0 }
 0x2d0   : > { %v24158_v17 = vadd.f32 %v18786_v15, %v18785_v9  ;;  %v18708_v30 = vpop.f32.mrf.mxu1 }
 0x2d1   : > { %v18788_v39 = vpop.f32.mrf.mxu0 }
 0x2d2   : > { %v18709_v43 = vpop.f32.mrf.mxu1 }
 0x2d3   : > { %v18789_v46 = vpop.f32.mrf.mxu0  ;;  %v20969_v43 = vld [vmem:[#allocation2 + $0x1e8] ss:$12 sps:$4 sm:$0xff]  }
 0x2d4   : > { %v24160_v18 = vadd.f32 %v18789_v46, %v18788_v39  ;;  %v18711_v19 = vpop.f32.mrf.mxu1  ;;  %v20971_v46 = vld [vmem:[%s26497_s1 + $0x5b8] sm:$0xff]  }
 0x2d5   : > { %v18791_v4 = vpop.f32.mrf.mxu0  ;;  %7961 = vmatmul.mubr.bf16.gmra.mxu1 %v23811_v38  ;;  %8836 = vmatmul.mubr.bf16.gmra.mxu0 %v26692_v26 }
 0x2d6   : > { %7968 = vmatprep.mubr.bf16.mxu1 %v23834_v40  ;;  %8843 = vmatprep.mubr.bf16.mxu0 %v26693_v8  ;;  %v18712_v59 = vpop.f32.mrf.mxu1 }
 0x2d7   : > { %v18792_v7 = vpop.f32.mrf.mxu0  ;;  %v20973_v59 = vld [vmem:[#allocation2 + $0x200] ss:$12 sps:$4 sm:$0xff]  }
 0x2d8   : > { %v24166_v10 = vadd.f32 %v18792_v7, %v18791_v4  ;;  %v18714_v29 = vpop.f32.mrf.mxu1 }
 0x2d9   : > { %v18794_v61 = vpop.f32.mrf.mxu0 }
 0x2da   : > { %v18715_v25 = vpop.f32.mrf.mxu1 }
 0x2db   : > { %v18795_v50 = vpop.f32.mrf.mxu0 }
 0x2dc   : > { %v24168_v57 = vadd.f32 %v18795_v50, %v18794_v61  ;;  %v18717_v9 = vpop.f32.mrf.mxu1 }
 0x2dd   : > { %v18797_v37 = vpop.f32.mrf.mxu0  ;;  %7969 = vmatmul.mubr.bf16.gmra.mxu1 %v23836_v44  ;;  %8844 = vmatmul.mubr.bf16.gmra.mxu0 %v26696_v55 }
 0x2de   : > { %8851 = vmatprep.mubr.bf16.mxu0 %v26697_v56  ;;  %19889 = vmatprep.mubr.msk.bf16.mxu1 %vm2149_vm0, %v20968_v0  ;;  %v18718_v26 = vpop.f32.mrf.mxu1  ;;  %v20975_v56 = vld [vmem:[%s26497_s1 + $0x5f0] sm:$0xff]  }
 0x2df   : > { %v18798_v8 = vpop.f32.mrf.mxu0  ;;  %v20976_v0 = vld [vmem:[%s26497_s1 + $0x5b0] sm:$0xff]  }
 0x2e0   : > { %v24174_v15 = vadd.f32 %v18798_v8, %v18797_v37  ;;  %v18720_v30 = vpop.f32.mrf.mxu1  ;;  %v20974_v8 = vld [vmem:[#allocation2 + $0x218] ss:$12 sps:$4 sm:$0xff]  }
 0x2e1   : > { %v18800_v39 = vpop.f32.mrf.mxu0 }
 0x2e2   : > { %v18721_v19 = vpop.f32.mrf.mxu1 }
 0x2e3   : > { %v18801_v4 = vpop.f32.mrf.mxu0 }
 0x2e4   : > { %v24182_v55 = vadd.f32 %v18801_v4, %v18800_v39  ;;  %v19803_v29 = vpop.f32.mrf.mxu1 }
 0x2e5   : > { %v18803_v7 = vpop.f32.mrf.mxu0  ;;  %8852 = vmatmul.mubr.bf16.gmra.mxu0 %v26700_v23  ;;  %19890 = vmatmul.mubr.msk.bf16.vlgmr.msra.gmra.mxu1 %vm2149_vm0, %v20969_v43  ;;  %v7073_v61 = vadd.f32 %v19803_v29, %v24109_v11  ;;  %v20979_v23 = vld [vmem:[%s26497_s1 + $0x5e8] sm:$0xff]   ;;  %v20977_v43 = vld [vmem:[#allocation2 + $0x230] ss:$12 sps:$4 sm:$0xff]  }
 0x2e6   : > { %19148 = vmatpush3.bf16.msra.mxu1 %v20971_v46  ;;  %8859 = vmatprep.mubr.bf16.mxu0 %v26701_v16  ;;  %v7064_v50 = vpop.f32.mrf.mxu1 }
 0x2e7   : > { %v18804_v25 = vpop.f32.mrf.mxu0  ;;  %19893 = vmatprep.mubr.msk.bf16.mxu1 %vm2149_vm0, %v20973_v59  ;;  %19149 = vmatprep.subr.bf16.mxu1 %v20975_v56  ;;  %v24196_v9 = vadd.f32 %v7073_v61, %v23902_v48  ;;  %v7065_v16 = vadd.f32 %v24088_v49, %v7064_v50  ;;  %v20980_v48 = vld [vmem:[%s26497_s1 + $0x5a8] sm:$0xff]   ;;  %v20984_v61 = vld [vmem:[%s26497_s1 + $0x5a0] sm:$0xff]  }
 0x2e8   : > { %v24198_v11 = vadd.f32 %v18804_v25, %v18803_v7  ;;  %v19804_v26 = vpop.f32.mrf.mxu1 }
 0x2e9   : > { %v18806_v37 = vpop.f32.mrf.mxu0  ;;  %v24202_v30 = vadd.f32 %v7065_v16, %v23890_v52  ;;  %v7076_v39 = vadd.f32 %v19804_v26, %v24118_v62  ;;  %v20983_v52 = vld [vmem:[%s26497_s1 + $0x5e0] sm:$0xff]   ;;  %v26708_v16 = vld [vmem:[#allocation12_spill] sm:$0xff] }
 0x2ea   : > { %19150 = vmatpush3.bf16.msra.mxu1 %v20976_v0  ;;  %v7067_v19 = vpop.f32.mrf.mxu1  ;;  %v26707_v0 = vld [vmem:[#allocation14_spill] sm:$0xff] }
 0x2eb   : > { %v18807_v46 = vpop.f32.mrf.mxu0  ;;  %19151 = vmatprep.subr.bf16.mxu1 %v20979_v23  ;;  %v24209_v4 = vadd.f32 %v7076_v39, %v23923_v6  ;;  %v7068_v59 = vadd.f32 %v24097_v51, %v7067_v19  ;;  %v20978_v23 = vld [vmem:[#allocation2 + $0x248] ss:$12 sps:$4 sm:$0xff]  }
 0x2ec   : > { %v24211_v49 = vadd.f32 %v18807_v46, %v18806_v37  ;;  %v19807_v56 = vpop.f32.mrf.mxu1  ;;  %v26709_v46 = vld [vmem:[#allocation18_spill] sm:$0xff] }
 0x2ed   : > { %v18809_v62 = vpop.f32.mrf.mxu0  ;;  %8860 = vmatmul.mubr.bf16.gmra.mxu0 %v26702_v60  ;;  %19894 = vmatmul.mubr.msk.bf16.gmra.mxu1 %vm2149_vm0, %v20974_v8  ;;  %v24220_v7 = vadd.f32 %v7068_v59, %v23909_v2  ;;  %v7089_v6 = vadd.f32 %v19807_v56, %v24147_v21  ;;  %v20981_v8 = vld [vmem:[#allocation2 + $0x260] ss:$12 sps:$4 sm:$0xff]   ;;  %v26710_v56 = vld [vmem:[#allocation13_spill] sm:$0xff] }
 0x2ee   : > { %8867 = vmatprep.mubr.bf16.mxu0 %v26703_v53  ;;  %19897 = vmatprep.mubr.msk.bf16.mxu1 %vm2149_vm0, %v20977_v43  ;;  %v7080_v29 = vpop.f32.mrf.mxu1  ;;  %v20988_v53 = vld [vmem:[%s26497_s1 + $0x5d8] sm:$0xff]  }
 0x2ef   : > { %v18810_v51 = vpop.f32.mrf.mxu0  ;;  %19152 = vmatpush3.bf16.msra.mxu1 %v20980_v48  ;;  %v24229_v60 = vadd.f32 %v7089_v6, %v26707_v0  ;;  %v7081_v2 = vadd.f32 %v24131_v22, %v7080_v29  ;;  %v20989_v22 = vld [vmem:[%s26497_s1 + $0x598] sm:$0xff]   ;;  %v26711_v0 = vld [vmem:[#allocation9_spill] sm:$0xff] }
 0x2f0   : > { %v24231_v25 = vadd.f32 %v18810_v51, %v18809_v62  ;;  %19153 = vmatprep.subr.bf16.mxu1 %v20983_v52  ;;  %v19808_v50 = vpop.f32.mrf.mxu1 }
 0x2f1   : > { %v18812_v21 = vpop.f32.mrf.mxu0  ;;  %v24238_v37 = vadd.f32 %v7081_v2, %v26708_v16  ;;  %v7092_v26 = vadd.f32 %v19808_v50, %v24152_v36  ;;  %v20992_v36 = vld [vmem:[%s26497_s1 + $0x5d0] sm:$0xff]   ;;  %v20982_v50 = vld [vmem:[#allocation2 + $0x278] ss:$12 sps:$4 sm:$0xff]  }
 0x2f2   : > { %v7083_v43 = vpop.f32.mrf.mxu1 }
 0x2f3   : > { %v18813_v39 = vpop.f32.mrf.mxu0  ;;  %19154 = vmatpush3.bf16.msra.mxu1 %v20984_v61  ;;  %v24245_v19 = vadd.f32 %v7092_v26, %v26709_v46  ;;  %v7084_v59 = vadd.f32 %v24137_v5, %v7083_v43  ;;  %v20993_v61 = vld [vmem:[%s26497_s1 + $0x590] sm:$0xff]  }
 0x2f4   : > { %v24247_v48 = vadd.f32 %v18813_v39, %v18812_v21  ;;  %19155 = vmatprep.subr.bf16.mxu1 %v20988_v53  ;;  %v19811_v62 = vpop.f32.mrf.mxu1 }
 0x2f5   : > { %v18815_v52 = vpop.f32.mrf.mxu0  ;;  %8868 = vmatmul.mubr.bf16.gmra.mxu0 %v26704_v41  ;;  %19898 = vmatmul.mubr.msk.bf16.gmra.mxu1 %vm2149_vm0, %v20978_v23  ;;  %v24256_v6 = vadd.f32 %v7084_v59, %v26710_v56  ;;  %v7105_v51 = vadd.f32 %v19811_v62, %v24166_v10  ;;  %v26712_v23 = vld [vmem:[#allocation17_spill] sm:$0xff]  ;;  %v26714_v56 = vld [vmem:[#allocation19_spill] sm:$0xff] }
 0x2f6   : > { %8875 = vmatprep.mubr.bf16.mxu0 %v26705_v42  ;;  %19901 = vmatprep.mubr.msk.bf16.mxu1 %vm2149_vm0, %v20981_v8  ;;  %v7096_v29 = vpop.f32.mrf.mxu1  ;;  %v20997_v42 = vld [vmem:[%s26497_s1 + $0x5c8] sm:$0xff]   ;;  %v20986_v8 = vld [vmem:[#allocation2 + $0x290] ss:$12 sps:$4 sm:$0xff]  }
 0x2f7   : > { %v18816_v5 = vpop.f32.mrf.mxu0  ;;  %19156 = vmatpush3.bf16.msra.mxu1 %v20989_v22  ;;  %v24265_v41 = vadd.f32 %v7105_v51, %v26711_v0  ;;  %v7097_v53 = vadd.f32 %v24158_v17, %v7096_v29  ;;  %v20998_v17 = vld [vmem:[%s26497_s1 + $0x588] sm:$0xff]  }
 0x2f8   : > { %v18817_v2 = vadd.f32 %v18816_v5, %v18815_v52  ;;  %19157 = vmatprep.subr.bf16.mxu1 %v20992_v36  ;;  %v19812_v21 = vpop.f32.mrf.mxu1  ;;  %v26713_v22 = vld [vmem:[#allocation20_spill] sm:$0xff]  ;;  %v21001_v52 = vld [vmem:[%s26497_s1 + $0x5c0] sm:$0xff]  }
 0x2f9   : > { %v18818_v10 = vpop.f32.mrf.mxu0  ;;  %v24272_v16 = vadd.f32 %v7097_v53, %v26712_v23  ;;  %v7108_v26 = vadd.f32 %v19812_v21, %v24168_v57  ;;  %v20990_v23 = vld [vmem:[#allocation2 + $0x2c0] ss:$12 sps:$4 sm:$0xff]  }
 0x2fa   : > { %v7099_v43 = vpop.f32.mrf.mxu1 }
 0x2fb   : > { %v18819_v39 = vpop.f32.mrf.mxu0  ;;  %19158 = vmatpush3.bf16.msra.mxu1 %v20993_v61  ;;  %v24279_v46 = vadd.f32 %v7108_v26, %v26713_v22  ;;  %v7100_v36 = vadd.f32 %v24160_v18, %v7099_v43  ;;  %v21002_v61 = vld [vmem:[%s26497_s1 + $0x580] sm:$0xff]  }
 0x2fc   : > { %v18820_v59 = vadd.f32 %v18819_v39, %v18818_v10  ;;  %19159 = vmatprep.subr.bf16.mxu1 %v20997_v42  ;;  %v19815_v62 = vpop.f32.mrf.mxu1  ;;  %v20987_v10 = vld [vmem:[#allocation2 + $0x2a8] ss:$12 sps:$4 sm:$0xff]  }
 0x2fd   : > { %v18821_v57 = vpop.f32.mrf.mxu0  ;;  %8876 = vmatmul.mubr.bf16.gmra.mxu0 %v26706_v14  ;;  %19902 = vmatmul.mubr.msk.bf16.gmra.mxu1 %vm2149_vm0, %v20982_v50  ;;  %v24288_v51 = vadd.f32 %v7100_v36, %v26714_v56  ;;  %v7121_v5 = vadd.f32 %v19815_v62, %v24198_v11  ;;  %v20991_v56 = vld [vmem:[#allocation2 + $0x2d8] ss:$12 sps:$4 sm:$0xff]  }
 0x2fe   : > { %8883 = vmatprep.mubr.bf16.mxu0 %v23751_v45  ;;  %19905 = vmatprep.mubr.msk.bf16.mxu1 %vm2149_vm0, %v20986_v8  ;;  %v7112_v29 = vpop.f32.mrf.mxu1  ;;  %v26715_v45 = vld [vmem:[#allocation26_spill] sm:$0xff] }
 0x2ff   : > { %v18822_v18 = vpop.f32.mrf.mxu0  ;;  %19160 = vmatpush3.bf16.msra.mxu1 %v20998_v17  ;;  %v24297_v14 = vadd.f32 %v7121_v5, %v24068_v63  ;;  %v7113_v53 = vadd.f32 %v24174_v15, %v7112_v29 }
 0x300   : > { %v18823_v0 = vadd.f32 %v18822_v18, %v18821_v57  ;;  %19161 = vmatprep.subr.bf16.mxu1 %v21001_v52  ;;  %v19816_v11 = vpop.f32.mrf.mxu1 }
 0x301   : > { %v18824_v42 = vpop.f32.mrf.mxu0  ;;  %v24301_v21 = vadd.f32 %v7113_v53, %v26715_v45  ;;  %v7124_v50 = vadd.f32 %v19816_v11, %v24211_v49 }
 0x302   : > { %v7115_v8 = vpop.f32.mrf.mxu1 }
 0x303   : > { %v18825_v26 = vpop.f32.mrf.mxu0  ;;  %19162 = vmatpush3.bf16.msra.mxu1 %v21002_v61  ;;  %v24305_v39 = vadd.f32 %v7124_v50, %v24075_v1  ;;  %v7116_v43 = vadd.f32 %v24182_v55, %v7115_v8  ;;  %v20996_v50 = vld [vmem:[#allocation2 + $0x308] ss:$12 sps:$4 sm:$0xff]  }
 0x304   : > { %v18826_v63 = vadd.f32 %v18825_v26, %v18824_v42  ;;  %v19819_v17 = vpop.f32.mrf.mxu1 }
 0x305   : > { %v18827_v15 = vpop.f32.mrf.mxu0  ;;  %8884 = vmatmul.mubr.bf16.gmra.mxu0 %v23753_v58  ;;  %19906 = vmatmul.mubr.msk.bf16.gmra.mxu1 %vm2149_vm0, %v20987_v10  ;;  %v24311_v22 = vadd.f32 %v7116_v43, %v24048_v34  ;;  %v7137_v49 = vadd.f32 %v19819_v17, %v18817_v2  ;;  %v20994_v2 = vld [vmem:[#allocation2 + $0x2f0] ss:$12 sps:$4 sm:$0xff]  }
 0x306   : > { %8891 = vmatprep.mubr.bf16.mxu0 %v23782_v32  ;;  %19909 = vmatprep.mubr.msk.bf16.mxu1 %vm2149_vm0, %v20990_v23  ;;  %v7128_v1 = vpop.f32.mrf.mxu1 }
 0x307   : > { %v18828_v36 = vpop.f32.mrf.mxu0  ;;  %v24316_v52 = vadd.f32 %v7137_v49, %v24103_v20  ;;  %v7129_v57 = vadd.f32 %v24231_v25, %v7128_v1  ;;  %v21005_v1 = vld [vmem:[#allocation2 + $0x1e4] ss:$12 sps:$4 sm:$0xff]  }
 0x308   : > { %v18829_v55 = vadd.f32 %v18828_v36, %v18827_v15  ;;  %v19820_v58 = vpop.f32.mrf.mxu1 }
 0x309   : > { %v18830_v62 = vpop.f32.mrf.mxu0  ;;  %v24320_v5 = vadd.f32 %v7129_v57, %v24082_v33  ;;  %v7140_v34 = vadd.f32 %v19820_v58, %v18820_v59 }
 0x30a   : > { %v7131_v32 = vpop.f32.mrf.mxu1 }
 0x30b   : > { %v18831_v18 = vpop.f32.mrf.mxu0  ;;  %v24323_v29 = vadd.f32 %v7140_v34, %v24112_v12  ;;  %v7132_v20 = vadd.f32 %v24247_v48, %v7131_v32  ;;  %v21003_v34 = vld [vmem:[#allocation2 + $0x1e0] ss:$12 sps:$4 sm:$0xff]  }
 0x30c   : > { %v18832_v61 = vadd.f32 %v18831_v18, %v18830_v62  ;;  %v19823_v42 = vpop.f32.mrf.mxu1  ;;  %v21010_v18 = vld [vmem:[#allocation2 + $0x1e8] ss:$12 sps:$4 sm:$0xff]  }
 0x30d   : > { %v18833_v53 = vpop.f32.mrf.mxu0  ;;  %8892 = vmatmul.mubr.bf16.gmra.mxu0 %v23784_v35  ;;  %19910 = vmatmul.mubr.msk.bf16.gmra.mxu1 %vm2149_vm0, %v20991_v56  ;;  %v24329_v25 = vadd.f32 %v7132_v20, %v24094_v31  ;;  %v7153_v33 = vadd.f32 %v19823_v42, %v18829_v55  ;;  %v20999_v31 = vld [vmem:[#allocation2 + $0x320] ss:$12 sps:$4 sm:$0xff]  }
 0x30e   : > { %8899 = vmatprep.mubr.bf16.mxu0 %v23809_v27  ;;  %19913 = vmatprep.mubr.msk.bf16.mxu1 %vm2149_vm0, %v20994_v2  ;;  %v7144_v12 = vpop.f32.mrf.mxu1  ;;  %v21009_v2 = vld [vmem:[#allocation2 + $0x1fc] ss:$12 sps:$4 sm:$0xff]  }
 0x30f   : > { %v18834_v59 = vpop.f32.mrf.mxu0  ;;  %v24334_v11 = vadd.f32 %v7153_v33, %v24140_v54  ;;  %v7145_v48 = vadd.f32 %v18823_v0, %v7144_v12 }
 0x310   : > { %v19824_v45 = vpop.f32.mrf.mxu1 }
 0x311   : > { %v18836_v10 = vpop.f32.mrf.mxu0  ;;  %v24337_v35 = vadd.f32 %v7145_v48, %v24121_v47  ;;  %v7156_v23 = vadd.f32 %v19824_v45, %v18832_v61  ;;  %v21011_v45 = vld [vmem:[#allocation2 + $0x200] ss:$12 sps:$4 sm:$0xff]  }
 0x312   : > { %v7147_v8 = vpop.f32.mrf.mxu1  ;;  %v21007_v10 = vld [vmem:[#allocation2 + $0x1f8] ss:$12 sps:$4 sm:$0xff]  }
 0x313   : > { %v18837_v26 = vpop.f32.mrf.mxu0  ;;  %v24340_v27 = vadd.f32 %v7156_v23, %v24150_v13  ;;  %v7148_v43 = vadd.f32 %v18826_v63, %v7147_v8  ;;  %v21000_v13 = vld [vmem:[#allocation2 + $0x338] ss:$12 sps:$4 sm:$0xff]  }
 0x314   : > { %v19827_v17 = vpop.f32.mrf.mxu1  ;;  %v21015_v23 = vld [vmem:[#allocation2 + $0x218] ss:$12 sps:$4 sm:$0xff]  }
 0x315   : > { %v18839_v15 = vpop.f32.mrf.mxu0  ;;  %8900 = vmatmul.mubr.bf16.gmra.mxu0 %v23811_v38  ;;  %19914 = vmatmul.mubr.msk.bf16.gmra.mxu1 %vm2149_vm0, %v20996_v50  ;;  %v24345_v54 = vadd.f32 %v7148_v43, %v24134_v28  ;;  %v26716_v38 = vcombine.high %v24052_v24, %v24058_v3  ;;  %v21014_v50 = vld [vmem:[#allocation2 + $0x214] ss:$12 sps:$4 sm:$0xff]  }
 0x316   : > { %8907 = vmatprep.mubr.bf16.mxu0 %v23834_v40  ;;  %19917 = vmatprep.mubr.msk.bf16.mxu1 %vm2149_vm0, %v20999_v31  ;;  %v7160_v0 = vpop.f32.mrf.mxu1 }
 0x317   : > { %v18840_v47 = vpop.f32.mrf.mxu0 }
 0x318   : > { %v19828_v36 = vpop.f32.mrf.mxu1 }
 0x319   : > { %v18842_v49 = vpop.f32.mrf.mxu0  ;;  %v21012_v36 = vld [vmem:[#allocation2 + $0x210] ss:$12 sps:$4 sm:$0xff]  }
 0x31a   : > { %v7163_v55 = vpop.f32.mrf.mxu1 }
 0x31b   : > { %v18843_v63 = vpop.f32.mrf.mxu0  ;;  %v21019_v55 = vld [vmem:[#allocation2 + $0x22c] ss:$12 sps:$4 sm:$0xff]  }
 0x31c   : > { %v19831_v62 = vpop.f32.mrf.mxu1 }
 0x31d   : > { %v18845_v57 = vpop.f32.mrf.mxu0  ;;  %8908 = vmatmul.mubr.bf16.gmra.mxu0 %v23836_v44  ;;  %19918 = vmatmul.mubr.msk.bf16.gmra.mxu1 %vm2149_vm0, %v21000_v13  ;;  %v26717_v44 = vcombine.low %v24052_v24, %v24058_v3  ;;  %v21016_v13 = vld [vmem:[#allocation2 + $0x230] ss:$12 sps:$4 sm:$0xff]  }
 0x31e   : > { %8915 = vmatprep.mubr.bf16.mxu0 %v26716_v38  ;;  %9742 = vmatprep.mubr.bf16.mxu1 %v21005_v1  ;;  %v7176_v28 = vpop.f32.mrf.mxu1  ;;  %v21023_v57 = vld [vmem:[#allocation2 + $0x248] ss:$12 sps:$4 sm:$0xff]  }
 0x31f   : > { %v18846_v40 = vpop.f32.mrf.mxu0 }
 0x320   : > { %v19832_v56 = vpop.f32.mrf.mxu1 }
 0x321   : > { %v18848_v58 = vpop.f32.mrf.mxu0 }
 0x322   : > { %v7179_v61 = vpop.f32.mrf.mxu1 }
 0x323   : > { %v18849_v32 = vpop.f32.mrf.mxu0 }
 0x324   : > { %v18895_v53 = vpop.f32.mrf.mxu1 }
 0x325   : > { %v18851_v20 = vpop.f32.mrf.mxu0  ;;  %8916 = vmatmul.mubr.bf16.gmra.mxu0 %v26717_v44  ;;  %9743 = vmatmul.mubr.bf16.vlgmr.msra.gmra.mxu1 %v21003_v34  ;;  %v21017_v44 = vld [vmem:[#allocation2 + $0x228] ss:$12 sps:$4 sm:$0xff]  }
 0x326   : > { %9750 = vmatprep.mubr.bf16.mxu1 %v21009_v2  ;;  %19933 = vmatprep.mubr.msk.bf16.mxu0 %vm2149_vm0, %v21010_v18  ;;  %v18896_v33 = vpop.f32.mrf.mxu1 }
 0x327   : > { %v18852_v42 = vpop.f32.mrf.mxu0  ;;  %v18897_v59 = vadd.f32 %v18896_v33, %v18895_v53 }
 0x328   : > { %v18898_v48 = vpop.f32.mrf.mxu1  ;;  %v21024_v42 = vld [vmem:[#allocation2 + $0x260] ss:$12 sps:$4 sm:$0xff]  }
 0x329   : > { %v18854_v12 = vpop.f32.mrf.mxu0 }
 0x32a   : > { %v18899_v26 = vpop.f32.mrf.mxu1  ;;  %v21031_v12 = vld [vmem:[#allocation2 + $0x278] ss:$12 sps:$4 sm:$0xff]  }
 0x32b   : > { %v18855_v31 = vpop.f32.mrf.mxu0  ;;  %v18900_v8 = vadd.f32 %v18899_v26, %v18898_v48 }
 0x32c   : > { %v18901_v43 = vpop.f32.mrf.mxu1 }
 0x32d   : > { %v19847_v15 = vpop.f32.mrf.mxu0  ;;  %9751 = vmatmul.mubr.bf16.gmra.mxu1 %v21007_v10  ;;  %19934 = vmatmul.mubr.msk.bf16.vlgmr.msra.gmra.mxu0 %vm2149_vm0, %v21011_v45 }
 0x32e   : > { %9758 = vmatprep.mubr.bf16.mxu1 %v21014_v50  ;;  %19937 = vmatprep.mubr.msk.bf16.mxu0 %vm2149_vm0, %v21015_v23  ;;  %v18902_v24 = vpop.f32.mrf.mxu1 }
 0x32f   : > { %v8011_v3 = vpop.f32.mrf.mxu0  ;;  %v18903_v17 = vadd.f32 %v18902_v24, %v18901_v43 }
 0x330   : > { %v8012_v47 = vadd.f32 %v18897_v59, %v8011_v3  ;;  %v18904_v0 = vpop.f32.mrf.mxu1  ;;  %v21022_v59 = vld [vmem:[#allocation2 + $0x244] ss:$12 sps:$4 sm:$0xff]  }
 0x331   : > { %v19848_v49 = vpop.f32.mrf.mxu0  ;;  %v8020_v1 = vadd.f32 %v19847_v15, %v18903_v17  ;;  %v21032_v3 = vld [vmem:[#allocation2 + $0x290] ss:$12 sps:$4 sm:$0xff]  }
 0x332   : > { %v24361_v63 = vadd.f32 %v8012_v47, %v24202_v30  ;;  %v18905_v62 = vpop.f32.mrf.mxu1  ;;  %v21027_v47 = vld [vmem:[#allocation2 + $0x25c] ss:$12 sps:$4 sm:$0xff]  }
 0x333   : > { %v8014_v38 = vpop.f32.mrf.mxu0  ;;  %v18906_v40 = vadd.f32 %v18905_v62, %v18904_v0  ;;  %v24364_v58 = vadd.f32 %v8020_v1, %v24196_v9  ;;  %v21039_v0 = vld [vmem:[#allocation2 + $0x2a8] ss:$12 sps:$4 sm:$0xff]  }
 0x334   : > { %v8015_v28 = vadd.f32 %v18900_v8, %v8014_v38 }
 0x335   : > { %v18907_v56 = vpop.f32.mrf.mxu1  ;;  %v19851_v34 = vpop.f32.mrf.mxu0  ;;  %9759 = vmatmul.mubr.bf16.gmra.mxu1 %v21012_v36  ;;  %19938 = vmatmul.mubr.msk.bf16.gmra.mxu0 %vm2149_vm0, %v21016_v13  ;;  %v8023_v2 = vadd.f32 %v19848_v49, %v18906_v40 }
 0x336   : > { %v24368_v18 = vadd.f32 %v8015_v28, %v24220_v7  ;;  %9766 = vmatprep.mubr.bf16.mxu1 %v21019_v55  ;;  %19941 = vmatprep.mubr.msk.bf16.mxu0 %vm2149_vm0, %v21023_v57 }
 0x337   : > { %v18908_v30 = vpop.f32.mrf.mxu1  ;;  %v8027_v32 = vpop.f32.mrf.mxu0  ;;  %v24372_v20 = vadd.f32 %v8023_v2, %v24209_v4  ;;  %v21040_v2 = vld [vmem:[#allocation2 + $0x2c0] ss:$12 sps:$4 sm:$0xff]  }
 0x338   : > { %v18909_v61 = vadd.f32 %v18908_v30, %v18907_v56 }
 0x339   : > { %v18910_v9 = vpop.f32.mrf.mxu1  ;;  %v19852_v53 = vpop.f32.mrf.mxu0 }
 0x33a   : > { %v8028_v33 = vadd.f32 %v18909_v61, %v8027_v32  ;;  %v21030_v32 = vld [vmem:[#allocation2 + $0x274] ss:$12 sps:$4 sm:$0xff]   ;;  %v21047_v61 = vld [vmem:[#allocation2 + $0x2d8] ss:$12 sps:$4 sm:$0xff]  }
 0x33b   : > { %v18911_v48 = vpop.f32.mrf.mxu1  ;;  %v8030_v10 = vpop.f32.mrf.mxu0 }
 0x33c   : > { %v24375_v7 = vadd.f32 %v8028_v33, %v24238_v37  ;;  %v18912_v45 = vadd.f32 %v18911_v48, %v18910_v9  ;;  %v21020_v37 = vld [vmem:[#allocation2 + $0x240] ss:$12 sps:$4 sm:$0xff]  }
 0x33d   : > { %v18913_v50 = vpop.f32.mrf.mxu1  ;;  %v19855_v23 = vpop.f32.mrf.mxu0  ;;  %9767 = vmatmul.mubr.bf16.gmra.mxu1 %v21017_v44  ;;  %19942 = vmatmul.mubr.msk.bf16.gmra.mxu0 %vm2149_vm0, %v21024_v42 }
 0x33e   : > { %v8031_v4 = vadd.f32 %v18912_v45, %v8030_v10  ;;  %9774 = vmatprep.mubr.bf16.mxu1 %v21022_v59  ;;  %19945 = vmatprep.mubr.msk.bf16.mxu0 %vm2149_vm0, %v21031_v12 }
 0x33f   : > { %v18914_v31 = vpop.f32.mrf.mxu1  ;;  %v8043_v26 = vpop.f32.mrf.mxu0 }
 0x340   : > { %v24380_v8 = vadd.f32 %v8031_v4, %v24256_v6  ;;  %v18915_v43 = vadd.f32 %v18914_v31, %v18913_v50  ;;  %v21028_v4 = vld [vmem:[#allocation2 + $0x270] ss:$12 sps:$4 sm:$0xff]  }
 0x341   : > { %v18916_v15 = vpop.f32.mrf.mxu1  ;;  %v19856_v24 = vpop.f32.mrf.mxu0  ;;  %v21048_v31 = vld [vmem:[#allocation2 + $0x2f0] ss:$12 sps:$4 sm:$0xff]  }
 0x342   : > { %v8036_v17 = vadd.f32 %v19851_v34, %v18915_v43  ;;  %v21035_v43 = vld [vmem:[#allocation2 + $0x28c] ss:$12 sps:$4 sm:$0xff]  }
 0x343   : > { %v18917_v49 = vpop.f32.mrf.mxu1  ;;  %v8046_v36 = vpop.f32.mrf.mxu0 }
 0x344   : > { %v18918_v13 = vadd.f32 %v18917_v49, %v18916_v15  ;;  %v24383_v1 = vadd.f32 %v8036_v17, %v24229_v60  ;;  %v21025_v60 = vld [vmem:[#allocation2 + $0x258] ss:$12 sps:$4 sm:$0xff]  }
 0x345   : > { %v18919_v55 = vpop.f32.mrf.mxu1  ;;  %v24385_v57 = vpop.f32.mrf.mxu0  ;;  %9775 = vmatmul.mubr.bf16.gmra.mxu1 %v21020_v37  ;;  %19946 = vmatmul.mubr.msk.bf16.gmra.mxu0 %vm2149_vm0, %v21032_v3 }
 0x346   : > { %v8039_v6 = vadd.f32 %v19852_v53, %v18918_v13  ;;  %9782 = vmatprep.mubr.bf16.mxu1 %v21027_v47  ;;  %19949 = vmatprep.mubr.msk.bf16.mxu0 %vm2149_vm0, %v21039_v0 }
 0x347   : > { %v18920_v62 = vpop.f32.mrf.mxu1  ;;  %v8059_v38 = vpop.f32.mrf.mxu0 }
 0x348   : > { %v18921_v40 = vadd.f32 %v18920_v62, %v18919_v55  ;;  %v24390_v28 = vadd.f32 %v8039_v6, %v24245_v19 }
 0x349   : > { %v18922_v56 = vpop.f32.mrf.mxu1  ;;  %v24392_v34 = vpop.f32.mrf.mxu0 }
 0x34a   : > { %v8044_v30 = vadd.f32 %v18921_v40, %v8043_v26  ;;  %v21038_v40 = vld [vmem:[#allocation2 + $0x2a4] ss:$12 sps:$4 sm:$0xff]  }
 0x34b   : > { %v18923_v9 = vpop.f32.mrf.mxu1  ;;  %v8062_v44 = vpop.f32.mrf.mxu0 }
 0x34c   : > { %v18924_v53 = vadd.f32 %v18923_v9, %v18922_v56  ;;  %v24395_v42 = vadd.f32 %v8044_v30, %v24272_v16 }
 0x34d   : > { %v18925_v33 = vpop.f32.mrf.mxu1  ;;  %v24397_v59 = vpop.f32.mrf.mxu0  ;;  %9783 = vmatmul.mubr.bf16.gmra.mxu1 %v21025_v60  ;;  %19950 = vmatmul.mubr.msk.bf16.gmra.mxu0 %vm2149_vm0, %v21040_v2 }
 0x34e   : > { %v8047_v19 = vadd.f32 %v18924_v53, %v8046_v36  ;;  %9790 = vmatprep.mubr.bf16.mxu1 %v21030_v32  ;;  %19953 = vmatprep.mubr.msk.bf16.mxu0 %vm2149_vm0, %v21047_v61 }
 0x34f   : > { %v18926_v12 = vpop.f32.mrf.mxu1  ;;  %v24401_v48 = vpop.f32.mrf.mxu0 }
 0x350   : > { %v18927_v10 = vadd.f32 %v18926_v12, %v18925_v33  ;;  %v24404_v45 = vadd.f32 %v8047_v19, %v24288_v51 }
 0x351   : > { %v18928_v50 = vpop.f32.mrf.mxu1  ;;  %v24406_v16 = vpop.f32.mrf.mxu0 }
 0x352   : > { %v8052_v26 = vadd.f32 %v19855_v23, %v18927_v10  ;;  %v21036_v10 = vld [vmem:[#allocation2 + $0x2a0] ss:$12 sps:$4 sm:$0xff]  }
 0x353   : > { %v18929_v15 = vpop.f32.mrf.mxu1  ;;  %v24408_v37 = vpop.f32.mrf.mxu0 }
 0x354   : > { %v18930_v3 = vadd.f32 %v18929_v15, %v18928_v50  ;;  %v24411_v17 = vadd.f32 %v8052_v26, %v24265_v41  ;;  %v21033_v41 = vld [vmem:[#allocation2 + $0x288] ss:$12 sps:$4 sm:$0xff]  }
 0x355   : > { %v18931_v47 = vpop.f32.mrf.mxu1  ;;  %v24413_v0 = vpop.f32.mrf.mxu0  ;;  %9791 = vmatmul.mubr.bf16.gmra.mxu1 %v21028_v4  ;;  %19954 = vmatmul.mubr.msk.bf16.gmra.mxu0 %vm2149_vm0, %v21048_v31  ;;  %v21057_v26 = vld [vmem:[%s26498_s2 + $0xb0] sm:$0xff]  }
 0x356   : > { %v8055_v51 = vadd.f32 %v19856_v24, %v18930_v3  ;;  %9798 = vmatprep.mubr.bf16.mxu1 %v21035_v43 }
 0x357   : > { %v18932_v49 = vpop.f32.mrf.mxu1  ;;  %v24416_v36 = vpop.f32.mrf.mxu0 }
 0x358   : > { %v18933_v23 = vadd.f32 %v18932_v49, %v18931_v47  ;;  %v24419_v13 = vadd.f32 %v8055_v51, %v24279_v46  ;;  %v21052_v46 = vld [vmem:[%s26498_s2 + $0xb8] sm:$0xff]   ;;  %v21062_v49 = vld [vmem:[%s26498_s2 + $0xa8] sm:$0xff]  }
 0x359   : > { %v18934_v55 = vpop.f32.mrf.mxu1  ;;  %v24421_v6 = vpop.f32.mrf.mxu0  ;;  %20029 = vmatprep.subr.bf16.mxu1 %v21052_v46 }
 0x35a   : > { %v8060_v62 = vadd.f32 %v18933_v23, %v8059_v38  ;;  %v21053_v38 = vld [vmem:[%s26498_s2 + $0x38] sm:$0xff]   ;;  %20030 = vmatpush3.bf16.msra.mxu1 %v21052_v46 }
 0x35b   : > { %v18935_v56 = vpop.f32.mrf.mxu1  ;;  %v24423_v60 = vpop.f32.mrf.mxu0  ;;  %19965 = vmatprep.subr.bf16.mxu0 %v21053_v38  ;;  %20031 = vmatprep.subr.bf16.mxu1 %v21057_v26 }
 0x35c   : > { %v18936_v2 = vadd.f32 %v18935_v56, %v18934_v55  ;;  %v24426_v24 = vadd.f32 %v8060_v62, %v24301_v21  ;;  %19966 = vmatpush3.bf16.msra.mxu0 %v21053_v38  ;;  %v21046_v56 = vld [vmem:[#allocation2 + $0x2d4] ss:$12 sps:$4 sm:$0xff]  }
 0x35d   : > { %v18937_v30 = vpop.f32.mrf.mxu1  ;;  %v19871_v32 = vpop.f32.mrf.mxu0  ;;  %9799 = vmatmul.mubr.bf16.gmra.mxu1 %v21033_v41 }
 0x35e   : > { %v8063_v61 = vadd.f32 %v18936_v2, %v8062_v44  ;;  %9806 = vmatprep.mubr.bf16.mxu1 %v21038_v40  ;;  %v21043_v44 = vld [vmem:[#allocation2 + $0x2bc] ss:$12 sps:$4 sm:$0xff]   ;;  %20032 = vmatpush3.bf16.msra.mxu1 %v21057_v26  ;;  %v21041_v40 = vld [vmem:[#allocation2 + $0x2b8] ss:$12 sps:$4 sm:$0xff]  }
 0x35f   : > { %v18938_v9 = vpop.f32.mrf.mxu1  ;;  %v8107_v53 = vpop.f32.mrf.mxu0  ;;  %20033 = vmatprep.subr.bf16.mxu1 %v21062_v49 }
 0x360   : > { %v18939_v33 = vadd.f32 %v18938_v9, %v18937_v30  ;;  %v24435_v21 = vadd.f32 %v8063_v61, %v24311_v22 }
 0x361   : > { %v18940_v19 = vpop.f32.mrf.mxu1  ;;  %v19872_v12 = vpop.f32.mrf.mxu0 }
 0x362   : > { %v8068_v50 = vadd.f32 %v24385_v57, %v18939_v33  ;;  %20034 = vmatpush3.bf16.msra.mxu1 %v21062_v49  ;;  %v21068_v33 = vld [vmem:[%s26498_s2 + $0x98] sm:$0xff]  }
 0x363   : > { %v18941_v4 = vpop.f32.mrf.mxu1  ;;  %v8110_v31 = vpop.f32.mrf.mxu0 }
 0x364   : > { %v18942_v43 = vadd.f32 %v18941_v4, %v18940_v19  ;;  %v24442_v15 = vadd.f32 %v8068_v50, %v24297_v14  ;;  %v21058_v14 = vld [vmem:[%s26498_s2 + $0x30] sm:$0xff]   ;;  %v21051_v4 = vld [vmem:[#allocation2 + $0x2ec] ss:$12 sps:$4 sm:$0xff]   ;;  %v1219_v31 = vld [vmem:[%s21484_s26 + $0x1a4] sm:$0xff] }
 0x365   : > { %v18943_v22 = vpop.f32.mrf.mxu1  ;;  %v19875_v3 = vpop.f32.mrf.mxu0  ;;  %9807 = vmatmul.mubr.bf16.gmra.mxu1 %v21036_v10  ;;  %19967 = vmatprep.subr.bf16.mxu0 %v21058_v14 }
 0x366   : > { %v8071_v47 = vadd.f32 %v24392_v34, %v18942_v43  ;;  %9814 = vmatprep.mubr.bf16.mxu1 %v21043_v44  ;;  %19968 = vmatpush3.bf16.msra.mxu0 %v21058_v14 }
 0x367   : > { %v18944_v57 = vpop.f32.mrf.mxu1  ;;  %v8123_v51 = vpop.f32.mrf.mxu0 }
 0x368   : > { %v18945_v23 = vadd.f32 %v18944_v57, %v18943_v22  ;;  %v24449_v55 = vadd.f32 %v8071_v47, %v24305_v39  ;;  %v21063_v39 = vld [vmem:[%s26498_s2 + $0xa0] sm:$0xff]   ;;  %v1507_v22 = vrot.slane %v1219_v31, 5  ;;  %v1221_v57 = vld [vmem:[%s21484_s26 + $0x1b0] sm:$0x11] }
 0x369   : > { %v18946_v41 = vpop.f32.mrf.mxu1  ;;  %v19876_v62 = vpop.f32.mrf.mxu0  ;;  %20035 = vmatprep.subr.bf16.mxu1 %v21063_v39 }
 0x36a   : > { %v8076_v34 = vadd.f32 %v18945_v23, %v24401_v48  ;;  %20036 = vmatpush3.bf16.msra.mxu1 %v21063_v39  ;;  %v26718_v23 = vld [vmem:[#allocation22_spill] sm:$0xff]  ;;  %v1512_v62 = vrot.slane %v1507_v22, 4 }
 0x36b   : > { %v18947_v2 = vpop.f32.mrf.mxu1  ;;  %v8126_v30 = vpop.f32.mrf.mxu0  ;;  %20037 = vmatprep.subr.bf16.mxu1 %v21068_v33  ;;  %v26719_v14 = vrot.slane %v26718_v23, 5 }
 0x36c   : > { %v18948_v32 = vadd.f32 %v18947_v2, %v18946_v41  ;;  %v24459_v46 = vadd.f32 %v8076_v34, %v24320_v5 }
 0x36d   : > { %v18949_v61 = vpop.f32.mrf.mxu1  ;;  %v19029_v9 = vpop.f32.mrf.mxu0  ;;  %9815 = vmatmul.mubr.bf16.gmra.mxu1 %v21041_v40  ;;  %v1506_v41 = vrot.slane %v26719_v14, 4  ;;  %v1513_v40 = vrot.slane %v1221_v57, 5  ;;  %v21072_v57 = vld [vmem:[#allocation2 + $0x308] ss:$12 sps:$4 sm:$0xff]  }
 0x36e   : > { %v8079_v48 = vadd.f32 %v18948_v32, %v24408_v37  ;;  %9822 = vmatprep.mubr.bf16.mxu1 %v21046_v56  ;;  %v21044_v37 = vld [vmem:[#allocation2 + $0x2d0] ss:$12 sps:$4 sm:$0xff]   ;;  %20038 = vmatpush3.bf16.msra.mxu1 %v21068_v33 }
 0x36f   : > { %v18950_v53 = vpop.f32.mrf.mxu1  ;;  %v19030_v38 = vpop.f32.mrf.mxu0  ;;  %v24491_v30 = vsel %vm23204_vm7, %v1506_v41, %v1507_v22  ;;  %v24495_v39 = vsel %vm23204_vm7, %v1512_v62, %v1513_v40  ;;  %v1222_v22 = vld [vmem:[%s21484_s26 + $0x1b8] sm:$0x1]  ;;  %19957 = vmatprep.mubr.msk.bf16.mxu0 %vm2149_vm0, %v21072_v57 }
 0x370   : > { %v18951_v19 = vadd.f32 %v18950_v53, %v18949_v61  ;;  %v24465_v12 = vadd.f32 %v19030_v38, %v19029_v9  ;;  %v24468_v5 = vadd.f32 %v8079_v48, %v24329_v25  ;;  %v21064_v25 = vld [vmem:[%s26498_s2 + $0x28] sm:$0xff]   ;;  %v1516_v41 = vrot.slane %v1222_v22, 5 }
 0x371   : > { %v18952_v10 = vpop.f32.mrf.mxu1  ;;  %v24470_v50 = vpop.f32.mrf.mxu0  ;;  %19969 = vmatprep.subr.bf16.mxu0 %v21064_v25  ;;  %v21049_v53 = vld [vmem:[#allocation2 + $0x2e8] ss:$12 sps:$4 sm:$0xff]  }
 0x372   : > { %v8084_v44 = vadd.f32 %v24397_v59, %v18951_v19  ;;  %v21069_v59 = vld [vmem:[%s26498_s2 + $0x90] sm:$0xff]   ;;  %19970 = vmatpush3.bf16.msra.mxu0 %v21064_v25  ;;  %v21071_v38 = vld [vmem:[%s26498_s2 + $0x88] sm:$0xff]  }
 0x373   : > { %v18953_v26 = vpop.f32.mrf.mxu1  ;;  %v24474_v43 = vpop.f32.mrf.mxu0  ;;  %20039 = vmatprep.subr.bf16.mxu1 %v21069_v59  ;;  %v21056_v19 = vld [vmem:[#allocation2 + $0x304] ss:$12 sps:$4 sm:$0xff]  }
 0x374   : > { %v18954_v3 = vadd.f32 %v18953_v26, %v18952_v10  ;;  %v24477_v47 = vadd.f32 %v8084_v44, %v24316_v52  ;;  %20040 = vmatpush3.bf16.msra.mxu1 %v21069_v59  ;;  %v21070_v10 = vld [vmem:[%s26498_s2 + $0x20] sm:$0xff]  }
 0x375   : > { %v18955_v51 = vpop.f32.mrf.mxu1  ;;  %v19035_v49 = vpop.f32.mrf.mxu0  ;;  %9823 = vmatmul.mubr.bf16.gmra.mxu1 %v21044_v37  ;;  %v21398_v37 = vmov 0   ;;  %20041 = vmatprep.subr.bf16.mxu1 %v21071_v38 }
 0x376   : > { %v8087_v52 = vadd.f32 %v24406_v16, %v18954_v3  ;;  %9830 = vmatprep.mubr.bf16.mxu1 %v21051_v4  ;;  %1664 = vst [vmem:[#allocation3 + $0x4] sm:$0xf] %v21398_v37  ;;  %1665 = vst [vmem:[#allocation3 + $0x8] sm:$0xf] %v21398_v37  ;;  %19971 = vmatprep.subr.bf16.mxu0 %v21070_v10 }
 0x377   : > { %v18956_v34 = vpop.f32.mrf.mxu1  ;;  %v19036_v56 = vpop.f32.mrf.mxu0  ;;  %1666 = vst [vmem:[#allocation3 + $0xc] sm:$0xf] %v21398_v37  ;;  %1667 = vst [vmem:[#allocation3 + $0x10] sm:$0xf] %v21398_v37  ;;  %19972 = vmatpush3.bf16.msra.mxu0 %v21070_v10  ;;  %v21061_v10 = vld [vmem:[#allocation2 + $0x31c] ss:$12 sps:$4 sm:$0xff]  }
 0x378   : > { %v18957_v32 = vadd.f32 %v18956_v34, %v18955_v51  ;;  %v24497_v61 = vadd.f32 %v19036_v56, %v19035_v49  ;;  %v24500_v16 = vadd.f32 %v8087_v52, %v24323_v29  ;;  %1668 = vst [vmem:[#allocation3 + $0x14] sm:$0xf] %v21398_v37  ;;  %v1220_v29 = vld [vmem:[%s21484_s26 + $0x1ac] sm:$0xf]  ;;  %20042 = vmatpush3.bf16.msra.mxu1 %v21071_v38  ;;  %v21073_v51 = vld [vmem:[%s26498_s2 + $0x80] sm:$0xff]   ;;  %v21075_v34 = vld [vmem:[%s26498_s2 + $0x18] sm:$0xff]  }
 0x379   : > { %v18958_v9 = vpop.f32.mrf.mxu1  ;;  %v24502_v48 = vpop.f32.mrf.mxu0  ;;  %v1510_v31 = vrot.slane %v1220_v29, 5  ;;  %v26721_v49 = vld [vmem:[#allocation11_spill] sm:$0xff]  ;;  %20043 = vmatprep.subr.bf16.mxu1 %v21073_v51  ;;  %19973 = vmatprep.subr.bf16.mxu0 %v21075_v34 }
 0x37a   : > { %v8092_v33 = vadd.f32 %v18957_v32, %v24416_v36  ;;  %v26722_v59 = vrot.slane %v26721_v49, 5  ;;  %v21074_v52 = vld [vmem:[#allocation2 + $0x320] ss:$12 sps:$4 sm:$0xff]  }
 0x37b   : > { %v18959_v44 = vpop.f32.mrf.mxu1  ;;  %v24512_v4 = vpop.f32.mrf.mxu0  ;;  %v1515_v14 = vrot.slane %v1510_v31, 4  ;;  %19958 = vmatmul.mubr.msk.bf16.gmra.mxu0 %vm2149_vm0, %v21074_v52 }
 0x37c   : > { %v18960_v26 = vadd.f32 %v18959_v44, %v18958_v9  ;;  %v24515_v36 = vadd.f32 %v8092_v33, %v24337_v35  ;;  %v1509_v23 = vrot.slane %v26722_v59, 4  ;;  %20044 = vmatpush3.bf16.msra.mxu1 %v21073_v51  ;;  %19974 = vmatpush3.bf16.msra.mxu0 %v21075_v34 }
 0x37d   : > { %v18961_v3 = vpop.f32.mrf.mxu1  ;;  %v19041_v25 = vpop.f32.mrf.mxu0  ;;  %9831 = vmatmul.mubr.bf16.gmra.mxu1 %v21049_v53  ;;  %v1517_v32 = vsel %vm23204_vm7, %v1515_v14, %v1516_v41  ;;  %v11026_v44 = vld [vmem:[#allocation3 + $0x8] sm:$0xf]  ;;  %v26723_v14 = vmov 0 }
 0x37e   : > { %v8095_v35 = vadd.f32 %v18960_v26, %v24423_v60  ;;  %9838 = vmatprep.mubr.bf16.mxu1 %v21056_v19  ;;  %v1511_v56 = vsel %vm23204_vm7, %v1509_v23, %v1510_v31  ;;  %1662 = vst.msk [vmem:[#allocation2 + $0x35c] sm:$0xf] %vm1077_vm4, %v1517_v32  ;;  %v21054_v19 = vld [vmem:[#allocation2 + $0x300] ss:$12 sps:$4 sm:$0xff]   ;;  %v11104_v49 = vrot.slane %v11026_v44, 7  ;;  %v26724_v14 = vsel %vm24552_vm10, 4294967295, %v26723_v14 }
 0x37f   : > { %v18962_v62 = vpop.f32.mrf.mxu1  ;;  %v19042_v40 = vpop.f32.mrf.mxu0  ;;  %1660 = vst.msk [vmem:[#allocation2 + $0x350] sm:$0xf] %vm1077_vm4, %v1511_v56  ;;  %v11027_v31 = vld [vmem:[#allocation3 + $0xc] sm:$0xf]  ;;  %v21079_v23 = vld [vmem:[#allocation2 + $0x338] ss:$12 sps:$4 sm:$0xff]  }
 0x380   : > { %v18963_v9 = vadd.f32 %v18962_v62, %v18961_v3  ;;  %v24532_v53 = vadd.f32 %v19042_v40, %v19041_v25  ;;  %v24535_v60 = vadd.f32 %v8095_v35, %v24345_v54  ;;  %v21078_v54 = vld [vmem:[%s26498_s2 + $0x10] sm:$0xff]   ;;  %v11025_v3 = vld [vmem:[#allocation3 + $0x4] sm:$0x8]  ;;  %26725 = vst [vmem:[#allocation10_spill] sm:$0xff] %v26724_v14  ;;  %19961 = vmatprep.mubr.msk.bf16.mxu0 %vm2149_vm0, %v21079_v23 }
 0x381   : > { %v18964_v38 = vpop.f32.mrf.mxu1  ;;  %v24539_v33 = vpop.f32.mrf.mxu0  ;;  %v11028_v25 = vld [vmem:[#allocation3 + $0x10] sm:$0xf]  ;;  %19975 = vmatprep.subr.bf16.mxu0 %v21078_v54  ;;  %v24556_v35 = vld [vmem:[#allocation3 + $0x14] sm:$0xf]  ;;  %v21059_v32 = vld [vmem:[#allocation2 + $0x318] ss:$12 sps:$4 sm:$0xff]  }
 0x382   : > { %v8100_v2 = vadd.f32 %v24413_v0, %v18963_v9  ;;  %v17429_v0 = vrot.slane %v11025_v3, 11  ;;  %19976 = vmatpush3.bf16.msra.mxu0 %v21078_v54  ;;  %v11110_v41 = vrot.slane %v11028_v25, 7  ;;  %26726 = vst [vmem:[#allocation21_spill] sm:$0xff] %v24556_v35  ;;  %v21081_v9 = vld [vmem:[%s26498_s2 + $0x8] sm:$0xff]   ;;  %v26541_v54 = vrot.slane %v24556_v35, 7 }
 0x383   : > { %v18965_v37 = vpop.f32.mrf.mxu1  ;;  %v24543_v29 = vpop.f32.mrf.mxu0  ;;  %19977 = vmatprep.subr.bf16.mxu0 %v21081_v9 }
 0x384   : > { %v18966_v26 = vadd.f32 %v18965_v37, %v18964_v38  ;;  %v24549_v22 = vadd.f32 %v8100_v2, %v24334_v11  ;;  %v11107_v11 = vrot.slane %v11027_v31, 7  ;;  %v11105_v34 = vsel %vm24552_vm10, %v17429_v0, %v11104_v49 }
 0x385   : > { %v18967_v57 = vpop.f32.mrf.mxu1  ;;  %v19047_v51 = vpop.f32.mrf.mxu0  ;;  %9839 = vmatmul.mubr.bf16.gmra.mxu1 %v21054_v19  ;;  %11247 = vst [vmem:[#allocation4] sm:$0xf] %v11105_v34  ;;  %v11106_v2 = vrot.slane %v11104_v49, 4  ;;  %v11112_v37 = vrot.slane %v11110_v41, 4 }
 0x386   : > { %v8103_v59 = vadd.f32 %v24421_v6, %v18966_v26  ;;  %9846 = vmatprep.mubr.bf16.mxu1 %v21061_v10  ;;  %v21080_v52 = vld [vmem:[#allocation2 + $0x350] ss:$12 sps:$4 sm:$0xff]   ;;  %v11109_v10 = vrot.slane %v11107_v11, 4  ;;  %19978 = vmatpush3.bf16.msra.mxu0 %v21081_v9  ;;  %v21084_v57 = vld [vmem:[%s26498_s2] sm:$0xff]  }
 0x387   : > { %v18968_v62 = vpop.f32.mrf.mxu1  ;;  %v19048_v40 = vpop.f32.mrf.mxu0  ;;  %19962 = vmatmul.mubr.msk.bf16.gmra.mxu0 %vm2149_vm0, %v21080_v52  ;;  %v11108_v26 = vsel %vm24552_vm10, %v11106_v2, %v11107_v11  ;;  %v11114_v25 = vsel %vm24552_vm10, %v11112_v37, %v26541_v54  ;;  %19979 = vmatprep.subr.bf16.mxu0 %v21084_v57 }
 0x388   : > { %v24560_v56 = vadd.f32 %v19048_v40, %v19047_v51  ;;  %v24563_v6 = vadd.f32 %v8103_v59, %v24340_v27  ;;  %v21067_v27 = vld [vmem:[#allocation2 + $0x334] ss:$12 sps:$4 sm:$0xff]   ;;  %v11111_v3 = vsel %vm24552_vm10, %v11109_v10, %v11110_v41  ;;  %11248 = vst [vmem:[#allocation4 + $0x4] sm:$0xf] %v11108_v26  ;;  %11250 = vst [vmem:[#allocation4 + $0xc] sm:$0xf] %v11114_v25 }
 0x389   : > { %v18970_v38 = vpop.f32.mrf.mxu1  ;;  %v24569_v19 = vpop.f32.mrf.mxu0  ;;  %11249 = vst [vmem:[#allocation4 + $0x8] sm:$0xf] %v11111_v3  ;;  %v21065_v62 = vld [vmem:[#allocation2 + $0x330] ss:$12 sps:$4 sm:$0xff]   ;;  %v17357_v40 = vcombine.high %v24491_v30, %v24495_v39  ;;  %v17356_v25 = vcombine.low %v24491_v30, %v24495_v39 }
 0x38a   : > { %19980 = vmatpush3.bf16.msra.mxu0 %v21084_v57  ;;  %v21076_v57 = vld [vmem:[#allocation3 + $0x8] sm:$0xff]   ;;  %v21090_v30 = vld [vmem:[%s26498_s2 + $0x130] sm:$0xff]  }
 0x38b   : > { %v18971_v44 = vpop.f32.mrf.mxu1  ;;  %v24573_v31 = vpop.f32.mrf.mxu0 }
 0x38d   : > { %v18973_v51 = vpop.f32.mrf.mxu1  ;;  %v19053_v0 = vpop.f32.mrf.mxu0  ;;  %9847 = vmatmul.mubr.bf16.gmra.mxu1 %v21059_v32  ;;  %v21088_v32 = vld [vmem:[%s26498_s2 + $0x138] sm:$0xff]  }
 0x38e   : > { %9854 = vmatprep.mubr.bf16.mxu1 %v21067_v27  ;;  %20093 = vmatprep.subr.bf16.mxu1 %v21088_v32 }
 0x38f   : > { %v18974_v49 = vpop.f32.mrf.mxu1  ;;  %v19054_v59 = vpop.f32.mrf.mxu0  ;;  %v21085_v9 = vld [vmem:[#allocation4] sm:$0xff]  }
 0x390   : > { %v24586_v23 = vadd.f32 %v19054_v59, %v19053_v0  ;;  %v21086_v38 = vld [vmem:[#allocation4 + $0x8] sm:$0xff]   ;;  %19981 = vmatprep.mubr.bf16.mxu0 %v21085_v9 }
 0x391   : > { %v18976_v11 = vpop.f32.mrf.mxu1  ;;  %v24588_v41 = vpop.f32.mrf.mxu0  ;;  %19982 = vmatmul.mubr.bf16.vlgmr.msra.gmra.mxu0 %v21086_v38  ;;  %v21077_v38 = vld [vmem:[#allocation3 + $0x10] sm:$0xff]  }
 0x393   : > { %v18977_v52 = vpop.f32.mrf.mxu1  ;;  %v24592_v34 = vpop.f32.mrf.mxu0 }
 0x395   : > { %v18979_v2 = vpop.f32.mrf.mxu1  ;;  %v19059_v10 = vpop.f32.mrf.mxu0  ;;  %9855 = vmatmul.mubr.bf16.gmra.mxu1 %v21065_v62 }
 0x396   : > { %9862 = vmatprep.mubr.bf16.mxu1 %v17357_v40 }
 0x397   : > { %v18980_v37 = vpop.f32.mrf.mxu1  ;;  %v19060_v27 = vpop.f32.mrf.mxu0 }
 0x398   : > { %v24597_v44 = vadd.f32 %v19060_v27, %v19059_v10 }
 0x399   : > { %v18982_v26 = vpop.f32.mrf.mxu1  ;;  %v24599_v3 = vpop.f32.mrf.mxu0 }
 0x39b   : > { %v18983_v51 = vpop.f32.mrf.mxu1  ;;  %v24603_v0 = vpop.f32.mrf.mxu0 }
 0x39c   : > { %v21096_v51 = vld [vmem:[%s26498_s2 + $0x78] sm:$0xff]  }
 0x39d   : > { %v18985_v49 = vpop.f32.mrf.mxu1  ;;  %v19065_v59 = vpop.f32.mrf.mxu0  ;;  %9863 = vmatmul.mubr.bf16.gmra.mxu1 %v17356_v25  ;;  %19997 = vmatprep.subr.bf16.mxu0 %v21096_v51 }
 0x39e   : > { %20045 = vmatprep.mubr.bf16.mxu1 %v21076_v57  ;;  %v21093_v57 = vld [vmem:[%s26498_s2 + $0x128] sm:$0xff]   ;;  %v11287_v49 = vld [vmem:[#allocation3 + $0x14] sm:$0xf]  ;;  %19998 = vmatpush3.bf16.msra.mxu0 %v21096_v51 }
 0x39f   : > { %v18986_v11 = vpop.f32.mrf.mxu1  ;;  %v19066_v62 = vpop.f32.mrf.mxu0 }
 0x3a0   : > { %v24605_v40 = vadd.f32 %v19066_v62, %v19065_v59  ;;  %v19040_v59 = vadd.f32 %v24512_v4, %v24502_v48  ;;  %v24636_v48 = vld [vmem:[#allocation3 + $0xc] sm:$0xf]  ;;  %v11356_v4 = vshrl.u32 %v11287_v49, 16 }
 0x3a1   : > { %v18988_v52 = vpop.f32.mrf.mxu1  ;;  %v24607_v9 = vpop.f32.mrf.mxu0 }
 0x3a2   : > { %v24656_v35 = vrot.slane %v11356_v4, 7 }
 0x3a3   : > { %v18989_v2 = vpop.f32.mrf.mxu1  ;;  %v24609_v10 = vpop.f32.mrf.mxu0 }
 0x3a5   : > { %v19071_v39 = vpop.f32.mrf.mxu0  ;;  %v19891_v37 = vpop.f32.mrf.mxu1  ;;  %20046 = vmatmul.mubr.bf16.vlgmr.msra.gmra.mxu1 %v21077_v38  ;;  %v19034_v38 = vadd.f32 %v24474_v43, %v24470_v50  ;;  %v11338_v50 = vshrl.u32 %v24636_v48, 16 }
 0x3a6   : > { %v8967_v27 = vadd.f32 %v19891_v37, %v24497_v61  ;;  %20094 = vmatpush3.bf16.msra.mxu1 %v21088_v32 }
 0x3a7   : > { %v19072_v26 = vpop.f32.mrf.mxu0  ;;  %v8958_v25 = vpop.f32.mrf.mxu1  ;;  %20095 = vmatprep.subr.bf16.mxu1 %v21090_v30 }
 0x3a8   : > { %v24624_v11 = vadd.f32 %v8967_v27, %v24364_v58  ;;  %v24626_v61 = vadd.f32 %v19072_v26, %v19071_v39  ;;  %v8959_v32 = vadd.f32 %v24465_v12, %v8958_v25  ;;  %v11286_v58 = vld [vmem:[#allocation3 + $0x10] sm:$0xf]  ;;  %v21094_v27 = vld [vmem:[%s26498_s2 + $0x120] sm:$0xff]  }
 0x3a9   : > { %v24629_v62 = vpop.f32.mrf.mxu0  ;;  %v19892_v52 = vpop.f32.mrf.mxu1  ;;  %v11347_v43 = vshrl.u32 %v11286_v58, 16 }
 0x3aa   : > { %v24634_v2 = vadd.f32 %v8959_v32, %v24361_v63  ;;  %v8970_v37 = vadd.f32 %v19892_v52, %v19040_v59  ;;  %20096 = vmatpush3.bf16.msra.mxu1 %v21090_v30  ;;  %v21099_v63 = vld [vmem:[%s26498_s2 + $0x70] sm:$0xff]   ;;  %v24650_v59 = vrot.slane %v11338_v50, 7  ;;  %v11350_v52 = vshll.u32 %v11286_v58, 16  ;;  %v21098_v58 = vld [vmem:[%s26498_s2 + $0x118] sm:$0xff]  }
 0x3ab   : > { %v24638_v39 = vpop.f32.mrf.mxu0  ;;  %v8961_v12 = vpop.f32.mrf.mxu1  ;;  %20097 = vmatprep.subr.bf16.mxu1 %v21093_v57  ;;  %19999 = vmatprep.subr.bf16.mxu0 %v21099_v63  ;;  %v11349_v32 = vrot.slane %v11347_v43, 7  ;;  %v19046_v43 = vadd.f32 %v24543_v29, %v24539_v33  ;;  %v21100_v29 = vld [vmem:[%s26498_s2 + $0x110] sm:$0xff]  }
 0x3ac   : > { %v24648_v30 = vadd.f32 %v8970_v37, %v24372_v20  ;;  %v8962_v26 = vadd.f32 %v19034_v38, %v8961_v12  ;;  %20000 = vmatpush3.bf16.msra.mxu0 %v21099_v63  ;;  %v11359_v20 = vshll.u32 %v11287_v49, 16  ;;  %v19052_v38 = vadd.f32 %v24573_v31, %v24569_v19 }
 0x3ad   : > { %v19077_v25 = vpop.f32.mrf.mxu0  ;;  %v19895_v51 = vpop.f32.mrf.mxu1  ;;  %v11354_v4 = vrot.slane %v11349_v32, 4 }
 0x3ae   : > { %v24653_v54 = vadd.f32 %v8962_v26, %v24368_v18  ;;  %v8983_v14 = vadd.f32 %v19895_v51, %v24560_v56  ;;  %20098 = vmatpush3.bf16.msra.mxu1 %v21093_v57  ;;  %v21102_v18 = vld [vmem:[%s26498_s2 + $0x68] sm:$0xff]   ;;  %v11345_v56 = vrot.slane %v24650_v59, 4  ;;  %v11352_v57 = vor.u32 %v11350_v52, %v11349_v32 }
 0x3af   : > { %v19078_v37 = vpop.f32.mrf.mxu0  ;;  %v8974_v12 = vpop.f32.mrf.mxu1  ;;  %20099 = vmatprep.subr.bf16.mxu1 %v21094_v27  ;;  %v11361_v50 = vor.u32 %v11359_v20, %v24656_v35  ;;  %20001 = vmatprep.subr.bf16.mxu0 %v21102_v18 }
 0x3b0   : > { %v24668_v49 = vadd.f32 %v8983_v14, %v24383_v1  ;;  %v24670_v63 = vadd.f32 %v19078_v37, %v19077_v25  ;;  %v8975_v19 = vadd.f32 %v24532_v53, %v8974_v12  ;;  %v11353_v1 = vsel %vm24675_vm13, %v11345_v56, %v11352_v57  ;;  %20002 = vmatpush3.bf16.msra.mxu0 %v21102_v18  ;;  %v21104_v57 = vld [vmem:[%s26498_s2 + $0x108] sm:$0xff]  }
 0x3b1   : > { %v24682_v26 = vpop.f32.mrf.mxu0  ;;  %v19896_v51 = vpop.f32.mrf.mxu1  ;;  %v11362_v25 = vsel %vm24675_vm13, %v11354_v4, %v11361_v50  ;;  %11690 = vst [vmem:[#allocation4 + $0x98] sm:$0xf] %v11353_v1  ;;  %v19064_v4 = vadd.f32 %v24603_v0, %v24599_v3 }
 0x3b2   : > { %v24687_v53 = vadd.f32 %v8975_v19, %v24375_v7  ;;  %v8986_v14 = vadd.f32 %v19896_v51, %v19052_v38  ;;  %20100 = vmatpush3.bf16.msra.mxu1 %v21094_v27  ;;  %v21105_v7 = vld [vmem:[%s26498_s2 + $0x60] sm:$0xff]   ;;  %11691 = vst [vmem:[#allocation4 + $0x9c] sm:$0xf] %v11362_v25 }
 0x3b3   : > { %v24691_v32 = vpop.f32.mrf.mxu0  ;;  %v8977_v33 = vpop.f32.mrf.mxu1  ;;  %20101 = vmatprep.subr.bf16.mxu1 %v21098_v58  ;;  %20003 = vmatprep.subr.bf16.mxu0 %v21105_v7 }
 0x3b4   : > { %v24700_v27 = vadd.f32 %v8986_v14, %v24390_v28  ;;  %v8978_v52 = vadd.f32 %v19046_v43, %v8977_v33  ;;  %20004 = vmatpush3.bf16.msra.mxu0 %v21105_v7  ;;  %v21108_v28 = vld [vmem:[%s26498_s2 + $0x58] sm:$0xff]   ;;  %v19058_v43 = vadd.f32 %v24592_v34, %v24588_v41 }
 0x3b5   : > { %v19083_v20 = vpop.f32.mrf.mxu0  ;;  %v19899_v38 = vpop.f32.mrf.mxu1  ;;  %20005 = vmatprep.subr.bf16.mxu0 %v21108_v28 }
 0x3b6   : > { %v24703_v37 = vadd.f32 %v8978_v52, %v24380_v8  ;;  %v8999_v12 = vadd.f32 %v19899_v38, %v24597_v44  ;;  %20102 = vmatpush3.bf16.msra.mxu1 %v21098_v58  ;;  %v21111_v52 = vld [vmem:[%s26498_s2 + $0x1b8] sm:$0xff]  }
 0x3b7   : > { %v19084_v18 = vpop.f32.mrf.mxu0  ;;  %v8990_v56 = vpop.f32.mrf.mxu1  ;;  %20103 = vmatprep.subr.bf16.mxu1 %v21100_v29 }
 0x3b8   : > { %v24715_v8 = vadd.f32 %v8999_v12, %v24411_v17  ;;  %v19085_v44 = vadd.f32 %v19084_v18, %v19083_v20  ;;  %v8991_v58 = vadd.f32 %v24586_v23, %v8990_v56  ;;  %20006 = vmatpush3.bf16.msra.mxu0 %v21108_v28  ;;  %v21106_v17 = vld [vmem:[%s26498_s2 + $0x100] sm:$0xff]   ;;  %v21112_v23 = vld [vmem:[%s26498_s2 + $0x50] sm:$0xff]   ;;  %v19070_v18 = vadd.f32 %v24609_v10, %v24607_v9 }
 0x3b9   : > { %v19086_v19 = vpop.f32.mrf.mxu0  ;;  %v19900_v50 = vpop.f32.mrf.mxu1  ;;  %20007 = vmatprep.subr.bf16.mxu0 %v21112_v23 }
 0x3ba   : > { %v24721_v51 = vadd.f32 %v8991_v58, %v24395_v42  ;;  %v9002_v1 = vadd.f32 %v19900_v50, %v19064_v4  ;;  %20104 = vmatpush3.bf16.msra.mxu1 %v21100_v29 }
 0x3bb   : > { %v19087_v14 = vpop.f32.mrf.mxu0  ;;  %v8993_v3 = vpop.f32.mrf.mxu1  ;;  %20105 = vmatprep.subr.bf16.mxu1 %v21104_v57 }
 0x3bc   : > { %v24730_v0 = vadd.f32 %v9002_v1, %v24419_v13  ;;  %v8994_v41 = vadd.f32 %v19058_v43, %v8993_v3  ;;  %20008 = vmatpush3.bf16.msra.mxu0 %v21112_v23  ;;  %v19076_v13 = vadd.f32 %v24638_v39, %v24629_v62 }
 0x3bd   : > { %v19089_v42 = vpop.f32.mrf.mxu0  ;;  %v19903_v34 = vpop.f32.mrf.mxu1 }
 0x3be   : > { %v24733_v25 = vadd.f32 %v8994_v41, %v24404_v45  ;;  %v9015_v33 = vadd.f32 %v19903_v34, %v24626_v61  ;;  %20106 = vmatpush3.bf16.msra.mxu1 %v21104_v57  ;;  %v19082_v41 = vadd.f32 %v24691_v32, %v24682_v26  ;;  %v11283_v34 = vld [vmem:[#allocation3 + $0x4] sm:$0x8] }
 0x3bf   : > { %v19090_v29 = vpop.f32.mrf.mxu0  ;;  %v9006_v7 = vpop.f32.mrf.mxu1  ;;  %20107 = vmatprep.subr.bf16.mxu1 %v21106_v17  ;;  %v11324_v26 = vshrl.u32 %v11283_v34, 16 }
 0x3c0   : > { %v24742_v20 = vadd.f32 %v9015_v33, %v24442_v15  ;;  %v19091_v38 = vadd.f32 %v19090_v29, %v19089_v42  ;;  %v9007_v45 = vadd.f32 %v24605_v40, %v9006_v7  ;;  %v19088_v40 = vadd.f32 %v19087_v14, %v19086_v19 }
 0x3c1   : > { %v19092_v12 = vpop.f32.mrf.mxu0  ;;  %v19904_v61 = vpop.f32.mrf.mxu1 }
 0x3c2   : > { %v24748_v56 = vadd.f32 %v9007_v45, %v24426_v24  ;;  %v9018_v57 = vadd.f32 %v19904_v61, %v19076_v13  ;;  %20108 = vmatpush3.bf16.msra.mxu1 %v21106_v17  ;;  %v11341_v13 = vshll.u32 %v24636_v48, 16 }
 0x3c3   : > { %v19093_v28 = vpop.f32.mrf.mxu0  ;;  %v9009_v4 = vpop.f32.mrf.mxu1  ;;  %20157 = vmatprep.subr.bf16.mxu1 %v21111_v52 }
 0x3c4   : > { %v24751_v62 = vadd.f32 %v9018_v57, %v24449_v55  ;;  %v9010_v15 = vadd.f32 %v19070_v18, %v9009_v4  ;;  %v11284_v55 = vld [vmem:[#allocation3 + $0x8] sm:$0xf]  ;;  %v17430_v4 = vrot.slane %v11324_v26, 11 }
 0x3c5   : > { %v19095_v39 = vpop.f32.mrf.mxu0  ;;  %v19907_v58 = vpop.f32.mrf.mxu1  ;;  %v11329_v14 = vshrl.u32 %v11284_v55, 16  ;;  %v11332_v52 = vshll.u32 %v11284_v55, 16  ;;  %v21124_v55 = vld [vmem:[%s26498_s2 + $0xf8] sm:$0xff]  }
 0x3c6   : > { %v24754_v50 = vadd.f32 %v9010_v15, %v24435_v21  ;;  %v9031_v43 = vadd.f32 %v19907_v58, %v19085_v44  ;;  %v11343_v58 = vor.u32 %v11341_v13, %v24650_v59 }
 0x3c7   : > { %v19096_v9 = vpop.f32.mrf.mxu0  ;;  %v9022_v10 = vpop.f32.mrf.mxu1  ;;  %v11331_v32 = vrot.slane %v11329_v14, 7 }
 0x3c8   : > { %v24757_v24 = vadd.f32 %v9031_v43, %v24477_v47  ;;  %v19097_v1 = vadd.f32 %v19096_v9, %v19095_v39  ;;  %v9023_v3 = vadd.f32 %v24670_v63, %v9022_v10  ;;  %v21116_v63 = vld [vmem:[%s26498_s2 + $0x48] sm:$0xff]  }
 0x3c9   : > { %v19098_v17 = vpop.f32.mrf.mxu0  ;;  %v19908_v23 = vpop.f32.mrf.mxu1  ;;  %20009 = vmatprep.subr.bf16.mxu0 %v21116_v63  ;;  %v11334_v15 = vor.u32 %v11332_v52, %v11331_v32  ;;  %v11336_v39 = vrot.slane %v11331_v32, 4 }
 0x3ca   : > { %v24763_v19 = vadd.f32 %v9023_v3, %v24459_v46  ;;  %v9034_v21 = vadd.f32 %v19908_v23, %v19088_v40  ;;  %v21119_v46 = vld [vmem:[%s26498_s2 + $0x40] sm:$0xff]   ;;  %20010 = vmatpush3.bf16.msra.mxu0 %v21116_v63 }
 0x3cb   : > { %v19099_v44 = vpop.f32.mrf.mxu0  ;;  %v9025_v42 = vpop.f32.mrf.mxu1  ;;  %20011 = vmatprep.subr.bf16.mxu0 %v21119_v46  ;;  %v11344_v10 = vsel %vm24675_vm13, %v11336_v39, %v11343_v58 }
 0x3cc   : > { %v24766_v47 = vadd.f32 %v9034_v21, %v24500_v16  ;;  %v9026_v33 = vadd.f32 %v19082_v41, %v9025_v42  ;;  %v19100_v45 = vadd.f32 %v19099_v44, %v19098_v17  ;;  %11689 = vst [vmem:[#allocation4 + $0x94] sm:$0xf] %v11344_v10 }
 0x3cd   : > { %v19101_v29 = vpop.f32.mrf.mxu0  ;;  %v19911_v7 = vpop.f32.mrf.mxu1 }
 0x3ce   : > { %v24776_v16 = vadd.f32 %v9026_v33, %v24468_v5  ;;  %v9047_v61 = vadd.f32 %v19911_v7, %v19097_v1  ;;  %v11335_v5 = vsel %vm24675_vm13, %v17430_v4, %v11334_v15  ;;  %v19094_v1 = vadd.f32 %v19093_v28, %v19092_v12  ;;  %20012 = vmatpush3.bf16.msra.mxu0 %v21119_v46 }
 0x3cf   : > { %v19102_v18 = vpop.f32.mrf.mxu0  ;;  %v9038_v57 = vpop.f32.mrf.mxu1  ;;  %11688 = vst [vmem:[#allocation4 + $0x90] sm:$0xf] %v11335_v5  ;;  %20061 = vmatprep.subr.bf16.mxu0 %v21124_v55 }
 0x3d0   : > { %v24780_v40 = vadd.f32 %v9047_v61, %v24549_v22  ;;  %v9039_v43 = vadd.f32 %v19091_v38, %v9038_v57  ;;  %v10192_v61 = vlaneseq }
 0x3d1   : > { %v19104_v48 = vpop.f32.mrf.mxu0  ;;  %v19912_v9 = vpop.f32.mrf.mxu1 }
 0x3d2   : > { %v24787_v3 = vadd.f32 %v9039_v43, %v24515_v36  ;;  %v9050_v17 = vadd.f32 %v19912_v9, %v19100_v45  ;;  %v24798_v39 = vshrl.u32 %v10192_v61, 7 }
 0x3d3   : > { %v19105_v59 = vpop.f32.mrf.mxu0  ;;  %v9041_v22 = vpop.f32.mrf.mxu1 }
 0x3d4   : > { %v24790_v38 = vadd.f32 %v9050_v17, %v24563_v6  ;;  %v9042_v23 = vadd.f32 %v19094_v1, %v9041_v22  ;;  %v24801_v10 = vadd.s32 24, %v24798_v39  ;;  %v10194_v1 = vadd.s32 8, %v24798_v39 }
 0x3d5   : > { %v19107_v41 = vpop.f32.mrf.mxu0  ;;  %v19915_v21 = vpop.f32.mrf.mxu1  ;;  %v10200_v61 = vadd.s32 56, %v24798_v39 }
 0x3d6   : > { %v24796_v12 = vadd.f32 %v9042_v23, %v24535_v60 }
 0x3d7   : > { %v19108_v36 = vpop.f32.mrf.mxu0  ;;  %v9054_v28 = vpop.f32.mrf.mxu1 }
 0x3d8   : > { %v10234_v36 = vand.u32 15, %v24801_v10 }
 0x3d9   : > { %v19110_v14 = vpop.f32.mrf.mxu0  ;;  %v19916_v44 = vpop.f32.mrf.mxu1 }
 0x3da   : > { %v10220_v14 = vand.u32 15, %v10194_v1  ;;  %v10198_v44 = vadd.s32 40, %v24798_v39  ;;  %vm24808_vm14 = vcmp.lt.s32.totalorder %v10234_v36, 12 }
 0x3db   : > { %v19111_v42 = vpop.f32.mrf.mxu0  ;;  %v9057_v34 = vpop.f32.mrf.mxu1 }
 0x3dc   : > { %vm24813_vm15 = vcmp.lt.s32.totalorder %v10220_v14, 12 }
 0x3dd   : > { %v19113_v33 = vpop.f32.mrf.mxu0  ;;  %v19919_v6 = vpop.f32.mrf.mxu1 }
 0x3df   : > { %v19114_v63 = vpop.f32.mrf.mxu0  ;;  %v9070_v29 = vpop.f32.mrf.mxu1 }
 0x3e1   : > { %v19116_v7 = vpop.f32.mrf.mxu0  ;;  %v19920_v46 = vpop.f32.mrf.mxu1 }
 0x3e2   : > { %v24843_v46 = vadd.s32 104, %v24798_v39 }
 0x3e3   : > { %v19117_v26 = vpop.f32.mrf.mxu0  ;;  %v9073_v32 = vpop.f32.mrf.mxu1 }
 0x3e5   : > { %v19119_v52 = vpop.f32.mrf.mxu0  ;;  %v19163_v13 = vpop.f32.mrf.mxu1 }
 0x3e7   : > { %v19120_v45 = vpop.f32.mrf.mxu0  ;;  %v19164_v60 = vpop.f32.mrf.mxu1 }
 0x3e8   : > { %v19165_v48 = vadd.f32 %v19164_v60, %v19163_v13 }
 0x3e9   : > { %v19122_v18 = vpop.f32.mrf.mxu0  ;;  %v19166_v57 = vpop.f32.mrf.mxu1 }
 0x3eb   : > { %v19123_v4 = vpop.f32.mrf.mxu0  ;;  %v19167_v15 = vpop.f32.mrf.mxu1 }
 0x3ec   : > { %v19168_v41 = vadd.f32 %v19167_v15, %v19166_v57 }
 0x3ed   : > { %v19169_v58 = vpop.f32.mrf.mxu1  ;;  %v19935_v43 = vpop.f32.mrf.mxu0 }
 0x3ef   : > { %v19170_v9 = vpop.f32.mrf.mxu1  ;;  %v9905_v5 = vpop.f32.mrf.mxu0 }
 0x3f0   : > { %v19171_v17 = vadd.f32 %v19170_v9, %v19169_v58  ;;  %v9906_v59 = vadd.f32 %v19165_v48, %v9905_v5 }
 0x3f1   : > { %v19172_v22 = vpop.f32.mrf.mxu1  ;;  %v19936_v23 = vpop.f32.mrf.mxu0 }
 0x3f2   : > { %v9914_v55 = vadd.f32 %v19935_v43, %v19171_v17  ;;  %v10064_v42 = vadd.f32 %v9906_v59, %v24634_v2  ;;  %v10248_v2 = vand.u32 15, %v10198_v44 }
 0x3f3   : > { %v19173_v21 = vpop.f32.mrf.mxu1  ;;  %v9908_v28 = vpop.f32.mrf.mxu0 }
 0x3f4   : > { %v19174_v34 = vadd.f32 %v19173_v21, %v19172_v22  ;;  %v10066_v33 = vadd.f32 %v9914_v55, %v24624_v11  ;;  %v9909_v6 = vadd.f32 %v19168_v41, %v9908_v28  ;;  %v10160_v45 = vmul.f32 -0.08, %v10064_v42 }
 0x3f5   : > { %v19175_v63 = vpop.f32.mrf.mxu1  ;;  %v19939_v29 = vpop.f32.mrf.mxu0  ;;  %vm10144_vm0 = vcmp.gt.f32.partialorder %v10064_v42, 0.0  ;;  %vm24821_vm4 = vcmp.lt.s32.totalorder %v10248_v2, 12 }
 0x3f6   : > { %v9917_v7 = vadd.f32 %v19936_v23, %v19174_v34  ;;  %v10065_v26 = vadd.f32 %v9909_v6, %v24653_v54  ;;  %v10162_v18 = vmul.f32 -0.08, %v10066_v33  ;;  %vm10146_vm2 = vcmp.gt.f32.partialorder %v10066_v33, 0.0 }
 0x3f7   : > { %v19176_v52 = vpop.f32.mrf.mxu1  ;;  %v9921_v13 = vpop.f32.mrf.mxu0  ;;  %v10176_v17 = vsel %vm10144_vm0, %v10064_v42, %v10160_v45  ;;  %v10262_v6 = vand.u32 15, %v10200_v61  ;;  %v11363_v45 = vrot.slane %v24656_v35, 4 }
 0x3f8   : > { %v10067_v11 = vadd.f32 %v9917_v7, %v24648_v30  ;;  %v19177_v60 = vadd.f32 %v19176_v52, %v19175_v63  ;;  %vm10145_vm1 = vcmp.gt.f32.partialorder %v10065_v26, 0.0  ;;  %v10161_v57 = vmul.f32 -0.08, %v10065_v26  ;;  %v26735_v63 = vld [vmem:[#allocation21_spill] sm:$0xff] }
 0x3f9   : > { %v19178_v4 = vpop.f32.mrf.mxu1  ;;  %v24819_v15 = vpop.f32.mrf.mxu0  ;;  %v24826_v30 = vadd.s32 72, %v24798_v39  ;;  %v10178_v55 = vsel %vm10146_vm2, %v10066_v33, %v10162_v18  ;;  %v26736_v7 = vrot.slane %v26735_v63, 7  ;;  %v24840_v33 = vadd.s32 88, %v24798_v39 }
 0x3fa   : > { %vm10147_vm3 = vcmp.gt.f32.partialorder %v10067_v11, 0.0  ;;  %v10163_v54 = vmul.f32 -0.08, %v10067_v11  ;;  %v9922_v58 = vadd.f32 %v19177_v60, %v9921_v13  ;;  %v10177_v43 = vsel %vm10145_vm1, %v10065_v26, %v10161_v57 }
 0x3fb   : > { %v19179_v48 = vpop.f32.mrf.mxu1  ;;  %v9924_v9 = vpop.f32.mrf.mxu0  ;;  %v10482_v22 = vsel %vm24813_vm15, %v10177_v43, 0.0  ;;  %v24835_v26 = vrot.slane %v26736_v7, 4  ;;  %v24848_v52 = vadd.s32 128, %v10194_v1  ;;  %v10276_v57 = vand.u32 15, %v24826_v30 }
 0x3fc   : > { %v10179_v59 = vsel %vm10147_vm3, %v10067_v11, %v10163_v54  ;;  %v19180_v23 = vadd.f32 %v19179_v48, %v19178_v4  ;;  %v18006_v21 = vpack.c.bf16 %v10482_v22, %v10176_v17  ;;  %v10068_v36 = vadd.f32 %v9922_v58, %v24687_v53 }
 0x3fd   : > { %v10484_v41 = vsel %vm24808_vm14, %v10179_v59, 0.0  ;;  %v19181_v28 = vpop.f32.mrf.mxu1  ;;  %v24837_v32 = vpop.f32.mrf.mxu0  ;;  %v24846_v53 = vadd.s32 120, %v24798_v39  ;;  %v24853_v11 = vadd.s32 128, %v24801_v10  ;;  %v24856_v4 = vadd.s32 128, %v10198_v44 }
 0x3fe   : > { %v18011_v14 = vpack.c.bf16 %v10484_v41, %v10178_v55  ;;  %v9925_v34 = vadd.f32 %v19180_v23, %v9924_v9  ;;  %18063 = vst [vmem:[#allocation3 + $0x18] sm:$0xff] %v18006_v21   ;;  %v10164_v60 = vmul.f32 -0.08, %v10068_v36  ;;  %v24858_v54 = vadd.s32 128, %v10200_v61 }
 0x3ff   : > { %v19182_v42 = vpop.f32.mrf.mxu1  ;;  %vm10148_vm5 = vcmp.gt.f32.partialorder %v10068_v36, 0.0  ;;  %v10290_v43 = vand.u32 15, %v24840_v33  ;;  %vm24865_vm7 = vcmp.lt.s32.totalorder %v10262_v6, 12  ;;  %vm24885_vm11 = vcmp.lt.s32.totalorder %v10276_v57, 12 }
 0x400   : > { %18064 = vst [vmem:[#allocation3 + $0x20] sm:$0xff] %v18011_v14   ;;  %v10069_v13 = vadd.f32 %v9925_v34, %v24703_v37  ;;  %v19183_v2 = vadd.f32 %v19182_v42, %v19181_v28  ;;  %v9937_v37 = vpop.f32.mrf.mxu0  ;;  %v10180_v59 = vsel %vm10148_vm5, %v10068_v36, %v10164_v60 }
 0x401   : > { %v19184_v18 = vpop.f32.mrf.mxu1  ;;  %vm24923_vm15 = vcmp.lt.s32.totalorder %v10290_v43, 12 }
 0x402   : > { %vm10149_vm6 = vcmp.gt.f32.partialorder %v10069_v13, 0.0  ;;  %v10165_v39 = vmul.f32 -0.08, %v10069_v13  ;;  %v9930_v1 = vadd.f32 %v19939_v29, %v19183_v2  ;;  %v24877_v5 = vpop.f32.mrf.mxu0 }
 0x403   : > { %v19185_v58 = vpop.f32.mrf.mxu1 }
 0x404   : > { %v10181_v17 = vsel %vm10149_vm6, %v10069_v13, %v10165_v39  ;;  %v10070_v44 = vadd.f32 %v9930_v1, %v24668_v49  ;;  %v19186_v30 = vadd.f32 %v19185_v58, %v19184_v18 }
 0x405   : > { %v10486_v22 = vsel %vm24821_vm4, %v10181_v17, 0.0  ;;  %v19187_v23 = vpop.f32.mrf.mxu1  ;;  %v11288_v21 = vld [vmem:[#allocation3 + $0x18] sm:$0xf]  ;;  %v11289_v28 = vld [vmem:[#allocation3 + $0x1c] sm:$0xf] }
 0x406   : > { %v18016_v14 = vpack.c.bf16 %v10486_v22, %v10180_v59  ;;  %vm10150_vm8 = vcmp.gt.f32.partialorder %v10070_v44, 0.0  ;;  %v9933_v49 = vadd.f32 %v24819_v15, %v19186_v30  ;;  %v21082_v34 = vld [vmem:[#allocation3 + $0x18] sm:$0xff]   ;;  %v11365_v7 = vshrl.u32 %v11288_v21, 16 }
 0x407   : > { %v24875_v6 = vld [vmem:[#allocation3 + $0x20] sm:$0xf]  ;;  %v11033_v63 = vld [vmem:[#allocation3 + $0x24] sm:$0xf]  ;;  %v11368_v36 = vshll.u32 %v11288_v21, 16  ;;  %v19188_v42 = vpop.f32.mrf.mxu1  ;;  %v11374_v60 = vshrl.u32 %v11289_v28, 16  ;;  %20049 = vmatprep.mubr.bf16.mxu1 %v21082_v34 }
 0x408   : > { %v11122_v13 = vrot.slane %v24875_v6, 7  ;;  %v11125_v2 = vrot.slane %v11033_v63, 7  ;;  %v11377_v18 = vshll.u32 %v11289_v28, 16  ;;  %18065 = vst [vmem:[#allocation3 + $0x28] sm:$0xff] %v18016_v14   ;;  %v11367_v39 = vrot.slane %v11365_v7, 7  ;;  %v21083_v30 = vld [vmem:[#allocation3 + $0x20] sm:$0xff]   ;;  %v9940_v28 = vpop.f32.mrf.mxu0 }
 0x409   : > { %v10166_v1 = vmul.f32 -0.08, %v10070_v44  ;;  %v10071_v15 = vadd.f32 %v9933_v49, %v24700_v27  ;;  %v19189_v58 = vadd.f32 %v19188_v42, %v19187_v23  ;;  %v19190_v17 = vpop.f32.mrf.mxu1  ;;  %v24881_v59 = vrot.slane %v11374_v60, 7  ;;  %20050 = vmatmul.mubr.bf16.gmra.mxu1 %v21083_v30  ;;  %v11030_v34 = vld [vmem:[#allocation3 + $0x18] sm:$0xf] }
 0x40a   : > { %v11124_v22 = vrot.slane %v11122_v13, 4  ;;  %v11370_v21 = vor.u32 %v11368_v36, %v11367_v39  ;;  %v11372_v41 = vrot.slane %v11367_v39, 4  ;;  %v11031_v27 = vld [vmem:[#allocation3 + $0x1c] sm:$0xf]  ;;  %v11116_v55 = vrot.slane %v11030_v34, 7  ;;  %v21272_v36 = vld [vmem:[%s26498_s2 + $0x90] sm:$0xff]  }
 0x40b   : > { %vm10151_vm9 = vcmp.gt.f32.partialorder %v10071_v15, 0.0  ;;  %v19191_v63 = vpop.f32.mrf.mxu1  ;;  %v11379_v23 = vor.u32 %v11377_v18, %v24881_v59  ;;  %v10167_v49 = vmul.f32 -0.08, %v10071_v15  ;;  %v9938_v7 = vadd.f32 %v19189_v58, %v9937_v37 }
 0x40c   : > { %v19192_v42 = vadd.f32 %v19191_v63, %v19190_v17  ;;  %v11119_v29 = vrot.slane %v11031_v27, 7  ;;  %v11126_v39 = vsel %vm24552_vm10, %v11124_v22, %v11125_v2  ;;  %v11127_v30 = vrot.slane %v11125_v2, 4 }
 0x40d   : > { %v19193_v60 = vpop.f32.mrf.mxu1  ;;  %v11380_v57 = vsel %vm24675_vm13, %v11372_v41, %v11379_v23  ;;  %v10183_v9 = vsel %vm10151_vm9, %v10071_v15, %v10167_v49  ;;  %v10072_v10 = vadd.f32 %v9938_v7, %v24721_v51  ;;  %11254 = vst [vmem:[#allocation4 + $0x1c] sm:$0xf] %v11126_v39  ;;  %v10182_v58 = vsel %vm10150_vm8, %v10070_v44, %v10166_v1  ;;  %v24906_v15 = vpop.f32.mrf.mxu0 }
 0x40e   : > { %v9941_v48 = vadd.f32 %v19192_v42, %v9940_v28  ;;  %11693 = vst [vmem:[#allocation4 + $0xa4] sm:$0xf] %v11380_v57  ;;  %v10488_v17 = vsel %vm24865_vm7, %v10183_v9, 0.0  ;;  %v11117_v41 = vsel %vm24552_vm10, %v24835_v26, %v11116_v55  ;;  %v11371_v51 = vsel %vm24675_vm13, %v11363_v45, %v11370_v21 }
 0x40f   : > { %v24896_v18 = vld [vmem:[#allocation3 + $0x28] sm:$0xf]  ;;  %v24898_v37 = vld [vmem:[#allocation3 + $0x2c] sm:$0xf]  ;;  %v19194_v2 = vpop.f32.mrf.mxu1  ;;  %11251 = vst [vmem:[#allocation4 + $0x10] sm:$0xf] %v11117_v41  ;;  %v18021_v1 = vpack.c.bf16 %v10488_v17, %v10182_v58 }
 0x410   : > { %v21087_v22 = vld [vmem:[#allocation3 + $0x28] sm:$0xff]   ;;  %v11401_v63 = vshrl.u32 %v24896_v18, 16  ;;  %v11404_v44 = vshll.u32 %v24896_v18, 16  ;;  %v11410_v61 = vshrl.u32 %v24898_v37, 16  ;;  %v11413_v9 = vshll.u32 %v24898_v37, 16 }
 0x411   : > { %11692 = vst [vmem:[#allocation4 + $0xa0] sm:$0xf] %v11371_v51  ;;  %vm10152_vm12 = vcmp.gt.f32.partialorder %v10072_v10, 0.0  ;;  %v10168_v26 = vmul.f32 -0.08, %v10072_v10  ;;  %v10073_v28 = vadd.f32 %v9941_v48, %v24733_v25  ;;  %v19196_v34 = vpop.f32.mrf.mxu1  ;;  %20053 = vmatprep.mubr.bf16.mxu1 %v21087_v22  ;;  %v19195_v21 = vadd.f32 %v19194_v2, %v19193_v60  ;;  %18066 = vst [vmem:[#allocation3 + $0x30] sm:$0xff] %v18021_v1   ;;  %v9953_v48 = vpop.f32.mrf.mxu0 }
 0x412   : > { %v24917_v35 = vrot.slane %v11401_v63, 7  ;;  %v24919_v45 = vrot.slane %v11410_v61, 7  ;;  %v11118_v27 = vrot.slane %v11116_v55, 4  ;;  %v11034_v23 = vld [vmem:[#allocation3 + $0x28] sm:$0xf]  ;;  %v11121_v25 = vrot.slane %v11119_v29, 4 }
 0x413   : > { %v10184_v49 = vsel %vm10152_vm12, %v10072_v10, %v10168_v26  ;;  %vm10153_vm14 = vcmp.gt.f32.partialorder %v10073_v28, 0.0  ;;  %v10169_v7 = vmul.f32 -0.08, %v10073_v28  ;;  %v19197_v42 = vpop.f32.mrf.mxu1  ;;  %v11035_v57 = vld [vmem:[#allocation3 + $0x2c] sm:$0xf]  ;;  %v9946_v58 = vadd.f32 %v24837_v32, %v19195_v21  ;;  %v24945_v6 = vpop.f32.mrf.mxu0 }
 0x414   : > { %v19198_v17 = vadd.f32 %v19197_v42, %v19196_v34  ;;  %v11120_v55 = vsel %vm24552_vm10, %v11118_v27, %v11119_v29  ;;  %v11128_v60 = vrot.slane %v11034_v23, 7  ;;  %v24930_v10 = vld [vmem:[#allocation3 + $0x20] sm:$0xf]  ;;  %v24932_v2 = vld [vmem:[#allocation3 + $0x24] sm:$0xf]  ;;  %v11123_v43 = vsel %vm24552_vm10, %v11121_v25, %v11122_v13 }
 0x415   : > { %v10185_v22 = vsel %vm10153_vm14, %v10073_v28, %v10169_v7  ;;  %v19199_v33 = vpop.f32.mrf.mxu1  ;;  %11252 = vst [vmem:[#allocation4 + $0x14] sm:$0xf] %v11120_v55  ;;  %v11131_v41 = vrot.slane %v11035_v57, 7  ;;  %v11381_v32 = vrot.slane %v24881_v59, 4  ;;  %v10074_v29 = vadd.f32 %v9946_v58, %v24715_v8  ;;  %11253 = vst [vmem:[#allocation4 + $0x18] sm:$0xf] %v11123_v43 }
 0x416   : > { %v10490_v51 = vsel %vm24885_vm11, %v10185_v22, 0.0  ;;  %v9949_v63 = vadd.f32 %v24877_v5, %v19198_v17  ;;  %v11129_v61 = vsel %vm24552_vm10, %v11127_v30, %v11128_v60  ;;  %v11130_v28 = vrot.slane %v11128_v60, 4  ;;  %v9956_v22 = vpop.f32.mrf.mxu0 }
 0x417   : > { %v18026_v1 = vpack.c.bf16 %v10490_v51, %v10184_v49  ;;  %v19200_v26 = vpop.f32.mrf.mxu1  ;;  %v11133_v13 = vrot.slane %v11131_v41, 4  ;;  %11255 = vst [vmem:[#allocation4 + $0x20] sm:$0xf] %v11129_v61  ;;  %vm10154_vm0 = vcmp.gt.f32.partialorder %v10074_v29, 0.0  ;;  %v10170_v34 = vmul.f32 -0.08, %v10074_v29 }
 0x418   : > { %v10075_v14 = vadd.f32 %v9949_v63, %v24730_v0  ;;  %v19201_v21 = vadd.f32 %v19200_v26, %v19199_v33  ;;  %v11132_v5 = vsel %vm24552_vm10, %v11130_v28, %v11131_v41  ;;  %v11383_v27 = vshrl.u32 %v24930_v10, 16  ;;  %v11036_v49 = vld [vmem:[#allocation3 + $0x30] sm:$0xf]  ;;  %v11037_v7 = vld [vmem:[#allocation3 + $0x34] sm:$0xf] }
 0x419   : > { %18067 = vst [vmem:[#allocation3 + $0x38] sm:$0xff] %v18026_v1   ;;  %v19202_v8 = vpop.f32.mrf.mxu1  ;;  %v11386_v30 = vshll.u32 %v24930_v10, 16  ;;  %v11392_v23 = vshrl.u32 %v24932_v2, 16  ;;  %v21092_v25 = vld [vmem:[#allocation3 + $0x30] sm:$0xff]   ;;  %v26744_v57 = vand.u32 15, %v24843_v46  ;;  %v11134_v58 = vrot.slane %v11036_v49, 7 }
 0x41a   : > { %vm10155_vm1 = vcmp.gt.f32.partialorder %v10075_v14, 0.0  ;;  %v9954_v42 = vadd.f32 %v19201_v21, %v9953_v48  ;;  %11256 = vst [vmem:[#allocation4 + $0x24] sm:$0xf] %v11132_v5  ;;  %v11137_v17 = vrot.slane %v11037_v7, 7  ;;  %v10171_v55 = vmul.f32 -0.08, %v10075_v14  ;;  %20054 = vmatmul.mubr.bf16.gmra.mxu1 %v21092_v25 }
 0x41b   : > { %vm24955_vm2 = vcmp.lt.s32.totalorder %v26744_v57, 12  ;;  %v19203_v60 = vpop.f32.mrf.mxu1  ;;  %v24960_v41 = vrot.slane %v11383_v27, 7  ;;  %v10186_v48 = vsel %vm10154_vm0, %v10074_v29, %v10170_v34  ;;  %v11135_v61 = vsel %vm24552_vm10, %v11133_v13, %v11134_v58  ;;  %v24968_v34 = vpop.f32.mrf.mxu0  ;;  %v11295_v18 = vld [vmem:[#allocation3 + $0x34] sm:$0xf] }
 0x41c   : > { %v21089_v10 = vld [vmem:[#allocation4 + $0x10] sm:$0xff]   ;;  %v10076_v33 = vadd.f32 %v9954_v42, %v24748_v56  ;;  %v19204_v43 = vadd.f32 %v19203_v60, %v19202_v8  ;;  %v10187_v46 = vsel %vm10155_vm1, %v10075_v14, %v10171_v55  ;;  %v21091_v51 = vld [vmem:[#allocation4 + $0x18] sm:$0xff]   ;;  %v11136_v1 = vrot.slane %v11134_v58, 4  ;;  %11257 = vst [vmem:[#allocation4 + $0x28] sm:$0xf] %v11135_v61 }
 0x41d   : > { %v19205_v63 = vpop.f32.mrf.mxu1  ;;  %v10492_v26 = vsel %vm24923_vm15, %v10187_v46, 0.0  ;;  %19985 = vmatprep.mubr.bf16.mxu0 %v21089_v10  ;;  %v11139_v28 = vrot.slane %v11137_v17, 4  ;;  %v11388_v13 = vor.u32 %v11386_v30, %v24960_v41  ;;  %v11406_v7 = vor.u32 %v11404_v44, %v24917_v35 }
 0x41e   : > { %vm10156_vm3 = vcmp.gt.f32.partialorder %v10076_v33, 0.0  ;;  %v9957_v56 = vadd.f32 %v19204_v43, %v9956_v22  ;;  %v18031_v21 = vpack.c.bf16 %v10492_v26, %v10186_v48  ;;  %19986 = vmatmul.mubr.bf16.gmra.mxu0 %v21091_v51  ;;  %v10172_v8 = vmul.f32 -0.08, %v10076_v33  ;;  %v9969_v48 = vpop.f32.mrf.mxu0 }
 0x41f   : > { %v19206_v29 = vpop.f32.mrf.mxu1  ;;  %v11138_v14 = vsel %vm24552_vm10, %v11136_v1, %v11137_v17  ;;  %v11390_v58 = vrot.slane %v24960_v41, 4  ;;  %v26747_v60 = vand.u32 15, %v24846_v53  ;;  %v11389_v44 = vsel %vm24675_vm13, %v11381_v32, %v11388_v13 }
 0x420   : > { %v24973_v5 = vld [vmem:[#allocation3 + $0x38] sm:$0xf]  ;;  %v24975_v39 = vld [vmem:[#allocation3 + $0x3c] sm:$0xf]  ;;  %v10077_v27 = vadd.f32 %v9957_v56, %v24754_v50  ;;  %v19207_v49 = vadd.f32 %v19206_v29, %v19205_v63  ;;  %11258 = vst [vmem:[#allocation4 + $0x2c] sm:$0xf] %v11138_v14  ;;  %v10188_v43 = vsel %vm10156_vm3, %v10076_v33, %v10172_v8 }
 0x421   : > { %v11437_v42 = vshrl.u32 %v24973_v5, 16  ;;  %v11440_v25 = vshll.u32 %v24973_v5, 16  ;;  %v11446_v57 = vshrl.u32 %v24975_v39, 16  ;;  %18068 = vst [vmem:[#allocation3 + $0x40] sm:$0xff] %v18031_v21   ;;  %v19208_v30 = vpop.f32.mrf.mxu1  ;;  %v21095_v55 = vld [vmem:[#allocation4 + $0x20] sm:$0xff]   ;;  %vm24988_vm5 = vcmp.lt.s32.totalorder %v26747_v60, 12 }
 0x422   : > { %vm10157_vm4 = vcmp.gt.f32.partialorder %v10077_v27, 0.0  ;;  %v10173_v17 = vmul.f32 -0.08, %v10077_v27  ;;  %v9962_v50 = vadd.f32 %v24906_v15, %v19207_v49  ;;  %v11449_v10 = vshll.u32 %v24975_v39, 16  ;;  %v21097_v41 = vld [vmem:[#allocation3 + $0x38] sm:$0xff]   ;;  %19989 = vmatprep.mubr.bf16.mxu0 %v21095_v55 }
 0x423   : > { %v24996_v22 = vrot.slane %v11437_v42, 7  ;;  %v19209_v15 = vpop.f32.mrf.mxu1  ;;  %v11038_v46 = vld [vmem:[#allocation3 + $0x38] sm:$0xf]  ;;  %v11394_v53 = vrot.slane %v11392_v23, 7  ;;  %11694 = vst [vmem:[#allocation4 + $0xa8] sm:$0xf] %v11389_v44  ;;  %20057 = vmatprep.mubr.bf16.mxu1 %v21097_v41  ;;  %v11415_v44 = vor.u32 %v11413_v9, %v24919_v45 }
 0x424   : > { %v10189_v51 = vsel %vm10157_vm4, %v10077_v27, %v10173_v17  ;;  %v10078_v63 = vadd.f32 %v9962_v50, %v24742_v20  ;;  %v19210_v59 = vadd.f32 %v19209_v15, %v19208_v30  ;;  %v11039_v61 = vld [vmem:[#allocation3 + $0x3c] sm:$0xf]  ;;  %v11140_v1 = vrot.slane %v11038_v46, 7  ;;  %v25005_v14 = vld [vmem:[#allocation3 + $0x30] sm:$0xf]  ;;  %v25007_v27 = vpop.f32.mrf.mxu0 }
 0x425   : > { %v10494_v32 = vsel %vm24955_vm2, %v10189_v51, 0.0  ;;  %v19211_v26 = vpop.f32.mrf.mxu1  ;;  %v11143_v56 = vrot.slane %v11039_v61, 7  ;;  %v11395_v33 = vshll.u32 %v24932_v2, 16  ;;  %v11399_v21 = vrot.slane %v11394_v53, 4  ;;  %v21109_v30 = vld [vmem:[#allocation4 + $0x98] sm:$0xff]  }
 0x426   : > { %v18036_v8 = vpack.c.bf16 %v10494_v32, %v10188_v43  ;;  %vm10158_vm6 = vcmp.gt.f32.partialorder %v10078_v63, 0.0  ;;  %v10174_v23 = vmul.f32 -0.08, %v10078_v63  ;;  %v9965_v29 = vadd.f32 %v24945_v6, %v19210_v59 }
 0x427   : > { %v19212_v20 = vpop.f32.mrf.mxu1  ;;  %v21101_v13 = vld [vmem:[#allocation4 + $0x28] sm:$0xff]   ;;  %v11141_v0 = vsel %vm24552_vm10, %v11139_v28, %v11140_v1  ;;  %v11142_v49 = vrot.slane %v11140_v1, 4  ;;  %v11145_v42 = vrot.slane %v11143_v56, 4  ;;  %v11397_v17 = vor.u32 %v11395_v33, %v11394_v53 }
 0x428   : > { %v11040_v2 = vld [vmem:[#allocation3 + $0x40] sm:$0xf]  ;;  %v25011_v50 = vld [vmem:[#allocation3 + $0x44] sm:$0xf]  ;;  %18069 = vst [vmem:[#allocation3 + $0x48] sm:$0xff] %v18036_v8   ;;  %v10079_v55 = vadd.f32 %v9965_v29, %v24751_v62  ;;  %v19213_v6 = vadd.f32 %v19212_v20, %v19211_v26  ;;  %v11407_v60 = vsel %vm24675_vm13, %v11399_v21, %v11406_v7  ;;  %v10190_v43 = vsel %vm10158_vm6, %v10078_v63, %v10174_v23  ;;  %v9972_v63 = vpop.f32.mrf.mxu0 }
 0x429   : > { %11259 = vst [vmem:[#allocation4 + $0x30] sm:$0xf] %v11141_v0  ;;  %v11146_v28 = vrot.slane %v11040_v2, 7  ;;  %19990 = vmatmul.mubr.bf16.gmra.mxu0 %v21101_v13  ;;  %v19214_v41 = vpop.f32.mrf.mxu1  ;;  %v21103_v15 = vld [vmem:[#allocation3 + $0x40] sm:$0xff]   ;;  %v11144_v46 = vsel %vm24552_vm10, %v11142_v49, %v11143_v56  ;;  %v11398_v62 = vsel %vm24675_vm13, %v11390_v58, %v11397_v17  ;;  %11696 = vst [vmem:[#allocation4 + $0xb0] sm:$0xf] %v11407_v60 }
 0x42a   : > { %vm10159_vm7 = vcmp.gt.f32.partialorder %v10079_v55, 0.0  ;;  %v10175_v53 = vmul.f32 -0.08, %v10079_v55  ;;  %v9970_v7 = vadd.f32 %v19213_v6, %v9969_v48  ;;  %11260 = vst [vmem:[#allocation4 + $0x34] sm:$0xf] %v11144_v46  ;;  %v11408_v37 = vrot.slane %v24917_v35, 4  ;;  %20058 = vmatmul.mubr.bf16.gmra.mxu1 %v21103_v15 }
 0x42b   : > { %11695 = vst [vmem:[#allocation4 + $0xac] sm:$0xf] %v11398_v62  ;;  %v11149_v9 = vrot.slane %v25011_v50, 7  ;;  %v19215_v51 = vpop.f32.mrf.mxu1  ;;  %v26750_v59 = vand.u32 15, %v24848_v52  ;;  %v11147_v58 = vsel %vm24552_vm10, %v11145_v42, %v11146_v28  ;;  %v11148_v1 = vrot.slane %v11146_v28, 4  ;;  %20109 = vmatprep.mubr.bf16.mxu1 %v21109_v30  ;;  %v21110_v30 = vld [vmem:[#allocation4 + $0xa0] sm:$0xff]  }
 0x42c   : > { %v11419_v48 = vshrl.u32 %v25005_v14, 16  ;;  %v10191_v32 = vsel %vm10159_vm7, %v10079_v55, %v10175_v53  ;;  %v10080_v35 = vadd.f32 %v9970_v7, %v24763_v19  ;;  %v19216_v26 = vadd.f32 %v19215_v51, %v19214_v41  ;;  %11261 = vst [vmem:[#allocation4 + $0x38] sm:$0xf] %v11147_v58  ;;  %v25061_v55 = vpop.f32.mrf.mxu0  ;;  %v21121_v53 = vld [vmem:[#allocation4 + $0x90] sm:$0xff]   ;;  %v21138_v50 = vld [vmem:[%s26498_s2 + $0x180] sm:$0xff]  }
 0x42d   : > { %vm25028_vm8 = vcmp.lt.s32.totalorder %v26750_v59, 12  ;;  %v11416_v56 = vsel %vm24675_vm13, %v11408_v37, %v11415_v44  ;;  %v10496_v52 = vsel %vm24988_vm5, %v10191_v32, 0.0  ;;  %v19217_v33 = vpop.f32.mrf.mxu1  ;;  %v11150_v21 = vsel %vm24552_vm10, %v11148_v1, %v11149_v9  ;;  %v25078_v59 = vld [vmem:[%s26498_s2 + $0x1a8] sm:$0xff]  }
 0x42e   : > { %11697 = vst [vmem:[#allocation4 + $0xb4] sm:$0xf] %v11416_v56  ;;  %v25044_v8 = vrot.slane %v11419_v48, 7  ;;  %v11422_v19 = vshll.u32 %v25005_v14, 16  ;;  %v25049_v23 = vrot.slane %v11446_v57, 7  ;;  %v18041_v29 = vpack.c.bf16 %v10496_v52, %v10190_v43  ;;  %v21114_v14 = vld [vmem:[%s26498_s2 + $0x1b0] sm:$0xff]   ;;  %v25090_v48 = vpop.f32.mrf.mxu0 }
 0x42f   : > { %v9973_v20 = vadd.f32 %v19216_v26, %v9972_v63  ;;  %11262 = vst [vmem:[#allocation4 + $0x3c] sm:$0xf] %v11150_v21  ;;  %v11417_v13 = vrot.slane %v24919_v45, 4  ;;  %v25052_v0 = vld [vmem:[#allocation3 + $0x48] sm:$0xf]  ;;  %v19218_v42 = vpop.f32.mrf.mxu1  ;;  %vm10593_vm9 = vcmp.gt.f32.partialorder %v10080_v35, 0.0 }
 0x430   : > { %v25054_v49 = vld [vmem:[#allocation3 + $0x4c] sm:$0xf]  ;;  %v11424_v17 = vor.u32 %v11422_v19, %v25044_v8  ;;  %18070 = vst [vmem:[#allocation3 + $0x50] sm:$0xff] %v18041_v29   ;;  %v10609_v2 = vmul.f32 -0.08, %v10080_v35  ;;  %v11473_v45 = vshrl.u32 %v25052_v0, 16  ;;  %v19219_v60 = vadd.f32 %v19218_v42, %v19217_v33 }
 0x431   : > { %v11482_v57 = vshrl.u32 %v25054_v49, 16  ;;  %v10081_v6 = vadd.f32 %v9973_v20, %v24776_v16  ;;  %v21107_v44 = vld [vmem:[#allocation4 + $0x30] sm:$0xff]   ;;  %v19220_v28 = vpop.f32.mrf.mxu1  ;;  %v11476_v41 = vshll.u32 %v25052_v0, 16  ;;  %v11428_v62 = vshrl.u32 %v11295_v18, 16  ;;  %v25093_v56 = vld [vmem:[#allocation3 + $0x40] sm:$0xf] }
 0x432   : > { %v11425_v43 = vsel %vm24675_vm13, %v11417_v13, %v11424_v17  ;;  %v21113_v46 = vld [vmem:[#allocation4 + $0xa8] sm:$0xff]   ;;  %v11451_v7 = vor.u32 %v11449_v10, %v25049_v23  ;;  %v11485_v16 = vshll.u32 %v25054_v49, 16  ;;  %v9978_v51 = vadd.f32 %v24968_v34, %v19219_v60  ;;  %19993 = vmatprep.mubr.bf16.mxu0 %v21107_v44  ;;  %20110 = vmatmul.mubr.bf16.vlgmr.msra.gmra.mxu1 %v21110_v30  ;;  %v21388_v34 = vld [vmem:[%s26498_s2 + $0x1b8] sm:$0xff]   ;;  %v25120_v60 = vpop.f32.mrf.mxu0 }
 0x433   : > { %v25068_v15 = vrot.slane %v11482_v57, 7  ;;  %11698 = vst [vmem:[#allocation4 + $0xb8] sm:$0xf] %v11425_v43  ;;  %vm10594_vm11 = vcmp.gt.f32.partialorder %v10081_v6, 0.0  ;;  %v10610_v37 = vmul.f32 -0.08, %v10081_v6  ;;  %v19221_v63 = vpop.f32.mrf.mxu1  ;;  %v10625_v58 = vsel %vm10593_vm9, %v10080_v35, %v10609_v2  ;;  %20113 = vmatprep.mubr.bf16.mxu1 %v21113_v46  ;;  %20158 = vmatpush3.bf16.msra.mxu1 %v21388_v34 }
 0x434   : > { %v19222_v1 = vadd.f32 %v19221_v63, %v19220_v28  ;;  %v26753_v39 = vand.u32 15, %v24853_v11  ;;  %v11430_v32 = vrot.slane %v11428_v62, 7  ;;  %v11444_v26 = vrot.slane %v24996_v22, 4  ;;  %20159 = vmatprep.subr.bf16.mxu1 %v21114_v14  ;;  %v25138_v34 = vld [vmem:[%s26498_s2 + $0x198] sm:$0xff]  }
 0x435   : > { %v25095_v35 = vrot.slane %v11473_v45, 7  ;;  %v10626_v11 = vsel %vm10594_vm11, %v10081_v6, %v10610_v37  ;;  %v19223_v52 = vpop.f32.mrf.mxu1  ;;  %v11426_v21 = vrot.slane %v25044_v8, 4  ;;  %v11431_v19 = vshll.u32 %v11295_v18, 16  ;;  %v25111_v8 = vld [vmem:[%s26498_s2 + $0x1a0] sm:$0xff]   ;;  %v21125_v0 = vld [vmem:[#allocation4 + $0xa0] sm:$0xff]  }
 0x436   : > { %vm25083_vm12 = vcmp.lt.s32.totalorder %v26753_v39, 12  ;;  %v21115_v33 = vld [vmem:[#allocation4 + $0x38] sm:$0xff]   ;;  %v11489_v29 = vrot.slane %v25068_v15, 4  ;;  %v10930_v20 = vsel %vm25028_vm8, %v10626_v11, 0.0  ;;  %v10082_v13 = vadd.f32 %v9978_v51, %v24757_v24  ;;  %v9988_v11 = vpop.f32.mrf.mxu0 }
 0x437   : > { %v9981_v42 = vadd.f32 %v25007_v27, %v19222_v1  ;;  %v25104_v30 = vld [vmem:[#allocation3 + $0x50] sm:$0xf]  ;;  %v25106_v17 = vld [vmem:[#allocation3 + $0x54] sm:$0xf]  ;;  %v18046_v2 = vpack.c.bf16 %v10930_v20, %v10625_v58  ;;  %v19224_v45 = vpop.f32.mrf.mxu1  ;;  %19994 = vmatmul.mubr.bf16.gmra.mxu0 %v21115_v33  ;;  %v11433_v6 = vor.u32 %v11431_v19, %v11430_v32  ;;  %v11442_v24 = vor.u32 %v11440_v25, %v24996_v22  ;;  %v11042_v33 = vld [vmem:[#allocation3 + $0x48] sm:$0xf] }
 0x438   : > { %v11302_v57 = vld [vmem:[#allocation3 + $0x50] sm:$0xf]  ;;  %v11452_v27 = vsel %vm24675_vm13, %v11444_v26, %v11451_v7  ;;  %v25118_v61 = vld [vmem:[#allocation3 + $0x54] sm:$0xf]  ;;  %20160 = vmatpush3.bf16.msra.mxu1 %v21114_v14  ;;  %20013 = vmatprep.mubr.bf16.mxu0 %v21121_v53  ;;  %v11435_v44 = vrot.slane %v11430_v32, 4  ;;  %v11453_v28 = vrot.slane %v25049_v23, 4  ;;  %v19225_v51 = vadd.f32 %v19224_v45, %v19223_v52 }
 0x439   : > { %v11491_v18 = vshrl.u32 %v11302_v57, 16  ;;  %11701 = vst [vmem:[#allocation4 + $0xc4] sm:$0xf] %v11452_v27  ;;  %v11455_v43 = vshrl.u32 %v25093_v56, 16  ;;  %v11158_v46 = vrot.slane %v25104_v30, 7  ;;  %v11161_v5 = vrot.slane %v25106_v17, 7  ;;  %v19226_v62 = vpop.f32.mrf.mxu1  ;;  %20161 = vmatprep.subr.bf16.mxu1 %v25078_v59 }
 0x43a   : > { %v11494_v25 = vshll.u32 %v11302_v57, 16  ;;  %v11500_v22 = vshrl.u32 %v25118_v61, 16  ;;  %18071 = vst [vmem:[#allocation3 + $0x58] sm:$0xff] %v18046_v2   ;;  %v21117_v7 = vld [vmem:[#allocation4 + $0xb0] sm:$0xff]   ;;  %v21123_v14 = vld [vmem:[#allocation4 + $0x98] sm:$0xff]   ;;  %v10083_v37 = vadd.f32 %v9981_v42, %v24766_v47  ;;  %vm10595_vm14 = vcmp.gt.f32.partialorder %v10082_v13, 0.0 }
 0x43b   : > { %v10611_v53 = vmul.f32 -0.08, %v10082_v13  ;;  %v25129_v63 = vrot.slane %v11491_v18, 7  ;;  %20114 = vmatmul.mubr.bf16.gmra.mxu1 %v21117_v7  ;;  %v19227_v58 = vpop.f32.mrf.mxu1  ;;  %v11434_v1 = vsel %vm24675_vm13, %v11426_v21, %v11433_v6  ;;  %v11443_v39 = vsel %vm24675_vm13, %v11435_v44, %v11442_v24  ;;  %v25140_v32 = vld [vmem:[#allocation3 + $0x44] sm:$0xf] }
 0x43c   : > { %v11503_v47 = vshll.u32 %v25118_v61, 16  ;;  %vm10596_vm15 = vcmp.gt.f32.partialorder %v10083_v37, 0.0  ;;  %v10612_v26 = vmul.f32 -0.08, %v10083_v37  ;;  %11699 = vst [vmem:[#allocation4 + $0xbc] sm:$0xf] %v11434_v1  ;;  %20162 = vmatpush3.bf16.msra.mxu1 %v25078_v59  ;;  %v25153_v21 = vor.u32 %v11476_v41, %v25095_v35 }
 0x43d   : > { %v26756_v52 = vand.u32 15, %v24856_v4  ;;  %11700 = vst [vmem:[#allocation4 + $0xc0] sm:$0xf] %v11443_v39  ;;  %v11163_v19 = vrot.slane %v11161_v5, 4  ;;  %v9986_v20 = vadd.f32 %v19225_v51, %v25090_v48  ;;  %v19228_v42 = vadd.f32 %v19227_v58, %v19226_v62  ;;  %v19229_v59 = vpop.f32.mrf.mxu1  ;;  %20163 = vmatprep.subr.bf16.mxu1 %v25111_v8  ;;  %v21128_v41 = vld [vmem:[%s26498_s2 + $0xf0] sm:$0xff]   ;;  %v19959_v51 = vpop.f32.mrf.mxu0 }
 0x43e   : > { %v25159_v4 = vrot.slane %v11455_v43, 7  ;;  %v25161_v57 = vrot.slane %v11500_v22, 7  ;;  %v10627_v2 = vsel %vm10595_vm14, %v10082_v13, %v10611_v53  ;;  %v10628_v45 = vsel %vm10596_vm15, %v10083_v37, %v10612_v26  ;;  %v21130_v37 = vld [vmem:[%s26498_s2 + $0x190] sm:$0xff]   ;;  %v21132_v26 = vld [vmem:[%s26498_s2 + $0xe8] sm:$0xff]   ;;  %v25265_v51 = vld [vmem:[%s26498_s2 + $0x238] sm:$0xff]  }
 0x43f   : > { %vm25146_vm0 = vcmp.lt.s32.totalorder %v26756_v52, 12  ;;  %v11458_v6 = vshll.u32 %v25093_v56, 16  ;;  %v11496_v48 = vor.u32 %v11494_v25, %v25129_v63  ;;  %v10932_v24 = vsel %vm25083_vm12, %v10628_v45, 0.0  ;;  %v19230_v44 = vpop.f32.mrf.mxu1  ;;  %20014 = vmatmul.mubr.bf16.vlgmr.msra.gmra.mxu0 %v21123_v14 }
 0x440   : > { %v10084_v27 = vadd.f32 %v9986_v20, %v24787_v3  ;;  %v9989_v18 = vadd.f32 %v19228_v42, %v9988_v11  ;;  %v18051_v22 = vpack.c.bf16 %v10932_v24, %v10627_v2  ;;  %v19231_v62 = vadd.f32 %v19230_v44, %v19229_v59  ;;  %20164 = vmatpush3.bf16.msra.mxu1 %v25111_v8  ;;  %v21389_v3 = vld [vmem:[%s26498_s2 + $0xf8] sm:$0xff]   ;;  %v10001_v59 = vpop.f32.mrf.mxu0 }
 0x441   : > { %v11046_v13 = vld [vmem:[#allocation3 + $0x58] sm:$0xf]  ;;  %v25173_v43 = vld [vmem:[#allocation3 + $0x5c] sm:$0xf]  ;;  %20017 = vmatprep.mubr.bf16.mxu0 %v21125_v0  ;;  %v11460_v56 = vor.u32 %v11458_v6, %v25159_v4  ;;  %v11464_v25 = vshrl.u32 %v25140_v32, 16  ;;  %20062 = vmatpush3.bf16.msra.mxu0 %v21389_v3  ;;  %v19232_v14 = vpop.f32.mrf.mxu1  ;;  %v11462_v53 = vrot.slane %v25159_v4, 4 }
 0x442   : > { %v11164_v7 = vrot.slane %v11046_v13, 7  ;;  %v11167_v10 = vrot.slane %v25173_v43, 7  ;;  %20165 = vmatprep.subr.bf16.mxu1 %v25138_v34  ;;  %v11467_v8 = vshll.u32 %v25140_v32, 16  ;;  %18072 = vst [vmem:[#allocation3 + $0x60] sm:$0xff] %v18051_v22   ;;  %vm10597_vm1 = vcmp.gt.f32.partialorder %v10084_v27, 0.0  ;;  %20063 = vmatprep.subr.bf16.mxu0 %v21128_v41 }
 0x443   : > { %v10613_v58 = vmul.f32 -0.08, %v10084_v27  ;;  %v10085_v1 = vadd.f32 %v9989_v18, %v24796_v12  ;;  %v9994_v39 = vadd.f32 %v25061_v55, %v19231_v62  ;;  %v21120_v52 = vld [vmem:[#allocation4 + $0xb8] sm:$0xff]   ;;  %v19233_v20 = vpop.f32.mrf.mxu1  ;;  %v11461_v42 = vsel %vm24675_vm13, %v11453_v28, %v11460_v56  ;;  %v25202_v12 = vld [vmem:[%s26498_s2 + $0x188] sm:$0xff]  }
 0x444   : > { %v11165_v32 = vsel %vm24552_vm10, %v11163_v19, %v11164_v7  ;;  %v11166_v11 = vrot.slane %v11164_v7, 4  ;;  %v11497_v55 = vsel %vm24675_vm13, %v11489_v29, %v11496_v48  ;;  %v21126_v23 = vld [vmem:[#allocation4 + $0xc0] sm:$0xff]   ;;  %11702 = vst [vmem:[#allocation4 + $0xc8] sm:$0xf] %v11461_v42  ;;  %20166 = vmatpush3.bf16.msra.mxu1 %v25138_v34  ;;  %v11487_v28 = vor.u32 %v11485_v16, %v25068_v15  ;;  %v25223_v34 = vld [vmem:[%s26498_s2 + $0xe0] sm:$0xff]   ;;  %v19960_v15 = vpop.f32.mrf.mxu0 }
 0x445   : > { %11267 = vst [vmem:[#allocation4 + $0x50] sm:$0xf] %v11165_v32  ;;  %vm10598_vm2 = vcmp.gt.f32.partialorder %v10085_v1, 0.0  ;;  %v10614_v19 = vmul.f32 -0.08, %v10085_v1  ;;  %v25209_v2 = vadd.f32 %v9994_v39, %v24780_v40  ;;  %20117 = vmatprep.mubr.bf16.mxu1 %v21120_v52  ;;  %v19234_v45 = vadd.f32 %v19233_v20, %v19232_v14  ;;  %20064 = vmatpush3.bf16.msra.mxu0 %v21128_v41  ;;  %v21131_v40 = vld [vmem:[#allocation4 + $0xa8] sm:$0xff]   ;;  %v19235_v49 = vpop.f32.mrf.mxu1 }
 0x446   : > { %11706 = vst [vmem:[#allocation4 + $0xd8] sm:$0xf] %v11497_v55  ;;  %v11168_v29 = vsel %vm24552_vm10, %v11166_v11, %v11167_v10  ;;  %v11466_v0 = vrot.slane %v11464_v25, 7  ;;  %v11480_v6 = vrot.slane %v25095_v35, 4  ;;  %v11498_v16 = vrot.slane %v25129_v63, 4  ;;  %20118 = vmatmul.mubr.bf16.gmra.mxu1 %v21126_v23  ;;  %20167 = vmatprep.subr.bf16.mxu1 %v21130_v37  ;;  %v21133_v41 = vld [vmem:[#allocation4 + $0xb0] sm:$0xff]   ;;  %v10004_v56 = vpop.f32.mrf.mxu0 }
 0x447   : > { %11268 = vst [vmem:[#allocation4 + $0x54] sm:$0xf] %v11168_v29  ;;  %v10629_v48 = vsel %vm10597_vm1, %v10084_v27, %v10613_v58  ;;  %v10630_v24 = vsel %vm10598_vm2, %v10085_v1, %v10614_v19  ;;  %v10615_v18 = vmul.f32 -0.08, %v25209_v2  ;;  %v9997_v44 = vadd.f32 %v25120_v60, %v19234_v45  ;;  %20018 = vmatmul.mubr.bf16.gmra.mxu0 %v21131_v40  ;;  %v19236_v62 = vpop.f32.mrf.mxu1  ;;  %v25271_v32 = vld [vmem:[#allocation3 + $0x5c] sm:$0xf] }
 0x448   : > { %v10934_v35 = vsel %vm25146_vm0, %v10630_v24, 0.0  ;;  %v11469_v13 = vor.u32 %v11467_v8, %v11466_v0  ;;  %20065 = vmatprep.subr.bf16.mxu0 %v21132_v26  ;;  %v11471_v22 = vrot.slane %v11466_v0, 4  ;;  %v11505_v27 = vor.u32 %v11503_v47, %v25161_v57  ;;  %20168 = vmatpush3.bf16.msra.mxu1 %v21130_v37  ;;  %v19963_v8 = vpop.f32.mrf.mxu0  ;;  %v21139_v11 = vld [vmem:[#allocation4 + $0xb8] sm:$0xff]   ;;  %v21141_v52 = vld [vmem:[#allocation4 + $0xc0] sm:$0xff]   ;;  %v21148_v15 = vld [vmem:[%s26498_s2 + $0xc8] sm:$0xff]  }
 0x449   : > { %v18056_v25 = vpack.c.bf16 %v10934_v35, %v10629_v48  ;;  %20021 = vmatprep.mubr.bf16.mxu0 %v21133_v41  ;;  %v11488_v7 = vsel %vm24675_vm13, %v11480_v6, %v11487_v28  ;;  %v11151_v60 = vrot.slane %v11149_v9, 4  ;;  %v10087_v3 = vadd.f32 %v9997_v44, %v24790_v38  ;;  %20066 = vmatpush3.bf16.msra.mxu0 %v21132_v26  ;;  %v11043_v9 = vld [vmem:[#allocation3 + $0x4c] sm:$0xf]  ;;  %v19238_v38 = vpop.f32.mrf.mxu1  ;;  %v25269_v26 = vld [vmem:[#allocation3 + $0x58] sm:$0xf]  ;;  %v21144_v20 = vld [vmem:[%s26498_s2 + $0xd0] sm:$0xff]  }
 0x44a   : > { %v11470_v14 = vsel %vm24675_vm13, %v11462_v53, %v11469_v13  ;;  %v11479_v61 = vsel %vm24675_vm13, %v11471_v22, %v25153_v21  ;;  %11705 = vst [vmem:[#allocation4 + $0xd4] sm:$0xf] %v11488_v7  ;;  %20169 = vmatprep.subr.bf16.mxu1 %v25202_v12  ;;  %v11152_v47 = vrot.slane %v11042_v33, 7  ;;  %vm10599_vm3 = vcmp.gt.f32.partialorder %v25209_v2, 0.0  ;;  %20067 = vmatprep.subr.bf16.mxu0 %v25223_v34  ;;  %v21140_v21 = vld [vmem:[%s26498_s2 + $0xd8] sm:$0xff]   ;;  %v10017_v39 = vpop.f32.mrf.mxu0  ;;  %v21137_v13 = vld [vmem:[#allocation4 + $0x10] sm:$0xff]  }
 0x44b   : > { %18073 = vst [vmem:[#allocation3 + $0x68] sm:$0xff] %v18056_v25   ;;  %v26759_v4 = vand.u32 15, %v24858_v54  ;;  %11703 = vst [vmem:[#allocation4 + $0xcc] sm:$0xf] %v11470_v14  ;;  %vm10600_vm5 = vcmp.gt.f32.partialorder %v10087_v3, 0.0  ;;  %v19239_v1 = vpop.f32.mrf.mxu1  ;;  %v11155_v42 = vrot.slane %v11043_v9, 7  ;;  %v10631_v23 = vsel %vm10599_vm3, %v25209_v2, %v10615_v18 }
 0x44c   : > { %11704 = vst [vmem:[#allocation4 + $0xd0] sm:$0xf] %v11479_v61  ;;  %v10616_v37 = vmul.f32 -0.08, %v10087_v3  ;;  %v11153_v54 = vsel %vm24552_vm10, %v11151_v60, %v11152_v47  ;;  %v11154_v58 = vrot.slane %v11152_v47, 4  ;;  %20170 = vmatpush3.bf16.msra.mxu1 %v25202_v12  ;;  %v11160_v55 = vrot.slane %v11158_v46, 4  ;;  %v19964_v45 = vpop.f32.mrf.mxu0 }
 0x44d   : > { %vm25254_vm4 = vcmp.lt.s32.totalorder %v26759_v4, 12  ;;  %11263 = vst [vmem:[#allocation4 + $0x40] sm:$0xf] %v11153_v54  ;;  %v25279_v59 = vld [vmem:[#allocation3 + $0x60] sm:$0xf]  ;;  %20068 = vmatpush3.bf16.msra.mxu0 %v25223_v34  ;;  %20171 = vmatprep.subr.bf16.mxu1 %v21138_v50  ;;  %v11506_v28 = vsel %vm24675_vm13, %v11498_v16, %v11505_v27  ;;  %v19241_v29 = vpop.f32.mrf.mxu1  ;;  %v11157_v2 = vrot.slane %v11155_v42, 4 }
 0x44e   : > { %v25281_v19 = vld [vmem:[#allocation3 + $0x64] sm:$0xf]  ;;  %v10632_v12 = vsel %vm10600_vm5, %v10087_v3, %v10616_v37  ;;  %20069 = vmatprep.subr.bf16.mxu0 %v21140_v21  ;;  %v11156_v40 = vsel %vm24552_vm10, %v11154_v58, %v11155_v42  ;;  %v11162_v6 = vsel %vm24552_vm10, %v11160_v55, %v11161_v5  ;;  %11707 = vst [vmem:[#allocation4 + $0xdc] sm:$0xf] %v11506_v28  ;;  %v10020_v49 = vpop.f32.mrf.mxu0  ;;  %v11509_v5 = vshrl.u32 %v25269_v26, 16  ;;  %v21146_v58 = vld [vmem:[%s26498_s2 + $0x230] sm:$0xff]  }
 0x44f   : > { %v10936_v0 = vsel %vm25254_vm4, %v10632_v12, 0.0  ;;  %20022 = vmatmul.mubr.bf16.gmra.mxu0 %v21139_v11  ;;  %11264 = vst [vmem:[#allocation4 + $0x44] sm:$0xf] %v11156_v40  ;;  %11266 = vst [vmem:[#allocation4 + $0x4c] sm:$0xf] %v11162_v6  ;;  %v19242_v34 = vpop.f32.mrf.mxu1  ;;  %v11159_v17 = vsel %vm24552_vm10, %v11157_v2, %v11158_v46  ;;  %v11518_v16 = vshrl.u32 %v25271_v32, 16 }
 0x450   : > { %v18061_v63 = vpack.c.bf16 %v10936_v0, %v10631_v23  ;;  %20172 = vmatpush3.bf16.msra.mxu1 %v21138_v50  ;;  %20025 = vmatprep.mubr.bf16.mxu0 %v21141_v52  ;;  %11265 = vst [vmem:[#allocation4 + $0x48] sm:$0xf] %v11159_v17  ;;  %v11527_v41 = vshrl.u32 %v25279_v59, 16  ;;  %v11530_v30 = vshll.u32 %v25279_v59, 16  ;;  %v11536_v46 = vshrl.u32 %v25281_v19, 16  ;;  %v21153_v22 = vld [vmem:[#allocation4 + $0x8] sm:$0xff]  }
 0x451   : > { %20070 = vmatpush3.bf16.msra.mxu0 %v21140_v21  ;;  %20221 = vmatprep.subr.bf16.mxu1 %v25265_v51  ;;  %v19244_v18 = vpop.f32.mrf.mxu1  ;;  %v21151_v33 = vld [vmem:[%s26498_s2 + $0xc0] sm:$0xff]   ;;  %v11511_v9 = vrot.slane %v11509_v5, 7  ;;  %v11512_v47 = vshll.u32 %v25269_v26, 16  ;;  %v11539_v53 = vshll.u32 %v25281_v19, 16  ;;  %v21156_v1 = vld [vmem:[%s26498_s2 + $0x178] sm:$0xff]   ;;  %v11507_v39 = vrot.slane %v25161_v57, 4 }
 0x452   : > { %v25309_v48 = vld [vmem:[#allocation3 + $0x68] sm:$0xf]  ;;  %v25311_v24 = vld [vmem:[#allocation3 + $0x6c] sm:$0xf]  ;;  %18074 = vst [vmem:[#allocation3 + $0x70] sm:$0xff] %v18061_v63   ;;  %v21129_v44 = vld [vmem:[#allocation4 + $0xc8] sm:$0xff]   ;;  %20071 = vmatprep.subr.bf16.mxu0 %v21144_v20 }
 0x453   : > { %v11176_v35 = vrot.slane %v25309_v48, 7  ;;  %v11179_v62 = vrot.slane %v25311_v24, 7  ;;  %v21134_v56 = vld [vmem:[#allocation4 + $0xd0] sm:$0xff]   ;;  %v19245_v27 = vpop.f32.mrf.mxu1  ;;  %20121 = vmatprep.mubr.bf16.mxu1 %v21129_v44  ;;  %v21147_v7 = vld [vmem:[#allocation4 + $0xc8] sm:$0xff]   ;;  %v11529_v3 = vrot.slane %v11527_v41, 7  ;;  %v25324_v14 = vrot.slane %v11536_v46, 7 }
 0x454   : > { %20122 = vmatmul.mubr.bf16.gmra.mxu1 %v21134_v56  ;;  %v25330_v50 = vld [vmem:[#allocation3 + $0x68] sm:$0xf]  ;;  %v25336_v21 = vld [vmem:[#allocation3 + $0x6c] sm:$0xf]  ;;  %v11514_v11 = vor.u32 %v11512_v47, %v11511_v9  ;;  %v21142_v52 = vld [vmem:[#allocation4 + $0x18] sm:$0xff]   ;;  %v11516_v45 = vrot.slane %v11511_v9, 4 }
 0x455   : > { %v11178_v25 = vrot.slane %v11176_v35, 4  ;;  %20072 = vmatpush3.bf16.msra.mxu0 %v21144_v20  ;;  %v19247_v60 = vpop.f32.mrf.mxu1  ;;  %20173 = vmatprep.mubr.bf16.mxu1 %v21137_v13  ;;  %v21145_v20 = vld [vmem:[#allocation4 + $0x20] sm:$0xff]   ;;  %v11532_v42 = vor.u32 %v11530_v30, %v11529_v3  ;;  %v11545_v59 = vshrl.u32 %v25330_v50, 16  ;;  %v21160_v23 = vld [vmem:[%s26498_s2 + $0x170] sm:$0xff]   ;;  %v11541_v57 = vor.u32 %v11539_v53, %v25324_v14  ;;  %v21150_v29 = vld [vmem:[%s26498_s2 + $0x228] sm:$0xff]  }
 0x456   : > { %20073 = vmatprep.subr.bf16.mxu0 %v21148_v15  ;;  %v11515_v12 = vsel %vm24675_vm13, %v11507_v39, %v11514_v11  ;;  %v11554_v28 = vshrl.u32 %v25336_v21, 16  ;;  %v11520_v0 = vrot.slane %v11518_v16, 7  ;;  %v11521_v40 = vshll.u32 %v25271_v32, 16  ;;  %v21155_v34 = vld [vmem:[#allocation4 + $0x10] sm:$0xff]   ;;  %v21149_v27 = vld [vmem:[#allocation4 + $0x28] sm:$0xff]  }
 0x457   : > { %v11180_v61 = vsel %vm24552_vm10, %v11178_v25, %v11179_v62  ;;  %20026 = vmatmul.mubr.bf16.gmra.mxu0 %v21147_v7  ;;  %v19248_v38 = vpop.f32.mrf.mxu1  ;;  %11708 = vst [vmem:[#allocation4 + $0xe0] sm:$0xf] %v11515_v12  ;;  %v11534_v49 = vrot.slane %v11529_v3, 4  ;;  %v11547_v41 = vrot.slane %v11545_v59, 7  ;;  %v11548_v13 = vshll.u32 %v25330_v50, 16  ;;  %v21164_v25 = vld [vmem:[%s26498_s2 + $0x168] sm:$0xff]  }
 0x458   : > { %11272 = vst [vmem:[#allocation4 + $0x64] sm:$0xf] %v11180_v61  ;;  %20077 = vmatprep.mubr.bf16.mxu0 %v21153_v22  ;;  %v11523_v17 = vor.u32 %v11521_v40, %v11520_v0  ;;  %v11525_v5 = vrot.slane %v11520_v0, 4  ;;  %v11556_v22 = vrot.slane %v11554_v28, 7  ;;  %v11543_v3 = vrot.slane %v25324_v14, 4  ;;  %v21152_v47 = vld [vmem:[#allocation4 + $0x30] sm:$0xff]  }
 0x459   : > { %v11310_v8 = vld [vmem:[#allocation3 + $0x70] sm:$0xf]  ;;  %v25333_v4 = vld [vmem:[#allocation3 + $0x74] sm:$0xf]  ;;  %20074 = vmatpush3.bf16.msra.mxu0 %v21148_v15  ;;  %v19250_v26 = vpop.f32.mrf.mxu1  ;;  %v11542_v32 = vsel %vm24675_vm13, %v11534_v49, %v11541_v57  ;;  %v11552_v7 = vrot.slane %v11547_v41, 4  ;;  %v11550_v61 = vor.u32 %v11548_v13, %v11547_v41  ;;  %v21159_v14 = vld [vmem:[%s26498_s2 + $0x218] sm:$0xff]  }
 0x45a   : > { %v11563_v37 = vshrl.u32 %v11310_v8, 16  ;;  %v11572_v54 = vshrl.u32 %v25333_v4, 16  ;;  %20075 = vmatprep.subr.bf16.mxu0 %v21151_v33  ;;  %v11566_v6 = vshll.u32 %v11310_v8, 16  ;;  %v21157_v15 = vld [vmem:[#allocation4 + $0x18] sm:$0xff]   ;;  %v11575_v16 = vshll.u32 %v25333_v4, 16  ;;  %v21165_v26 = vld [vmem:[#allocation4 + $0x28] sm:$0xff]  }
 0x45b   : > { %v19251_v55 = vpop.f32.mrf.mxu1  ;;  %v11524_v46 = vsel %vm24675_vm13, %v11516_v45, %v11523_v17  ;;  %v11533_v44 = vsel %vm24675_vm13, %v11525_v5, %v11532_v42  ;;  %11711 = vst [vmem:[#allocation4 + $0xec] sm:$0xf] %v11542_v32  ;;  %v11561_v50 = vrot.slane %v11556_v22, 4  ;;  %v11551_v4 = vsel %vm24675_vm13, %v11543_v3, %v11550_v61  ;;  %v21172_v42 = vld [vmem:[%s26498_s2 + $0x158] sm:$0xff]   ;;  %v21167_v59 = vld [vmem:[%s26498_s2 + $0x208] sm:$0xff]   ;;  %v21173_v12 = vld [vmem:[#allocation4 + $0x38] sm:$0xff]  }
 0x45c   : > { %v25347_v19 = vrot.slane %v11563_v37, 7  ;;  %20174 = vmatmul.mubr.bf16.vlgmr.msra.gmra.mxu1 %v21142_v52  ;;  %v25362_v63 = vrot.slane %v11572_v54, 7  ;;  %11709 = vst [vmem:[#allocation4 + $0xe4] sm:$0xf] %v11524_v46  ;;  %11710 = vst [vmem:[#allocation4 + $0xe8] sm:$0xf] %v11533_v44 }
 0x45d   : > { %20076 = vmatpush3.bf16.msra.mxu0 %v21151_v33  ;;  %v19253_v2 = vpop.f32.mrf.mxu1  ;;  %20177 = vmatprep.mubr.bf16.mxu1 %v21145_v20  ;;  %v11557_v33 = vshll.u32 %v25336_v21, 16  ;;  %v21163_v21 = vld [vmem:[#allocation4 + $0x20] sm:$0xff]   ;;  %v21168_v37 = vld [vmem:[%s26498_s2 + $0x160] sm:$0xff]   ;;  %11712 = vst [vmem:[#allocation4 + $0xf0] sm:$0xf] %v11551_v4  ;;  %v21162_v52 = vld [vmem:[%s26498_s2 + $0x210] sm:$0xff]  }
 0x45e   : > { %20222 = vmatpush3.bf16.msra.mxu1 %v25265_v51  ;;  %20125 = vmatprep.subr.bf16.mxu0 %v21156_v1  ;;  %v11568_v30 = vor.u32 %v11566_v6, %v25347_v19  ;;  %v21154_v51 = vld [vmem:[%s26498_s2 + $0x220] sm:$0xff]   ;;  %v11577_v60 = vor.u32 %v11575_v16, %v25362_v63  ;;  %v11570_v8 = vrot.slane %v25347_v19, 4  ;;  %v21158_v20 = vld [vmem:[#allocation4 + $0x38] sm:$0xff]   ;;  %v21161_v55 = vld [vmem:[#allocation4 + $0x40] sm:$0xff]  }
 0x45f   : > { %20223 = vmatprep.subr.bf16.mxu1 %v21146_v58  ;;  %v19254_v18 = vpop.f32.mrf.mxu1  ;;  %v11559_v38 = vor.u32 %v11557_v33, %v11556_v22  ;;  %v21171_v19 = vld [vmem:[#allocation4 + $0x30] sm:$0xff]   ;;  %v21170_v57 = vld [vmem:[%s26498_s2 + $0x200] sm:$0xff]   ;;  %v21169_v0 = vld [vmem:[#allocation3 + $0x18] sm:$0xff]  }
 0x460   : > { %20078 = vmatmul.mubr.bf16.vlgmr.msra.gmra.mxu0 %v21155_v34  ;;  %v11569_v53 = vsel %vm24675_vm13, %v11561_v50, %v11568_v30  ;;  %v21180_v28 = vld [vmem:[%s26498_s2 + $0x148] sm:$0xff]   ;;  %v21166_v45 = vld [vmem:[#allocation4 + $0x48] sm:$0xff]   ;;  %v21185_v5 = vld [vmem:[#allocation3 + $0x10] sm:$0xff]  }
 0x461   : > { %20081 = vmatprep.mubr.bf16.mxu0 %v21157_v15  ;;  %20126 = vmatpush3.bf16.msra.mxu0 %v21156_v1  ;;  %v19256_v56 = vpop.f32.mrf.mxu1  ;;  %v11560_v54 = vsel %vm24675_vm13, %v11552_v7, %v11559_v38  ;;  %11714 = vst [vmem:[#allocation4 + $0xf8] sm:$0xf] %v11569_v53  ;;  %v21399_v1 = vmov 0.0|0.0   ;;  %v11579_v15 = vrot.slane %v25362_v63, 4  ;;  %v21179_v41 = vld [vmem:[#allocation4 + $0x40] sm:$0xff]   ;;  %v21183_v30 = vld [vmem:[%s26498_s2 + $0x140] sm:$0xff]  }
 0x462   : > { %20224 = vmatpush3.bf16.msra.mxu1 %v21146_v58  ;;  %20127 = vmatprep.subr.bf16.mxu0 %v21160_v23  ;;  %v11578_v58 = vsel %vm24675_vm13, %v11570_v8, %v11577_v60  ;;  %v17421_v39 = vcombine.low %v21399_v1, %v21399_v1  ;;  %11713 = vst [vmem:[#allocation4 + $0xf4] sm:$0xf] %v11560_v54  ;;  %v21175_v63 = vld [vmem:[%s26498_s2 + $0x78] sm:$0xff]   ;;  %v21178_v61 = vld [vmem:[%s26498_s2 + $0x70] sm:$0xff]   ;;  %v21177_v4 = vld [vmem:[#allocation3 + $0x28] sm:$0xff]  }
 0x463   : > { %20225 = vmatprep.subr.bf16.mxu1 %v21150_v29  ;;  %v19257_v9 = vpop.f32.mrf.mxu1  ;;  %11715 = vst [vmem:[#allocation4 + $0xfc] sm:$0xf] %v11578_v58  ;;  %v17422_v11 = vcombine.high %v21399_v1, %v21399_v1  ;;  %v21188_v38 = vld [vmem:[%s26498_s2 + $0x1f8] sm:$0xff]   ;;  %v11169_v58 = vrot.slane %v11167_v10, 4  ;;  %v21200_v24 = vld [vmem:[%s26498_s2 + $0x1e0] sm:$0xff]  }
 0x464   : > { %20178 = vmatmul.mubr.bf16.gmra.mxu1 %v21149_v27  ;;  %11017 = vst [vmem:[#allocation3 + $0x78] sm:$0xf] %v17421_v39  ;;  %11019 = vst [vmem:[#allocation3 + $0x80] sm:$0xf] %v17421_v39 }
 0x465   : > { %20128 = vmatpush3.bf16.msra.mxu0 %v21160_v23  ;;  %20181 = vmatprep.mubr.bf16.mxu1 %v21152_v47  ;;  %11021 = vst [vmem:[#allocation3 + $0x88] sm:$0xf] %v17421_v39  ;;  %11023 = vst [vmem:[#allocation3 + $0x90] sm:$0xf] %v17421_v39  ;;  %v21176_v23 = vld [vmem:[%s26498_s2 + $0x150] sm:$0xff]   ;;  %v21174_v47 = vld [vmem:[#allocation3 + $0x20] sm:$0xff]  }
 0x466   : > { %20226 = vmatpush3.bf16.msra.mxu1 %v21150_v29  ;;  %20129 = vmatprep.subr.bf16.mxu0 %v21164_v25  ;;  %11018 = vst [vmem:[#allocation3 + $0x7c] sm:$0xf] %v17422_v11  ;;  %11020 = vst [vmem:[#allocation3 + $0x84] sm:$0xf] %v17422_v11 }
 0x467   : > { %20227 = vmatprep.subr.bf16.mxu1 %v21154_v51  ;;  %11022 = vst [vmem:[#allocation3 + $0x8c] sm:$0xf] %v17422_v11  ;;  %11024 = vst [vmem:[#allocation3 + $0x94] sm:$0xf] %v17422_v11  ;;  %v21182_v11 = vld [vmem:[%s26498_s2 + $0x68] sm:$0xff]  }
 0x468   : > { %20082 = vmatmul.mubr.bf16.gmra.mxu0 %v21163_v21  ;;  %v11049_v21 = vld [vmem:[#allocation3 + $0x64] sm:$0xf] }
 0x469   : > { %20085 = vmatprep.mubr.bf16.mxu0 %v21165_v26  ;;  %20130 = vmatpush3.bf16.msra.mxu0 %v21164_v25  ;;  %v11173_v39 = vrot.slane %v11049_v21, 7  ;;  %v21192_v26 = vld [vmem:[%s26498_s2 + $0x1f0] sm:$0xff]  }
 0x46a   : > { %20228 = vmatpush3.bf16.msra.mxu1 %v21154_v51  ;;  %20131 = vmatprep.subr.bf16.mxu0 %v21168_v37 }
 0x46b   : > { %20229 = vmatprep.subr.bf16.mxu1 %v21159_v14  ;;  %v11312_v29 = vld [vmem:[#allocation3 + $0x78] sm:$0xf]  ;;  %v11314_v16 = vld [vmem:[#allocation3 + $0x80] sm:$0xf] }
 0x46c   : > { %20182 = vmatmul.mubr.bf16.gmra.mxu1 %v21158_v20  ;;  %v11581_v2 = vshrl.u32 %v11312_v29, 16  ;;  %v11584_v6 = vshll.u32 %v11312_v29, 16  ;;  %v11599_v44 = vshrl.u32 %v11314_v16, 16  ;;  %v11602_v13 = vshll.u32 %v11314_v16, 16  ;;  %v21196_v29 = vld [vmem:[%s26498_s2 + $0x1e8] sm:$0xff]  }
 0x46d   : > { %20132 = vmatpush3.bf16.msra.mxu0 %v21168_v37  ;;  %20185 = vmatprep.mubr.bf16.mxu1 %v21161_v55  ;;  %v11313_v40 = vld [vmem:[#allocation3 + $0x7c] sm:$0xf]  ;;  %v11315_v32 = vld [vmem:[#allocation3 + $0x84] sm:$0xf]  ;;  %v11175_v20 = vrot.slane %v11173_v39, 4 }
 0x46e   : > { %20230 = vmatpush3.bf16.msra.mxu1 %v21159_v14  ;;  %20133 = vmatprep.subr.bf16.mxu0 %v21172_v42  ;;  %v11590_v34 = vshrl.u32 %v11313_v40, 16  ;;  %v11593_v49 = vshll.u32 %v11313_v40, 16  ;;  %v11583_v17 = vrot.slane %v11581_v2, 7  ;;  %v11608_v56 = vshrl.u32 %v11315_v32, 16  ;;  %v11048_v14 = vld [vmem:[#allocation3 + $0x60] sm:$0xf] }
 0x46f   : > { %20231 = vmatprep.subr.bf16.mxu1 %v21162_v52  ;;  %v11611_v27 = vshll.u32 %v11315_v32, 16  ;;  %v11601_v33 = vrot.slane %v11599_v44, 7  ;;  %v21187_v37 = vld [vmem:[#allocation3 + $0x18] sm:$0xff]   ;;  %v11170_v1 = vrot.slane %v11048_v14, 7  ;;  %v21195_v40 = vld [vmem:[#allocation3 + $0x28] sm:$0xff]   ;;  %v21190_v32 = vld [vmem:[#allocation3 + $0x40] sm:$0xff]  }
 0x470   : > { %20086 = vmatmul.mubr.bf16.gmra.mxu0 %v21171_v19  ;;  %v11592_v18 = vrot.slane %v11590_v34, 7  ;;  %v11586_v51 = vor.u32 %v11584_v6, %v11583_v17  ;;  %v11588_v46 = vrot.slane %v11583_v17, 4  ;;  %v25427_v3 = vrot.slane %v11608_v56, 7  ;;  %v11052_v19 = vld [vmem:[#allocation3 + $0x70] sm:$0xf]  ;;  %v21199_v56 = vld [vmem:[%s26498_s2 + $0x48] sm:$0xff]  }
 0x471   : > { %20089 = vmatprep.mubr.bf16.mxu0 %v21173_v12  ;;  %20134 = vmatpush3.bf16.msra.mxu0 %v21172_v42  ;;  %v11604_v50 = vor.u32 %v11602_v13, %v11601_v33  ;;  %v11606_v9 = vrot.slane %v11601_v33, 4  ;;  %v11171_v43 = vsel %vm24552_vm10, %v11169_v58, %v11170_v1  ;;  %v11172_v10 = vrot.slane %v11170_v1, 4  ;;  %v21186_v42 = vld [vmem:[%s26498_s2 + $0x60] sm:$0xff]   ;;  %v11054_v6 = vld [vmem:[#allocation3 + $0x78] sm:$0xf]  ;;  %v21193_v13 = vld [vmem:[#allocation3 + $0x48] sm:$0xff]  }
 0x472   : > { %20232 = vmatpush3.bf16.msra.mxu1 %v21162_v52  ;;  %20135 = vmatprep.subr.bf16.mxu0 %v21176_v23  ;;  %v11595_v22 = vor.u32 %v11593_v49, %v11592_v18  ;;  %v11587_v25 = vsel %vm24675_vm13, %v11579_v15, %v11586_v51  ;;  %v11597_v7 = vrot.slane %v11592_v18, 4  ;;  %v11613_v8 = vor.u32 %v11611_v27, %v25427_v3  ;;  %v21189_v52 = vld [vmem:[#allocation3 + $0x20] sm:$0xff]   ;;  %v11055_v34 = vld [vmem:[#allocation3 + $0x7c] sm:$0xf]  ;;  %v21197_v15 = vld [vmem:[#allocation3 + $0x30] sm:$0xff]  }
 0x473   : > { %20233 = vmatprep.subr.bf16.mxu1 %v21167_v59  ;;  %11716 = vst [vmem:[#allocation4 + $0x100] sm:$0xf] %v11587_v25  ;;  %11269 = vst [vmem:[#allocation4 + $0x58] sm:$0xf] %v11171_v43  ;;  %v11174_v55 = vsel %vm24552_vm10, %v11172_v10, %v11173_v39  ;;  %v11181_v12 = vrot.slane %v11179_v62, 4  ;;  %v21191_v49 = vld [vmem:[%s26498_s2 + $0x58] sm:$0xff]  }
 0x474   : > { %20186 = vmatmul.mubr.bf16.gmra.mxu1 %v21166_v45  ;;  %v11596_v60 = vsel %vm24675_vm13, %v11588_v46, %v11595_v22  ;;  %v11605_v53 = vsel %vm24675_vm13, %v11597_v7, %v11604_v50  ;;  %v11614_v54 = vsel %vm24675_vm13, %v11606_v9, %v11613_v8  ;;  %11270 = vst [vmem:[#allocation4 + $0x5c] sm:$0xf] %v11174_v55  ;;  %v21184_v45 = vld [vmem:[#allocation3 + $0x38] sm:$0xff]   ;;  %v11188_v17 = vrot.slane %v11054_v6, 7  ;;  %v11056_v44 = vld [vmem:[#allocation3 + $0x80] sm:$0xf] }
 0x475   : > { %20136 = vmatpush3.bf16.msra.mxu0 %v21176_v23  ;;  %20237 = vmatprep.mubr.bf16.mxu1 %v21169_v0  ;;  %11717 = vst [vmem:[#allocation4 + $0x104] sm:$0xf] %v11596_v60  ;;  %11718 = vst [vmem:[#allocation4 + $0x108] sm:$0xf] %v11605_v53  ;;  %v11053_v23 = vld [vmem:[#allocation3 + $0x74] sm:$0xf] }
 0x476   : > { %20234 = vmatpush3.bf16.msra.mxu1 %v21167_v59  ;;  %20137 = vmatprep.subr.bf16.mxu0 %v21180_v28  ;;  %11719 = vst [vmem:[#allocation4 + $0x10c] sm:$0xf] %v11614_v54  ;;  %v11177_v59 = vsel %vm24552_vm10, %v11175_v20, %v11176_v35  ;;  %v11185_v48 = vrot.slane %v11053_v23, 7  ;;  %v11190_v16 = vrot.slane %v11188_v17, 4  ;;  %v21204_v51 = vld [vmem:[%s26498_s2 + $0x1d8] sm:$0xff]   ;;  %v11194_v22 = vrot.slane %v11056_v44, 7 }
 0x477   : > { %20235 = vmatprep.subr.bf16.mxu1 %v21170_v57  ;;  %11271 = vst [vmem:[#allocation4 + $0x60] sm:$0xf] %v11177_v59  ;;  %v21203_v27 = vld [vmem:[#allocation3 + $0x38] sm:$0xff]   ;;  %v11058_v7 = vld [vmem:[#allocation3 + $0x88] sm:$0xf]  ;;  %v21208_v60 = vld [vmem:[%s26498_s2 + $0x1d0] sm:$0xff]  }
 0x478   : > { %20090 = vmatmul.mubr.bf16.gmra.mxu0 %v21179_v41  ;;  %v11187_v2 = vrot.slane %v11185_v48, 4  ;;  %v21194_v41 = vld [vmem:[%s26498_s2 + $0x50] sm:$0xff]   ;;  %v25487_v33 = vld [vmem:[#allocation3 + $0x8c] sm:$0xf]  ;;  %v11196_v50 = vrot.slane %v11194_v22, 4  ;;  %v11200_v9 = vrot.slane %v11058_v7, 7 }
 0x479   : > { %20138 = vmatpush3.bf16.msra.mxu0 %v21180_v28  ;;  %20141 = vmatprep.mubr.bf16.mxu0 %v21185_v5  ;;  %v21181_v28 = vld [vmem:[#allocation3 + $0x30] sm:$0xff]   ;;  %v11191_v5 = vrot.slane %v11055_v34, 7  ;;  %v21212_v58 = vld [vmem:[%s26498_s2 + $0x1c8] sm:$0xff]   ;;  %v21220_v20 = vld [vmem:[%s26498_s2 + $0x38] sm:$0xff]  }
 0x47a   : > { %20236 = vmatpush3.bf16.msra.mxu1 %v21170_v57  ;;  %20139 = vmatprep.subr.bf16.mxu0 %v21183_v30  ;;  %v11182_v57 = vrot.slane %v11052_v19, 7  ;;  %v11189_v18 = vsel %vm24552_vm10, %v11187_v2, %v11188_v17  ;;  %v11202_v53 = vrot.slane %v11200_v9, 4  ;;  %v21198_v14 = vld [vmem:[#allocation3 + $0x50] sm:$0xff]   ;;  %v21201_v1 = vld [vmem:[#allocation4 + $0xd0] sm:$0xff]   ;;  %v21219_v55 = vld [vmem:[#allocation4 + $0xa8] sm:$0xff]  }
 0x47b   : > { %20285 = vmatprep.subr.bf16.mxu1 %v21175_v63  ;;  %11275 = vst [vmem:[#allocation4 + $0x70] sm:$0xf] %v11189_v18  ;;  %v11192_v46 = vsel %vm24552_vm10, %v11190_v16, %v11191_v5  ;;  %v21211_v39 = vld [vmem:[#allocation3 + $0x48] sm:$0xff]   ;;  %v21206_v43 = vld [vmem:[#allocation4 + $0xd8] sm:$0xff]   ;;  %v21235_v34 = vld [vmem:[#allocation4 + $0xc8] sm:$0xff]  }
 0x47c   : > { %v11183_v35 = vsel %vm24552_vm10, %v11181_v12, %v11182_v57  ;;  %v11184_v0 = vrot.slane %v11182_v57, 4  ;;  %11276 = vst [vmem:[#allocation4 + $0x74] sm:$0xf] %v11192_v46  ;;  %v21210_v10 = vld [vmem:[%s26498_s2 + $0xf0] sm:$0xff]   ;;  %v21215_v19 = vld [vmem:[%s26498_s2 + $0xe8] sm:$0xff]   ;;  %v21214_v12 = vld [vmem:[#allocation4 + $0xe8] sm:$0xff]  }
 0x47d   : > { %20238 = vmatmul.mubr.bf16.vlgmr.msra.gmra.mxu1 %v21174_v47  ;;  %20140 = vmatpush3.bf16.msra.mxu0 %v21183_v30  ;;  %11273 = vst [vmem:[#allocation4 + $0x68] sm:$0xf] %v11183_v35  ;;  %v11193_v30 = vrot.slane %v11191_v5, 4  ;;  %v11203_v47 = vrot.slane %v25487_v33, 7  ;;  %v21224_v59 = vld [vmem:[%s26498_s2 + $0x30] sm:$0xff]   ;;  %v21221_v23 = vld [vmem:[#allocation4 + $0xb0] sm:$0xff]  }
 0x47e   : > { %20241 = vmatprep.mubr.bf16.mxu1 %v21177_v4  ;;  %20286 = vmatpush3.bf16.msra.mxu1 %v21175_v63  ;;  %v11186_v62 = vsel %vm24552_vm10, %v11184_v0, %v11185_v48  ;;  %v11057_v63 = vld [vmem:[#allocation3 + $0x84] sm:$0xf]  ;;  %v21227_v48 = vld [vmem:[#allocation4 + $0xb8] sm:$0xff]   ;;  %v21223_v35 = vld [vmem:[%s26498_s2 + $0xd8] sm:$0xff]  }
 0x47f   : > { %20287 = vmatprep.subr.bf16.mxu1 %v21178_v61  ;;  %20189 = vmatprep.subr.bf16.mxu0 %v21188_v38  ;;  %11274 = vst [vmem:[#allocation4 + $0x6c] sm:$0xf] %v11186_v62  ;;  %v11197_v25 = vrot.slane %v11057_v63, 7  ;;  %v11204_v54 = vsel %vm24552_vm10, %v11202_v53, %v11203_v47  ;;  %v21218_v57 = vld [vmem:[%s26498_s2 + $0xe0] sm:$0xff]   ;;  %v21229_v0 = vld [vmem:[#allocation4 + $0xc0] sm:$0xff]   ;;  %v21226_v2 = vld [vmem:[%s26498_s2 + $0xd0] sm:$0xff]  }
 0x480   : > { %20142 = vmatmul.mubr.bf16.vlgmr.msra.gmra.mxu0 %v21187_v37  ;;  %v21202_v37 = vld [vmem:[%s26498_s2 + $0x40] sm:$0xff]   ;;  %11280 = vst [vmem:[#allocation4 + $0x84] sm:$0xf] %v11204_v54  ;;  %v21225_v62 = vld [vmem:[#allocation4 + $0x100] sm:$0xff]   ;;  %v21231_v6 = vld [vmem:[%s26498_s2 + $0xc8] sm:$0xff]  }
 0x481   : > { %20145 = vmatprep.mubr.bf16.mxu0 %v21189_v52  ;;  %20190 = vmatpush3.bf16.msra.mxu0 %v21188_v38  ;;  %v21205_v38 = vld [vmem:[#allocation3 + $0x40] sm:$0xff]   ;;  %v11199_v8 = vrot.slane %v11197_v25, 4  ;;  %v11198_v4 = vsel %vm24552_vm10, %v11196_v50, %v11197_v25  ;;  %v21213_v52 = vld [vmem:[#allocation4 + $0xa0] sm:$0xff]   ;;  %v21244_v18 = vld [vmem:[%s26498_s2 + $0x8] sm:$0xff]  }
 0x482   : > { %20288 = vmatpush3.bf16.msra.mxu1 %v21178_v61  ;;  %20191 = vmatprep.subr.bf16.mxu0 %v21192_v26  ;;  %v11195_v61 = vsel %vm24552_vm10, %v11193_v30, %v11194_v22  ;;  %11278 = vst [vmem:[#allocation4 + $0x7c] sm:$0xf] %v11198_v4  ;;  %v21230_v17 = vld [vmem:[#allocation4 + $0x108] sm:$0xff]   ;;  %v21239_v30 = vld [vmem:[%s26498_s2 + $0x178] sm:$0xff]   ;;  %v21238_v46 = vld [vmem:[#allocation4 + $0x50] sm:$0xff]  }
 0x483   : > { %20289 = vmatprep.subr.bf16.mxu1 %v21182_v11  ;;  %11277 = vst [vmem:[#allocation4 + $0x78] sm:$0xf] %v11195_v61  ;;  %v11201_v21 = vsel %vm24552_vm10, %v11199_v8, %v11200_v9  ;;  %v21234_v5 = vld [vmem:[%s26498_s2 + $0xc0] sm:$0xff]   ;;  %v11316_v44 = vld [vmem:[#allocation3 + $0x88] sm:$0xf]  ;;  %v21242_v63 = vld [vmem:[%s26498_s2 + $0x170] sm:$0xff]  }
 0x484   : > { %11279 = vst [vmem:[#allocation4 + $0x80] sm:$0xf] %v11201_v21  ;;  %v21233_v16 = vld [vmem:[#allocation4 + $0x48] sm:$0xff]   ;;  %v21252_v22 = vld [vmem:[%s26498_s2 + $0xb8] sm:$0xff]   ;;  %v11615_v61 = vrot.slane %v25427_v3, 4  ;;  %v21256_v8 = vld [vmem:[%s26498_s2 + $0xb0] sm:$0xff]   ;;  %v25578_v3 = vpop.f32.mrf.mxu1 }
 0x485   : > { %20242 = vmatmul.mubr.bf16.gmra.mxu1 %v21181_v28  ;;  %20192 = vmatpush3.bf16.msra.mxu0 %v21192_v26  ;;  %v21216_v26 = vld [vmem:[%s26498_s2 + $0x1c0] sm:$0xff]   ;;  %v21228_v28 = vld [vmem:[%s26498_s2 + $0x28] sm:$0xff]  }
 0x486   : > { %20245 = vmatprep.mubr.bf16.mxu1 %v21184_v45  ;;  %20290 = vmatpush3.bf16.msra.mxu1 %v21182_v11  ;;  %v21207_v11 = vld [vmem:[%s26498_s2 + $0xf8] sm:$0xff]   ;;  %v21232_v45 = vld [vmem:[%s26498_s2 + $0x20] sm:$0xff]   ;;  %v21247_v4 = vld [vmem:[%s26498_s2 + $0x168] sm:$0xff]  }
 0x487   : > { %20291 = vmatprep.subr.bf16.mxu1 %v21186_v42  ;;  %20193 = vmatprep.subr.bf16.mxu0 %v21196_v29  ;;  %v21253_v53 = vld [vmem:[#allocation4 + $0x50] sm:$0xff]  }
 0x488   : > { %20146 = vmatmul.mubr.bf16.gmra.mxu0 %v21195_v40  ;;  %v21222_v40 = vld [vmem:[#allocation4 + $0xf8] sm:$0xff]  }
 0x489   : > { %20149 = vmatprep.mubr.bf16.mxu0 %v21197_v15  ;;  %20194 = vmatpush3.bf16.msra.mxu0 %v21196_v29  ;;  %v21217_v29 = vld [vmem:[#allocation4 + $0xf0] sm:$0xff]  }
 0x48a   : > { %20292 = vmatpush3.bf16.msra.mxu1 %v21186_v42  ;;  %20195 = vmatprep.subr.bf16.mxu0 %v21200_v24  ;;  %v21209_v42 = vld [vmem:[#allocation4 + $0xe0] sm:$0xff]   ;;  %v21237_v15 = vld [vmem:[#allocation4 + $0xd0] sm:$0xff]   ;;  %v21275_v31 = vld [vmem:[#allocation4 + $0x78] sm:$0xff]  }
 0x48b   : > { %20293 = vmatprep.subr.bf16.mxu1 %v21191_v49 }
 0x48d   : > { %20246 = vmatmul.mubr.bf16.gmra.mxu1 %v21190_v32  ;;  %20196 = vmatpush3.bf16.msra.mxu0 %v21200_v24  ;;  %v21236_v24 = vld [vmem:[%s26498_s2 + $0x18] sm:$0xff]   ;;  %v21243_v32 = vld [vmem:[#allocation4 + $0xd8] sm:$0xff]  }
 0x48e   : > { %20249 = vmatprep.mubr.bf16.mxu1 %v21193_v13  ;;  %20294 = vmatpush3.bf16.msra.mxu1 %v21191_v49  ;;  %v21240_v49 = vld [vmem:[%s26498_s2 + $0x10] sm:$0xff]   ;;  %v11317_v13 = vld [vmem:[#allocation3 + $0x8c] sm:$0xf] }
 0x48f   : > { %20295 = vmatprep.subr.bf16.mxu1 %v21194_v41  ;;  %20197 = vmatprep.subr.bf16.mxu0 %v21204_v51  ;;  %v11626_v25 = vshrl.u32 %v11317_v13, 16  ;;  %v11629_v7 = vshll.u32 %v11317_v13, 16  ;;  %v21262_v13 = vld [vmem:[#allocation4 + $0x80] sm:$0xff]  }
 0x490   : > { %20150 = vmatmul.mubr.bf16.gmra.mxu0 %v21203_v27  ;;  %v11620_v27 = vshll.u32 %v11316_v44, 16 }
 0x491   : > { %20153 = vmatprep.mubr.bf16.mxu0 %v21205_v38  ;;  %20198 = vmatpush3.bf16.msra.mxu0 %v21204_v51  ;;  %v21245_v51 = vld [vmem:[#allocation4 + $0x40] sm:$0xff]   ;;  %v25570_v9 = vrot.slane %v11626_v25, 7  ;;  %v21251_v38 = vld [vmem:[#allocation4 + $0x48] sm:$0xff]   ;;  %v21276_v25 = vld [vmem:[%s26498_s2 + $0x88] sm:$0xff]  }
 0x492   : > { %20296 = vmatpush3.bf16.msra.mxu1 %v21194_v41  ;;  %20199 = vmatprep.subr.bf16.mxu0 %v21208_v60  ;;  %v21248_v41 = vld [vmem:[%s26498_s2] sm:$0xff]  }
 0x493   : > { %20297 = vmatprep.subr.bf16.mxu1 %v21199_v56 }
 0x495   : > { %20250 = vmatmul.mubr.bf16.gmra.mxu1 %v21198_v14  ;;  %20200 = vmatpush3.bf16.msra.mxu0 %v21208_v60  ;;  %v21241_v60 = vld [vmem:[#allocation4 + $0x58] sm:$0xff]  }
 0x496   : > { %20298 = vmatpush3.bf16.msra.mxu1 %v21199_v56  ;;  %20301 = vmatprep.mubr.bf16.mxu1 %v21201_v1  ;;  %v11617_v56 = vshrl.u32 %v11316_v44, 16  ;;  %v21250_v1 = vld [vmem:[%s26498_s2 + $0x160] sm:$0xff]  }
 0x497   : > { %20299 = vmatprep.subr.bf16.mxu1 %v21202_v37  ;;  %20201 = vmatprep.subr.bf16.mxu0 %v21212_v58 }
 0x498   : > { %20154 = vmatmul.mubr.bf16.gmra.mxu0 %v21211_v39  ;;  %v11619_v50 = vrot.slane %v11617_v56, 7  ;;  %v21246_v39 = vld [vmem:[#allocation4 + $0x60] sm:$0xff]   ;;  %v21266_v56 = vld [vmem:[%s26498_s2 + $0x140] sm:$0xff]  }
 0x499   : > { %20202 = vmatpush3.bf16.msra.mxu0 %v21212_v58  ;;  %20205 = vmatprep.mubr.bf16.mxu0 %v21213_v52  ;;  %v21249_v52 = vld [vmem:[#allocation4 + $0x68] sm:$0xff]  }
 0x49a   : > { %20300 = vmatpush3.bf16.msra.mxu1 %v21202_v37  ;;  %20203 = vmatprep.subr.bf16.mxu0 %v21216_v26  ;;  %v11622_v14 = vor.u32 %v11620_v27, %v11619_v50  ;;  %v11624_v21 = vrot.slane %v11619_v50, 4  ;;  %v11631_v37 = vor.u32 %v11629_v7, %v25570_v9  ;;  %v21265_v7 = vld [vmem:[#allocation3 + $0x50] sm:$0xff]   ;;  %v21271_v50 = vld [vmem:[%s26498_s2 + $0x1f8] sm:$0xff]  }
 0x49b   : > { %20349 = vmatprep.subr.bf16.mxu1 %v21207_v11 }
 0x49c   : > { %v11623_v54 = vsel %vm24675_vm13, %v11615_v61, %v11622_v14  ;;  %v11632_v58 = vsel %vm24675_vm13, %v11624_v21, %v11631_v37  ;;  %v21274_v14 = vld [vmem:[%s26498_s2 + $0x1f0] sm:$0xff]   ;;  %v21284_v21 = vld [vmem:[%s26498_s2 + $0x138] sm:$0xff]   ;;  %v21273_v37 = vld [vmem:[#allocation3 + $0x60] sm:$0xff]  }
 0x49d   : > { %20302 = vmatmul.mubr.bf16.vlgmr.msra.gmra.mxu1 %v21206_v43  ;;  %20204 = vmatpush3.bf16.msra.mxu0 %v21216_v26  ;;  %11720 = vst [vmem:[#allocation4 + $0x110] sm:$0xf] %v11623_v54  ;;  %11721 = vst [vmem:[#allocation4 + $0x114] sm:$0xf] %v11632_v58  ;;  %v25588_v26 = vpop.f32.mrf.mxu1  ;;  %v21258_v43 = vld [vmem:[#allocation4 + $0x58] sm:$0xff]  }
 0x49e   : > { %20305 = vmatprep.mubr.bf16.mxu1 %v21209_v42  ;;  %20350 = vmatpush3.bf16.msra.mxu1 %v21207_v11  ;;  %v21259_v11 = vld [vmem:[%s26498_s2 + $0xa8] sm:$0xff]   ;;  %v11060_v42 = vld [vmem:[#allocation3 + $0x90] sm:$0xf] }
 0x49f   : > { %20351 = vmatprep.subr.bf16.mxu1 %v21210_v10  ;;  %20253 = vmatprep.subr.bf16.mxu0 %v21220_v20  ;;  %v21283_v58 = vld [vmem:[#allocation3 + $0x50] sm:$0xff]  }
 0x4a0   : > { %20206 = vmatmul.mubr.bf16.vlgmr.msra.gmra.mxu0 %v21219_v55  ;;  %v11061_v55 = vld [vmem:[#allocation3 + $0x94] sm:$0x7] }
 0x4a1   : > { %20209 = vmatprep.mubr.bf16.mxu0 %v21221_v23  ;;  %20254 = vmatpush3.bf16.msra.mxu0 %v21220_v20  ;;  %v21264_v20 = vld [vmem:[%s26498_s2 + $0xa0] sm:$0xff]   ;;  %v21260_v23 = vld [vmem:[#allocation4 + $0x60] sm:$0xff]   ;;  %v11209_v33 = vrot.slane %v11061_v55, 7 }
 0x4a2   : > { %20352 = vmatpush3.bf16.msra.mxu1 %v21210_v10  ;;  %20255 = vmatprep.subr.bf16.mxu0 %v21224_v59  ;;  %v11205_v10 = vrot.slane %v11203_v47, 4  ;;  %v11318_v47 = vld [vmem:[#allocation3 + $0x90] sm:$0xf]  ;;  %v21282_v55 = vld [vmem:[%s26498_s2 + $0x1e0] sm:$0xff]  }
 0x4a3   : > { %20353 = vmatprep.subr.bf16.mxu1 %v21215_v19 }
 0x4a5   : > { %20306 = vmatmul.mubr.bf16.gmra.mxu1 %v21214_v12  ;;  %20256 = vmatpush3.bf16.msra.mxu0 %v21224_v59  ;;  %v21255_v59 = vld [vmem:[%s26498_s2 + $0x158] sm:$0xff]   ;;  %v11206_v12 = vrot.slane %v11060_v42, 7 }
 0x4a6   : > { %20309 = vmatprep.mubr.bf16.mxu1 %v21217_v29  ;;  %20354 = vmatpush3.bf16.msra.mxu1 %v21215_v19  ;;  %v25601_v19 = vpop.f32.mrf.mxu1  ;;  %v21268_v29 = vld [vmem:[%s26498_s2 + $0x98] sm:$0xff]  }
 0x4a7   : > { %20355 = vmatprep.subr.bf16.mxu1 %v21218_v57  ;;  %20257 = vmatprep.subr.bf16.mxu0 %v21228_v28 }
 0x4a8   : > { %20210 = vmatmul.mubr.bf16.gmra.mxu0 %v21227_v48  ;;  %v11207_v48 = vsel %vm24552_vm10, %v11205_v10, %v11206_v12 }
 0x4a9   : > { %20213 = vmatprep.mubr.bf16.mxu0 %v21229_v0  ;;  %20258 = vmatpush3.bf16.msra.mxu0 %v21228_v28  ;;  %v21257_v28 = vld [vmem:[%s26498_s2 + $0x150] sm:$0xff]   ;;  %11281 = vst [vmem:[#allocation4 + $0x88] sm:$0xf] %v11207_v48  ;;  %v11635_v0 = vshrl.u32 %v11318_v47, 16 }
 0x4aa   : > { %20356 = vmatpush3.bf16.msra.mxu1 %v21218_v57  ;;  %20259 = vmatprep.subr.bf16.mxu0 %v21232_v45  ;;  %v11319_v57 = vld [vmem:[#allocation3 + $0x94] sm:$0xf] }
 0x4ab   : > { %20357 = vmatprep.subr.bf16.mxu1 %v21223_v35 }
 0x4ad   : > { %20310 = vmatmul.mubr.bf16.gmra.mxu1 %v21222_v40  ;;  %20260 = vmatpush3.bf16.msra.mxu0 %v21232_v45  ;;  %v11208_v45 = vrot.slane %v11206_v12, 4  ;;  %v21254_v40 = vld [vmem:[#allocation4 + $0x70] sm:$0xff]  }
 0x4ae   : > { %20313 = vmatprep.mubr.bf16.mxu1 %v21225_v62  ;;  %20358 = vmatpush3.bf16.msra.mxu1 %v21223_v35  ;;  %v21261_v35 = vld [vmem:[#allocation4 + $0x78] sm:$0xff]   ;;  %v11638_v62 = vshll.u32 %v11318_v47, 16  ;;  %v21296_v47 = vld [vmem:[%s26498_s2 + $0x120] sm:$0xff]  }
 0x4af   : > { %20359 = vmatprep.subr.bf16.mxu1 %v21226_v2  ;;  %20261 = vmatprep.subr.bf16.mxu0 %v21236_v24 }
 0x4b0   : > { %20214 = vmatmul.mubr.bf16.gmra.mxu0 %v21235_v34  ;;  %v11647_v34 = vshll.u32 %v11319_v57, 16 }
 0x4b1   : > { %20217 = vmatprep.mubr.bf16.mxu0 %v21237_v15  ;;  %20262 = vmatpush3.bf16.msra.mxu0 %v21236_v24  ;;  %v11210_v24 = vsel %vm24552_vm10, %v11208_v45, %v11209_v33  ;;  %v11633_v15 = vrot.slane %v25570_v9, 4  ;;  %v21290_v33 = vld [vmem:[#allocation3 + $0x60] sm:$0xff]   ;;  %v21286_v45 = vld [vmem:[#allocation3 + $0x78] sm:$0xff]   ;;  %vm13956_vm10 = vcmask 64512  }
 0x4b2   : > { %20360 = vmatpush3.bf16.msra.mxu1 %v21226_v2  ;;  %20263 = vmatprep.subr.bf16.mxu0 %v21240_v49  ;;  %v25611_v2 = vpop.f32.mrf.mxu1  ;;  %11282 = vst [vmem:[#allocation4 + $0x8c] sm:$0xf] %v11210_v24 }
 0x4b3   : > { %20361 = vmatprep.subr.bf16.mxu1 %v21231_v6 }
 0x4b5   : > { %20314 = vmatmul.mubr.bf16.gmra.mxu1 %v21230_v17  ;;  %20264 = vmatpush3.bf16.msra.mxu0 %v21240_v49  ;;  %v21267_v49 = vld [vmem:[#allocation4 + $0x68] sm:$0xff]   ;;  %v11637_v17 = vrot.slane %v11635_v0, 7 }
 0x4b6   : > { %20362 = vmatpush3.bf16.msra.mxu1 %v21231_v6  ;;  %20365 = vmatprep.mubr.bf16.mxu1 %v21233_v16  ;;  %v11644_v6 = vshrl.u32 %v11319_v57, 16  ;;  %v21293_v0 = vld [vmem:[#allocation3 + $0x80] sm:$0xff]  }
 0x4b7   : > { %20363 = vmatprep.subr.bf16.mxu1 %v21234_v5  ;;  %20265 = vmatprep.subr.bf16.mxu0 %v21244_v18 }
 0x4b8   : > { %20218 = vmatmul.mubr.bf16.gmra.mxu0 %v21243_v32  ;;  %v11646_v16 = vrot.slane %v11644_v6, 7  ;;  %v11640_v32 = vor.u32 %v11638_v62, %v11637_v17  ;;  %v21300_v62 = vld [vmem:[%s26498_s2 + $0x118] sm:$0xff]  }
 0x4b9   : > { %20266 = vmatpush3.bf16.msra.mxu0 %v21244_v18  ;;  %20269 = vmatprep.mubr.bf16.mxu0 %v21245_v51  ;;  %v21269_v18 = vld [vmem:[#allocation4 + $0x70] sm:$0xff]   ;;  %v25624_v51 = vpop.f32.mrf.mxu0 }
 0x4ba   : > { %20364 = vmatpush3.bf16.msra.mxu1 %v21234_v5  ;;  %20267 = vmatprep.subr.bf16.mxu0 %v21248_v41  ;;  %v21263_v5 = vld [vmem:[%s26498_s2 + $0x148] sm:$0xff]   ;;  %v11641_v44 = vsel %vm24675_vm13, %v11633_v15, %v11640_v32  ;;  %v21299_v15 = vld [vmem:[#allocation3 + $0x70] sm:$0xff]  }
 0x4bb   : > { %20413 = vmatprep.subr.bf16.mxu1 %v21239_v30  ;;  %11722 = vst [vmem:[#allocation4 + $0x118] sm:$0xf] %v11641_v44  ;;  %v25635_v27 = vpop.f32.mrf.mxu0  ;;  %v21306_v44 = vld [vmem:[%s26498_s2 + $0x108] sm:$0xff]  }
 0x4bd   : > { %20366 = vmatmul.mubr.bf16.vlgmr.msra.gmra.mxu1 %v21238_v46  ;;  %20268 = vmatpush3.bf16.msra.mxu0 %v21248_v41  ;;  %v11642_v41 = vrot.slane %v11637_v17, 4  ;;  %v11649_v46 = vor.u32 %v11647_v34, %v11646_v16  ;;  %v25648_v9 = vpop.f32.mrf.mxu0  ;;  %v21302_v17 = vld [vmem:[%s26498_s2 + $0x110] sm:$0xff]   ;;  %v21294_v16 = vld [vmem:[#allocation3 + $0x88] sm:$0xff]  }
 0x4be   : > { %20369 = vmatprep.mubr.bf16.mxu1 %v21241_v60  ;;  %20414 = vmatpush3.bf16.msra.mxu1 %v21239_v30  ;;  %v21280_v60 = vld [vmem:[%s26498_s2 + $0x80] sm:$0xff]  }
 0x4bf   : > { %20415 = vmatprep.subr.bf16.mxu1 %v21242_v63  ;;  %20317 = vmatprep.subr.bf16.mxu0 %v21252_v22 }
 0x4c0   : > { %20270 = vmatmul.mubr.bf16.vlgmr.msra.gmra.mxu0 %v21251_v38  ;;  %v21277_v38 = vld [vmem:[#allocation3 + $0x48] sm:$0xff]  }
 0x4c1   : > { %20273 = vmatprep.mubr.bf16.mxu0 %v21253_v53  ;;  %20318 = vmatpush3.bf16.msra.mxu0 %v21252_v22  ;;  %v25652_v53 = vpop.f32.mrf.mxu0 }
 0x4c2   : > { %20416 = vmatpush3.bf16.msra.mxu1 %v21242_v63  ;;  %20319 = vmatprep.subr.bf16.mxu0 %v21256_v8  ;;  %v11650_v63 = vsel %vm24675_vm13, %v11642_v41, %v11649_v46  ;;  %v21298_v41 = vld [vmem:[%s26498_s2 + $0x1c0] sm:$0xff]  }
 0x4c3   : > { %20417 = vmatprep.subr.bf16.mxu1 %v21247_v4  ;;  %11723 = vst [vmem:[#allocation4 + $0x11c] sm:$0xf] %v11650_v63  ;;  %v21305_v63 = vld [vmem:[#allocation3 + $0x80] sm:$0xff]  }
 0x4c5   : > { %20370 = vmatmul.mubr.bf16.gmra.mxu1 %v21246_v39  ;;  %20320 = vmatpush3.bf16.msra.mxu0 %v21256_v8 }
 0x4c6   : > { %20373 = vmatprep.mubr.bf16.mxu1 %v21249_v52  ;;  %20418 = vmatpush3.bf16.msra.mxu1 %v21247_v4  ;;  %v21270_v4 = vld [vmem:[#allocation3 + $0x58] sm:$0xff]  }
 0x4c7   : > { %20419 = vmatprep.subr.bf16.mxu1 %v21250_v1  ;;  %20321 = vmatprep.subr.bf16.mxu0 %v21259_v11  ;;  %v21285_v52 = vld [vmem:[#allocation3 + $0x58] sm:$0xff]  }
 0x4c8   : > { %20274 = vmatmul.mubr.bf16.gmra.mxu0 %v21258_v43 }
 0x4c9   : > { %20277 = vmatprep.mubr.bf16.mxu0 %v21260_v23  ;;  %20322 = vmatpush3.bf16.msra.mxu0 %v21259_v11  ;;  %v25622_v30 = vpop.f32.mrf.mxu1  ;;  %v21279_v11 = vld [vmem:[%s26498_s2 + $0x1e8] sm:$0xff]   ;;  %v21281_v23 = vld [vmem:[#allocation3 + $0x70] sm:$0xff]  }
 0x4ca   : > { %20420 = vmatpush3.bf16.msra.mxu1 %v21250_v1  ;;  %20323 = vmatprep.subr.bf16.mxu0 %v21264_v20  ;;  %v21288_v1 = vld [vmem:[%s26498_s2 + $0x130] sm:$0xff]  }
 0x4cb   : > { %20421 = vmatprep.subr.bf16.mxu1 %v21255_v59  ;;  %v25630_v22 = vpop.f32.mrf.mxu1 }
 0x4cd   : > { %20374 = vmatmul.mubr.bf16.gmra.mxu1 %v21254_v40  ;;  %20324 = vmatpush3.bf16.msra.mxu0 %v21264_v20  ;;  %v25643_v61 = vpop.f32.mrf.mxu1  ;;  %v21278_v20 = vld [vmem:[#allocation3 + $0x68] sm:$0xff]   ;;  %v21289_v40 = vld [vmem:[%s26498_s2 + $0x1d0] sm:$0xff]  }
 0x4ce   : > { %20422 = vmatpush3.bf16.msra.mxu1 %v21255_v59  ;;  %20377 = vmatprep.mubr.bf16.mxu1 %v21261_v35  ;;  %v21291_v59 = vld [vmem:[%s26498_s2 + $0x128] sm:$0xff]  }
 0x4cf   : > { %20423 = vmatprep.subr.bf16.mxu1 %v21257_v28  ;;  %20325 = vmatprep.subr.bf16.mxu0 %v21268_v29  ;;  %v25650_v8 = vpop.f32.mrf.mxu1 }
 0x4d0   : > { %20278 = vmatmul.mubr.bf16.gmra.mxu0 %v21267_v49  ;;  %v21304_v49 = vld [vmem:[#allocation3 + $0x78] sm:$0xff]  }
 0x4d1   : > { %20281 = vmatprep.mubr.bf16.mxu0 %v21269_v18  ;;  %20326 = vmatpush3.bf16.msra.mxu0 %v21268_v29  ;;  %v21292_v29 = vld [vmem:[#allocation3 + $0x68] sm:$0xff]  }
 0x4d2   : > { %20424 = vmatpush3.bf16.msra.mxu1 %v21257_v28  ;;  %20327 = vmatprep.subr.bf16.mxu0 %v21272_v36  ;;  %v21287_v28 = vld [vmem:[%s26498_s2 + $0x1d8] sm:$0xff]  }
 0x4d3   : > { %20425 = vmatprep.subr.bf16.mxu1 %v21263_v5 }
 0x4d5   : > { %20378 = vmatmul.mubr.bf16.gmra.mxu1 %v21262_v13  ;;  %20328 = vmatpush3.bf16.msra.mxu0 %v21272_v36  ;;  %v21297_v13 = vld [vmem:[#allocation4 + $0xe0] sm:$0xff]  }
 0x4d6   : > { %20426 = vmatpush3.bf16.msra.mxu1 %v21263_v5  ;;  %20429 = vmatprep.mubr.bf16.mxu1 %v21265_v7  ;;  %v21295_v5 = vld [vmem:[%s26498_s2 + $0x1c8] sm:$0xff]   ;;  %v21309_v7 = vld [vmem:[%s26498_s2 + $0x100] sm:$0xff]  }
 0x4d7   : > { %20427 = vmatprep.subr.bf16.mxu1 %v21266_v56  ;;  %20329 = vmatprep.subr.bf16.mxu0 %v21276_v25 }
 0x4d8   : > { %20282 = vmatmul.mubr.bf16.gmra.mxu0 %v21275_v31 }
 0x4d9   : > { %20330 = vmatpush3.bf16.msra.mxu0 %v21276_v25  ;;  %20333 = vmatprep.mubr.bf16.mxu0 %v21277_v38 }
 0x4da   : > { %20428 = vmatpush3.bf16.msra.mxu1 %v21266_v56  ;;  %20331 = vmatprep.subr.bf16.mxu0 %v21280_v60  ;;  %v25660_v54 = vpop.f32.mrf.mxu1 }
 0x4db   : > { %20477 = vmatprep.subr.bf16.mxu1 %v21271_v50 }
 0x4dc   : > { %v25672_v10 = vpop.f32.mrf.mxu1 }
 0x4dd   : > { %20430 = vmatmul.mubr.bf16.vlgmr.msra.gmra.mxu1 %v21270_v4  ;;  %20332 = vmatpush3.bf16.msra.mxu0 %v21280_v60 }
 0x4de   : > { %20433 = vmatprep.mubr.bf16.mxu1 %v21273_v37  ;;  %20478 = vmatpush3.bf16.msra.mxu1 %v21271_v50  ;;  %v25665_v39 = vpop.f32.mrf.mxu0  ;;  %v25682_v12 = vpop.f32.mrf.mxu1  ;;  %v21307_v50 = vld [vmem:[#allocation4 + $0xd8] sm:$0xff]  }
 0x4df   : > { %20479 = vmatprep.subr.bf16.mxu1 %v21274_v14  ;;  %20381 = vmatprep.subr.bf16.mxu0 %v21284_v21 }
 0x4e0   : > { %20334 = vmatmul.mubr.bf16.vlgmr.msra.gmra.mxu0 %v21283_v58  ;;  %v25670_v43 = vpop.f32.mrf.mxu0  ;;  %v25692_v48 = vpop.f32.mrf.mxu1 }
 0x4e1   : > { %20337 = vmatprep.mubr.bf16.mxu0 %v21285_v52  ;;  %20382 = vmatpush3.bf16.msra.mxu0 %v21284_v21  ;;  %v21301_v21 = vld [vmem:[#allocation4 + $0xe8] sm:$0xff]  }
 0x4e2   : > { %20480 = vmatpush3.bf16.msra.mxu1 %v21274_v14  ;;  %20383 = vmatprep.subr.bf16.mxu0 %v21288_v1  ;;  %v25674_v42 = vpop.f32.mrf.mxu0  ;;  %v21312_v14 = vld [vmem:[%s26498_s2 + $0x1b8] sm:$0xff]  }
 0x4e3   : > { %20481 = vmatprep.subr.bf16.mxu1 %v21279_v11 }
 0x4e4   : > { %v25687_v57 = vpop.f32.mrf.mxu0 }
 0x4e5   : > { %20434 = vmatmul.mubr.bf16.gmra.mxu1 %v21278_v20  ;;  %20384 = vmatpush3.bf16.msra.mxu0 %v21288_v1  ;;  %v21303_v1 = vld [vmem:[#allocation4 + $0xf0] sm:$0xff]  }
 0x4e6   : > { %20437 = vmatprep.mubr.bf16.mxu1 %v21281_v23  ;;  %20482 = vmatpush3.bf16.msra.mxu1 %v21279_v11  ;;  %v25753_v11 = vld [vmem:[%s26499_s3] ss:$0 sm:$0xff]  ;;  %v21314_v23 = vld [vmem:[%s26498_s2 + $0x1b0] sm:$0xff]  }
 0x4e7   : > { %20483 = vmatprep.subr.bf16.mxu1 %v21282_v55  ;;  %20385 = vmatprep.subr.bf16.mxu0 %v21291_v59  ;;  %26762 = vst [vmem:[#allocation23_spill] sm:$0xff] %v25753_v11 }
 0x4e8   : > { %20338 = vmatmul.mubr.bf16.gmra.mxu0 %v21290_v33 }
 0x4e9   : > { %v25694_v35 = vpop.f32.mrf.mxu0  ;;  %20341 = vmatprep.mubr.bf16.mxu0 %v21292_v29  ;;  %20386 = vmatpush3.bf16.msra.mxu0 %v21291_v59  ;;  %v21311_v59 = vld [vmem:[#allocation4 + $0xe0] sm:$0xff]   ;;  %v11956_v29 = vadd.f32 %v25753_v11, %v25635_v27 }
 0x4ea   : > { %20484 = vmatpush3.bf16.msra.mxu1 %v21282_v55  ;;  %20387 = vmatprep.subr.bf16.mxu0 %v21296_v47  ;;  %v25699_v24 = vpop.f32.mrf.mxu1  ;;  %v11958_v55 = vadd.f32 %v25624_v51, %v25753_v11 }
 0x4eb   : > { %20485 = vmatprep.subr.bf16.mxu1 %v21287_v28  ;;  %v25704_v6 = vpop.f32.mrf.mxu0 }
 0x4ec   : > { %v25706_v34 = vpop.f32.mrf.mxu1 }
 0x4ed   : > { %20438 = vmatmul.mubr.bf16.gmra.mxu1 %v21286_v45  ;;  %20388 = vmatpush3.bf16.msra.mxu0 %v21296_v47  ;;  %v25716_v36 = vpop.f32.mrf.mxu0 }
 0x4ee   : > { %20486 = vmatpush3.bf16.msra.mxu1 %v21287_v28  ;;  %20441 = vmatprep.mubr.bf16.mxu1 %v21293_v0  ;;  %v25714_v18 = vpop.f32.mrf.mxu1  ;;  %v21313_v28 = vld [vmem:[#allocation4 + $0xe8] sm:$0xff]   ;;  %v11959_v0 = vadd.f32 %v25648_v9, %v25753_v11 }
 0x4ef   : > { %20487 = vmatprep.subr.bf16.mxu1 %v21289_v40  ;;  %20389 = vmatprep.subr.bf16.mxu0 %v21300_v62  ;;  %v25728_v56 = vpop.f32.mrf.mxu0 }
 0x4f0   : > { %20342 = vmatmul.mubr.bf16.gmra.mxu0 %v21299_v15  ;;  %v25718_v32 = vpop.f32.mrf.mxu1  ;;  %v21308_v15 = vld [vmem:[#allocation4 + $0xf8] sm:$0xff]  }
 0x4f1   : > { %20390 = vmatpush3.bf16.msra.mxu0 %v21300_v62  ;;  %20345 = vmatprep.mubr.bf16.mxu0 %v21304_v49  ;;  %v21316_v49 = vld [vmem:[%s26498_s2 + $0x1a8] sm:$0xff]  }
 0x4f2   : > { %20488 = vmatpush3.bf16.msra.mxu1 %v21289_v40  ;;  %20391 = vmatprep.subr.bf16.mxu0 %v21302_v17  ;;  %v25723_v46 = vpop.f32.mrf.mxu1 }
 0x4f3   : > { %20489 = vmatprep.subr.bf16.mxu1 %v21295_v5 }
 0x4f4   : > { %v25730_v25 = vpop.f32.mrf.mxu1 }
 0x4f5   : > { %20442 = vmatmul.mubr.bf16.gmra.mxu1 %v21294_v16  ;;  %20392 = vmatpush3.bf16.msra.mxu0 %v21302_v17  ;;  %v11957_v17 = vadd.f32 %v25753_v11, %v25652_v53 }
 0x4f6   : > { %20490 = vmatpush3.bf16.msra.mxu1 %v21295_v5  ;;  %20493 = vmatprep.mubr.bf16.mxu1 %v21297_v13  ;;  %v25735_v31 = vpop.f32.mrf.mxu1  ;;  %v21310_v5 = vld [vmem:[#allocation4 + $0x100] sm:$0xff]  }
 0x4f7   : > { %20491 = vmatprep.subr.bf16.mxu1 %v21298_v41  ;;  %v25737_v60 = vpop.f32.mrf.mxu0  ;;  %20393 = vmatprep.subr.bf16.mxu0 %v21306_v44 }
 0x4f8   : > { %20346 = vmatmul.mubr.bf16.gmra.mxu0 %v21305_v63  ;;  %v25739_v38 = vpop.f32.mrf.mxu1  ;;  %v21315_v63 = vld [vmem:[#allocation4 + $0xf0] sm:$0xff]  }
 0x4f9   : > { %20394 = vmatpush3.bf16.msra.mxu0 %v21306_v44  ;;  %20397 = vmatprep.mubr.bf16.mxu0 %v21307_v50  ;;  %v25741_v4 = vpop.f32.mrf.mxu0  ;;  %v21317_v50 = vld [vmem:[#allocation4 + $0xf8] sm:$0xff]  }
 0x4fa   : > { %20492 = vmatpush3.bf16.msra.mxu1 %v21298_v41  ;;  %20395 = vmatprep.subr.bf16.mxu0 %v21309_v7  ;;  %v11962_v41 = vadd.f32 %v25665_v39, %v25753_v11 }
 0x4fb   : > { %v25746_v37 = vpop.f32.mrf.mxu1  ;;  %v25748_v58 = vpop.f32.mrf.mxu0 }
 0x4fd   : > { %20494 = vmatmul.mubr.bf16.vlgmr.msra.gmra.mxu1 %v21301_v21  ;;  %v25755_v52 = vpop.f32.mrf.mxu1  ;;  %20396 = vmatpush3.bf16.msra.mxu0 %v21309_v7  ;;  %v25757_v20 = vpop.f32.mrf.mxu0  ;;  %v21318_v7 = vld [vmem:[%s26498_s2 + $0x1a0] sm:$0xff]  }
 0x4fe   : > { %20497 = vmatprep.mubr.bf16.mxu1 %v21303_v1  ;;  %20445 = vmatprep.subr.bf16.mxu0 %v21312_v14 }
 0x4ff   : > { %v25764_v33 = vpop.f32.mrf.mxu1  ;;  %v20015_v47 = vpop.f32.mrf.mxu0 }
 0x500   : > { %v25768_v45 = vadd.f32 %v20015_v47, %v11958_v55  ;;  %20398 = vmatmul.mubr.bf16.vlgmr.msra.gmra.mxu0 %v21311_v59  ;;  %v21337_v59 = vld [vmem:[#allocation4 + $0x108] sm:$0xff]  }
 0x501   : > { %20401 = vmatprep.mubr.bf16.mxu0 %v21313_v28  ;;  %20446 = vmatpush3.bf16.msra.mxu0 %v21312_v14  ;;  %v12135_v51 = vpop.f32.mrf.mxu0  ;;  %v25772_v40 = vpop.f32.mrf.mxu1  ;;  %v11960_v14 = vadd.f32 %v25753_v11, %v25670_v43  ;;  %v21320_v43 = vld [vmem:[%s26498_s2 + $0x198] sm:$0xff]  }
 0x502   : > { %v25774_v62 = vadd.f32 %v12135_v51, %v11956_v29  ;;  %20447 = vmatprep.subr.bf16.mxu0 %v21314_v23  ;;  %v11961_v51 = vadd.f32 %v25753_v11, %v25687_v57  ;;  %v21321_v57 = vld [vmem:[%s26498_s2 + $0x190] sm:$0xff]  }
 0x503   : > { %v20016_v27 = vpop.f32.mrf.mxu0 }
 0x504   : > { %v25781_v16 = vadd.f32 %v20016_v27, %v11959_v0  ;;  %v21322_v27 = vld [vmem:[#allocation4 + $0x108] sm:$0xff]  }
 0x505   : > { %20498 = vmatmul.mubr.bf16.gmra.mxu1 %v21308_v15  ;;  %20448 = vmatpush3.bf16.msra.mxu0 %v21314_v23  ;;  %v12138_v9 = vpop.f32.mrf.mxu0  ;;  %v11963_v23 = vadd.f32 %v25674_v42, %v25753_v11 }
 0x506   : > { %20501 = vmatprep.mubr.bf16.mxu1 %v21310_v5  ;;  %v25785_v44 = vpop.f32.mrf.mxu1  ;;  %v12199_v13 = vadd.f32 %v12138_v9, %v11957_v17  ;;  %20449 = vmatprep.subr.bf16.mxu0 %v21316_v49  ;;  %v11966_v17 = vadd.f32 %v25694_v35, %v25753_v11  ;;  %v21319_v5 = vld [vmem:[#allocation4 + $0x100] sm:$0xff]  }
 0x507   : > { %v20019_v53 = vpop.f32.mrf.mxu0 }
 0x508   : > { %v12204_v21 = vadd.f32 %v20019_v53, %v11962_v41  ;;  %20402 = vmatmul.mubr.bf16.gmra.mxu0 %v21315_v63  ;;  %v25793_v1 = vadd.f32 %v25611_v2, %v12199_v13  ;;  %v25795_v39 = vpop.f32.mrf.mxu1  ;;  %v21342_v2 = vld [vmem:[#allocation4 + $0x110] sm:$0xff]   ;;  %v11964_v41 = vadd.f32 %v25753_v11, %v25704_v6  ;;  %v21344_v53 = vld [vmem:[#allocation4 + $0x118] sm:$0xff]  }
 0x509   : > { %20405 = vmatprep.mubr.bf16.mxu0 %v21317_v50  ;;  %20450 = vmatpush3.bf16.msra.mxu0 %v21316_v49  ;;  %v12151_v55 = vpop.f32.mrf.mxu0  ;;  %v21324_v6 = vld [vmem:[%s26498_s2 + $0x188] sm:$0xff]  }
 0x50a   : > { %v12202_v47 = vadd.f32 %v12151_v55, %v11960_v14  ;;  %20451 = vmatprep.subr.bf16.mxu0 %v21318_v7  ;;  %v25803_v28 = vadd.f32 %v25622_v30, %v12204_v21  ;;  %v25810_v15 = vpop.f32.mrf.mxu1  ;;  %v11965_v21 = vadd.f32 %v25753_v11, %v25728_v56 }
 0x50b   : > { %v20020_v29 = vpop.f32.mrf.mxu0 }
 0x50c   : > { %v12205_v0 = vadd.f32 %v20020_v29, %v11963_v23  ;;  %v25808_v49 = vadd.f32 %v25630_v22, %v12202_v47  ;;  %v25825_v35 = vpop.f32.mrf.mxu1 }
 0x50d   : > { %20452 = vmatpush3.bf16.msra.mxu0 %v21318_v7  ;;  %v12154_v42 = vpop.f32.mrf.mxu0  ;;  %20502 = vmatmul.mubr.bf16.gmra.mxu1 %v21337_v59  ;;  %26763 = vst [vmem:[#allocation24_spill] sm:$0xff] %v25825_v35  ;;  %v21323_v59 = vld [vmem:[#allocation4 + $0x110] sm:$0xff]  }
 0x50e   : > { %v12203_v30 = vadd.f32 %v12154_v42, %v11961_v51  ;;  %20453 = vmatprep.subr.bf16.mxu0 %v21320_v43  ;;  %v25818_v9 = vadd.f32 %v25643_v61, %v12205_v0  ;;  %20505 = vmatprep.mubr.bf16.mxu1 %v21342_v2  ;;  %v11967_v61 = vadd.f32 %v25716_v36, %v25753_v11  ;;  %v21325_v51 = vld [vmem:[#allocation4 + $0x50] sm:$0xff]  }
 0x50f   : > { %v20023_v22 = vpop.f32.mrf.mxu0  ;;  %v11968_v0 = vadd.f32 %v25753_v11, %v25741_v4 }
 0x510   : > { %v12208_v13 = vadd.f32 %v20023_v22, %v11966_v17  ;;  %20406 = vmatmul.mubr.bf16.gmra.mxu0 %v21319_v5  ;;  %v25823_v63 = vadd.f32 %v25650_v8, %v12203_v30  ;;  %v21328_v5 = vld [vmem:[%s26498_s2 + $0x238] sm:$0xff]   ;;  %v11969_v22 = vadd.f32 %v25753_v11, %v25757_v20 }
 0x511   : > { %20454 = vmatpush3.bf16.msra.mxu0 %v21320_v43  ;;  %v12167_v7 = vpop.f32.mrf.mxu0  ;;  %20409 = vmatprep.mubr.bf16.mxu0 %v21322_v27  ;;  %v11970_v43 = vadd.f32 %v25737_v60, %v25753_v11  ;;  %v21329_v20 = vld [vmem:[#allocation4 + $0x60] sm:$0xff]  }
 0x512   : > { %v12206_v50 = vadd.f32 %v12167_v7, %v11964_v41  ;;  %20455 = vmatprep.subr.bf16.mxu0 %v21321_v57  ;;  %v25833_v14 = vadd.f32 %v25660_v54, %v12208_v13  ;;  %v21326_v54 = vld [vmem:[%s26498_s2 + $0x180] sm:$0xff]  }
 0x513   : > { %v20024_v8 = vpop.f32.mrf.mxu0 }
 0x514   : > { %v12209_v55 = vadd.f32 %v20024_v8, %v11967_v61  ;;  %v25838_v23 = vadd.f32 %v25672_v10, %v12206_v50  ;;  %v25840_v47 = vpop.f32.mrf.mxu1  ;;  %v21327_v61 = vld [vmem:[#allocation4 + $0x58] sm:$0xff]  }
 0x515   : > { %26764 = vst [vmem:[#allocation27_spill] sm:$0xff] %v25840_v47  ;;  %20456 = vmatpush3.bf16.msra.mxu0 %v21321_v57  ;;  %v12170_v36 = vpop.f32.mrf.mxu0  ;;  %20506 = vmatmul.mubr.bf16.gmra.mxu1 %v21344_v53 }
 0x516   : > { %v12207_v2 = vadd.f32 %v12170_v36, %v11965_v21  ;;  %20457 = vmatprep.subr.bf16.mxu0 %v21324_v6  ;;  %v25848_v56 = vadd.f32 %v25682_v12, %v12209_v55  ;;  %v25850_v29 = vpop.f32.mrf.mxu1  ;;  %v11971_v12 = vadd.f32 %v25748_v58, %v25753_v11  ;;  %v21340_v11 = vld [vmem:[#allocation4 + $0x88] sm:$0xff]  }
 0x517   : > { %26765 = vst [vmem:[#allocation25_spill] sm:$0xff] %v25850_v29  ;;  %v20027_v10 = vpop.f32.mrf.mxu0 }
 0x518   : > { %v12212_v42 = vadd.f32 %v20027_v10, %v11970_v43  ;;  %20410 = vmatmul.mubr.bf16.gmra.mxu0 %v21323_v59  ;;  %v25855_v60 = vadd.f32 %v25692_v48, %v12207_v2  ;;  %v25857_v27 = vpop.f32.mrf.mxu1  ;;  %v21331_v2 = vld [vmem:[#allocation4 + $0x68] sm:$0xff]  }
 0x519   : > { %26766 = vst [vmem:[#allocation28_spill] sm:$0xff] %v25857_v27  ;;  %20458 = vmatpush3.bf16.msra.mxu0 %v21324_v6  ;;  %20461 = vmatprep.mubr.bf16.mxu0 %v21325_v51  ;;  %v12183_v17 = vpop.f32.mrf.mxu0  ;;  %v21333_v51 = vld [vmem:[#allocation4 + $0x70] sm:$0xff]   ;;  %v21343_v27 = vld [vmem:[#allocation3 + $0x58] sm:$0xff]  }
 0x51a   : > { %v12210_v30 = vadd.f32 %v12183_v17, %v11968_v0  ;;  %20459 = vmatprep.subr.bf16.mxu0 %v21326_v54  ;;  %v25865_v4 = vadd.f32 %v25699_v24, %v12212_v42  ;;  %v25867_v57 = vpop.f32.mrf.mxu1  ;;  %v21330_v24 = vld [vmem:[%s26498_s2 + $0x230] sm:$0xff]  }
 0x51b   : > { %26768 = vst [vmem:[#allocation8_spill] sm:$0xff] %v25867_v57  ;;  %v20028_v48 = vpop.f32.mrf.mxu0 }
 0x51c   : > { %26767 = vst [vmem:[#allocation29_spill] sm:$0xff] %v25865_v4  ;;  %v12213_v41 = vadd.f32 %v20028_v48, %v11971_v12  ;;  %v25872_v13 = vadd.f32 %v25706_v34, %v12210_v30  ;;  %v25874_v58 = vpop.f32.mrf.mxu1  ;;  %v21336_v12 = vld [vmem:[%s26498_s2 + $0x218] sm:$0xff]   ;;  %v21335_v48 = vld [vmem:[#allocation4 + $0x78] sm:$0xff]  }
 0x51d   : > { %20460 = vmatpush3.bf16.msra.mxu0 %v21326_v54  ;;  %v12186_v7 = vpop.f32.mrf.mxu0  ;;  %v21334_v54 = vld [vmem:[%s26498_s2 + $0x220] sm:$0xff]  }
 0x51e   : > { %26769 = vst [vmem:[#allocation7_spill] sm:$0xff] %v25872_v13  ;;  %v12211_v53 = vadd.f32 %v12186_v7, %v11969_v22  ;;  %20509 = vmatprep.subr.bf16.mxu0 %v21328_v5  ;;  %v25880_v50 = vadd.f32 %v25714_v18, %v12213_v41  ;;  %v25882_v6 = vpop.f32.mrf.mxu1  ;;  %v21332_v18 = vld [vmem:[%s26498_s2 + $0x228] sm:$0xff]   ;;  %v21339_v41 = vld [vmem:[#allocation4 + $0x80] sm:$0xff]  }
 0x520   : > { %26770 = vst [vmem:[#allocation6_spill] sm:$0xff] %v25880_v50  ;;  %v25884_v8 = vpop.f32.mrf.mxu0  ;;  %20462 = vmatmul.mubr.bf16.vlgmr.msra.gmra.mxu0 %v21327_v61  ;;  %v25887_v34 = vadd.f32 %v25718_v32, %v12211_v53  ;;  %v25889_v21 = vpop.f32.mrf.mxu1  ;;  %v21338_v53 = vld [vmem:[%s26498_s2 + $0x210] sm:$0xff]  }
 0x521   : > { %20465 = vmatprep.mubr.bf16.mxu0 %v21329_v20  ;;  %20510 = vmatpush3.bf16.msra.mxu0 %v21328_v5 }
 0x522   : > { %26771 = vst [vmem:[#allocation16_spill] sm:$0xff] %v25887_v34  ;;  %v25891_v55 = vpop.f32.mrf.mxu0  ;;  %20511 = vmatprep.subr.bf16.mxu0 %v21330_v24  ;;  %v25896_v59 = vpop.f32.mrf.mxu1 }
 0x524   : > { %v25898_v36 = vpop.f32.mrf.mxu0  ;;  %v25900_v43 = vpop.f32.mrf.mxu1 }
 0x525   : > { %20512 = vmatpush3.bf16.msra.mxu0 %v21330_v24 }
 0x526   : > { %v25902_v32 = vpop.f32.mrf.mxu0  ;;  %20513 = vmatprep.subr.bf16.mxu0 %v21332_v18  ;;  %v25907_v10 = vpop.f32.mrf.mxu1 }
 0x527   : > { %26772 = vst [vmem:[#allocation14_spill] sm:$0xff] %v25907_v10 }
 0x528   : > { %v25909_v0 = vpop.f32.mrf.mxu0  ;;  %20466 = vmatmul.mubr.bf16.gmra.mxu0 %v21331_v2  ;;  %v25911_v42 = vpop.f32.mrf.mxu1  ;;  %v21341_v2 = vld [vmem:[%s26498_s2 + $0x208] sm:$0xff]  }
 0x529   : > { %26773 = vst [vmem:[#allocation12_spill] sm:$0xff] %v25911_v42  ;;  %20469 = vmatprep.mubr.bf16.mxu0 %v21333_v51  ;;  %20514 = vmatpush3.bf16.msra.mxu0 %v21332_v18 }
 0x52a   : > { %v25913_v17 = vpop.f32.mrf.mxu0  ;;  %20515 = vmatprep.subr.bf16.mxu0 %v21334_v54  ;;  %v25918_v30 = vpop.f32.mrf.mxu1 }
 0x52b   : > { %26774 = vst [vmem:[#allocation18_spill] sm:$0xff] %v25918_v30 }
 0x52c   : > { %v25920_v5 = vpop.f32.mrf.mxu0  ;;  %v25922_v22 = vpop.f32.mrf.mxu1 }
 0x52d   : > { %26775 = vst [vmem:[#allocation13_spill] sm:$0xff] %v25922_v22  ;;  %20516 = vmatpush3.bf16.msra.mxu0 %v21334_v54 }
 0x52e   : > { %v25924_v7 = vpop.f32.mrf.mxu0  ;;  %20517 = vmatprep.subr.bf16.mxu0 %v21336_v12  ;;  %v25929_v61 = vpop.f32.mrf.mxu1 }
 0x52f   : > { %26776 = vst [vmem:[#allocation9_spill] sm:$0xff] %v25929_v61 }
 0x530   : > { %v25931_v24 = vpop.f32.mrf.mxu0  ;;  %20470 = vmatmul.mubr.bf16.gmra.mxu0 %v21335_v48  ;;  %v25933_v20 = vpop.f32.mrf.mxu1 }
 0x531   : > { %26777 = vst [vmem:[#allocation17_spill] sm:$0xff] %v25933_v20  ;;  %20518 = vmatpush3.bf16.msra.mxu0 %v21336_v12  ;;  %20473 = vmatprep.mubr.bf16.mxu0 %v21339_v41  ;;  %v21345_v12 = vld [vmem:[%s26498_s2 + $0x200] sm:$0xff]  }
 0x532   : > { %v25935_v18 = vpop.f32.mrf.mxu0  ;;  %20519 = vmatprep.subr.bf16.mxu0 %v21338_v53  ;;  %v25940_v54 = vpop.f32.mrf.mxu1 }
 0x533   : > { %26778 = vst [vmem:[#allocation20_spill] sm:$0xff] %v25940_v54 }
 0x534   : > { %v25942_v51 = vpop.f32.mrf.mxu0  ;;  %v25944_v57 = vpop.f32.mrf.mxu1 }
 0x535   : > { %26779 = vst [vmem:[#allocation19_spill] sm:$0xff] %v25944_v57  ;;  %20520 = vmatpush3.bf16.msra.mxu0 %v21338_v53 }
 0x536   : > { %v25946_v48 = vpop.f32.mrf.mxu0  ;;  %20521 = vmatprep.subr.bf16.mxu0 %v21341_v2  ;;  %v25951_v41 = vpop.f32.mrf.mxu1 }
 0x537   : > { %26780 = vst [vmem:[#allocation26_spill] sm:$0xff] %v25951_v41  ;;  %v21346_v41 = vld [vmem:[#allocation3 + $0x60] sm:$0xff]  }
 0x538   : > { %v25953_v20 = vpop.f32.mrf.mxu0  ;;  %20474 = vmatmul.mubr.bf16.gmra.mxu0 %v21340_v11  ;;  %v25955_v54 = vpop.f32.mrf.mxu1  ;;  %v21347_v11 = vld [vmem:[#allocation3 + $0x68] sm:$0xff]  }
 0x539   : > { %26781 = vst [vmem:[#allocation22_spill] sm:$0xff] %v25953_v20  ;;  %26782 = vst [vmem:[#allocation15_spill] sm:$0xff] %v25955_v54  ;;  %20522 = vmatpush3.bf16.msra.mxu0 %v21341_v2  ;;  %20525 = vmatprep.mubr.bf16.mxu0 %v21343_v27 }
 0x53a   : > { %v25957_v34 = vpop.f32.mrf.mxu0  ;;  %20523 = vmatprep.subr.bf16.mxu0 %v21345_v12  ;;  %v25959_v53 = vpop.f32.mrf.mxu1 }
 0x53b   : > { %26783 = vst [vmem:[#allocation11_spill] sm:$0xff] %v25957_v34  ;;  %26784 = vst [vmem:[#allocation21_spill] sm:$0xff] %v25959_v53 }
 0x53c   : > { %v25961_v57 = vpop.f32.mrf.mxu0 }
 0x53d   : > { %26785 = vst [vmem:[#allocation10_spill] sm:$0xff] %v25961_v57  ;;  %v25963_v61 = vpop.f32.mrf.mxu1  ;;  %20524 = vmatpush3.bf16.msra.mxu0 %v21345_v12  ;;  %v21349_v57 = vld [vmem:[#allocation3 + $0x78] sm:$0xff]   ;;  %v21348_v12 = vld [vmem:[#allocation3 + $0x70] sm:$0xff]  }
 0x53e   : > { %v25965_v29 = vpop.f32.mrf.mxu0 }
 0x53f   : > { %26786 = vst [vmem:[#allocation30_spill] sm:$0xff] %v25965_v29  ;;  %v25967_v50 = vpop.f32.mrf.mxu1 }
 0x540   : > { %v20143_v22 = vpop.f32.mrf.mxu0  ;;  %20526 = vmatmul.mubr.bf16.vlgmr.msra.gmra.mxu0 %v21346_v41 }
 0x541   : > { %v25969_v2 = vpop.f32.mrf.mxu1  ;;  %20529 = vmatprep.mubr.bf16.mxu0 %v21347_v11 }
 0x542   : > { %v13103_v27 = vpop.f32.mrf.mxu0 }
 0x543   : > { %v25971_v54 = vpop.f32.mrf.mxu1 }
 0x544   : > { %26787 = vst [vmem:[#allocation31_spill] sm:$0xff] %v25971_v54  ;;  %v20144_v53 = vpop.f32.mrf.mxu0  ;;  %v21350_v54 = vld [vmem:[#allocation3 + $0x80] sm:$0xff]  }
 0x545   : > { %v25973_v30 = vpop.f32.mrf.mxu1 }
 0x546   : > { %26788 = vst [vmem:[#allocation32_spill] sm:$0xff] %v25973_v30  ;;  %v25975_v47 = vpop.f32.mrf.mxu0  ;;  %v21351_v30 = vld [vmem:[#allocation3 + $0x88] sm:$0xff]  }
 0x547   : > { %v25977_v29 = vpop.f32.mrf.mxu1 }
 0x548   : > { %26789 = vst [vmem:[#allocation33_spill] sm:$0xff] %v25977_v29  ;;  %v20147_v42 = vpop.f32.mrf.mxu0  ;;  %20530 = vmatmul.mubr.bf16.gmra.mxu0 %v21348_v12 }
 0x549   : > { %v25979_v34 = vpop.f32.mrf.mxu1  ;;  %20533 = vmatprep.mubr.bf16.mxu0 %v21349_v57 }
 0x54a   : > { %26790 = vst [vmem:[#allocation34_spill] sm:$0xff] %v25979_v34  ;;  %v25981_v41 = vpop.f32.mrf.mxu0 }
 0x54b   : > { %v25983_v11 = vpop.f32.mrf.mxu1 }
 0x54c   : > { %26791 = vst [vmem:[#allocation35_spill] sm:$0xff] %v25983_v11  ;;  %v25985_v13 = vpop.f32.mrf.mxu0  ;;  %v12442_v11 = vadd.f32 %v25578_v3, %v25768_v45 }
 0x54d   : > { %v25987_v10 = vpop.f32.mrf.mxu1 }
 0x54e   : > { %26792 = vst [vmem:[#allocation36_spill] sm:$0xff] %v25987_v10  ;;  %v25989_v35 = vpop.f32.mrf.mxu0  ;;  %v21352_v10 = vld [vmem:[#allocation3 + $0x90] sm:$0xff]  }
 0x54f   : > { %26793 = vst [vmem:[#allocation37_spill] sm:$0xff] %v25989_v35  ;;  %v25991_v20 = vpop.f32.mrf.mxu1  ;;  %v12684_v35 = vadd.f32 %v25884_v8, %v12442_v11 }
 0x550   : > { %26794 = vst [vmem:[#allocation38_spill] sm:$0xff] %v25991_v20  ;;  %v25993_v29 = vpop.f32.mrf.mxu0  ;;  %20534 = vmatmul.mubr.bf16.gmra.mxu0 %v21350_v54  ;;  %v12440_v20 = vadd.f32 %v25588_v26, %v25774_v62 }
 0x551   : > { %26795 = vst [vmem:[#allocation39_spill] sm:$0xff] %v25993_v29  ;;  %v25995_v12 = vpop.f32.mrf.mxu1  ;;  %20537 = vmatprep.mubr.bf16.mxu0 %v21351_v30  ;;  %v12926_v8 = vadd.f32 %v25723_v46, %v12684_v35  ;;  %v12686_v46 = vadd.f32 %v25913_v17, %v25808_v49  ;;  %v12692_v49 = vadd.f32 %v25931_v24, %v25833_v14 }
 0x552   : > { %26796 = vst [vmem:[#allocation40_spill] sm:$0xff] %v25995_v12  ;;  %v25997_v57 = vpop.f32.mrf.mxu0  ;;  %v12682_v30 = vadd.f32 %v25891_v55, %v12440_v20  ;;  %v12443_v12 = vadd.f32 %v25601_v19, %v25781_v16  ;;  %v12683_v19 = vadd.f32 %v25902_v32, %v25793_v1  ;;  %v12688_v16 = vadd.f32 %v25909_v0, %v25803_v28 }
 0x553   : > { %v26001_v34 = vpop.f32.mrf.mxu1  ;;  %v13168_v62 = vadd.f32 %v20143_v22, %v12926_v8  ;;  %v12687_v1 = vadd.f32 %v25924_v7, %v25823_v63  ;;  %v12928_v17 = vadd.f32 %v25755_v52, %v12686_v46  ;;  %v26801_v46 = vld [vmem:[#allocation24_spill] sm:$0xff] }
 0x554   : > { %26797 = vst [vmem:[#allocation41_spill] sm:$0xff] %v26001_v34  ;;  %v26003_v4 = vpop.f32.mrf.mxu0  ;;  %v12685_v34 = vadd.f32 %v25898_v36, %v12443_v12 }
 0x555   : > { %v26008_v29 = vpop.f32.mrf.mxu1  ;;  %v13410_v0 = vadd.f32 %v25874_v58, %v13168_v62  ;;  %v12693_v58 = vadd.f32 %v25942_v51, %v25848_v56  ;;  %v13170_v56 = vadd.f32 %v25981_v41, %v12928_v17  ;;  %v26807_v17 = vld [vmem:[#allocation31_spill] sm:$0xff] }
 0x556   : > { %26798 = vst [vmem:[#allocation42_spill] sm:$0xff] %v26008_v29  ;;  %v26010_v54 = vpop.f32.mrf.mxu0  ;;  %v12924_v29 = vadd.f32 %v25730_v25, %v12682_v30  ;;  %v12927_v36 = vadd.f32 %v25735_v31, %v12685_v34  ;;  %v12689_v25 = vadd.f32 %v25920_v5, %v25818_v9  ;;  %v12690_v31 = vadd.f32 %v25935_v18, %v25838_v23 }
 0x557   : > { %v26015_v3 = vpop.f32.mrf.mxu1  ;;  %v12930_v9 = vadd.f32 %v25746_v37, %v12688_v16  ;;  %v12929_v37 = vadd.f32 %v25772_v40, %v12687_v1 }
 0x558   : > { %v26017_v45 = vpop.f32.mrf.mxu0  ;;  %20538 = vmatmul.mubr.bf16.gmra.mxu0 %v21352_v10  ;;  %v13166_v35 = vadd.f32 %v13103_v27, %v12924_v29  ;;  %v13169_v32 = vadd.f32 %v20144_v53, %v12927_v36  ;;  %v12925_v29 = vadd.f32 %v25739_v38, %v12683_v19  ;;  %v12931_v23 = vadd.f32 %v25764_v33, %v12689_v25  ;;  %v26799_v19 = vld [vmem:[#allocation29_spill] sm:$0xff] }
 0x559   : > { %v26021_v11 = vpop.f32.mrf.mxu1  ;;  %v13172_v24 = vadd.f32 %v20147_v42, %v12930_v9  ;;  %v12932_v33 = vadd.f32 %v25795_v39, %v12690_v31  ;;  %v26805_v31 = vld [vmem:[#allocation37_spill] sm:$0xff]  ;;  %v26806_v9 = vld [vmem:[#allocation39_spill] sm:$0xff] }
 0x55a   : > { %v26023_v26 = vpop.f32.mrf.mxu0  ;;  %v13408_v7 = vadd.f32 %v25882_v6, %v13166_v35  ;;  %v13167_v14 = vadd.f32 %v25975_v47, %v12925_v29  ;;  %v13411_v27 = vadd.f32 %v25889_v21, %v13169_v32  ;;  %v12691_v6 = vadd.f32 %v25946_v48, %v25855_v60  ;;  %v26802_v35 = vld [vmem:[#allocation14_spill] sm:$0xff] }
 0x55b   : > { %v26026_v55 = vpop.f32.mrf.mxu1  ;;  %v12934_v47 = vadd.f32 %v25785_v44, %v12692_v49  ;;  %v12935_v44 = vadd.f32 %v25810_v15, %v12693_v58  ;;  %v13414_v41 = vadd.f32 %v25900_v43, %v13172_v24  ;;  %v13412_v36 = vadd.f32 %v26802_v35, %v13170_v56  ;;  %v26808_v24 = vld [vmem:[#allocation32_spill] sm:$0xff] }
 0x55c   : > { %v26032_v10 = vpop.f32.mrf.mxu0  ;;  %v13409_v39 = vadd.f32 %v25896_v59, %v13167_v14  ;;  %v13171_v29 = vadd.f32 %v26805_v31, %v12929_v37 }
 0x55d   : > { %v26037_v20 = vpop.f32.mrf.mxu1 }
 0x55e   : > { %v26041_v22 = vpop.f32.mrf.mxu0 }
 0x55f   : > { %v26045_v28 = vpop.f32.mrf.mxu1 }
 0x560   : > { %v20207_v34 = vpop.f32.mrf.mxu0 }
 0x561   : > { %v26055_v63 = vpop.f32.mrf.mxu1  ;;  %v13652_v5 = vadd.f32 %v20207_v34, %v13410_v0  ;;  %v26803_v0 = vld [vmem:[#allocation7_spill] sm:$0xff]  ;;  %v13176_v34 = vadd.f32 %v26806_v9, %v12934_v47  ;;  %v26819_v9 = vld [vmem:[#allocation16_spill] sm:$0xff] }
 0x562   : > { %v13587_v38 = vpop.f32.mrf.mxu0 }
 0x563   : > { %v26064_v18 = vpop.f32.mrf.mxu1  ;;  %v13894_v52 = vadd.f32 %v25963_v61, %v13652_v5  ;;  %v13650_v53 = vadd.f32 %v13587_v38, %v13408_v7  ;;  %v13173_v61 = vadd.f32 %v25985_v13, %v12931_v23  ;;  %v12933_v13 = vadd.f32 %v26801_v46, %v12691_v6  ;;  %v26810_v6 = vld [vmem:[#allocation27_spill] sm:$0xff] }
 0x564   : > { %v20208_v42 = vpop.f32.mrf.mxu0 }
 0x565   : > { %v26073_v51 = vpop.f32.mrf.mxu1  ;;  %vm13910_vm13 = vcmp.gt.f32.partialorder %v13894_v52, 0.0  ;;  %v13926_v40 = vmul.f32 -0.41, %v13894_v52  ;;  %v13892_v21 = vadd.f32 %v25967_v50, %v13650_v53  ;;  %v13653_v60 = vadd.f32 %v20208_v42, %v13411_v27  ;;  %v26800_v50 = vld [vmem:[#allocation22_spill] sm:$0xff] }
 0x566   : > { %v13590_v48 = vpop.f32.mrf.mxu0  ;;  %v12696_v16 = vadd.f32 %v26800_v50, %v26799_v19  ;;  %v13174_v27 = vadd.f32 %v25997_v57, %v12932_v33  ;;  %v26812_v57 = vld [vmem:[#allocation18_spill] sm:$0xff] }
 0x567   : > { %v26085_v12 = vpop.f32.mrf.mxu1  ;;  %v13942_v30 = vsel %vm13910_vm13, %v13894_v52, %v13926_v40  ;;  %vm13908_vm6 = vcmp.gt.f32.partialorder %v13892_v21, 0.0  ;;  %v13924_v8 = vmul.f32 -0.41, %v13892_v21  ;;  %v13895_v62 = vadd.f32 %v25969_v2, %v13653_v60  ;;  %v26804_v2 = vld [vmem:[#allocation11_spill] sm:$0xff]  ;;  %v26809_v52 = vld [vmem:[#allocation12_spill] sm:$0xff] }
 0x568   : > { %13959 = vst.msk [vmem:[%s26078_s7 + $0x10] sm:$0xff] %vm13956_vm10, %v13942_v30  ;;  %v13651_v15 = vadd.f32 %v13590_v48, %v13409_v39  ;;  %v20211_v59 = vpop.f32.mrf.mxu0  ;;  %v12694_v49 = vadd.f32 %v26804_v2, %v26803_v0  ;;  %v13415_v53 = vadd.f32 %v26809_v52, %v13173_v61  ;;  %v12938_v56 = vadd.f32 %v26810_v6, %v12696_v16  ;;  %v26813_v30 = vld [vmem:[#allocation13_spill] sm:$0xff]  ;;  %v26814_v16 = vld [vmem:[#allocation34_spill] sm:$0xff]  ;;  %v26822_v52 = vld [vmem:[#allocation36_spill] sm:$0xff] }
 0x569   : > { %v26094_v43 = vpop.f32.mrf.mxu1  ;;  %v13940_v25 = vsel %vm13908_vm6, %v13892_v21, %v13924_v8  ;;  %vm13911_vm7 = vcmp.gt.f32.partialorder %v13895_v62, 0.0  ;;  %v13927_v1 = vmul.f32 -0.41, %v13895_v62  ;;  %v13656_v32 = vadd.f32 %v20211_v59, %v13414_v41  ;;  %v26811_v21 = vld [vmem:[#allocation33_spill] sm:$0xff]  ;;  %v26816_v59 = vld [vmem:[#allocation10_spill] sm:$0xff] }
 0x56a   : > { %13957 = vst.msk [vmem:[%s26078_s7] sm:$0xff] %vm13956_vm10, %v13940_v25  ;;  %v13893_v5 = vadd.f32 %v26807_v17, %v13651_v15  ;;  %v13603_v7 = vpop.f32.mrf.mxu0  ;;  %v13177_v61 = vadd.f32 %v26003_v4, %v12935_v44  ;;  %v13413_v33 = vadd.f32 %v26812_v57, %v13171_v29  ;;  %v13418_v8 = vadd.f32 %v26813_v30, %v13176_v34  ;;  %v26815_v15 = vld [vmem:[#allocation6_spill] sm:$0xff]  ;;  %v26817_v4 = vld [vmem:[#allocation25_spill] sm:$0xff]  ;;  %v26827_v30 = vld [vmem:[#allocation19_spill] sm:$0xff] }
 0x56b   : > { %v26103_v58 = vpop.f32.mrf.mxu1  ;;  %v13943_v14 = vsel %vm13911_vm7, %v13895_v62, %v13927_v1  ;;  %v13898_v23 = vadd.f32 %v26808_v24, %v13656_v32  ;;  %v13654_v38 = vadd.f32 %v13603_v7, %v13412_v36  ;;  %v12697_v35 = vadd.f32 %v26816_v59, %v26815_v15  ;;  %v26818_v1 = vld [vmem:[#allocation9_spill] sm:$0xff]  ;;  %v26820_v34 = vld [vmem:[#allocation30_spill] sm:$0xff]  ;;  %v26821_v7 = vld [vmem:[#allocation35_spill] sm:$0xff] }
 0x56c   : > { %13960 = vst.msk [vmem:[%s26078_s7 + $0x18] sm:$0xff] %vm13956_vm10, %v13943_v14  ;;  %vm13909_vm8 = vcmp.gt.f32.partialorder %v13893_v5, 0.0  ;;  %v13925_v37 = vmul.f32 -0.41, %v13893_v5  ;;  %v20212_v47 = vpop.f32.mrf.mxu0  ;;  %v12936_v44 = vadd.f32 %v26817_v4, %v12694_v49  ;;  %v13416_v32 = vadd.f32 %v26818_v1, %v13174_v27  ;;  %v26823_v6 = vld [vmem:[#allocation17_spill] sm:$0xff]  ;;  %v26829_v59 = vld [vmem:[#allocation8_spill] sm:$0xff] }
 0x56d   : > { %v26111_v42 = vpop.f32.mrf.mxu1  ;;  %vm13914_vm9 = vcmp.gt.f32.partialorder %v13898_v23, 0.0  ;;  %v13930_v40 = vmul.f32 -0.41, %v13898_v23  ;;  %v13896_v60 = vadd.f32 %v26811_v21, %v13654_v38  ;;  %v13657_v39 = vadd.f32 %v20212_v47, %v13415_v53 }
 0x56e   : > { %v13941_v48 = vsel %vm13909_vm8, %v13893_v5, %v13925_v37  ;;  %v13606_v41 = vpop.f32.mrf.mxu0  ;;  %v12695_v17 = vadd.f32 %v26820_v34, %v26819_v9  ;;  %v13175_v5 = vadd.f32 %v26010_v54, %v12933_v13  ;;  %v13180_v49 = vadd.f32 %v26017_v45, %v12938_v56 }
 0x56f   : > { %v26117_v62 = vpop.f32.mrf.mxu1  ;;  %13958 = vst.msk [vmem:[%s26078_s7 + $0x8] sm:$0xff] %vm13956_vm10, %v13941_v48  ;;  %v13946_v19 = vsel %vm13914_vm9, %v13898_v23, %v13930_v40  ;;  %vm13912_vm11 = vcmp.gt.f32.partialorder %v13896_v60, 0.0  ;;  %v13928_v50 = vmul.f32 -0.41, %v13896_v60  ;;  %v13899_v46 = vadd.f32 %v26814_v16, %v13657_v39  ;;  %v26824_v40 = vld [vmem:[#allocation28_spill] sm:$0xff] }
 0x570   : > { %13963 = vst.msk [vmem:[%s26078_s7 + $0x30] sm:$0xff] %vm13956_vm10, %v13946_v19  ;;  %v13655_v36 = vadd.f32 %v13606_v41, %v13413_v33  ;;  %v20215_v25 = vpop.f32.mrf.mxu0  ;;  %v13419_v37 = vadd.f32 %v26823_v6, %v13177_v61  ;;  %v13178_v47 = vadd.f32 %v26023_v26, %v12936_v44  ;;  %v12939_v21 = vadd.f32 %v26824_v40, %v12697_v35  ;;  %v26826_v26 = vld [vmem:[#allocation20_spill] sm:$0xff]  ;;  %v26830_v44 = vld [vmem:[#allocation26_spill] sm:$0xff]  ;;  %v26834_v40 = vld [vmem:[#allocation21_spill] sm:$0xff] }
 0x571   : > { %v26128_v0 = vpop.f32.mrf.mxu1  ;;  %v13944_v2 = vsel %vm13912_vm11, %v13896_v60, %v13928_v50  ;;  %vm13915_vm12 = vcmp.gt.f32.partialorder %v13899_v46, 0.0  ;;  %v13931_v31 = vmul.f32 -0.41, %v13899_v46  ;;  %v13660_v29 = vadd.f32 %v20215_v25, %v13418_v8  ;;  %v26825_v60 = vld [vmem:[#allocation38_spill] sm:$0xff] }
 0x572   : > { %13961 = vst.msk [vmem:[%s26078_s7 + $0x20] sm:$0xff] %vm13956_vm10, %v13944_v2  ;;  %v13897_v14 = vadd.f32 %v26821_v7, %v13655_v36  ;;  %v13619_v24 = vpop.f32.mrf.mxu0  ;;  %v13181_v61 = vadd.f32 %v26032_v10, %v12939_v21  ;;  %v13417_v33 = vadd.f32 %v26826_v26, %v13175_v5  ;;  %v13422_v8 = vadd.f32 %v26827_v30, %v13180_v49  ;;  %v26832_v49 = vld [vmem:[#allocation42_spill] sm:$0xff] }
 0x573   : > { %v26137_v23 = vpop.f32.mrf.mxu1  ;;  %v13947_v38 = vsel %vm13915_vm12, %v13899_v46, %v13931_v31  ;;  %v13902_v53 = vadd.f32 %v26822_v52, %v13660_v29  ;;  %v13658_v27 = vadd.f32 %v13619_v24, %v13416_v32  ;;  %v26828_v46 = vld [vmem:[#allocation40_spill] sm:$0xff]  ;;  %v12937_v35 = vadd.f32 %v26829_v59, %v12695_v17  ;;  %v26831_v29 = vld [vmem:[#allocation41_spill] sm:$0xff]  ;;  %v26833_v24 = vld [vmem:[#allocation15_spill] sm:$0xff] }
 0x574   : > { %13964 = vst.msk [vmem:[%s26078_s7 + $0x38] sm:$0xff] %vm13956_vm10, %v13947_v38  ;;  %vm13913_vm14 = vcmp.gt.f32.partialorder %v13897_v14, 0.0  ;;  %v13929_v54 = vmul.f32 -0.41, %v13897_v14  ;;  %v20216_v45 = vpop.f32.mrf.mxu0  ;;  %v13420_v36 = vadd.f32 %v26830_v44, %v13178_v47  ;;  %v13423_v38 = vadd.f32 %v26833_v24, %v13181_v61 }
 0x575   : > { %v26145_v13 = vpop.f32.mrf.mxu1  ;;  %vm13918_vm15 = vcmp.gt.f32.partialorder %v13902_v53, 0.0  ;;  %v13934_v56 = vmul.f32 -0.41, %v13902_v53  ;;  %v13900_v39 = vadd.f32 %v26825_v60, %v13658_v27  ;;  %v13661_v48 = vadd.f32 %v20216_v45, %v13419_v37 }
 0x576   : > { %v13945_v57 = vsel %vm13913_vm14, %v13897_v14, %v13929_v54  ;;  %v13622_v41 = vpop.f32.mrf.mxu0  ;;  %v13179_v31 = vadd.f32 %v26041_v22, %v12937_v35 }
 0x577   : > { %v26151_v19 = vpop.f32.mrf.mxu1  ;;  %13962 = vst.msk [vmem:[%s26078_s7 + $0x28] sm:$0xff] %vm13956_vm10, %v13945_v57  ;;  %v13950_v50 = vsel %vm13918_vm15, %v13902_v53, %v13934_v56  ;;  %vm13916_vm0 = vcmp.gt.f32.partialorder %v13900_v39, 0.0  ;;  %v13932_v16 = vmul.f32 -0.41, %v13900_v39  ;;  %v13903_v15 = vadd.f32 %v26828_v46, %v13661_v48 }
 0x578   : > { %13967 = vst.msk [vmem:[%s26078_s7 + $0x50] sm:$0xff] %vm13956_vm10, %v13950_v50  ;;  %v13659_v10 = vadd.f32 %v13622_v41, %v13417_v33  ;;  %v20219_v4 = vpop.f32.mrf.mxu0  ;;  %v13421_v21 = vadd.f32 %v26834_v40, %v13179_v31  ;;  %v26835_v33 = vld [vmem:[#allocation23_spill] sm:$0xff] }
 0x579   : > { %v26160_v25 = vpop.f32.mrf.mxu1  ;;  %v13948_v1 = vsel %vm13916_vm0, %v13900_v39, %v13932_v16  ;;  %vm13919_vm1 = vcmp.gt.f32.partialorder %v13903_v15, 0.0  ;;  %v13935_v32 = vmul.f32 -0.41, %v13903_v15  ;;  %v13664_v2 = vadd.f32 %v20219_v4, %v13422_v8 }
 0x57a   : > { %13965 = vst.msk [vmem:[%s26078_s7 + $0x40] sm:$0xff] %vm13956_vm10, %v13948_v1  ;;  %v13901_v9 = vadd.f32 %v26831_v29, %v13659_v10  ;;  %v13635_v34 = vpop.f32.mrf.mxu0 }
 0x57b   : > { %v26166_v17 = vpop.f32.mrf.mxu1  ;;  %v13951_v5 = vsel %vm13919_vm1, %v13903_v15, %v13935_v32  ;;  %v13906_v7 = vadd.f32 %v26832_v49, %v13664_v2  ;;  %v13662_v14 = vadd.f32 %v13635_v34, %v13420_v36 }
 0x57c   : > { %13968 = vst.msk [vmem:[%s26078_s7 + $0x58] sm:$0xff] %vm13956_vm10, %v13951_v5  ;;  %vm13917_vm2 = vcmp.gt.f32.partialorder %v13901_v9, 0.0  ;;  %v13933_v52 = vmul.f32 -0.41, %v13901_v9  ;;  %v20220_v22 = vpop.f32.mrf.mxu0 }
 0x57d   : > { %v26172_v53 = vpop.f32.mrf.mxu1  ;;  %vm13922_vm3 = vcmp.gt.f32.partialorder %v13906_v7, 0.0  ;;  %v13938_v27 = vmul.f32 -0.41, %v13906_v7  ;;  %v13904_v6 = vadd.f32 %v26015_v3, %v13662_v14  ;;  %v13665_v37 = vadd.f32 %v20220_v22, %v13423_v38 }
 0x57e   : > { %v13949_v47 = vsel %vm13917_vm2, %v13901_v9, %v13933_v52  ;;  %v13638_v54 = vpop.f32.mrf.mxu0 }
 0x57f   : > { %v26176_v45 = vpop.f32.mrf.mxu1  ;;  %13966 = vst.msk [vmem:[%s26078_s7 + $0x48] sm:$0xff] %vm13956_vm10, %v13949_v47  ;;  %v13954_v56 = vsel %vm13922_vm3, %v13906_v7, %v13938_v27  ;;  %vm13920_vm4 = vcmp.gt.f32.partialorder %v13904_v6, 0.0  ;;  %v13936_v60 = vmul.f32 -0.41, %v13904_v6  ;;  %v13907_v39 = vadd.f32 %v26021_v11, %v13665_v37 }
 0x580   : > { %13971 = vst.msk [vmem:[%s26078_s7 + $0x70] sm:$0xff] %vm13956_vm10, %v13954_v56  ;;  %v13663_v48 = vadd.f32 %v13638_v54, %v13421_v21  ;;  %v20271_v3 = vpop.f32.mrf.mxu0 }
 0x581   : > { %v26183_v61 = vpop.f32.mrf.mxu1  ;;  %v13952_v57 = vsel %vm13920_vm4, %v13904_v6, %v13936_v60  ;;  %vm13923_vm5 = vcmp.gt.f32.partialorder %v13907_v39, 0.0  ;;  %v13939_v26 = vmul.f32 -0.41, %v13907_v39  ;;  %v14200_v41 = vadd.f32 %v20271_v3, %v26835_v33 }
 0x582   : > { %13969 = vst.msk [vmem:[%s26078_s7 + $0x60] sm:$0xff] %vm13956_vm10, %v13952_v57  ;;  %v13905_v30 = vadd.f32 %v26026_v55, %v13663_v48  ;;  %v14135_v8 = vpop.f32.mrf.mxu0 }
 0x583   : > { %v26189_v50 = vpop.f32.mrf.mxu1  ;;  %v13955_v11 = vsel %vm13923_vm5, %v13907_v39, %v13939_v26  ;;  %v14198_v16 = vadd.f32 %v26835_v33, %v14135_v8  ;;  %v14441_v46 = vadd.f32 %v26037_v20, %v14200_v41 }
 0x584   : > { %13972 = vst.msk [vmem:[%s26078_s7 + $0x78] sm:$0xff] %vm13956_vm10, %v13955_v11  ;;  %vm13921_vm13 = vcmp.gt.f32.partialorder %v13905_v30, 0.0  ;;  %v13937_v15 = vmul.f32 -0.41, %v13905_v30  ;;  %v20272_v59 = vpop.f32.mrf.mxu0 }
 0x585   : > { %v26195_v35 = vpop.f32.mrf.mxu1  ;;  %v14201_v10 = vadd.f32 %v20272_v59, %v26835_v33  ;;  %v14439_v55 = vadd.f32 %v26045_v28, %v14198_v16 }
 0x586   : > { %v13953_v4 = vsel %vm13921_vm13, %v13905_v30, %v13937_v15  ;;  %v14138_v44 = vpop.f32.mrf.mxu0 }
 0x587   : > { %v26199_v36 = vpop.f32.mrf.mxu1  ;;  %13970 = vst.msk [vmem:[%s26078_s7 + $0x68] sm:$0xff] %vm13956_vm10, %v13953_v4  ;;  %v14199_v1 = vadd.f32 %v26835_v33, %v14138_v44  ;;  %v14442_v20 = vadd.f32 %v26055_v63, %v14201_v10 }
 0x588   : > { %v20275_v32 = vpop.f32.mrf.mxu0 }
 0x589   : > { %v26205_v2 = vpop.f32.mrf.mxu1  ;;  %v14204_v31 = vadd.f32 %v20275_v32, %v26835_v33  ;;  %v14440_v29 = vadd.f32 %v26064_v18, %v14199_v1 }
 0x58a   : > { %v14151_v9 = vpop.f32.mrf.mxu0 }
 0x58b   : > { %v26209_v34 = vpop.f32.mrf.mxu1  ;;  %v14202_v28 = vadd.f32 %v26835_v33, %v14151_v9  ;;  %v14445_v5 = vadd.f32 %v26073_v51, %v14204_v31 }
 0x58c   : > { %v20276_v49 = vpop.f32.mrf.mxu0 }
 0x58d   : > { %v26213_v7 = vpop.f32.mrf.mxu1  ;;  %v14205_v14 = vadd.f32 %v20276_v49, %v26835_v33  ;;  %v14443_v63 = vadd.f32 %v26085_v12, %v14202_v28 }
 0x58e   : > { %v14154_v24 = vpop.f32.mrf.mxu0 }
 0x58f   : > { %v26217_v38 = vpop.f32.mrf.mxu1  ;;  %v14203_v52 = vadd.f32 %v26835_v33, %v14154_v24  ;;  %v14446_v18 = vadd.f32 %v26094_v43, %v14205_v14 }
 0x590   : > { %v20279_v22 = vpop.f32.mrf.mxu0 }
 0x591   : > { %v26221_v27 = vpop.f32.mrf.mxu1  ;;  %v14208_v6 = vadd.f32 %v20279_v22, %v26835_v33  ;;  %v14444_v51 = vadd.f32 %v26103_v58, %v14203_v52 }
 0x592   : > { %v14167_v37 = vpop.f32.mrf.mxu0 }
 0x593   : > { %v26225_v47 = vpop.f32.mrf.mxu1  ;;  %v14206_v40 = vadd.f32 %v26835_v33, %v14167_v37  ;;  %v14449_v12 = vadd.f32 %v26111_v42, %v14208_v6 }
 0x594   : > { %v20280_v21 = vpop.f32.mrf.mxu0 }
 0x595   : > { %v26229_v54 = vpop.f32.mrf.mxu1  ;;  %v14209_v56 = vadd.f32 %v20280_v21, %v26835_v33  ;;  %v14447_v43 = vadd.f32 %v26117_v62, %v14206_v40 }
 0x596   : > { %v14170_v60 = vpop.f32.mrf.mxu0 }
 0x597   : > { %v26233_v39 = vpop.f32.mrf.mxu1  ;;  %v14207_v48 = vadd.f32 %v26835_v33, %v14170_v60  ;;  %v14450_v58 = vadd.f32 %v26128_v0, %v14209_v56 }
 0x598   : > { %v20283_v3 = vpop.f32.mrf.mxu0 }
 0x599   : > { %v26237_v57 = vpop.f32.mrf.mxu1  ;;  %v14212_v26 = vadd.f32 %v20283_v3, %v26835_v33  ;;  %v14448_v42 = vadd.f32 %v26137_v23, %v14207_v48 }
 0x59a   : > { %v14183_v41 = vpop.f32.mrf.mxu0 }
 0x59b   : > { %v26241_v30 = vpop.f32.mrf.mxu1  ;;  %v14210_v8 = vadd.f32 %v26835_v33, %v14183_v41  ;;  %v14453_v62 = vadd.f32 %v26145_v13, %v14212_v26 }
 0x59c   : > { %v20284_v11 = vpop.f32.mrf.mxu0 }
 0x59d   : > { %v14213_v16 = vadd.f32 %v20284_v11, %v26835_v33  ;;  %v14451_v15 = vadd.f32 %v26151_v19, %v14210_v8  ;;  %v26247_v59 = vpop.f32.mrf.mxu1 }
 0x59e   : > { %v14186_v0 = vpop.f32.mrf.mxu0 }
 0x59f   : > { %v14211_v10 = vadd.f32 %v26835_v33, %v14186_v0  ;;  %v14454_v4 = vadd.f32 %v26160_v25, %v14213_v16  ;;  %v26254_v31 = vpop.f32.mrf.mxu1 }
 0x5a0   : > { %v20335_v23 = vpop.f32.mrf.mxu0 }
 0x5a1   : > { %v26251_v44 = vadd.f32 %v20335_v23, %v14441_v46  ;;  %v14452_v1 = vadd.f32 %v26166_v17, %v14211_v10  ;;  %v26260_v49 = vpop.f32.mrf.mxu1 }
 0x5a2   : > { %v14617_v32 = vpop.f32.mrf.mxu0 }
 0x5a3   : > { %v26256_v13 = vadd.f32 %v14617_v32, %v14439_v55  ;;  %v26266_v24 = vpop.f32.mrf.mxu1 }
 0x5a4   : > { %v20336_v9 = vpop.f32.mrf.mxu0 }
 0x5a5   : > { %v26258_v28 = vadd.f32 %v20336_v9, %v14442_v20  ;;  %v26272_v6 = vpop.f32.mrf.mxu1 }
 0x5a6   : > { %v14620_v19 = vpop.f32.mrf.mxu0 }
 0x5a7   : > { %v26262_v14 = vadd.f32 %v14620_v19, %v14440_v29  ;;  %v26278_v21 = vpop.f32.mrf.mxu1 }
 0x5a8   : > { %v20339_v33 = vpop.f32.mrf.mxu0 }
 0x5a9   : > { %v26264_v25 = vadd.f32 %v20339_v33, %v14445_v5  ;;  %v26284_v48 = vpop.f32.mrf.mxu1 }
 0x5aa   : > { %v14633_v46 = vpop.f32.mrf.mxu0  ;;  %26836 = vst [vmem:[#allocation29_spill] sm:$0xff] %v26284_v48  ;;  %v14923_v48 = vadd.f32 %v26172_v53, %v26251_v44 }
 0x5ab   : > { %v26268_v17 = vadd.f32 %v14633_v46, %v14443_v63  ;;  %v26290_v41 = vpop.f32.mrf.mxu1 }
 0x5ac   : > { %v20340_v52 = vpop.f32.mrf.mxu0  ;;  %26837 = vst [vmem:[#allocation22_spill] sm:$0xff] %v26290_v41 }
 0x5ad   : > { %v26270_v22 = vadd.f32 %v20340_v52, %v14446_v18  ;;  %v26296_v16 = vpop.f32.mrf.mxu1 }
 0x5ae   : > { %v14636_v55 = vpop.f32.mrf.mxu0  ;;  %26838 = vst [vmem:[#allocation24_spill] sm:$0xff] %v26296_v16 }
 0x5af   : > { %v26274_v20 = vadd.f32 %v14636_v55, %v14444_v51 }
 0x5b0   : > { %v20343_v37 = vpop.f32.mrf.mxu0 }
 0x5b1   : > { %v26276_v40 = vadd.f32 %v20343_v37, %v14449_v12 }
 0x5b2   : > { %v14649_v29 = vpop.f32.mrf.mxu0 }
 0x5b3   : > { %v26280_v5 = vadd.f32 %v14649_v29, %v14447_v43 }
 0x5b4   : > { %v20344_v56 = vpop.f32.mrf.mxu0 }
 0x5b5   : > { %v26282_v60 = vadd.f32 %v20344_v56, %v14450_v58 }
 0x5b6   : > { %v14652_v63 = vpop.f32.mrf.mxu0 }
 0x5b7   : > { %v26286_v18 = vadd.f32 %v14652_v63, %v14448_v42  ;;  %v26300_v42 = vpop.f32.mrf.mxu1 }
 0x5b8   : > { %v20347_v3 = vpop.f32.mrf.mxu0  ;;  %26839 = vst [vmem:[#allocation14_spill] sm:$0xff] %v26300_v42 }
 0x5b9   : > { %v26288_v26 = vadd.f32 %v20347_v3, %v14453_v62  ;;  %v26302_v32 = vpop.f32.mrf.mxu1 }
 0x5ba   : > { %v14665_v51 = vpop.f32.mrf.mxu0  ;;  %26840 = vst [vmem:[#allocation7_spill] sm:$0xff] %v26302_v32 }
 0x5bb   : > { %v26292_v12 = vadd.f32 %v14665_v51, %v14451_v15  ;;  %v26304_v15 = vpop.f32.mrf.mxu1 }
 0x5bc   : > { %v20348_v8 = vpop.f32.mrf.mxu0  ;;  %26841 = vst [vmem:[#allocation11_spill] sm:$0xff] %v26304_v15 }
 0x5bd   : > { %v26294_v11 = vadd.f32 %v20348_v8, %v14454_v4  ;;  %v26310_v46 = vpop.f32.mrf.mxu1 }
 0x5be   : > { %v14668_v43 = vpop.f32.mrf.mxu0  ;;  %26842 = vst [vmem:[#allocation37_spill] sm:$0xff] %v26310_v46 }
 0x5bf   : > { %v26298_v58 = vadd.f32 %v14668_v43, %v14452_v1  ;;  %v26316_v55 = vpop.f32.mrf.mxu1 }
 0x5c0   : > { %v20399_v0 = vpop.f32.mrf.mxu0  ;;  %26845 = vst [vmem:[#allocation32_spill] sm:$0xff] %v26316_v55 }
 0x5c1   : > { %v26322_v56 = vpop.f32.mrf.mxu1 }
 0x5c2   : > { %v15099_v10 = vpop.f32.mrf.mxu0  ;;  %26848 = vst [vmem:[#allocation33_spill] sm:$0xff] %v26322_v56 }
 0x5c3   : > { %v26328_v51 = vpop.f32.mrf.mxu1 }
 0x5c4   : > { %v20400_v23 = vpop.f32.mrf.mxu0  ;;  %26851 = vst [vmem:[#allocation34_spill] sm:$0xff] %v26328_v51 }
 0x5c5   : > { %v20495_v46 = vpop.f32.mrf.mxu1 }
 0x5c6   : > { %v15102_v62 = vpop.f32.mrf.mxu0 }
 0x5c7   : > { %v15822_v55 = vpop.f32.mrf.mxu1 }
 0x5c8   : > { %v20403_v9 = vpop.f32.mrf.mxu0 }
 0x5ca   : > { %v15115_v19 = vpop.f32.mrf.mxu0 }
 0x5cc   : > { %v26306_v33 = vpop.f32.mrf.mxu0 }
 0x5ce   : > { %v26308_v4 = vpop.f32.mrf.mxu0 }
 0x5d0   : > { %v26312_v1 = vpop.f32.mrf.mxu0 }
 0x5d1   : > { %26843 = vst [vmem:[#allocation39_spill] sm:$0xff] %v26312_v1 }
 0x5d2   : > { %v26314_v52 = vpop.f32.mrf.mxu0 }
 0x5d3   : > { %26844 = vst [vmem:[#allocation31_spill] sm:$0xff] %v26314_v52 }
 0x5d4   : > { %v26318_v37 = vpop.f32.mrf.mxu0 }
 0x5d5   : > { %26846 = vst [vmem:[#allocation12_spill] sm:$0xff] %v26318_v37  ;;  %v26334_v37 = vpop.f32.mrf.mxu1 }
 0x5d6   : > { %v26320_v29 = vpop.f32.mrf.mxu0 }
 0x5d7   : > { %26847 = vst [vmem:[#allocation27_spill] sm:$0xff] %v26320_v29 }
 0x5d8   : > { %v26324_v63 = vpop.f32.mrf.mxu0 }
 0x5d9   : > { %26849 = vst [vmem:[#allocation18_spill] sm:$0xff] %v26324_v63  ;;  %v26338_v63 = vpop.f32.mrf.mxu1 }
 0x5da   : > { %v26326_v3 = vpop.f32.mrf.mxu0  ;;  %26855 = vst [vmem:[#allocation9_spill] sm:$0xff] %v26338_v63  ;;  %v14921_v63 = vadd.f32 %v26176_v45, %v26256_v13  ;;  %v14927_v45 = vadd.f32 %v26195_v35, %v26264_v25 }
 0x5db   : > { %26850 = vst [vmem:[#allocation13_spill] sm:$0xff] %v26326_v3 }
 0x5dc   : > { %v26330_v8 = vpop.f32.mrf.mxu0 }
 0x5dd   : > { %26852 = vst [vmem:[#allocation6_spill] sm:$0xff] %v26330_v8  ;;  %v26344_v8 = vpop.f32.mrf.mxu1 }
 0x5de   : > { %v26332_v43 = vpop.f32.mrf.mxu0  ;;  %26858 = vst [vmem:[#allocation35_spill] sm:$0xff] %v26344_v8  ;;  %v15162_v8 = vadd.f32 %v15099_v10, %v14921_v63 }
 0x5df   : > { %26853 = vst [vmem:[#allocation10_spill] sm:$0xff] %v26332_v43  ;;  %v26350_v52 = vpop.f32.mrf.mxu1 }
 0x5e0   : > { %v20463_v15 = vpop.f32.mrf.mxu0  ;;  %26861 = vst [vmem:[#allocation28_spill] sm:$0xff] %v26350_v52  ;;  %v15403_v63 = vadd.f32 %v26254_v31, %v15162_v8  ;;  %v14931_v31 = vadd.f32 %v26213_v7, %v26276_v40  ;;  %v14935_v7 = vadd.f32 %v26229_v54, %v26288_v26  ;;  %v26415_v54 = vadd.f32 %v26241_v30, %v26298_v58 }
 0x5e2   : > { %v15581_v32 = vpop.f32.mrf.mxu0 }
 0x5e3   : > { %v15644_v35 = vadd.f32 %v15581_v32, %v15403_v63 }
 0x5e4   : > { %v20464_v42 = vpop.f32.mrf.mxu0 }
 0x5e6   : > { %v15584_v16 = vpop.f32.mrf.mxu0 }
 0x5e8   : > { %v20467_v29 = vpop.f32.mrf.mxu0 }
 0x5ea   : > { %v26336_v56 = vpop.f32.mrf.mxu0 }
 0x5eb   : > { %26854 = vst [vmem:[#allocation25_spill] sm:$0xff] %v26336_v56  ;;  %v15164_v56 = vadd.f32 %v20399_v0, %v14923_v48 }
 0x5ec   : > { %v26340_v3 = vpop.f32.mrf.mxu0 }
 0x5ed   : > { %26856 = vst [vmem:[#allocation16_spill] sm:$0xff] %v26340_v3  ;;  %v15405_v44 = vadd.f32 %v26247_v59, %v15164_v56  ;;  %v14928_v59 = vadd.f32 %v26205_v2, %v26270_v22  ;;  %v14932_v2 = vadd.f32 %v26221_v27, %v26282_v60  ;;  %v26408_v27 = vadd.f32 %v26237_v57, %v26294_v11  ;;  %v26862_v11 = vld [vmem:[#allocation39_spill] sm:$0xff] }
 0x5ee   : > { %v26342_v51 = vpop.f32.mrf.mxu0  ;;  %v15172_v32 = vadd.f32 %v26862_v11, %v14931_v31  ;;  %v26866_v56 = vld [vmem:[#allocation31_spill] sm:$0xff]  ;;  %v26877_v11 = vld [vmem:[#allocation18_spill] sm:$0xff] }
 0x5ef   : > { %26857 = vst [vmem:[#allocation30_spill] sm:$0xff] %v26342_v51  ;;  %v26360_v51 = vpop.f32.mrf.mxu1  ;;  %v15646_v10 = vadd.f32 %v20463_v15, %v15405_v44  ;;  %v26864_v15 = vld [vmem:[#allocation29_spill] sm:$0xff] }
 0x5f0   : > { %v26346_v43 = vpop.f32.mrf.mxu0 }
 0x5f1   : > { %26859 = vst [vmem:[#allocation36_spill] sm:$0xff] %v26346_v43  ;;  %v14924_v43 = vadd.f32 %v26183_v61, %v26258_v28  ;;  %v26373_v0 = vpop.f32.mrf.mxu1  ;;  %v15168_v61 = vadd.f32 %v20403_v9, %v14927_v45  ;;  %v15887_v22 = vadd.f32 %v20495_v46, %v15646_v10  ;;  %v26865_v46 = vld [vmem:[#allocation9_spill] sm:$0xff]  ;;  %v26869_v45 = vld [vmem:[#allocation35_spill] sm:$0xff] }
 0x5f2   : > { %v26348_v41 = vpop.f32.mrf.mxu0  ;;  %v26863_v9 = vld [vmem:[#allocation25_spill] sm:$0xff] }
 0x5f3   : > { %26860 = vst [vmem:[#allocation17_spill] sm:$0xff] %v26348_v41  ;;  %v14922_v41 = vadd.f32 %v26189_v50, %v26262_v14  ;;  %v15165_v53 = vadd.f32 %v20400_v23, %v14924_v43  ;;  %v14925_v50 = vadd.f32 %v26199_v36, %v26268_v17  ;;  %v14926_v14 = vadd.f32 %v26209_v34, %v26274_v20 }
 0x5f4   : > { %v26354_v1 = vpop.f32.mrf.mxu0  ;;  %v14929_v36 = vadd.f32 %v26217_v38, %v26280_v5  ;;  %v14930_v34 = vadd.f32 %v26225_v47, %v26286_v18  ;;  %v15169_v20 = vadd.f32 %v26306_v33, %v14928_v59  ;;  %v15409_v38 = vadd.f32 %v26272_v6, %v15168_v61  ;;  %v26867_v43 = vld [vmem:[#allocation16_spill] sm:$0xff] }
 0x5f5   : > { %v15163_v48 = vadd.f32 %v15102_v62, %v14922_v41  ;;  %v15406_v25 = vadd.f32 %v26260_v49, %v15165_v53  ;;  %v26385_v41 = vpop.f32.mrf.mxu1  ;;  %v15166_v23 = vadd.f32 %v15115_v19, %v14925_v50  ;;  %v15885_v18 = vadd.f32 %v15822_v55, %v15644_v35  ;;  %v26868_v53 = vld [vmem:[#allocation22_spill] sm:$0xff]  ;;  %v26870_v59 = vld [vmem:[#allocation12_spill] sm:$0xff] }
 0x5f6   : > { %v26358_v3 = vpop.f32.mrf.mxu0  ;;  %v15650_v6 = vadd.f32 %v20467_v29, %v15409_v38  ;;  %v15410_v33 = vadd.f32 %v26864_v15, %v15169_v20  ;;  %v15170_v8 = vadd.f32 %v26866_v56, %v14929_v36  ;;  %v26871_v35 = vld [vmem:[#allocation30_spill] sm:$0xff]  ;;  %v26879_v15 = vld [vmem:[#allocation7_spill] sm:$0xff] }
 0x5f7   : > { %v15404_v17 = vadd.f32 %v26266_v24, %v15163_v48  ;;  %v15647_v49 = vadd.f32 %v20464_v42, %v15406_v25  ;;  %v26404_v24 = vadd.f32 %v26233_v39, %v26292_v12  ;;  %v26410_v47 = vpop.f32.mrf.mxu1  ;;  %v15167_v42 = vadd.f32 %v26308_v4, %v14926_v14 }
 0x5f8   : > { %v26366_v52 = vpop.f32.mrf.mxu0  ;;  %v15407_v26 = vadd.f32 %v26278_v21, %v15166_v23  ;;  %v15891_v10 = vadd.f32 %v26869_v45, %v15650_v6  ;;  %v15173_v14 = vadd.f32 %v26870_v59, %v14932_v2  ;;  %v26872_v23 = vld [vmem:[#allocation24_spill] sm:$0xff]  ;;  %v26876_v2 = vld [vmem:[#allocation14_spill] sm:$0xff] }
 0x5f9   : > { %v15645_v40 = vadd.f32 %v15584_v16, %v15404_v17  ;;  %v15888_v57 = vadd.f32 %v26334_v37, %v15647_v49  ;;  %v26423_v58 = vpop.f32.mrf.mxu1  ;;  %v15651_v37 = vadd.f32 %v26867_v43, %v15410_v33  ;;  %v15408_v44 = vadd.f32 %v26868_v53, %v15167_v42  ;;  %v26873_v17 = vld [vmem:[#allocation28_spill] sm:$0xff] }
 0x5fa   : > { %v26371_v13 = vpop.f32.mrf.mxu0  ;;  %v15648_v19 = vadd.f32 %v26863_v9, %v15407_v26  ;;  %v15413_v31 = vadd.f32 %v26872_v23, %v15172_v32  ;;  %v15411_v6 = vadd.f32 %v26876_v2, %v15170_v8  ;;  %v15176_v32 = vadd.f32 %v26877_v11, %v14935_v7  ;;  %v26878_v9 = vld [vmem:[#allocation17_spill] sm:$0xff]  ;;  %v26881_v8 = vld [vmem:[#allocation11_spill] sm:$0xff]  ;;  %v26885_v23 = vld [vmem:[#allocation32_spill] sm:$0xff] }
 0x5fb   : > { %v15886_v30 = vadd.f32 %v26865_v46, %v15645_v40  ;;  %v15649_v25 = vadd.f32 %v26871_v35, %v15408_v44  ;;  %v26884_v35 = vld [vmem:[#allocation10_spill] sm:$0xff] }
 0x5fc   : > { %v26378_v28 = vpop.f32.mrf.mxu0  ;;  %v15889_v49 = vadd.f32 %v26873_v17, %v15648_v19  ;;  %v15652_v19 = vadd.f32 %v26878_v9, %v15411_v6  ;;  %v26887_v6 = vld [vmem:[#allocation34_spill] sm:$0xff] }
 0x5fe   : > { %v26392_v62 = vpop.f32.mrf.mxu0 }
 0x600   : > { %v20527_v5 = vpop.f32.mrf.mxu0 }
 0x601   : > { %v16128_v60 = vadd.f32 %v20527_v5, %v15887_v22  ;;  %v15857_v22 = vpop.f32.mrf.mxu1  ;;  %v26874_v5 = vld [vmem:[#allocation27_spill] sm:$0xff] }
 0x602   : > { %v16063_v16 = vpop.f32.mrf.mxu0 }
 0x603   : > { %vm16144_vm6 = vcmp.gt.f32.partialorder %v16128_v60, 0.0  ;;  %v16160_v39 = vmul.f32 -0.41, %v16128_v60  ;;  %v16126_v12 = vadd.f32 %v16063_v16, %v15885_v18  ;;  %v26875_v18 = vld [vmem:[#allocation36_spill] sm:$0xff]  ;;  %v15892_v16 = vadd.f32 %v26360_v51, %v15651_v37  ;;  %v20507_v46 = vpop.f32.mrf.mxu1 }
 0x604   : > { %v20528_v4 = vpop.f32.mrf.mxu0  ;;  %v15654_v42 = vadd.f32 %v26875_v18, %v15413_v31 }
 0x605   : > { %v16176_v55 = vsel %vm16144_vm6, %v16128_v60, %v16160_v39  ;;  %vm16142_vm7 = vcmp.gt.f32.partialorder %v16126_v12, 0.0  ;;  %v16158_v21 = vmul.f32 -0.41, %v16126_v12  ;;  %v16129_v29 = vadd.f32 %v20528_v4, %v15888_v57 }
 0x606   : > { %16192 = vst.msk [vmem:[%s26078_s7 + $0x90] sm:$0xff] %vm13956_vm10, %v16176_v55  ;;  %v16066_v48 = vpop.f32.mrf.mxu0  ;;  %v15171_v60 = vadd.f32 %v26874_v5, %v14930_v34  ;;  %v15414_v34 = vadd.f32 %v26879_v15, %v15173_v14  ;;  %v15890_v4 = vadd.f32 %v26373_v0, %v15649_v25  ;;  %v15895_v7 = vadd.f32 %v26385_v41, %v15654_v42  ;;  %v26883_v41 = vld [vmem:[#allocation37_spill] sm:$0xff] }
 0x607   : > { %v16174_v63 = vsel %vm16142_vm7, %v16126_v12, %v16158_v21  ;;  %vm16145_vm8 = vcmp.gt.f32.partialorder %v16129_v29, 0.0  ;;  %v16161_v61 = vmul.f32 -0.41, %v16129_v29  ;;  %v16127_v50 = vadd.f32 %v16066_v48, %v15886_v30  ;;  %v26880_v21 = vld [vmem:[#allocation13_spill] sm:$0xff]  ;;  %v26882_v48 = vld [vmem:[#allocation6_spill] sm:$0xff] }
 0x608   : > { %16190 = vst.msk [vmem:[%s26078_s7 + $0x80] sm:$0xff] %vm13956_vm10, %v16174_v63  ;;  %v20531_v36 = vpop.f32.mrf.mxu0  ;;  %v15655_v56 = vadd.f32 %v26354_v1, %v15414_v34  ;;  %v15412_v43 = vadd.f32 %v26881_v8, %v15171_v60  ;;  %v15177_v45 = vadd.f32 %v26882_v48, %v26408_v27  ;;  %v15417_v63 = vadd.f32 %v26883_v41, %v15176_v32 }
 0x609   : > { %v16177_v20 = vsel %vm16145_vm8, %v16129_v29, %v16161_v61  ;;  %vm16143_vm9 = vcmp.gt.f32.partialorder %v16127_v50, 0.0  ;;  %v16159_v40 = vmul.f32 -0.41, %v16127_v50  ;;  %v16132_v38 = vadd.f32 %v20531_v36, %v15891_v10  ;;  %v15870_v61 = vpop.f32.mrf.mxu1 }
 0x60a   : > { %16193 = vst.msk [vmem:[%s26078_s7 + $0x98] sm:$0xff] %vm13956_vm10, %v16177_v20  ;;  %v16079_v26 = vpop.f32.mrf.mxu0  ;;  %v15174_v29 = vadd.f32 %v26880_v21, %v26404_v24  ;;  %v15893_v10 = vadd.f32 %v26410_v47, %v15652_v19  ;;  %v15653_v24 = vadd.f32 %v26358_v3, %v15412_v43  ;;  %v15175_v25 = vadd.f32 %v26884_v35, %v26415_v54 }
 0x60b   : > { %v16175_v39 = vsel %vm16143_vm9, %v16127_v50, %v16159_v40  ;;  %vm16148_vm11 = vcmp.gt.f32.partialorder %v16132_v38, 0.0  ;;  %v16164_v12 = vmul.f32 -0.41, %v16132_v38  ;;  %v16130_v57 = vadd.f32 %v16079_v26, %v15889_v49 }
 0x60c   : > { %16191 = vst.msk [vmem:[%s26078_s7 + $0x88] sm:$0xff] %vm13956_vm10, %v16175_v39  ;;  %v20532_v33 = vpop.f32.mrf.mxu0  ;;  %v15896_v27 = vadd.f32 %v26423_v58, %v15655_v56  ;;  %v15658_v47 = vadd.f32 %v26366_v52, %v15417_v63  ;;  %v15415_v3 = vadd.f32 %v26885_v23, %v15174_v29  ;;  %v15894_v20 = vadd.f32 %v15857_v22, %v15653_v24  ;;  %v20508_v58 = vpop.f32.mrf.mxu1 }
 0x60d   : > { %v16180_v30 = vsel %vm16148_vm11, %v16132_v38, %v16164_v12  ;;  %vm16146_vm12 = vcmp.gt.f32.partialorder %v16130_v57, 0.0  ;;  %v16162_v51 = vmul.f32 -0.41, %v16130_v57  ;;  %v16133_v55 = vadd.f32 %v20532_v33, %v15892_v16  ;;  %v26886_v38 = vld [vmem:[#allocation33_spill] sm:$0xff] }
 0x60e   : > { %16196 = vst.msk [vmem:[%s26078_s7 + $0xb0] sm:$0xff] %vm13956_vm10, %v16180_v30  ;;  %v16082_v37 = vpop.f32.mrf.mxu0  ;;  %v15656_v40 = vadd.f32 %v26371_v13, %v15415_v3  ;;  %v15418_v5 = vadd.f32 %v26886_v38, %v15177_v45  ;;  %v15899_v42 = vadd.f32 %v20507_v46, %v15658_v47  ;;  %v15416_v26 = vadd.f32 %v26887_v6, %v15175_v25  ;;  %v15873_v32 = vpop.f32.mrf.mxu1 }
 0x60f   : > { %v16178_v53 = vsel %vm16146_vm12, %v16130_v57, %v16162_v51  ;;  %vm16149_vm14 = vcmp.gt.f32.partialorder %v16133_v55, 0.0  ;;  %v16165_v0 = vmul.f32 -0.41, %v16133_v55  ;;  %v16131_v44 = vadd.f32 %v16082_v37, %v15890_v4 }
 0x610   : > { %16194 = vst.msk [vmem:[%s26078_s7 + $0xa0] sm:$0xff] %vm13956_vm10, %v16178_v53  ;;  %v20535_v1 = vpop.f32.mrf.mxu0  ;;  %v15659_v2 = vadd.f32 %v26378_v28, %v15418_v5  ;;  %v15897_v12 = vadd.f32 %v15870_v61, %v15656_v40  ;;  %v15657_v57 = vadd.f32 %v26392_v62, %v15416_v26 }
 0x611   : > { %v16181_v50 = vsel %vm16149_vm14, %v16133_v55, %v16165_v0  ;;  %vm16147_vm15 = vcmp.gt.f32.partialorder %v16131_v44, 0.0  ;;  %v16163_v59 = vmul.f32 -0.41, %v16131_v44  ;;  %v16136_v14 = vadd.f32 %v20535_v1, %v15895_v7 }
 0x612   : > { %16197 = vst.msk [vmem:[%s26078_s7 + $0xb8] sm:$0xff] %vm13956_vm10, %v16181_v50  ;;  %v16095_v31 = vpop.f32.mrf.mxu0  ;;  %v15900_v15 = vadd.f32 %v20508_v58, %v15659_v2  ;;  %v15898_v62 = vadd.f32 %v15873_v32, %v15657_v57 }
 0x613   : > { %v16179_v36 = vsel %vm16147_vm15, %v16131_v44, %v16163_v59  ;;  %vm16152_vm0 = vcmp.gt.f32.partialorder %v16136_v14, 0.0  ;;  %v16168_v17 = vmul.f32 -0.41, %v16136_v14  ;;  %v16134_v49 = vadd.f32 %v16095_v31, %v15893_v10 }
 0x614   : > { %16195 = vst.msk [vmem:[%s26078_s7 + $0xa8] sm:$0xff] %vm13956_vm10, %v16179_v36  ;;  %v20536_v54 = vpop.f32.mrf.mxu0 }
 0x615   : > { %v16184_v52 = vsel %vm16152_vm0, %v16136_v14, %v16168_v17  ;;  %vm16150_vm1 = vcmp.gt.f32.partialorder %v16134_v49, 0.0  ;;  %v16166_v60 = vmul.f32 -0.41, %v16134_v49  ;;  %v16137_v18 = vadd.f32 %v20536_v54, %v15896_v27 }
 0x616   : > { %16200 = vst.msk [vmem:[%s26078_s7 + $0xd0] sm:$0xff] %vm13956_vm10, %v16184_v52  ;;  %v16098_v13 = vpop.f32.mrf.mxu0 }
 0x617   : > { %v16182_v22 = vsel %vm16150_vm1, %v16134_v49, %v16166_v60  ;;  %vm16153_vm2 = vcmp.gt.f32.partialorder %v16137_v18, 0.0  ;;  %v16169_v16 = vmul.f32 -0.41, %v16137_v18  ;;  %v16135_v39 = vadd.f32 %v16098_v13, %v15894_v20 }
 0x618   : > { %16198 = vst.msk [vmem:[%s26078_s7 + $0xc0] sm:$0xff] %vm13956_vm10, %v16182_v22  ;;  %v20539_v11 = vpop.f32.mrf.mxu0 }
 0x619   : > { %v16185_v9 = vsel %vm16153_vm2, %v16137_v18, %v16169_v16  ;;  %vm16151_vm3 = vcmp.gt.f32.partialorder %v16135_v39, 0.0  ;;  %v16167_v28 = vmul.f32 -0.41, %v16135_v39  ;;  %v16140_v19 = vadd.f32 %v20539_v11, %v15899_v42 }
 0x61a   : > { %16201 = vst.msk [vmem:[%s26078_s7 + $0xd8] sm:$0xff] %vm13956_vm10, %v16185_v9  ;;  %v16111_v34 = vpop.f32.mrf.mxu0 }
 0x61b   : > { %v16183_v33 = vsel %vm16151_vm3, %v16135_v39, %v16167_v28  ;;  %vm16156_vm4 = vcmp.gt.f32.partialorder %v16140_v19, 0.0  ;;  %v16172_v4 = vmul.f32 -0.41, %v16140_v19  ;;  %v16138_v46 = vadd.f32 %v16111_v34, %v15897_v12 }
 0x61c   : > { %16199 = vst.msk [vmem:[%s26078_s7 + $0xc8] sm:$0xff] %vm13956_vm10, %v16183_v33  ;;  %v20540_v30 = vpop.f32.mrf.mxu0 }
 0x61d   : > { %v16188_v51 = vsel %vm16156_vm4, %v16140_v19, %v16172_v4  ;;  %vm16154_vm5 = vcmp.gt.f32.partialorder %v16138_v46, 0.0  ;;  %v16170_v55 = vmul.f32 -0.41, %v16138_v46  ;;  %v16141_v21 = vadd.f32 %v20540_v30, %v15900_v15 }
 0x61e   : > { %16204 = vst.msk [vmem:[%s26078_s7 + $0xf0] sm:$0xff] %vm13956_vm10, %v16188_v51  ;;  %v16114_v29 = vpop.f32.mrf.mxu0 }
 0x61f   : > { %v16186_v7 = vsel %vm16154_vm5, %v16138_v46, %v16170_v55  ;;  %vm16157_vm13 = vcmp.gt.f32.partialorder %v16141_v21, 0.0  ;;  %v16173_v56 = vmul.f32 -0.41, %v16141_v21  ;;  %v16139_v8 = vadd.f32 %v16114_v29, %v15898_v62 }
 0x620   : > { %16202 = vst.msk [vmem:[%s26078_s7 + $0xe0] sm:$0xff] %vm13956_vm10, %v16186_v7 }
 0x621   : > { %v16189_v43 = vsel %vm16157_vm13, %v16141_v21, %v16173_v56  ;;  %vm16155_vm6 = vcmp.gt.f32.partialorder %v16139_v8, 0.0  ;;  %v16171_v37 = vmul.f32 -0.41, %v16139_v8 }
 0x622   : > { %16205 = vst.msk [vmem:[%s26078_s7 + $0xf8] sm:$0xff] %vm13956_vm10, %v16189_v43 }
 0x623   : > { %v16187_v53 = vsel %vm16155_vm6, %v16139_v8, %v16171_v37 }
 0x624   : > { %16203 = vst.msk [vmem:[%s26078_s7 + $0xe8] sm:$0xff] %vm13956_vm10, %v16187_v53 }
 0x625 PF: > { %s14_s15 = sadd.s32 1, %s21396_s15  }
 0x626   : > { %p11_p4 = scmp.ge.s32.totalorder %s14_s15, 4  }
 0x628   :  { %13 = sbr.rel (!%p11_p4) target bundleno = 1 (0x1), region = 84 }

</bundles_post_ra>
